<compile_context>
chip_gen: v7x
topology: tpu7x:2x2x1
jax: 0.10.0
libtpu: 0.0.40
codegen_flags: <defaults>
</compile_context>

<pallas_src>
import functools

import jax
import jax.numpy as jnp
from jax.experimental import pallas as pl
from jax.experimental.pallas import tpu as pltpu

EPS = 1e-5  # PyTorch BatchNorm2d default

# Set to jnp.bfloat16 on v6e/v7x for higher MXU throughput (accumulation stays f32;
# re-check the tolerance assert below if flipped).
MATMUL_DTYPE = jnp.float32

_COMPILER_PARAMS = pltpu.CompilerParams(
    dimension_semantics=("parallel",),       # batch axis -> megacore sharding on v7x
    vmem_limit_bytes=32 * 1024 * 1024,       # explicit cap; per-image blocks are small
)


# ----------------------------- Pallas kernels -----------------------------

def _build_patches(src, patch_ref, h, w, c):
    """Fill patch_ref (h*w, 9*c) from a zero-padded (h+2, w+2, c) view `src` (callable)."""
    k = 0
    for dh in range(3):
        for dw in range(3):
            tap = src(dh, dw)                                  # (h, w, c)
            patch_ref[:, k * c:(k + 1) * c] = tap.reshape(h * w, c)
            k += 1


def _conv_stats_kernel(xp_ref, wt_ref, raw_ref, st_ref, patch_ref, *, h, w):
    """Fused conv1|conv3: one (M,9Cin)@(9Cin,2Cout) matmul + per-image BN partial sums.

    xp_ref:    (1, H+2, W+2, Cin)   zero-padded image (NHWC)
    wt_ref:    (9*Cin, Ctot)        fused conv weights
    raw_ref:   (1, H*W, Ctot)       raw (pre-BN) conv output
    st_ref:    (1, 2, Ctot)         [sum; sum of squares] over this image
    patch_ref: (H*W, 9*Cin)         VMEM scratch (in-kernel im2col)
    """
    cin = xp_ref.shape[3]
    _build_patches(lambda dh, dw: xp_ref[0, dh:dh + h, dw:dw + w, :],
                   patch_ref, h, w, cin)
    raw = jnp.dot(patch_ref[...].astype(MATMUL_DTYPE),
                  wt_ref[...].astype(MATMUL_DTYPE),
                  preferred_element_type=jnp.float32)          # (H*W, Ctot)
    raw_ref[0] = raw
    st_ref[0, 0:1, :] = jnp.sum(raw, axis=0, keepdims=True)
    st_ref[0, 1:2, :] = jnp.sum(raw * raw, axis=0, keepdims=True)


def _bn_relu_conv_stats_kernel(c1_ref, s_ref, t_ref, wt_ref, raw_ref, st_ref,
                               pad_ref, patch_ref, *, h, w, cout):
    """y1 = relu(bn(conv1_raw)) -> conv2 as one matmul -> raw conv2 + BN partial sums.

    c1_ref:    (1, H*W, 2*Cout)  fused conv1|conv3 raw output (conv1 = first half)
    s_ref/t_ref: (1, Cout)       precomputed BN scale/shift for conv1
    wt_ref:    (9*Cout, Cout)    conv2 weights
    raw_ref:   (1, H*W, Cout)    raw conv2 output
    st_ref:    (1, 2, Cout)      per-image [sum; sumsq]
    pad_ref:   (H+2, W+2, Cout)  VMEM scratch (zero-padded y1)
    patch_ref: (H*W, 9*Cout)     VMEM scratch (im2col of y1)
    """
    y1 = jnp.maximum(c1_ref[0, :, 0:cout] * s_ref[...] + t_ref[...], 0.0)  # (H*W, Cout)
    pad_ref[...] = jnp.zeros_like(pad_ref)
    pad_ref[1:h + 1, 1:w + 1, :] = y1.reshape(h, w, cout)
    _build_patches(lambda dh, dw: pad_ref[dh:dh + h, dw:dw + w, :],
                   patch_ref, h, w, cout)
    raw = jnp.dot(patch_ref[...].astype(MATMUL_DTYPE),
                  wt_ref[...].astype(MATMUL_DTYPE),
                  preferred_element_type=jnp.float32)          # (H*W, Cout)
    raw_ref[0] = raw
    st_ref[0, 0:1, :] = jnp.sum(raw, axis=0, keepdims=True)
    st_ref[0, 1:2, :] = jnp.sum(raw * raw, axis=0, keepdims=True)


def _bn_add_relu_pool_kernel(c2_ref, c1_ref, s2_ref, t2_ref, sp_ref, tp_ref, o_ref,
                             *, h, w, cout):
    """out = maxpool2(relu(bn(conv2_raw) + bn(proj_raw))), fully fused in-kernel."""
    y2 = c2_ref[0] * s2_ref[...] + t2_ref[...]                       # (H*W, Cout)
    pr = c1_ref[0, :, cout:2 * cout] * sp_ref[...] + tp_ref[...]     # projection half
    z = jnp.maximum(y2 + pr, 0.0).reshape(h // 2, 2, w // 2, 2, cout)
    z = jnp.max(jnp.max(z, axis=3), axis=1)                          # (H/2, W/2, Cout)
    o_ref[0] = z


# ----------------------------- pallas_call wrappers ------------------------

def _conv_stats_call(xp, wt, h, w):
    n, hp, wp, cin = xp.shape
    ctot = wt.shape[1]
    return pl.pallas_call(
        functools.partial(_conv_stats_kernel, h=h, w=w),
        grid=(n,),
        in_specs=[
            pl.BlockSpec((1, hp, wp, cin), lambda i: (i, 0, 0, 0)),
            pl.BlockSpec((9 * cin, ctot), lambda i: (0, 0)),
        ],
        out_specs=(
            pl.BlockSpec((1, h * w, ctot), lambda i: (i, 0, 0)),
            pl.BlockSpec((1, 2, ctot), lambda i: (i, 0, 0)),
        ),
        out_shape=(
            jax.ShapeDtypeStruct((n, h * w, ctot), jnp.float32),
            jax.ShapeDtypeStruct((n, 2, ctot), jnp.float32),
        ),
        scratch_shapes=[pltpu.VMEM((h * w, 9 * cin), jnp.float32)],
        compiler_params=_COMPILER_PARAMS,
    )(xp, wt)


def _bn_relu_conv_stats_call(c1_raw, s, t, wt2, h, w, cout):
    n, _, ctot = c1_raw.shape
    return pl.pallas_call(
        functools.partial(_bn_relu_conv_stats_kernel, h=h, w=w, cout=cout),
        grid=(n,),
        in_specs=[
            pl.BlockSpec((1, h * w, ctot), lambda i: (i, 0, 0)),
            pl.BlockSpec((1, cout), lambda i: (0, 0)),
            pl.BlockSpec((1, cout), lambda i: (0, 0)),
            pl.BlockSpec((9 * cout, cout), lambda i: (0, 0)),
        ],
        out_specs=(
            pl.BlockSpec((1, h * w, cout), lambda i: (i, 0, 0)),
            pl.BlockSpec((1, 2, cout), lambda i: (i, 0, 0)),
        ),
        out_shape=(
            jax.ShapeDtypeStruct((n, h * w, cout), jnp.float32),
            jax.ShapeDtypeStruct((n, 2, cout), jnp.float32),
        ),
        scratch_shapes=[
            pltpu.VMEM((h + 2, w + 2, cout), jnp.float32),
            pltpu.VMEM((h * w, 9 * cout), jnp.float32),
        ],
        compiler_params=_COMPILER_PARAMS,
    )(c1_raw, s, t, wt2)


def _bn_add_relu_pool_call(c2_raw, c1_raw, s2, t2, sp, tp, h, w, cout):
    n = c2_raw.shape[0]
    ctot = c1_raw.shape[2]
    return pl.pallas_call(
        functools.partial(_bn_add_relu_pool_kernel, h=h, w=w, cout=cout),
        grid=(n,),
        in_specs=[
            pl.BlockSpec((1, h * w, cout), lambda i: (i, 0, 0)),
            pl.BlockSpec((1, h * w, ctot), lambda i: (i, 0, 0)),
            pl.BlockSpec((1, cout), lambda i: (0, 0)),
            pl.BlockSpec((1, cout), lambda i: (0, 0)),
            pl.BlockSpec((1, cout), lambda i: (0, 0)),
            pl.BlockSpec((1, cout), lambda i: (0, 0)),
        ],
        out_specs=pl.BlockSpec((1, h // 2, w // 2, cout), lambda i: (i, 0, 0, 0)),
        out_shape=jax.ShapeDtypeStruct((n, h // 2, w // 2, cout), jnp.float32),
        compiler_params=_COMPILER_PARAMS,
    )(c2_raw, c1_raw, s2, t2, sp, tp)


# ----------------------------- forward ------------------------------------

def _bn_scale_shift(stats, gamma, beta, m):
    """Fold training-mode BN (biased batch var) into per-channel scale/shift."""
    total = jnp.sum(stats, axis=0)              # (2, C): [sum; sumsq] over the batch
    mean = total[0] / m
    var = total[1] / m - mean * mean
    scale = gamma * jax.lax.rsqrt(var + EPS)
    shift = beta - mean * scale
    return scale.reshape(1, -1), shift.reshape(1, -1)


def down_forward(x_nchw, p):
    x = jnp.transpose(x_nchw, (0, 2, 3, 1)).astype(jnp.float32)    # NCHW -> NHWC
    n, h, w, cin = x.shape
    cout = p["g1"].shape[0]
    m = n * h * w

    xp = jnp.pad(x, ((0, 0), (1, 1), (1, 1), (0, 0)))

    # conv1 & conv3 both read x -> fused along Cout.  Conv biases omitted: exactly
    # cancelled by the batch-mean subtraction of training-mode BatchNorm.
    wt13 = jnp.concatenate([p["w1"], p["w3"]], axis=-1).reshape(9 * cin, 2 * cout)
    c1_raw, stats1 = _conv_stats_call(xp, wt13, h, w)

    g13 = jnp.concatenate([p["g1"], p["g3"]])
    b13 = jnp.concatenate([p["be1"], p["be3"]])
    s13, t13 = _bn_scale_shift(stats1, g13, b13, m)
    s1c, t1c = s13[:, :cout], t13[:, :cout]          # conv branch BN
    spr, tpr = s13[:, cout:], t13[:, cout:]          # projection branch BN

    wt2 = p["w2"].reshape(9 * cout, cout)
    c2_raw, stats2 = _bn_relu_conv_stats_call(c1_raw, s1c, t1c, wt2, h, w, cout)

    s2, t2 = _bn_scale_shift(stats2, p["g2"], p["be2"], m)
    pooled = _bn_add_relu_pool_call(c2_raw, c1_raw, s2, t2, spr, tpr, h, w, cout)
    return jnp.transpose(pooled, (0, 3, 1, 2))                     # NHWC -> NCHW


# ----------------------------- params & reference --------------------------

def init_params(key, in_ch, out_ch):
    ks = jax.random.split(key, 8)

    def conv(kw, kb, cin, cout_):
        fan_in = float(cin * 9)
        wgt = jax.random.normal(kw, (3, 3, cin, cout_), jnp.float32) / (fan_in ** 0.5)
        b = 0.1 * jax.random.normal(kb, (cout_,), jnp.float32)
        return wgt, b

    w1, b1 = conv(ks[0], ks[1], in_ch, out_ch)
    w2, b2 = conv(ks[2], ks[3], out_ch, out_ch)
    w3, b3 = conv(ks[4], ks[5], in_ch, out_ch)
    gks = jax.random.split(ks[6], 3)
    bks = jax.random.split(ks[7], 3)
    params = dict(w1=w1, b1=b1, w2=w2, b2=b2, w3=w3, b3=b3)
    for i, name in enumerate(("1", "2", "3")):
        params["g" + name] = 1.0 + 0.1 * jax.random.normal(gks[i], (out_ch,), jnp.float32)
        params["be" + name] = 0.1 * jax.random.normal(bks[i], (out_ch,), jnp.float32)
    return params


def _conv_ref(x, w, b):
    y = jax.lax.conv_general_dilated(
        x, w, window_strides=(1, 1), padding="SAME",
        dimension_numbers=("NCHW", "HWIO", "NCHW"))
    return y + b.reshape(1, -1, 1, 1)


def _bn_ref(x, gamma, beta):
    mean = jnp.mean(x, axis=(0, 2, 3), keepdims=True)
    var = jnp.mean((x - mean) ** 2, axis=(0, 2, 3), keepdims=True)
    return (x - mean) * jax.lax.rsqrt(var + EPS) * gamma.reshape(1, -1, 1, 1) \
        + beta.reshape(1, -1, 1, 1)


def ref_forward(x_nchw, p):
    x = x_nchw.astype(jnp.float32)
    y1 = jnp.maximum(_bn_ref(_conv_ref(x, p["w1"], p["b1"]), p["g1"], p["be1"]), 0.0)
    y2 = _bn_ref(_conv_ref(y1, p["w2"], p["b2"]), p["g2"], p["be2"])
    pr = _bn_ref(_conv_ref(x, p["w3"], p["b3"]), p["g3"], p["be3"])
    z = jnp.maximum(y2 + pr, 0.0)
    return jax.lax.reduce_window(z, -jnp.inf, jax.lax.max,
                                 (1, 1, 2, 2), (1, 1, 2, 2), "VALID")


if __name__ == "__main__":
    in_ch, out_ch = 4, 8
    N, H, W = 2, 16, 16

    key = jax.random.PRNGKey(0)
    kx, kp = jax.random.split(key)
    x = jax.random.normal(kx, (N, in_ch, H, W), jnp.float32)
    params = init_params(kp, in_ch, out_ch)

    out = jax.block_until_ready(jax.jit(down_forward)(x, params))
    assert out.shape == (N, out_ch, H // 2, W // 2), out.shape

    ref = ref_forward(x, params)
    if not bool(jnp.allclose(out, ref, atol=2e-3, rtol=2e-3)):
        raise AssertionError(
            f"mismatch vs reference, max abs err={float(jnp.max(jnp.abs(out - ref)))}")
    print("KERNEL_OK")
</pallas_src>

<mosaic_0001>
module attributes {stable_mosaic.version = 11 : i64} {
  func.func @_conv_stats_kernel(%arg0: i32, %arg1: memref<1x18x18x4xf32, #tpu.memory_space<vmem>>, %arg2: memref<36x16xf32, #tpu.memory_space<vmem>>, %arg3: memref<1x256x16xf32, #tpu.memory_space<vmem>>, %arg4: memref<1x2x16xf32, #tpu.memory_space<vmem>>, %arg5: memref<256x36xf32, #tpu.memory_space<vmem>>) attributes {dimension_semantics = [#tpu.dimension_semantics<parallel>], iteration_bounds = array<i64: 2>, scalar_prefetch = 0 : i64, scratch_operands = 1 : i64, tpu.core_type = #tpu.core_type<tc>, window_params = [{transform_indices = @transform_0, window_bounds = array<i64: 1, 18, 18, 4>}, {pipeline_mode = #tpu.pipeline_mode<synchronous>, transform_indices = @transform_1, window_bounds = array<i64: 36, 16>}, {transform_indices = @transform_2, window_bounds = array<i64: 1, 256, 16>}, {transform_indices = @transform_3, window_bounds = array<i64: 1, 2, 16>}]} {
    %c0 = arith.constant 0 : index
    %c0_0 = arith.constant 0 : index
    %c0_1 = arith.constant 0 : index
    %c0_2 = arith.constant 0 : index
    %0 = vector.load %arg1[%c0, %c0_0, %c0_1, %c0_2] : memref<1x18x18x4xf32, #tpu.memory_space<vmem>>, vector<1x16x16x4xf32>
    %1 = vector.shape_cast %0 : vector<1x16x16x4xf32> to vector<16x16x4xf32>
    %2 = vector.shape_cast %1 : vector<16x16x4xf32> to vector<256x4xf32>
    %c0_3 = arith.constant 0 : index
    %c0_4 = arith.constant 0 : index
    %3 = vector.load %arg5[%c0_3, %c0_4] : memref<256x36xf32, #tpu.memory_space<vmem>>, vector<256x4xf32>
    tpu.vector_store %arg5[%c0_3, %c0_4], %2 {strides = array<i32>} : memref<256x36xf32, #tpu.memory_space<vmem>>, vector<256x4xf32>,
    %c0_5 = arith.constant 0 : index
    %c0_6 = arith.constant 0 : index
    %c1 = arith.constant 1 : index
    %c0_7 = arith.constant 0 : index
    %4 = vector.load %arg1[%c0_5, %c0_6, %c1, %c0_7] : memref<1x18x18x4xf32, #tpu.memory_space<vmem>>, vector<1x16x16x4xf32>
    %5 = vector.shape_cast %4 : vector<1x16x16x4xf32> to vector<16x16x4xf32>
    %6 = vector.shape_cast %5 : vector<16x16x4xf32> to vector<256x4xf32>
    %c0_8 = arith.constant 0 : index
    %c4 = arith.constant 4 : index
    %7 = vector.load %arg5[%c0_8, %c4] : memref<256x36xf32, #tpu.memory_space<vmem>>, vector<256x4xf32>
    tpu.vector_store %arg5[%c0_8, %c4], %6 {strides = array<i32>} : memref<256x36xf32, #tpu.memory_space<vmem>>, vector<256x4xf32>,
    %c0_9 = arith.constant 0 : index
    %c0_10 = arith.constant 0 : index
    %c2 = arith.constant 2 : index
    %c0_11 = arith.constant 0 : index
    %8 = vector.load %arg1[%c0_9, %c0_10, %c2, %c0_11] : memref<1x18x18x4xf32, #tpu.memory_space<vmem>>, vector<1x16x16x4xf32>
    %9 = vector.shape_cast %8 : vector<1x16x16x4xf32> to vector<16x16x4xf32>
    %10 = vector.shape_cast %9 : vector<16x16x4xf32> to vector<256x4xf32>
    %c0_12 = arith.constant 0 : index
    %c8 = arith.constant 8 : index
    %11 = vector.load %arg5[%c0_12, %c8] : memref<256x36xf32, #tpu.memory_space<vmem>>, vector<256x4xf32>
    tpu.vector_store %arg5[%c0_12, %c8], %10 {strides = array<i32>} : memref<256x36xf32, #tpu.memory_space<vmem>>, vector<256x4xf32>,
    %c0_13 = arith.constant 0 : index
    %c1_14 = arith.constant 1 : index
    %c0_15 = arith.constant 0 : index
    %c0_16 = arith.constant 0 : index
    %12 = vector.load %arg1[%c0_13, %c1_14, %c0_15, %c0_16] : memref<1x18x18x4xf32, #tpu.memory_space<vmem>>, vector<1x16x16x4xf32>
    %13 = vector.shape_cast %12 : vector<1x16x16x4xf32> to vector<16x16x4xf32>
    %14 = vector.shape_cast %13 : vector<16x16x4xf32> to vector<256x4xf32>
    %c0_17 = arith.constant 0 : index
    %c12 = arith.constant 12 : index
    %15 = vector.load %arg5[%c0_17, %c12] : memref<256x36xf32, #tpu.memory_space<vmem>>, vector<256x4xf32>
    tpu.vector_store %arg5[%c0_17, %c12], %14 {strides = array<i32>} : memref<256x36xf32, #tpu.memory_space<vmem>>, vector<256x4xf32>,
    %c0_18 = arith.constant 0 : index
    %c1_19 = arith.constant 1 : index
    %c1_20 = arith.constant 1 : index
    %c0_21 = arith.constant 0 : index
    %16 = vector.load %arg1[%c0_18, %c1_19, %c1_20, %c0_21] : memref<1x18x18x4xf32, #tpu.memory_space<vmem>>, vector<1x16x16x4xf32>
    %17 = vector.shape_cast %16 : vector<1x16x16x4xf32> to vector<16x16x4xf32>
    %18 = vector.shape_cast %17 : vector<16x16x4xf32> to vector<256x4xf32>
    %c0_22 = arith.constant 0 : index
    %c16 = arith.constant 16 : index
    %19 = vector.load %arg5[%c0_22, %c16] : memref<256x36xf32, #tpu.memory_space<vmem>>, vector<256x4xf32>
    tpu.vector_store %arg5[%c0_22, %c16], %18 {strides = array<i32>} : memref<256x36xf32, #tpu.memory_space<vmem>>, vector<256x4xf32>,
    %c0_23 = arith.constant 0 : index
    %c1_24 = arith.constant 1 : index
    %c2_25 = arith.constant 2 : index
    %c0_26 = arith.constant 0 : index
    %20 = vector.load %arg1[%c0_23, %c1_24, %c2_25, %c0_26] : memref<1x18x18x4xf32, #tpu.memory_space<vmem>>, vector<1x16x16x4xf32>
    %21 = vector.shape_cast %20 : vector<1x16x16x4xf32> to vector<16x16x4xf32>
    %22 = vector.shape_cast %21 : vector<16x16x4xf32> to vector<256x4xf32>
    %c0_27 = arith.constant 0 : index
    %c20 = arith.constant 20 : index
    %23 = vector.load %arg5[%c0_27, %c20] : memref<256x36xf32, #tpu.memory_space<vmem>>, vector<256x4xf32>
    tpu.vector_store %arg5[%c0_27, %c20], %22 {strides = array<i32>} : memref<256x36xf32, #tpu.memory_space<vmem>>, vector<256x4xf32>,
    %c0_28 = arith.constant 0 : index
    %c2_29 = arith.constant 2 : index
    %c0_30 = arith.constant 0 : index
    %c0_31 = arith.constant 0 : index
    %24 = vector.load %arg1[%c0_28, %c2_29, %c0_30, %c0_31] : memref<1x18x18x4xf32, #tpu.memory_space<vmem>>, vector<1x16x16x4xf32>
    %25 = vector.shape_cast %24 : vector<1x16x16x4xf32> to vector<16x16x4xf32>
    %26 = vector.shape_cast %25 : vector<16x16x4xf32> to vector<256x4xf32>
    %c0_32 = arith.constant 0 : index
    %c24 = arith.constant 24 : index
    %27 = vector.load %arg5[%c0_32, %c24] : memref<256x36xf32, #tpu.memory_space<vmem>>, vector<256x4xf32>
    tpu.vector_store %arg5[%c0_32, %c24], %26 {strides = array<i32>} : memref<256x36xf32, #tpu.memory_space<vmem>>, vector<256x4xf32>,
    %c0_33 = arith.constant 0 : index
    %c2_34 = arith.constant 2 : index
    %c1_35 = arith.constant 1 : index
    %c0_36 = arith.constant 0 : index
    %28 = vector.load %arg1[%c0_33, %c2_34, %c1_35, %c0_36] : memref<1x18x18x4xf32, #tpu.memory_space<vmem>>, vector<1x16x16x4xf32>
    %29 = vector.shape_cast %28 : vector<1x16x16x4xf32> to vector<16x16x4xf32>
    %30 = vector.shape_cast %29 : vector<16x16x4xf32> to vector<256x4xf32>
    %c0_37 = arith.constant 0 : index
    %c28 = arith.constant 28 : index
    %31 = vector.load %arg5[%c0_37, %c28] : memref<256x36xf32, #tpu.memory_space<vmem>>, vector<256x4xf32>
    tpu.vector_store %arg5[%c0_37, %c28], %30 {strides = array<i32>} : memref<256x36xf32, #tpu.memory_space<vmem>>, vector<256x4xf32>,
    %c0_38 = arith.constant 0 : index
    %c2_39 = arith.constant 2 : index
    %c2_40 = arith.constant 2 : index
    %c0_41 = arith.constant 0 : index
    %32 = vector.load %arg1[%c0_38, %c2_39, %c2_40, %c0_41] : memref<1x18x18x4xf32, #tpu.memory_space<vmem>>, vector<1x16x16x4xf32>
    %33 = vector.shape_cast %32 : vector<1x16x16x4xf32> to vector<16x16x4xf32>
    %34 = vector.shape_cast %33 : vector<16x16x4xf32> to vector<256x4xf32>
    %c0_42 = arith.constant 0 : index
    %c32 = arith.constant 32 : index
    %35 = vector.load %arg5[%c0_42, %c32] : memref<256x36xf32, #tpu.memory_space<vmem>>, vector<256x4xf32>
    tpu.vector_store %arg5[%c0_42, %c32], %34 {strides = array<i32>} : memref<256x36xf32, #tpu.memory_space<vmem>>, vector<256x4xf32>,
    %c0_43 = arith.constant 0 : index
    %c0_44 = arith.constant 0 : index
    %36 = vector.load %arg5[%c0_43, %c0_44] : memref<256x36xf32, #tpu.memory_space<vmem>>, vector<256x36xf32>
    %c0_45 = arith.constant 0 : index
    %c0_46 = arith.constant 0 : index
    %37 = vector.load %arg2[%c0_45, %c0_46] : memref<36x16xf32, #tpu.memory_space<vmem>>, vector<36x16xf32>
    %cst = arith.constant dense<0.000000e+00> : vector<256x16xf32>
    %38 = tpu.matmul %36, %37, %cst {dimension_numbers = #tpu.dot_dimension_numbers<[1], [0], [0], [1], [0, 0, 1, 1], [], []>} : vector<256x36xf32>, vector<36x16xf32>, vector<256x16xf32> -> vector<256x16xf32>
    %c0_47 = arith.constant 0 : index
    %c0_48 = arith.constant 0 : index
    %c0_49 = arith.constant 0 : index
    %39 = vector.load %arg3[%c0_47, %c0_48, %c0_49] : memref<1x256x16xf32, #tpu.memory_space<vmem>>, vector<1x256x16xf32>
    %40 = vector.shape_cast %39 : vector<1x256x16xf32> to vector<256x16xf32>
    %41 = vector.shape_cast %38 : vector<256x16xf32> to vector<1x256x16xf32>
    tpu.vector_store %arg3[%c0_47, %c0_48, %c0_49], %41 {strides = array<i32>} : memref<1x256x16xf32, #tpu.memory_space<vmem>>, vector<1x256x16xf32>,
    %cst_50 = arith.constant dense<0.000000e+00> : vector<16xf32>
    %42 = vector.multi_reduction <add>, %38, %cst_50 [0] : vector<256x16xf32> to vector<16xf32>
    %43 = vector.shape_cast %42 : vector<16xf32> to vector<1x16xf32>
    %c0_51 = arith.constant 0 : index
    %c0_52 = arith.constant 0 : index
    %c0_53 = arith.constant 0 : index
    %44 = vector.load %arg4[%c0_51, %c0_52, %c0_53] : memref<1x2x16xf32, #tpu.memory_space<vmem>>, vector<1x1x16xf32>
    %45 = vector.shape_cast %44 : vector<1x1x16xf32> to vector<1x16xf32>
    %46 = vector.shape_cast %43 : vector<1x16xf32> to vector<1x1x16xf32>
    tpu.vector_store %arg4[%c0_51, %c0_52, %c0_53], %46 {strides = array<i32>} : memref<1x2x16xf32, #tpu.memory_space<vmem>>, vector<1x1x16xf32>,
    %47 = arith.mulf %38, %38 : vector<256x16xf32>
    %cst_54 = arith.constant dense<0.000000e+00> : vector<16xf32>
    %48 = vector.multi_reduction <add>, %47, %cst_54 [0] : vector<256x16xf32> to vector<16xf32>
    %49 = vector.shape_cast %48 : vector<16xf32> to vector<1x16xf32>
    %c0_55 = arith.constant 0 : index
    %c1_56 = arith.constant 1 : index
    %c0_57 = arith.constant 0 : index
    %50 = vector.load %arg4[%c0_55, %c1_56, %c0_57] : memref<1x2x16xf32, #tpu.memory_space<vmem>>, vector<1x1x16xf32>
    %51 = vector.shape_cast %50 : vector<1x1x16xf32> to vector<1x16xf32>
    %52 = vector.shape_cast %49 : vector<1x16xf32> to vector<1x1x16xf32>
    tpu.vector_store %arg4[%c0_55, %c1_56, %c0_57], %52 {strides = array<i32>} : memref<1x2x16xf32, #tpu.memory_space<vmem>>, vector<1x1x16xf32>,
    return
  }
  func.func @transform_0(%arg0: i32) -> (i32, i32, i32, i32) {
    %c0_i32 = arith.constant 0 : i32
    %c0_i32_0 = arith.constant 0 : i32
    %c0_i32_1 = arith.constant 0 : i32
    %c0_i32_2 = arith.constant 0 : i32
    return %arg0, %c0_i32, %c0_i32_0, %c0_i32_1 : i32, i32, i32, i32
  }
  func.func @transform_1(%arg0: i32) -> (i32, i32) {
    %c0_i32 = arith.constant 0 : i32
    %c0_i32_0 = arith.constant 0 : i32
    %c0_i32_1 = arith.constant 0 : i32
    return %c0_i32, %c0_i32_0 : i32, i32
  }
  func.func @transform_2(%arg0: i32) -> (i32, i32, i32) {
    %c0_i32 = arith.constant 0 : i32
    %c0_i32_0 = arith.constant 0 : i32
    %c0_i32_1 = arith.constant 0 : i32
    return %arg0, %c0_i32, %c0_i32_0 : i32, i32, i32
  }
  func.func @transform_3(%arg0: i32) -> (i32, i32, i32) {
    %c0_i32 = arith.constant 0 : i32
    %c0_i32_0 = arith.constant 0 : i32
    %c0_i32_1 = arith.constant 0 : i32
    return %arg0, %c0_i32, %c0_i32_0 : i32, i32, i32
  }
}

module attributes {stable_mosaic.version = 11 : i64} {
  func.func @_bn_relu_conv_stats_kernel(%arg0: i32, %arg1: memref<1x256x16xf32, #tpu.memory_space<vmem>>, %arg2: memref<1x8xf32, #tpu.memory_space<vmem>>, %arg3: memref<1x8xf32, #tpu.memory_space<vmem>>, %arg4: memref<72x8xf32, #tpu.memory_space<vmem>>, %arg5: memref<1x256x8xf32, #tpu.memory_space<vmem>>, %arg6: memref<1x2x8xf32, #tpu.memory_space<vmem>>, %arg7: memref<18x18x8xf32, #tpu.memory_space<vmem>>, %arg8: memref<256x72xf32, #tpu.memory_space<vmem>>) attributes {dimension_semantics = [#tpu.dimension_semantics<parallel>], iteration_bounds = array<i64: 2>, scalar_prefetch = 0 : i64, scratch_operands = 2 : i64, tpu.core_type = #tpu.core_type<tc>, window_params = [{transform_indices = @transform_0, window_bounds = array<i64: 1, 256, 16>}, {pipeline_mode = #tpu.pipeline_mode<synchronous>, transform_indices = @transform_1, window_bounds = array<i64: 1, 8>}, {pipeline_mode = #tpu.pipeline_mode<synchronous>, transform_indices = @transform_2, window_bounds = array<i64: 1, 8>}, {pipeline_mode = #tpu.pipeline_mode<synchronous>, transform_indices = @transform_3, window_bounds = array<i64: 72, 8>}, {transform_indices = @transform_4, window_bounds = array<i64: 1, 256, 8>}, {transform_indices = @transform_5, window_bounds = array<i64: 1, 2, 8>}]} {
    %c0 = arith.constant 0 : index
    %c0_0 = arith.constant 0 : index
    %c0_1 = arith.constant 0 : index
    %0 = vector.load %arg1[%c0, %c0_0, %c0_1] : memref<1x256x16xf32, #tpu.memory_space<vmem>>, vector<1x256x8xf32>
    %1 = vector.shape_cast %0 : vector<1x256x8xf32> to vector<256x8xf32>
    %c0_2 = arith.constant 0 : index
    %c0_3 = arith.constant 0 : index
    %2 = vector.load %arg2[%c0_2, %c0_3] : memref<1x8xf32, #tpu.memory_space<vmem>>, vector<1x8xf32>
    %3 = vector.broadcast %2 : vector<1x8xf32> to vector<256x8xf32>
    %4 = arith.mulf %1, %3 : vector<256x8xf32>
    %c0_4 = arith.constant 0 : index
    %c0_5 = arith.constant 0 : index
    %5 = vector.load %arg3[%c0_4, %c0_5] : memref<1x8xf32, #tpu.memory_space<vmem>>, vector<1x8xf32>
    %6 = vector.broadcast %5 : vector<1x8xf32> to vector<256x8xf32>
    %7 = arith.addf %4, %6 : vector<256x8xf32>
    %cst = arith.constant 0.000000e+00 : f32
    %8 = vector.broadcast %cst : f32 to vector<256x8xf32>
    %9 = arith.maximumf %7, %8 : vector<256x8xf32>
    %cst_6 = arith.constant 0.000000e+00 : f32
    %10 = vector.broadcast %cst_6 : f32 to vector<18x18x8xf32>
    %c0_7 = arith.constant 0 : index
    %c0_8 = arith.constant 0 : index
    %c0_9 = arith.constant 0 : index
    %11 = vector.load %arg7[%c0_7, %c0_8, %c0_9] : memref<18x18x8xf32, #tpu.memory_space<vmem>>, vector<18x18x8xf32>
    tpu.vector_store %arg7[%c0_7, %c0_8, %c0_9], %10 {strides = array<i32>} : memref<18x18x8xf32, #tpu.memory_space<vmem>>, vector<18x18x8xf32>,
    %12 = vector.shape_cast %9 : vector<256x8xf32> to vector<16x16x8xf32>
    %c1 = arith.constant 1 : index
    %c1_10 = arith.constant 1 : index
    %c0_11 = arith.constant 0 : index
    %13 = vector.load %arg7[%c1, %c1_10, %c0_11] : memref<18x18x8xf32, #tpu.memory_space<vmem>>, vector<16x16x8xf32>
    tpu.vector_store %arg7[%c1, %c1_10, %c0_11], %12 {strides = array<i32>} : memref<18x18x8xf32, #tpu.memory_space<vmem>>, vector<16x16x8xf32>,
    %c0_12 = arith.constant 0 : index
    %c0_13 = arith.constant 0 : index
    %c0_14 = arith.constant 0 : index
    %14 = vector.load %arg7[%c0_12, %c0_13, %c0_14] : memref<18x18x8xf32, #tpu.memory_space<vmem>>, vector<16x16x8xf32>
    %15 = vector.shape_cast %14 : vector<16x16x8xf32> to vector<256x8xf32>
    %c0_15 = arith.constant 0 : index
    %c0_16 = arith.constant 0 : index
    %16 = vector.load %arg8[%c0_15, %c0_16] : memref<256x72xf32, #tpu.memory_space<vmem>>, vector<256x8xf32>
    tpu.vector_store %arg8[%c0_15, %c0_16], %15 {strides = array<i32>} : memref<256x72xf32, #tpu.memory_space<vmem>>, vector<256x8xf32>,
    %c0_17 = arith.constant 0 : index
    %c1_18 = arith.constant 1 : index
    %c0_19 = arith.constant 0 : index
    %17 = vector.load %arg7[%c0_17, %c1_18, %c0_19] : memref<18x18x8xf32, #tpu.memory_space<vmem>>, vector<16x16x8xf32>
    %18 = vector.shape_cast %17 : vector<16x16x8xf32> to vector<256x8xf32>
    %c0_20 = arith.constant 0 : index
    %c8 = arith.constant 8 : index
    %19 = vector.load %arg8[%c0_20, %c8] : memref<256x72xf32, #tpu.memory_space<vmem>>, vector<256x8xf32>
    tpu.vector_store %arg8[%c0_20, %c8], %18 {strides = array<i32>} : memref<256x72xf32, #tpu.memory_space<vmem>>, vector<256x8xf32>,
    %c0_21 = arith.constant 0 : index
    %c2 = arith.constant 2 : index
    %c0_22 = arith.constant 0 : index
    %20 = vector.load %arg7[%c0_21, %c2, %c0_22] : memref<18x18x8xf32, #tpu.memory_space<vmem>>, vector<16x16x8xf32>
    %21 = vector.shape_cast %20 : vector<16x16x8xf32> to vector<256x8xf32>
    %c0_23 = arith.constant 0 : index
    %c16 = arith.constant 16 : index
    %22 = vector.load %arg8[%c0_23, %c16] : memref<256x72xf32, #tpu.memory_space<vmem>>, vector<256x8xf32>
    tpu.vector_store %arg8[%c0_23, %c16], %21 {strides = array<i32>} : memref<256x72xf32, #tpu.memory_space<vmem>>, vector<256x8xf32>,
    %c1_24 = arith.constant 1 : index
    %c0_25 = arith.constant 0 : index
    %c0_26 = arith.constant 0 : index
    %23 = vector.load %arg7[%c1_24, %c0_25, %c0_26] : memref<18x18x8xf32, #tpu.memory_space<vmem>>, vector<16x16x8xf32>
    %24 = vector.shape_cast %23 : vector<16x16x8xf32> to vector<256x8xf32>
    %c0_27 = arith.constant 0 : index
    %c24 = arith.constant 24 : index
    %25 = vector.load %arg8[%c0_27, %c24] : memref<256x72xf32, #tpu.memory_space<vmem>>, vector<256x8xf32>
    tpu.vector_store %arg8[%c0_27, %c24], %24 {strides = array<i32>} : memref<256x72xf32, #tpu.memory_space<vmem>>, vector<256x8xf32>,
    %c1_28 = arith.constant 1 : index
    %c1_29 = arith.constant 1 : index
    %c0_30 = arith.constant 0 : index
    %26 = vector.load %arg7[%c1_28, %c1_29, %c0_30] : memref<18x18x8xf32, #tpu.memory_space<vmem>>, vector<16x16x8xf32>
    %27 = vector.shape_cast %26 : vector<16x16x8xf32> to vector<256x8xf32>
    %c0_31 = arith.constant 0 : index
    %c32 = arith.constant 32 : index
    %28 = vector.load %arg8[%c0_31, %c32] : memref<256x72xf32, #tpu.memory_space<vmem>>, vector<256x8xf32>
    tpu.vector_store %arg8[%c0_31, %c32], %27 {strides = array<i32>} : memref<256x72xf32, #tpu.memory_space<vmem>>, vector<256x8xf32>,
    %c1_32 = arith.constant 1 : index
    %c2_33 = arith.constant 2 : index
    %c0_34 = arith.constant 0 : index
    %29 = vector.load %arg7[%c1_32, %c2_33, %c0_34] : memref<18x18x8xf32, #tpu.memory_space<vmem>>, vector<16x16x8xf32>
    %30 = vector.shape_cast %29 : vector<16x16x8xf32> to vector<256x8xf32>
    %c0_35 = arith.constant 0 : index
    %c40 = arith.constant 40 : index
    %31 = vector.load %arg8[%c0_35, %c40] : memref<256x72xf32, #tpu.memory_space<vmem>>, vector<256x8xf32>
    tpu.vector_store %arg8[%c0_35, %c40], %30 {strides = array<i32>} : memref<256x72xf32, #tpu.memory_space<vmem>>, vector<256x8xf32>,
    %c2_36 = arith.constant 2 : index
    %c0_37 = arith.constant 0 : index
    %c0_38 = arith.constant 0 : index
    %32 = vector.load %arg7[%c2_36, %c0_37, %c0_38] : memref<18x18x8xf32, #tpu.memory_space<vmem>>, vector<16x16x8xf32>
    %33 = vector.shape_cast %32 : vector<16x16x8xf32> to vector<256x8xf32>
    %c0_39 = arith.constant 0 : index
    %c48 = arith.constant 48 : index
    %34 = vector.load %arg8[%c0_39, %c48] : memref<256x72xf32, #tpu.memory_space<vmem>>, vector<256x8xf32>
    tpu.vector_store %arg8[%c0_39, %c48], %33 {strides = array<i32>} : memref<256x72xf32, #tpu.memory_space<vmem>>, vector<256x8xf32>,
    %c2_40 = arith.constant 2 : index
    %c1_41 = arith.constant 1 : index
    %c0_42 = arith.constant 0 : index
    %35 = vector.load %arg7[%c2_40, %c1_41, %c0_42] : memref<18x18x8xf32, #tpu.memory_space<vmem>>, vector<16x16x8xf32>
    %36 = vector.shape_cast %35 : vector<16x16x8xf32> to vector<256x8xf32>
    %c0_43 = arith.constant 0 : index
    %c56 = arith.constant 56 : index
    %37 = vector.load %arg8[%c0_43, %c56] : memref<256x72xf32, #tpu.memory_space<vmem>>, vector<256x8xf32>
    tpu.vector_store %arg8[%c0_43, %c56], %36 {strides = array<i32>} : memref<256x72xf32, #tpu.memory_space<vmem>>, vector<256x8xf32>,
    %c2_44 = arith.constant 2 : index
    %c2_45 = arith.constant 2 : index
    %c0_46 = arith.constant 0 : index
    %38 = vector.load %arg7[%c2_44, %c2_45, %c0_46] : memref<18x18x8xf32, #tpu.memory_space<vmem>>, vector<16x16x8xf32>
    %39 = vector.shape_cast %38 : vector<16x16x8xf32> to vector<256x8xf32>
    %c0_47 = arith.constant 0 : index
    %c64 = arith.constant 64 : index
    %40 = vector.load %arg8[%c0_47, %c64] : memref<256x72xf32, #tpu.memory_space<vmem>>, vector<256x8xf32>
    tpu.vector_store %arg8[%c0_47, %c64], %39 {strides = array<i32>} : memref<256x72xf32, #tpu.memory_space<vmem>>, vector<256x8xf32>,
    %c0_48 = arith.constant 0 : index
    %c0_49 = arith.constant 0 : index
    %41 = vector.load %arg8[%c0_48, %c0_49] : memref<256x72xf32, #tpu.memory_space<vmem>>, vector<256x72xf32>
    %c0_50 = arith.constant 0 : index
    %c0_51 = arith.constant 0 : index
    %42 = vector.load %arg4[%c0_50, %c0_51] : memref<72x8xf32, #tpu.memory_space<vmem>>, vector<72x8xf32>
    %cst_52 = arith.constant dense<0.000000e+00> : vector<256x8xf32>
    %43 = tpu.matmul %41, %42, %cst_52 {dimension_numbers = #tpu.dot_dimension_numbers<[1], [0], [0], [1], [0, 0, 1, 1], [], []>} : vector<256x72xf32>, vector<72x8xf32>, vector<256x8xf32> -> vector<256x8xf32>
    %c0_53 = arith.constant 0 : index
    %c0_54 = arith.constant 0 : index
    %c0_55 = arith.constant 0 : index
    %44 = vector.load %arg5[%c0_53, %c0_54, %c0_55] : memref<1x256x8xf32, #tpu.memory_space<vmem>>, vector<1x256x8xf32>
    %45 = vector.shape_cast %44 : vector<1x256x8xf32> to vector<256x8xf32>
    %46 = vector.shape_cast %43 : vector<256x8xf32> to vector<1x256x8xf32>
    tpu.vector_store %arg5[%c0_53, %c0_54, %c0_55], %46 {strides = array<i32>} : memref<1x256x8xf32, #tpu.memory_space<vmem>>, vector<1x256x8xf32>,
    %cst_56 = arith.constant dense<0.000000e+00> : vector<8xf32>
    %47 = vector.multi_reduction <add>, %43, %cst_56 [0] : vector<256x8xf32> to vector<8xf32>
    %48 = vector.shape_cast %47 : vector<8xf32> to vector<1x8xf32>
    %c0_57 = arith.constant 0 : index
    %c0_58 = arith.constant 0 : index
    %c0_59 = arith.constant 0 : index
    %49 = vector.load %arg6[%c0_57, %c0_58, %c0_59] : memref<1x2x8xf32, #tpu.memory_space<vmem>>, vector<1x1x8xf32>
    %50 = vector.shape_cast %49 : vector<1x1x8xf32> to vector<1x8xf32>
    %51 = vector.shape_cast %48 : vector<1x8xf32> to vector<1x1x8xf32>
    tpu.vector_store %arg6[%c0_57, %c0_58, %c0_59], %51 {strides = array<i32>} : memref<1x2x8xf32, #tpu.memory_space<vmem>>, vector<1x1x8xf32>,
    %52 = arith.mulf %43, %43 : vector<256x8xf32>
    %cst_60 = arith.constant dense<0.000000e+00> : vector<8xf32>
    %53 = vector.multi_reduction <add>, %52, %cst_60 [0] : vector<256x8xf32> to vector<8xf32>
    %54 = vector.shape_cast %53 : vector<8xf32> to vector<1x8xf32>
    %c0_61 = arith.constant 0 : index
    %c1_62 = arith.constant 1 : index
    %c0_63 = arith.constant 0 : index
    %55 = vector.load %arg6[%c0_61, %c1_62, %c0_63] : memref<1x2x8xf32, #tpu.memory_space<vmem>>, vector<1x1x8xf32>
    %56 = vector.shape_cast %55 : vector<1x1x8xf32> to vector<1x8xf32>
    %57 = vector.shape_cast %54 : vector<1x8xf32> to vector<1x1x8xf32>
    tpu.vector_store %arg6[%c0_61, %c1_62, %c0_63], %57 {strides = array<i32>} : memref<1x2x8xf32, #tpu.memory_space<vmem>>, vector<1x1x8xf32>,
    return
  }
  func.func @transform_0(%arg0: i32) -> (i32, i32, i32) {
    %c0_i32 = arith.constant 0 : i32
    %c0_i32_0 = arith.constant 0 : i32
    %c0_i32_1 = arith.constant 0 : i32
    return %arg0, %c0_i32, %c0_i32_0 : i32, i32, i32
  }
  func.func @transform_1(%arg0: i32) -> (i32, i32) {
    %c0_i32 = arith.constant 0 : i32
    %c0_i32_0 = arith.constant 0 : i32
    %c0_i32_1 = arith.constant 0 : i32
    return %c0_i32, %c0_i32_0 : i32, i32
  }
  func.func @transform_2(%arg0: i32) -> (i32, i32) {
    %c0_i32 = arith.constant 0 : i32
    %c0_i32_0 = arith.constant 0 : i32
    %c0_i32_1 = arith.constant 0 : i32
    return %c0_i32, %c0_i32_0 : i32, i32
  }
  func.func @transform_3(%arg0: i32) -> (i32, i32) {
    %c0_i32 = arith.constant 0 : i32
    %c0_i32_0 = arith.constant 0 : i32
    %c0_i32_1 = arith.constant 0 : i32
    return %c0_i32, %c0_i32_0 : i32, i32
  }
  func.func @transform_4(%arg0: i32) -> (i32, i32, i32) {
    %c0_i32 = arith.constant 0 : i32
    %c0_i32_0 = arith.constant 0 : i32
    %c0_i32_1 = arith.constant 0 : i32
    return %arg0, %c0_i32, %c0_i32_0 : i32, i32, i32
  }
  func.func @transform_5(%arg0: i32) -> (i32, i32, i32) {
    %c0_i32 = arith.constant 0 : i32
    %c0_i32_0 = arith.constant 0 : i32
    %c0_i32_1 = arith.constant 0 : i32
    return %arg0, %c0_i32, %c0_i32_0 : i32, i32, i32
  }
}

module attributes {stable_mosaic.version = 11 : i64} {
  func.func @_bn_add_relu_pool_kernel(%arg0: i32, %arg1: memref<1x256x8xf32, #tpu.memory_space<vmem>>, %arg2: memref<1x256x16xf32, #tpu.memory_space<vmem>>, %arg3: memref<1x8xf32, #tpu.memory_space<vmem>>, %arg4: memref<1x8xf32, #tpu.memory_space<vmem>>, %arg5: memref<1x8xf32, #tpu.memory_space<vmem>>, %arg6: memref<1x8xf32, #tpu.memory_space<vmem>>, %arg7: memref<1x8x8x8xf32, #tpu.memory_space<vmem>>) attributes {dimension_semantics = [#tpu.dimension_semantics<parallel>], iteration_bounds = array<i64: 2>, scalar_prefetch = 0 : i64, scratch_operands = 0 : i64, tpu.core_type = #tpu.core_type<tc>, window_params = [{transform_indices = @transform_0, window_bounds = array<i64: 1, 256, 8>}, {transform_indices = @transform_1, window_bounds = array<i64: 1, 256, 16>}, {pipeline_mode = #tpu.pipeline_mode<synchronous>, transform_indices = @transform_2, window_bounds = array<i64: 1, 8>}, {pipeline_mode = #tpu.pipeline_mode<synchronous>, transform_indices = @transform_3, window_bounds = array<i64: 1, 8>}, {pipeline_mode = #tpu.pipeline_mode<synchronous>, transform_indices = @transform_4, window_bounds = array<i64: 1, 8>}, {pipeline_mode = #tpu.pipeline_mode<synchronous>, transform_indices = @transform_5, window_bounds = array<i64: 1, 8>}, {transform_indices = @transform_6, window_bounds = array<i64: 1, 8, 8, 8>}]} {
    %c0 = arith.constant 0 : index
    %c0_0 = arith.constant 0 : index
    %c0_1 = arith.constant 0 : index
    %0 = vector.load %arg1[%c0, %c0_0, %c0_1] : memref<1x256x8xf32, #tpu.memory_space<vmem>>, vector<1x256x8xf32>
    %1 = vector.shape_cast %0 : vector<1x256x8xf32> to vector<256x8xf32>
    %c0_2 = arith.constant 0 : index
    %c0_3 = arith.constant 0 : index
    %2 = vector.load %arg3[%c0_2, %c0_3] : memref<1x8xf32, #tpu.memory_space<vmem>>, vector<1x8xf32>
    %3 = vector.broadcast %2 : vector<1x8xf32> to vector<256x8xf32>
    %4 = arith.mulf %1, %3 : vector<256x8xf32>
    %c0_4 = arith.constant 0 : index
    %c0_5 = arith.constant 0 : index
    %5 = vector.load %arg4[%c0_4, %c0_5] : memref<1x8xf32, #tpu.memory_space<vmem>>, vector<1x8xf32>
    %6 = vector.broadcast %5 : vector<1x8xf32> to vector<256x8xf32>
    %7 = arith.addf %4, %6 : vector<256x8xf32>
    %c0_6 = arith.constant 0 : index
    %c0_7 = arith.constant 0 : index
    %c8 = arith.constant 8 : index
    %8 = vector.load %arg2[%c0_6, %c0_7, %c8] : memref<1x256x16xf32, #tpu.memory_space<vmem>>, vector<1x256x8xf32>
    %9 = vector.shape_cast %8 : vector<1x256x8xf32> to vector<256x8xf32>
    %c0_8 = arith.constant 0 : index
    %c0_9 = arith.constant 0 : index
    %10 = vector.load %arg5[%c0_8, %c0_9] : memref<1x8xf32, #tpu.memory_space<vmem>>, vector<1x8xf32>
    %11 = vector.broadcast %10 : vector<1x8xf32> to vector<256x8xf32>
    %12 = arith.mulf %9, %11 : vector<256x8xf32>
    %c0_10 = arith.constant 0 : index
    %c0_11 = arith.constant 0 : index
    %13 = vector.load %arg6[%c0_10, %c0_11] : memref<1x8xf32, #tpu.memory_space<vmem>>, vector<1x8xf32>
    %14 = vector.broadcast %13 : vector<1x8xf32> to vector<256x8xf32>
    %15 = arith.addf %12, %14 : vector<256x8xf32>
    %16 = arith.addf %7, %15 : vector<256x8xf32>
    %cst = arith.constant 0.000000e+00 : f32
    %17 = vector.broadcast %cst : f32 to vector<256x8xf32>
    %18 = arith.maximumf %16, %17 : vector<256x8xf32>
    %19 = vector.shape_cast %18 : vector<256x8xf32> to vector<8x2x8x2x8xf32>
    %cst_12 = arith.constant dense<0xFF800000> : vector<8x2x8x8xf32>
    %20 = vector.multi_reduction <maximumf>, %19, %cst_12 [3] : vector<8x2x8x2x8xf32> to vector<8x2x8x8xf32>
    %cst_13 = arith.constant dense<0xFF800000> : vector<8x8x8xf32>
    %21 = vector.multi_reduction <maximumf>, %20, %cst_13 [1] : vector<8x2x8x8xf32> to vector<8x8x8xf32>
    %c0_14 = arith.constant 0 : index
    %c0_15 = arith.constant 0 : index
    %c0_16 = arith.constant 0 : index
    %c0_17 = arith.constant 0 : index
    %22 = vector.load %arg7[%c0_14, %c0_15, %c0_16, %c0_17] : memref<1x8x8x8xf32, #tpu.memory_space<vmem>>, vector<1x8x8x8xf32>
    %23 = vector.shape_cast %22 : vector<1x8x8x8xf32> to vector<8x8x8xf32>
    %24 = vector.shape_cast %21 : vector<8x8x8xf32> to vector<1x8x8x8xf32>
    tpu.vector_store %arg7[%c0_14, %c0_15, %c0_16, %c0_17], %24 {strides = array<i32>} : memref<1x8x8x8xf32, #tpu.memory_space<vmem>>, vector<1x8x8x8xf32>,
    return
  }
  func.func @transform_0(%arg0: i32) -> (i32, i32, i32) {
    %c0_i32 = arith.constant 0 : i32
    %c0_i32_0 = arith.constant 0 : i32
    %c0_i32_1 = arith.constant 0 : i32
    return %arg0, %c0_i32, %c0_i32_0 : i32, i32, i32
  }
  func.func @transform_1(%arg0: i32) -> (i32, i32, i32) {
    %c0_i32 = arith.constant 0 : i32
    %c0_i32_0 = arith.constant 0 : i32
    %c0_i32_1 = arith.constant 0 : i32
    return %arg0, %c0_i32, %c0_i32_0 : i32, i32, i32
  }
  func.func @transform_2(%arg0: i32) -> (i32, i32) {
    %c0_i32 = arith.constant 0 : i32
    %c0_i32_0 = arith.constant 0 : i32
    %c0_i32_1 = arith.constant 0 : i32
    return %c0_i32, %c0_i32_0 : i32, i32
  }
  func.func @transform_3(%arg0: i32) -> (i32, i32) {
    %c0_i32 = arith.constant 0 : i32
    %c0_i32_0 = arith.constant 0 : i32
    %c0_i32_1 = arith.constant 0 : i32
    return %c0_i32, %c0_i32_0 : i32, i32
  }
  func.func @transform_4(%arg0: i32) -> (i32, i32) {
    %c0_i32 = arith.constant 0 : i32
    %c0_i32_0 = arith.constant 0 : i32
    %c0_i32_1 = arith.constant 0 : i32
    return %c0_i32, %c0_i32_0 : i32, i32
  }
  func.func @transform_5(%arg0: i32) -> (i32, i32) {
    %c0_i32 = arith.constant 0 : i32
    %c0_i32_0 = arith.constant 0 : i32
    %c0_i32_1 = arith.constant 0 : i32
    return %c0_i32, %c0_i32_0 : i32, i32
  }
  func.func @transform_6(%arg0: i32) -> (i32, i32, i32, i32) {
    %c0_i32 = arith.constant 0 : i32
    %c0_i32_0 = arith.constant 0 : i32
    %c0_i32_1 = arith.constant 0 : i32
    %c0_i32_2 = arith.constant 0 : i32
    return %arg0, %c0_i32, %c0_i32_0, %c0_i32_1 : i32, i32, i32, i32
  }
}

</mosaic_0001>

<bundles_post_ra>
// kernel: down_forward.5
= control target key start
LH: loop header
LB: loop body
LE: loop exit
PB: predicated region body
PF: predicated region fallthrough
CT: control target
= control target key end

     0   :  { %s2773_s21 = smov 0   ;;  %s3846_s0 = inlined_call_operand.vmem [shape: f32[2,256,8], index: 0, kind: input, shape index: {}]   ;;  %s3847_s1 = inlined_call_operand.vmem [shape: f32[2,256,16], index: 1, kind: input, shape index: {}]   ;;  %s3848_s2 = inlined_call_operand.vmem [shape: f32[1,8], index: 2, kind: input, shape index: {}]   ;;  %s3849_s3 = inlined_call_operand.vmem [shape: f32[1,8], index: 3, kind: input, shape index: {}]   ;;  %s3850_s4 = inlined_call_operand.vmem [shape: f32[1,8], index: 4, kind: input, shape index: {}]   ;;  %s3851_s5 = inlined_call_operand.vmem [shape: f32[1,8], index: 5, kind: input, shape index: {}]   ;;  %s3852_s6 = inlined_call_operand.vmem [shape: f32[2,8,8,8], index: 6, kind: output, shape index: {}]  }
   0x1 LB: > { %s2692_s22 = sadd.s32 4294967295, %s2733_s21   ;;  %p2696_p0 = scmp.ge.s32.totalorder %s2733_s21, 1  ;;  %s2733_s21 = sphi %s2773_s21, %s16_s21  }
   0x2   : > { %p222_p1 = scmp.lt.s32.totalorder %s2733_s21, 3 }
   0x4   : > { %p223_p2 = pnand %p2696_p0, %p222_p1 }
   0x6   : > { %226 = sbr.rel (%p223_p2) target bundleno = 613 (0x265), region = 44 }
   0xd   : > { %v2705_v0 = vld [vmem:[%s3850_s4] ss:$0 sm:$0xff]  ;;  %s2735_s25 = smov 8   ;;  %p257_p3 = scmp.lt.s32.totalorder %s2692_s22, 1  ;;  %vm1392_vm0 = vcmask 58368   ;;  %vm2289_vm1 = vcmask 64512  }
   0xe   : > { %420 = vrot.lane.b32.xlu0 %v2705_v0, %s2735_s25  ;;  %v2706_v1 = vld [vmem:[%s3851_s5] ss:$0 sm:$0xff]  ;;  %s2736_s8 = smov 120   ;;  %vm2546_vm2 = vcmask 1041409   ;;  %vm2548_vm3 = vcmask 1042434   ;;  %vm2550_vm4 = vcmask 1043459  }
   0xf   : > { %s3881_s22 = smov (!%p257_p3, %s2692_s22), 1  ;;  %vm2552_vm5 = vcmask 1044484   ;;  %vm2554_vm6 = vcmask 1045509   ;;  %vm2556_vm7 = vcmask 1046534   ;;  %vm2558_vm8 = vcmask 1047559  }
  0x10   : > { %s2709_s28 = sshll.u32 %s3881_s22, 8  ;;  %s2711_s20 = sshll.u32 %s3881_s22, 6 }
  0x11   : > { %s2795_s7 = scalar_lea.vmem %s3847_s1, %s2709_s28  ;;  %s2937_s11 = scalar_lea.vmem %s3846_s0, %s2709_s28 }
  0x12   : > { %461 = vrot.lane.b32.xlu0 %v2706_v1, %s2735_s25  ;;  %v386_v3 = vld [vmem:[%s2795_s7 + $0x20] sm:$0xff]  ;;  %v384_v9 = vld [vmem:[%s2795_s7 + $0x10] sm:$0xff]  ;;  %v413_v24 = vld [vmem:[%s2795_s7 + $0xf8] sm:$0xff]  ;;  %s3519_s24 = scalar_lea.vmem %s3852_s6, %s2711_s20 }
  0x13   : > { %v382_v4 = vld [vmem:[%s2795_s7] sm:$0xff]  ;;  %v388_v15 = vld [vmem:[%s2795_s7 + $0x30] sm:$0xff]  ;;  %v383_v46 = vld [vmem:[%s2795_s7 + $0x8] sm:$0xff] }
  0x14   : > { %v390_v8 = vld [vmem:[%s2795_s7 + $0x40] sm:$0xff]  ;;  %v392_v21 = vld [vmem:[%s2795_s7 + $0x50] sm:$0xff]  ;;  %v387_v52 = vld [vmem:[%s2795_s7 + $0x28] sm:$0xff] }
  0x15   : > { %v394_v14 = vld [vmem:[%s2795_s7 + $0x60] sm:$0xff]  ;;  %v396_v28 = vld [vmem:[%s2795_s7 + $0x70] sm:$0xff]  ;;  %v391_v58 = vld [vmem:[%s2795_s7 + $0x48] sm:$0xff] }
  0x16   : > { %v398_v20 = vld [vmem:[%s2795_s7 + $0x80] sm:$0xff]  ;;  %v400_v35 = vld [vmem:[%s2795_s7 + $0x90] sm:$0xff]  ;;  %v385_v59 = vld [vmem:[%s2795_s7 + $0x18] sm:$0xff] }
  0x17   : > { %v402_v27 = vld [vmem:[%s2795_s7 + $0xa0] sm:$0xff]  ;;  %v404_v41 = vld [vmem:[%s2795_s7 + $0xb0] sm:$0xff]  ;;  %v395_v0 = vld [vmem:[%s2795_s7 + $0x68] sm:$0xff] }
  0x18   : > { %v406_v34 = vld [vmem:[%s2795_s7 + $0xc0] sm:$0xff]  ;;  %v408_v47 = vld [vmem:[%s2795_s7 + $0xd0] sm:$0xff]  ;;  %v389_v1 = vld [vmem:[%s2795_s7 + $0x38] sm:$0xff] }
  0x19   : > { %v410_v40 = vld [vmem:[%s2795_s7 + $0xe0] sm:$0xff]  ;;  %v412_v53 = vld [vmem:[%s2795_s7 + $0xf0] sm:$0xff] }
  0x80   : > { %v2797_v2 = vpop.permute.xlu0 %420 }
  0x81   : > { %v427_v5 = vmul.f32 %v2797_v2, %v386_v3  ;;  %v423_v6 = vmul.f32 %v2797_v2, %v382_v4  ;;  %v431_v12 = vmul.f32 %v2797_v2, %v390_v8  ;;  %v425_v13 = vmul.f32 %v2797_v2, %v384_v9  ;;  %v399_v8 = vld [vmem:[%s2795_s7 + $0x88] sm:$0xff]  ;;  %v393_v9 = vld [vmem:[%s2795_s7 + $0x58] sm:$0xff] }
  0x82   : > { %v435_v18 = vmul.f32 %v2797_v2, %v394_v14  ;;  %v429_v19 = vmul.f32 %v2797_v2, %v388_v15  ;;  %v439_v25 = vmul.f32 %v2797_v2, %v398_v20  ;;  %v433_v26 = vmul.f32 %v2797_v2, %v392_v21  ;;  %v403_v14 = vld [vmem:[%s2795_s7 + $0xa8] sm:$0xff]  ;;  %v397_v15 = vld [vmem:[%s2795_s7 + $0x78] sm:$0xff] }
  0x83   : > { %v2835_v31 = vmul.f32 %v2797_v2, %v413_v24  ;;  %v443_v32 = vmul.f32 %v2797_v2, %v402_v27  ;;  %v437_v33 = vmul.f32 %v2797_v2, %v396_v28  ;;  %v447_v38 = vmul.f32 %v2797_v2, %v406_v34  ;;  %v407_v20 = vld [vmem:[%s2795_s7 + $0xc8] sm:$0xff]  ;;  %v401_v21 = vld [vmem:[%s2795_s7 + $0x98] sm:$0xff] }
  0x84   : > { %v2803_v7 = vpop.permute.xlu0 %461  ;;  %v441_v39 = vmul.f32 %v2797_v2, %v400_v35  ;;  %v451_v44 = vmul.f32 %v2797_v2, %v410_v40  ;;  %v445_v45 = vmul.f32 %v2797_v2, %v404_v41  ;;  %v424_v50 = vmul.f32 %v2797_v2, %v383_v46  ;;  %v405_v27 = vld [vmem:[%s2795_s7 + $0xb8] sm:$0xff]  ;;  %v272_v40 = vld [vmem:[%s2937_s11] sm:$0xff] }
  0x85   : > { %v468_v10 = vadd.f32 %v2803_v7, %v427_v5  ;;  %v464_v11 = vadd.f32 %v2803_v7, %v423_v6  ;;  %v472_v16 = vadd.f32 %v2803_v7, %v431_v12  ;;  %v466_v17 = vadd.f32 %v2803_v7, %v425_v13 }
  0x86   : > { %v476_v22 = vadd.f32 %v2803_v7, %v435_v18  ;;  %v470_v23 = vadd.f32 %v2803_v7, %v429_v19  ;;  %v480_v29 = vadd.f32 %v2803_v7, %v439_v25  ;;  %v474_v30 = vadd.f32 %v2803_v7, %v433_v26  ;;  %v411_v26 = vld [vmem:[%s2795_s7 + $0xe8] sm:$0xff] }
  0x87   : > { %536 = vrot.lane.b32.xlu0 %v468_v10, %s2736_s8  ;;  %528 = vrot.lane.b32.xlu1 %v464_v11, %s2736_s8  ;;  %v484_v36 = vadd.f32 %v2803_v7, %v443_v32  ;;  %v478_v37 = vadd.f32 %v2803_v7, %v437_v33  ;;  %v488_v42 = vadd.f32 %v2803_v7, %v447_v38  ;;  %v409_v33 = vld [vmem:[%s2795_s7 + $0xd8] sm:$0xff]  ;;  %v2737_v41 = vmov 1983009808  }
  0x88   : > { %v482_v43 = vadd.f32 %v2803_v7, %v441_v39  ;;  %v492_v48 = vadd.f32 %v2803_v7, %v451_v44  ;;  %v486_v49 = vadd.f32 %v2803_v7, %v445_v45  ;;  %v449_v51 = vmul.f32 %v2797_v2, %v408_v47  ;;  %v276_v39 = vld [vmem:[%s2937_s11 + $0x20] sm:$0xff] }
  0x89   : > { %v465_v54 = vadd.f32 %v2803_v7, %v424_v50  ;;  %v428_v56 = vmul.f32 %v2797_v2, %v387_v52  ;;  %v453_v57 = vmul.f32 %v2797_v2, %v412_v53  ;;  %v432_v62 = vmul.f32 %v2797_v2, %v391_v58  ;;  %v2951_v44 = vld [vmem:[%s3849_s3] ss:$0 sm:$0xff]  ;;  %v274_v58 = vld [vmem:[%s2937_s11 + $0x10] sm:$0xff] }
  0x8a   : > { %v490_v55 = vadd.f32 %v2803_v7, %v449_v51  ;;  %v426_v63 = vmul.f32 %v2797_v2, %v385_v59  ;;  %v436_v5 = vmul.f32 %v2797_v2, %v395_v0  ;;  %v430_v6 = vmul.f32 %v2797_v2, %v389_v1  ;;  %v284_v59 = vld [vmem:[%s2937_s11 + $0x60] sm:$0xff] }
  0x8b   : > { %544 = vrot.lane.b32.xlu0 %v472_v16, %s2736_s8  ;;  %532 = vrot.lane.b32.xlu1 %v466_v17, %s2736_s8  ;;  %v469_v60 = vadd.f32 %v2803_v7, %v428_v56  ;;  %v494_v61 = vadd.f32 %v2803_v7, %v453_v57  ;;  %v473_v3 = vadd.f32 %v2803_v7, %v432_v62  ;;  %v288_v1 = vld [vmem:[%s2937_s11 + $0x80] sm:$0xff] }
  0x8c   : > { %v467_v4 = vadd.f32 %v2803_v7, %v426_v63  ;;  %v477_v10 = vadd.f32 %v2803_v7, %v436_v5  ;;  %v471_v11 = vadd.f32 %v2803_v7, %v430_v6  ;;  %v440_v12 = vmul.f32 %v2797_v2, %v399_v8 }
  0x8d   : > { %v434_v13 = vmul.f32 %v2797_v2, %v393_v9  ;;  %v444_v18 = vmul.f32 %v2797_v2, %v403_v14  ;;  %v438_v19 = vmul.f32 %v2797_v2, %v397_v15  ;;  %v448_v24 = vmul.f32 %v2797_v2, %v407_v20 }
  0x8e   : > { %v481_v16 = vadd.f32 %v2803_v7, %v440_v12  ;;  %v442_v25 = vmul.f32 %v2797_v2, %v401_v21  ;;  %v446_v32 = vmul.f32 %v2797_v2, %v405_v27  ;;  %v495_v38 = vadd.f32 %v2803_v7, %v2835_v31 }
  0x8f   : > { %552 = vrot.lane.b32.xlu0 %v476_v22, %s2736_s8  ;;  %540 = vrot.lane.b32.xlu1 %v470_v23, %s2736_s8  ;;  %v475_v17 = vadd.f32 %v2803_v7, %v434_v13  ;;  %v485_v22 = vadd.f32 %v2803_v7, %v444_v18  ;;  %v479_v23 = vadd.f32 %v2803_v7, %v438_v19  ;;  %v724_v31 = vlaneseq }
  0x90   : > { %v489_v28 = vadd.f32 %v2803_v7, %v448_v24  ;;  %v487_v35 = vadd.f32 %v2803_v7, %v446_v32 }
  0x91   : > { %v725_v46 = vshrl.u32 %v724_v31, 7 }
  0x93   : > { %560 = vrot.lane.b32.xlu0 %v480_v29, %s2736_s8  ;;  %548 = vrot.lane.b32.xlu1 %v474_v30, %s2736_s8  ;;  %v483_v29 = vadd.f32 %v2803_v7, %v442_v25  ;;  %v452_v30 = vmul.f32 %v2797_v2, %v411_v26 }
  0x95   : > { %v493_v34 = vadd.f32 %v2803_v7, %v452_v30 }
  0x97   : > { %568 = vrot.lane.b32.xlu0 %v484_v36, %s2736_s8  ;;  %556 = vrot.lane.b32.xlu1 %v478_v37, %s2736_s8  ;;  %v450_v36 = vmul.f32 %v2797_v2, %v409_v33  ;;  %v2942_v2 = vld [vmem:[%s3848_s2] ss:$0 sm:$0xff] }
  0x98   : > { %v323_v5 = vmul.f32 %v2942_v2, %v284_v59  ;;  %v327_v15 = vmul.f32 %v2942_v2, %v288_v1 }
  0x99   : > { %v491_v37 = vadd.f32 %v2803_v7, %v450_v36  ;;  %v722_v7 = vunpack.c.l.s4 %v2737_v41 }
  0x9b   : > { %576 = vrot.lane.b32.xlu0 %v488_v42, %s2736_s8  ;;  %564 = vrot.lane.b32.xlu1 %v482_v43, %s2736_s8  ;;  %v315_v42 = vmul.f32 %v2942_v2, %v276_v39  ;;  %v311_v43 = vmul.f32 %v2942_v2, %v272_v40  ;;  %v723_v45 = vunpack.c.0.s8 %v722_v7  ;;  %v286_v39 = vld [vmem:[%s2937_s11 + $0x70] sm:$0xff]  ;;  %v296_v40 = vld [vmem:[%s2937_s11 + $0xc0] sm:$0xff]  ;;  %v2987_v7 = vadd.f32 %v2951_v44, %v323_v5 }
  0x9d   : > { %v354_v47 = vadd.f32 %v2951_v44, %v315_v42  ;;  %v2956_v52 = vsub.s32 %v723_v45, %v725_v46  ;;  %v2993_v42 = vadd.f32 %v2951_v44, %v327_v15 }
  0x9f   : > { %584 = vrot.lane.b32.xlu0 %v492_v48, %s2736_s8  ;;  %572 = vrot.lane.b32.xlu1 %v486_v49, %s2736_s8  ;;  %v350_v48 = vadd.f32 %v2951_v44, %v311_v43  ;;  %v280_v49 = vld [vmem:[%s2937_s11 + $0x40] sm:$0xff] }
  0xa3   : > { %530 = vrot.lane.b32.xlu0 %v465_v54, %s2736_s8  ;;  %580 = vrot.lane.b32.xlu1 %v490_v55, %s2736_s8  ;;  %v319_v55 = vmul.f32 %v2942_v2, %v280_v49  ;;  %v300_v49 = vld [vmem:[%s2937_s11 + $0xe0] sm:$0xff] }
  0xa7   : > { %538 = vrot.lane.b32.xlu0 %v469_v60, %s2736_s8  ;;  %588 = vrot.lane.b32.xlu1 %v494_v61, %s2736_s8  ;;  %v278_v60 = vld [vmem:[%s2937_s11 + $0x30] sm:$0xff] }
  0xa8   : > { %v317_v6 = vmul.f32 %v2942_v2, %v278_v60 }
  0xaa   : > { %v2990_v31 = vadd.f32 %v2951_v44, %v317_v6 }
  0xab   : > { %546 = vrot.lane.b32.xlu0 %v473_v3, %s2736_s8  ;;  %534 = vrot.lane.b32.xlu1 %v467_v4, %s2736_s8  ;;  %v358_v3 = vadd.f32 %v2951_v44, %v319_v55  ;;  %v313_v4 = vmul.f32 %v2942_v2, %v274_v58  ;;  %v335_v55 = vmul.f32 %v2942_v2, %v296_v40 }
  0xad   : > { %v352_v27 = vadd.f32 %v2951_v44, %v313_v4 }
  0xaf   : > { %554 = vrot.lane.b32.xlu0 %v477_v10, %s2736_s8  ;;  %542 = vrot.lane.b32.xlu1 %v471_v11, %s2736_s8 }
  0xb3   : > { %562 = vrot.lane.b32.xlu0 %v481_v16, %s2736_s8  ;;  %550 = vrot.lane.b32.xlu1 %v475_v17, %s2736_s8  ;;  %v282_v16 = vld [vmem:[%s2937_s11 + $0x50] sm:$0xff] }
  0xb7   : > { %570 = vrot.lane.b32.xlu0 %v485_v22, %s2736_s8  ;;  %558 = vrot.lane.b32.xlu1 %v479_v23, %s2736_s8 }
  0xbb   : > { %578 = vrot.lane.b32.xlu0 %v489_v28, %s2736_s8  ;;  %566 = vrot.lane.b32.xlu1 %v483_v29, %s2736_s8  ;;  %v321_v28 = vmul.f32 %v2942_v2, %v282_v16 }
  0xbf   : > { %586 = vrot.lane.b32.xlu0 %v493_v34, %s2736_s8  ;;  %574 = vrot.lane.b32.xlu1 %v487_v35, %s2736_s8  ;;  %v292_v34 = vld [vmem:[%s2937_s11 + $0xa0] sm:$0xff] }
  0xc3   : > { %582 = vrot.lane.b32.xlu1 %v491_v37, %s2736_s8 }
  0xc7   : > { %590 = vrot.lane.b32.xlu1 %v495_v38, %s2736_s8 }
  0xf9   : > { %v537_v50 = vpop.permute.xlu0 %536  ;;  %v529_v51 = vpop.permute.xlu1 %528 }
  0xfa   : > { %v628_v53 = vadd.f32 %v537_v50, %v354_v47  ;;  %v624_v54 = vadd.f32 %v529_v51, %v350_v48  ;;  %v331_v47 = vmul.f32 %v2942_v2, %v292_v34  ;;  %v290_v48 = vld [vmem:[%s2937_s11 + $0x90] sm:$0xff] }
  0xfb   : > { %v294_v50 = vld [vmem:[%s2937_s11 + $0xb0] sm:$0xff] }
  0xfc   : > { %v660_v56 = vmax.f32 %v628_v53, 0.0  ;;  %v656_v57 = vmax.f32 %v624_v54, 0.0  ;;  %v3000_v53 = vadd.f32 %v2951_v44, %v321_v28  ;;  %v325_v54 = vmul.f32 %v2942_v2, %v286_v39 }
  0xfd   : > { %v545_v26 = vpop.permute.xlu0 %544  ;;  %v533_v60 = vpop.permute.xlu1 %532  ;;  %v3008_v5 = vadd.f32 %v2951_v44, %v331_v47 }
  0xfe   : > { %v788_v61 = vcombine.high %v660_v56, %v660_v56  ;;  %v795_v62 = vrot.slane %v660_v56, %v2956_v52  ;;  %v720_v63 = vcombine.high %v656_v57, %v656_v57  ;;  %v727_v0 = vrot.slane %v656_v57, %v2956_v52 }
  0xff   : > { %v632_v41 = vadd.f32 %v545_v26, %v358_v3 }
 0x100   : > { %v802_v8 = vrot.slane %v788_v61, %v2956_v52  ;;  %v803_v9 = vcombine.high %v795_v62, %v795_v62  ;;  %v1505_v10 = vsel %vm1392_vm0, %v795_v62, -inf  ;;  %v734_v11 = vrot.slane %v720_v63, %v2956_v52 }
 0x101   : > { %v1506_v12 = vrot.slane %v1505_v10, 4  ;;  %v735_v13 = vcombine.high %v727_v0, %v727_v0  ;;  %v1393_v14 = vsel %vm1392_vm0, %v727_v0, -inf  ;;  %v664_v61 = vmax.f32 %v632_v41, 0.0 }
 0x102   : > { %v804_v17 = vcombine.high %v802_v8, %v802_v8  ;;  %v1512_v18 = vsel %vm1392_vm0, %v803_v9, -inf  ;;  %v1519_v19 = vsel %vm1392_vm0, %v802_v8, -inf  ;;  %v736_v20 = vcombine.high %v734_v11, %v734_v11 }
 0x103   : > { %v1507_v21 = vmax.f32 %v1505_v10, %v1506_v12  ;;  %v1513_v22 = vrot.slane %v1512_v18, 4  ;;  %v1520_v23 = vrot.slane %v1519_v19, 4  ;;  %v1394_v24 = vrot.slane %v1393_v14, 4 }
 0x104   : > { %v1526_v25 = vsel %vm1392_vm0, %v804_v17, -inf  ;;  %v1400_v30 = vsel %vm1392_vm0, %v735_v13, -inf  ;;  %v1407_v32 = vsel %vm1392_vm0, %v734_v11, -inf  ;;  %v1414_v33 = vsel %vm1392_vm0, %v736_v20, -inf  ;;  %v273_v11 = vld [vmem:[%s2937_s11 + $0x8] sm:$0xff] }
 0x105   : > { %v1508_v29 = vrot.slane %v1507_v21, 2  ;;  %v1514_v35 = vmax.f32 %v1512_v18, %v1513_v22  ;;  %v1521_v36 = vmax.f32 %v1519_v19, %v1520_v23  ;;  %v1527_v37 = vrot.slane %v1526_v25, 4 }
 0x106   : > { %v1395_v38 = vmax.f32 %v1393_v14, %v1394_v24  ;;  %v1401_v43 = vrot.slane %v1400_v30, 4  ;;  %v1408_v45 = vrot.slane %v1407_v32, 4  ;;  %v1415_v46 = vrot.slane %v1414_v33, 4 }
 0x107   : > { %v1509_v51 = vmax.f32 %v1507_v21, %v1508_v29  ;;  %v1515_v56 = vrot.slane %v1514_v35, 2  ;;  %v1522_v57 = vrot.slane %v1521_v36, 2  ;;  %v1528_v58 = vmax.f32 %v1526_v25, %v1527_v37 }
 0x108   : > { %v1396_v59 = vrot.slane %v1395_v38, 2  ;;  %v329_v62 = vmul.f32 %v2942_v2, %v290_v48  ;;  %v339_v63 = vmul.f32 %v2942_v2, %v300_v49  ;;  %v333_v0 = vmul.f32 %v2942_v2, %v294_v50 }
 0x109   : > { %v1402_v1 = vmax.f32 %v1400_v30, %v1401_v43  ;;  %v1409_v3 = vmax.f32 %v1407_v32, %v1408_v45  ;;  %v1416_v4 = vmax.f32 %v1414_v33, %v1415_v46  ;;  %v1510_v6 = vrot.slane %v1509_v51, 1 }
 0x10a   : > { %v626_v8 = vadd.f32 %v533_v60, %v352_v27  ;;  %v3011_v9 = vadd.f32 %v2951_v44, %v325_v54  ;;  %v3014_v10 = vadd.f32 %v2951_v44, %v335_v55  ;;  %v1516_v12 = vmax.f32 %v1514_v35, %v1515_v56 }
 0x10b   : > { %v1523_v13 = vmax.f32 %v1521_v36, %v1522_v57  ;;  %v1529_v14 = vrot.slane %v1528_v58, 2  ;;  %v3017_v15 = vmax.f32 %v1395_v38, %v1396_v59  ;;  %v856_v16 = vcombine.high %v664_v61, %v664_v61 }
 0x10c   : > { %v3020_v17 = vadd.f32 %v2951_v44, %v329_v62  ;;  %v3023_v18 = vadd.f32 %v2951_v44, %v339_v63  ;;  %v3026_v19 = vadd.f32 %v2951_v44, %v333_v0  ;;  %v1403_v20 = vrot.slane %v1402_v1, 2  ;;  %v553_v44 = vpop.permute.xlu0 %552 }
 0x10d   : > { %v1410_v21 = vrot.slane %v1409_v3, 2  ;;  %v1417_v22 = vrot.slane %v1416_v4, 2  ;;  %v3029_v23 = vmul.f32 %v2942_v2, %v273_v11  ;;  %v1511_v24 = vmax.f32 %v1509_v51, %v1510_v6 }
 0x10e   : > { %v863_v25 = vrot.slane %v664_v61, %v2956_v52  ;;  %v870_v26 = vrot.slane %v856_v16, %v2956_v52  ;;  %v658_v27 = vmax.f32 %v626_v8, 0.0  ;;  %v1517_v28 = vrot.slane %v1516_v12, 1 }
 0x10f   : > { %v1524_v29 = vrot.slane %v1523_v13, 1  ;;  %v1530_v30 = vmax.f32 %v1528_v58, %v1529_v14  ;;  %v1398_v32 = vrot.slane %v3017_v15, 1  ;;  %v1404_v40 = vmax.f32 %v1402_v1, %v1403_v20 }
 0x110   : > { %v871_v33 = vcombine.high %v863_v25, %v863_v25  ;;  %v872_v34 = vcombine.high %v870_v26, %v870_v26  ;;  %v1617_v35 = vsel %vm1392_vm0, %v863_v25, -inf  ;;  %v1631_v2 = vsel %vm1392_vm0, %v870_v26, -inf }
 0x111   : > { %v1618_v36 = vrot.slane %v1617_v35, 4  ;;  %v1632_v37 = vrot.slane %v1631_v2, 4  ;;  %v754_v38 = vcombine.high %v658_v27, %v658_v27  ;;  %v761_v39 = vrot.slane %v658_v27, %v2956_v52 }
 0x112   : > { %v1624_v41 = vsel %vm1392_vm0, %v871_v33, -inf  ;;  %v1638_v43 = vsel %vm1392_vm0, %v872_v34, -inf  ;;  %v636_v45 = vadd.f32 %v553_v44, %v2987_v7  ;;  %v1411_v50 = vmax.f32 %v1409_v3, %v1410_v21 }
 0x113   : > { %v1619_v46 = vmax.f32 %v1617_v35, %v1618_v36  ;;  %v1625_v47 = vrot.slane %v1624_v41, 4  ;;  %v1633_v48 = vmax.f32 %v1631_v2, %v1632_v37  ;;  %v1639_v49 = vrot.slane %v1638_v43, 4 }
 0x114   : > { %v768_v51 = vrot.slane %v754_v38, %v2956_v52  ;;  %v769_v54 = vcombine.high %v761_v39, %v761_v39  ;;  %v1449_v55 = vsel %vm1392_vm0, %v761_v39, -inf  ;;  %v1518_v56 = vmax.f32 %v1516_v12, %v1517_v28 }
 0x115   : > { %v1531_v57 = vrot.slane %v1530_v30, 1  ;;  %v1418_v58 = vmax.f32 %v1416_v4, %v1417_v22  ;;  %v1626_v59 = vmax.f32 %v1624_v41, %v1625_v47  ;;  %v1450_v61 = vrot.slane %v1449_v55, 4 }
 0x116   : > { %v770_v60 = vcombine.high %v768_v51, %v768_v51  ;;  %v1456_v62 = vsel %vm1392_vm0, %v769_v54, -inf  ;;  %v1463_v7 = vsel %vm1392_vm0, %v768_v51, -inf  ;;  %v1620_v63 = vrot.slane %v1619_v46, 2 }
 0x117   : > { %v1634_v0 = vrot.slane %v1633_v48, 2  ;;  %v1640_v1 = vmax.f32 %v1638_v43, %v1639_v49  ;;  %v668_v6 = vmax.f32 %v636_v45, 0.0  ;;  %v1451_v3 = vmax.f32 %v1449_v55, %v1450_v61 }
 0x118   : > { %v1457_v8 = vrot.slane %v1456_v62, 4  ;;  %v1464_v11 = vrot.slane %v1463_v7, 4  ;;  %v1470_v14 = vsel %vm1392_vm0, %v770_v60, -inf  ;;  %v1525_v16 = vmax.f32 %v1523_v13, %v1524_v29 }
 0x119   : > { %v3046_v12 = vsel %vm2289_vm1, %v1511_v24, -inf  ;;  %v1405_v4 = vrot.slane %v1404_v40, 1  ;;  %v1627_v20 = vrot.slane %v1626_v59, 2  ;;  %v1412_v21 = vrot.slane %v1411_v50, 1 }
 0x11a   : > { %v1419_v22 = vrot.slane %v1418_v58, 1  ;;  %v1458_v25 = vmax.f32 %v1456_v62, %v1457_v8  ;;  %v1471_v26 = vrot.slane %v1470_v14, 4  ;;  %v1399_v27 = vmax.f32 %v3017_v15, %v1398_v32 }
 0x11b   : > { %v1641_v28 = vrot.slane %v1640_v1, 2  ;;  %v1465_v44 = vmax.f32 %v1463_v7, %v1464_v11  ;;  %v924_v33 = vcombine.high %v668_v6, %v668_v6  ;;  %v1532_v34 = vmax.f32 %v1530_v30, %v1531_v57 }
 0x11c   : > { %v1621_v35 = vmax.f32 %v1619_v46, %v1620_v63  ;;  %v1635_v2 = vmax.f32 %v1633_v48, %v1634_v0  ;;  %v1452_v36 = vrot.slane %v1451_v3, 2  ;;  %v3050_v13 = vsel %vm2289_vm1, %v1518_v56, -inf  ;;  %v541_v46 = vpop.permute.xlu1 %540 }
 0x11d   : > { %v3053_v24 = vsel %vm2289_vm1, %v1525_v16, -inf  ;;  %v1406_v29 = vmax.f32 %v1404_v40, %v1405_v4  ;;  %v1628_v37 = vmax.f32 %v1626_v59, %v1627_v20  ;;  %v1413_v38 = vmax.f32 %v1411_v50, %v1412_v21 }
 0x11e   : > { %v1420_v39 = vmax.f32 %v1418_v58, %v1419_v22  ;;  %v1459_v41 = vrot.slane %v1458_v25, 2  ;;  %v1472_v43 = vmax.f32 %v1470_v14, %v1471_v26  ;;  %v1642_v15 = vmax.f32 %v1640_v1, %v1641_v28 }
 0x11f   : > { %v1466_v32 = vrot.slane %v1465_v44, 2  ;;  %v931_v45 = vrot.slane %v668_v6, %v2956_v52  ;;  %v938_v30 = vrot.slane %v924_v33, %v2956_v52  ;;  %v3058_v47 = vsel %vm2289_vm1, %v1399_v27, -inf }
 0x120   : > { %v1622_v48 = vrot.slane %v1621_v35, 1  ;;  %v1636_v49 = vrot.slane %v1635_v2, 1  ;;  %v1453_v51 = vmax.f32 %v1451_v3, %v1452_v36  ;;  %v1629_v54 = vrot.slane %v1628_v37, 1 }
 0x121   : > { %v939_v40 = vcombine.high %v931_v45, %v931_v45  ;;  %v1729_v50 = vsel %vm1392_vm0, %v931_v45, -inf  ;;  %v1743_v55 = vsel %vm1392_vm0, %v938_v30, -inf  ;;  %v3063_v56 = vsel %vm2289_vm1, %v1532_v34, -inf }
 0x122   : > { %v1460_v57 = vmax.f32 %v1458_v25, %v1459_v41  ;;  %v1473_v58 = vrot.slane %v1472_v43, 2  ;;  %v630_v59 = vadd.f32 %v541_v46, %v2990_v31  ;;  %v1643_v60 = vrot.slane %v1642_v15, 1  ;;  %v561_v41 = vpop.permute.xlu0 %560 }
 0x123   : > { %v1467_v61 = vmax.f32 %v1465_v44, %v1466_v32  ;;  %v1730_v62 = vrot.slane %v1729_v50, 4  ;;  %v1736_v7 = vsel %vm1392_vm0, %v939_v40, -inf  ;;  %v3068_v63 = vsel %vm2289_vm1, %v1406_v29, -inf }
 0x124   : > { %v1623_v0 = vmax.f32 %v1621_v35, %v1622_v48  ;;  %v1454_v1 = vrot.slane %v1453_v51, 1  ;;  %v1744_v6 = vrot.slane %v1743_v55, 4  ;;  %v3071_v3 = vsel %vm2289_vm1, %v1413_v38, -inf }
 0x125   : > { %v1630_v8 = vmax.f32 %v1628_v37, %v1629_v54  ;;  %v1637_v11 = vmax.f32 %v1635_v2, %v1636_v49  ;;  %v940_v14 = vcombine.high %v938_v30, %v938_v30  ;;  %v1461_v16 = vrot.slane %v1460_v57, 1 }
 0x126   : > { %v1474_v4 = vmax.f32 %v1472_v43, %v1473_v58  ;;  %v1737_v31 = vrot.slane %v1736_v7, 4  ;;  %v662_v20 = vmax.f32 %v630_v59, 0.0  ;;  %v3074_v21 = vsel %vm2289_vm1, %v1420_v39, -inf }
 0x127   : > { %v1644_v22 = vmax.f32 %v1642_v15, %v1643_v60  ;;  %v1468_v25 = vrot.slane %v1467_v61, 1  ;;  %v1731_v26 = vmax.f32 %v1729_v50, %v1730_v62  ;;  %v3077_v27 = vsel %vm2289_vm1, %v1623_v0, -inf  ;;  %v549_v60 = vpop.permute.xlu1 %548 }
 0x128   : > { %v1455_v28 = vmax.f32 %v1453_v51, %v1454_v1  ;;  %v1745_v44 = vmax.f32 %v1743_v55, %v1744_v6  ;;  %v822_v33 = vcombine.high %v662_v20, %v662_v20  ;;  %v3080_v34 = vsel %vm2289_vm1, %v1630_v8, -inf }
 0x129   : > { %v3083_v35 = vsel %vm2289_vm1, %v1637_v11, -inf  ;;  %v1750_v2 = vsel %vm1392_vm0, %v940_v14, -inf  ;;  %v829_v36 = vrot.slane %v662_v20, %v2956_v52  ;;  %v1462_v29 = vmax.f32 %v1460_v57, %v1461_v16 }
 0x12a   : > { %v1475_v37 = vrot.slane %v1474_v4, 1  ;;  %v1738_v38 = vmax.f32 %v1736_v7, %v1737_v31  ;;  %v836_v39 = vrot.slane %v822_v33, %v2956_v52  ;;  %v1469_v43 = vmax.f32 %v1467_v61, %v1468_v25 }
 0x12b   : > { %v1732_v15 = vrot.slane %v1731_v26, 2  ;;  %v837_v32 = vcombine.high %v829_v36, %v829_v36  ;;  %v1561_v45 = vsel %vm1392_vm0, %v829_v36, -inf  ;;  %v2291_v30 = vsel %vm2289_vm1, %v1455_v28, -inf }
 0x12c   : > { %v1746_v46 = vrot.slane %v1745_v44, 2  ;;  %v1751_v48 = vrot.slane %v1750_v2, 4  ;;  %v838_v49 = vcombine.high %v836_v39, %v836_v39  ;;  %v1562_v51 = vrot.slane %v1561_v45, 4 }
 0x12d   : > { %v1568_v54 = vsel %vm1392_vm0, %v837_v32, -inf  ;;  %v1575_v40 = vsel %vm1392_vm0, %v836_v39, -inf  ;;  %v640_v50 = vadd.f32 %v561_v41, %v2993_v42  ;;  %v3094_v55 = vsel %vm2289_vm1, %v1644_v22, -inf }
 0x12e   : > { %v1476_v57 = vmax.f32 %v1474_v4, %v1475_v37  ;;  %v1739_v58 = vrot.slane %v1738_v38, 2  ;;  %v1569_v59 = vrot.slane %v1568_v54, 4  ;;  %v2292_v61 = vmax.f32 %v3058_v47, %v2291_v30 }
 0x12f   : > { %v2294_v62 = vsel %vm2289_vm1, %v1462_v29, -inf  ;;  %v1733_v7 = vmax.f32 %v1731_v26, %v1732_v15  ;;  %v1576_v0 = vrot.slane %v1575_v40, 4  ;;  %v1747_v1 = vmax.f32 %v1745_v44, %v1746_v46 }
 0x130   : > { %v1752_v6 = vmax.f32 %v1750_v2, %v1751_v48  ;;  %v1570_v8 = vmax.f32 %v1568_v54, %v1569_v59  ;;  %v1582_v11 = vsel %vm1392_vm0, %v838_v49, -inf  ;;  %v2297_v42 = vsel %vm2289_vm1, %v1469_v43, -inf }
 0x131   : > { %v1563_v14 = vmax.f32 %v1561_v45, %v1562_v51  ;;  %v672_v16 = vmax.f32 %v640_v50, 0.0  ;;  %v634_v4 = vadd.f32 %v549_v60, %v3000_v53  ;;  %v2295_v31 = vmax.f32 %v3068_v63, %v2294_v62 }
 0x132   : > { %v3103_v47 = vsel %vm2289_vm1, %v1476_v57, -inf  ;;  %v1740_v20 = vmax.f32 %v1738_v38, %v1739_v58  ;;  %v1577_v22 = vmax.f32 %v1575_v40, %v1576_v0  ;;  %v1734_v25 = vrot.slane %v1733_v7, 1 }
 0x133   : > { %v1583_v26 = vrot.slane %v1582_v11, 4  ;;  %v992_v28 = vcombine.high %v672_v16, %v672_v16  ;;  %v999_v44 = vrot.slane %v672_v16, %v2956_v52  ;;  %v2298_v33 = vmax.f32 %v3071_v3, %v2297_v42 }
 0x134   : > { %v1748_v2 = vrot.slane %v1747_v1, 1  ;;  %v1753_v36 = vrot.slane %v1752_v6, 2  ;;  %v1571_v29 = vrot.slane %v1570_v8, 2  ;;  %v1564_v37 = vrot.slane %v1563_v14, 2 }
 0x135   : > { %v1006_v53 = vrot.slane %v992_v28, %v2956_v52  ;;  %v1007_v39 = vcombine.high %v999_v44, %v999_v44  ;;  %v666_v63 = vmax.f32 %v634_v4, 0.0  ;;  %v2547_v38 = vsel %vm2546_vm2, %v2295_v31, %v2292_v61 }
 0x136   : > { %v1578_v43 = vrot.slane %v1577_v22, 2  ;;  %v1841_v15 = vsel %vm1392_vm0, %v999_v44, -inf  ;;  %v1735_v32 = vmax.f32 %v1733_v7, %v1734_v25  ;;  %v1741_v45 = vrot.slane %v1740_v20, 1 }
 0x137   : > { %v1584_v30 = vmax.f32 %v1582_v11, %v1583_v26  ;;  %v1008_v3 = vcombine.high %v1006_v53, %v1006_v53  ;;  %v1572_v46 = vmax.f32 %v1570_v8, %v1571_v29  ;;  %v1842_v48 = vrot.slane %v1841_v15, 4  ;;  %v569_v11 = vpop.permute.xlu0 %568 }
 0x138   : > { %v1848_v49 = vsel %vm1392_vm0, %v1007_v39, -inf  ;;  %v1855_v51 = vsel %vm1392_vm0, %v1006_v53, -inf  ;;  %v1749_v54 = vmax.f32 %v1747_v1, %v1748_v2  ;;  %v3114_v40 = vmax.f32 %v1752_v6, %v1753_v36 }
 0x139   : > { %v1565_v50 = vmax.f32 %v1563_v14, %v1564_v37  ;;  %v890_v57 = vcombine.high %v666_v63, %v666_v63  ;;  %v1579_v58 = vmax.f32 %v1577_v22, %v1578_v43  ;;  %v1849_v59 = vrot.slane %v1848_v49, 4 }
 0x13a   : > { %v1856_v60 = vrot.slane %v1855_v51, 4  ;;  %v1862_v61 = vsel %vm1392_vm0, %v1008_v3, -inf  ;;  %v3118_v62 = vsel %vm2548_vm3, %v2298_v33, %v2547_v38  ;;  %v3120_v7 = vmax.f32 %v1740_v20, %v1741_v45 }
 0x13b   : > { %v1585_v0 = vrot.slane %v1584_v30, 2  ;;  %v897_v8 = vrot.slane %v666_v63, %v2956_v52  ;;  %v3124_v1 = vsel %vm2289_vm1, %v1735_v32, -inf  ;;  %v1573_v6 = vrot.slane %v1572_v46, 1 }
 0x13c   : > { %v1843_v42 = vmax.f32 %v1841_v15, %v1842_v48  ;;  %v1863_v14 = vrot.slane %v1862_v61, 4  ;;  %v3127_v16 = vsel %vm2289_vm1, %v1749_v54, -inf  ;;  %v1566_v4 = vrot.slane %v1565_v50, 1 }
 0x13d   : > { %v1850_v31 = vmax.f32 %v1848_v49, %v1849_v59  ;;  %v904_v22 = vrot.slane %v890_v57, %v2956_v52  ;;  %v1755_v20 = vrot.slane %v3114_v40, 1  ;;  %v1580_v25 = vrot.slane %v1579_v58, 1 }
 0x13e   : > { %v1857_v26 = vmax.f32 %v1855_v51, %v1856_v60  ;;  %v644_v28 = vadd.f32 %v569_v11, %v3008_v5  ;;  %v1586_v44 = vmax.f32 %v1584_v30, %v1585_v0  ;;  %v1864_v33 = vmax.f32 %v1862_v61, %v1863_v14 }
 0x13f   : > { %v905_v2 = vcombine.high %v897_v8, %v897_v8  ;;  %v906_v36 = vcombine.high %v904_v22, %v904_v22  ;;  %v1574_v29 = vmax.f32 %v1572_v46, %v1573_v6  ;;  %v1844_v37 = vrot.slane %v1843_v42, 2 }
 0x140   : > { %v1673_v53 = vsel %vm1392_vm0, %v897_v8, -inf  ;;  %v1687_v39 = vsel %vm1392_vm0, %v904_v22, -inf  ;;  %v1567_v63 = vmax.f32 %v1565_v50, %v1566_v4  ;;  %v1851_v38 = vrot.slane %v1850_v31, 2 }
 0x141   : > { %v1674_v43 = vrot.slane %v1673_v53, 4  ;;  %v1680_v15 = vsel %vm1392_vm0, %v905_v2, -inf  ;;  %v1858_v32 = vrot.slane %v1857_v26, 2  ;;  %v1865_v45 = vrot.slane %v1864_v33, 2 }
 0x142   : > { %v1681_v3 = vrot.slane %v1680_v15, 4  ;;  %v1688_v48 = vrot.slane %v1687_v39, 4  ;;  %v1581_v5 = vmax.f32 %v1579_v58, %v1580_v25  ;;  %v1587_v30 = vrot.slane %v1586_v44, 1 }
 0x143   : > { %v1675_v49 = vmax.f32 %v1673_v53, %v1674_v43  ;;  %v1694_v51 = vsel %vm1392_vm0, %v906_v36, -inf  ;;  %v2318_v46 = vsel %vm2289_vm1, %v1574_v29, -inf  ;;  %v1845_v54 = vmax.f32 %v1843_v42, %v1844_v37 }
 0x144   : > { %v1682_v57 = vmax.f32 %v1680_v15, %v1681_v3  ;;  %v1689_v59 = vmax.f32 %v1687_v39, %v1688_v48  ;;  %v1852_v60 = vmax.f32 %v1850_v31, %v1851_v38  ;;  %v1695_v61 = vrot.slane %v1694_v51, 4 }
 0x145   : > { %v1676_v50 = vrot.slane %v1675_v49, 2  ;;  %v676_v0 = vmax.f32 %v644_v28, 0.0  ;;  %v1859_v8 = vmax.f32 %v1857_v26, %v1858_v32  ;;  %v1866_v11 = vmax.f32 %v1864_v33, %v1865_v45  ;;  %v557_v33 = vpop.permute.xlu1 %556 }
 0x146   : > { %v1683_v6 = vrot.slane %v1682_v57, 2  ;;  %v1690_v14 = vrot.slane %v1689_v59, 2  ;;  %v1588_v4 = vmax.f32 %v1586_v44, %v1587_v30  ;;  %v2315_v58 = vsel %vm2289_vm1, %v1567_v63, -inf }
 0x147   : > { %v1677_v22 = vmax.f32 %v1675_v49, %v1676_v50  ;;  %v1696_v25 = vmax.f32 %v1694_v51, %v1695_v61  ;;  %v2321_v2 = vsel %vm2289_vm1, %v1581_v5, -inf  ;;  %v1067_v42 = vrot.slane %v676_v0, %v2956_v52 }
 0x148   : > { %v1684_v36 = vmax.f32 %v1682_v57, %v1683_v6  ;;  %v1691_v29 = vmax.f32 %v1689_v59, %v1690_v14  ;;  %v1756_v31 = vmax.f32 %v3114_v40, %v1755_v20  ;;  %v2319_v37 = vmax.f32 %v3050_v13, %v2318_v46  ;;  %v577_v6 = vpop.permute.xlu0 %576 }
 0x149   : > { %v1846_v28 = vrot.slane %v1845_v54, 1  ;;  %v1853_v26 = vrot.slane %v1852_v60, 1  ;;  %v1860_v53 = vrot.slane %v1859_v8, 1  ;;  %v1867_v39 = vrot.slane %v1866_v11, 1 }
 0x14a   : > { %v1697_v44 = vrot.slane %v1696_v25, 2  ;;  %v1060_v38 = vcombine.high %v676_v0, %v676_v0  ;;  %v2316_v63 = vmax.f32 %v3046_v12, %v2315_v58  ;;  %v2322_v43 = vmax.f32 %v3053_v24, %v2321_v2 }
 0x14b   : > { %v3145_v15 = vsel %vm2289_vm1, %v1588_v4, -inf  ;;  %v1678_v32 = vrot.slane %v1677_v22, 1  ;;  %v1685_v45 = vrot.slane %v1684_v36, 1  ;;  %v1692_v3 = vrot.slane %v1691_v29, 1 }
 0x14c   : > { %v1953_v40 = vsel %vm1392_vm0, %v1067_v42, -inf  ;;  %v638_v13 = vadd.f32 %v557_v33, %v3011_v9  ;;  %v2560_v20 = vsel %vm2546_vm2, %v2319_v37, %v2316_v63  ;;  %v1847_v48 = vmax.f32 %v1845_v54, %v1846_v28 }
 0x14d   : > { %v1854_v5 = vmax.f32 %v1852_v60, %v1853_v26  ;;  %v1075_v30 = vcombine.high %v1067_v42, %v1067_v42  ;;  %v1861_v49 = vmax.f32 %v1859_v8, %v1860_v53  ;;  %v1868_v51 = vmax.f32 %v1866_v11, %v1867_v39 }
 0x14e   : > { %v1698_v12 = vmax.f32 %v1696_v25, %v1697_v44  ;;  %v1074_v24 = vrot.slane %v1060_v38, %v2956_v52  ;;  %v3153_v46 = vsel %vm2289_vm1, %v3120_v7, -inf  ;;  %v3156_v57 = vsel %vm2289_vm1, %v1756_v31, -inf }
 0x14f   : > { %3859 = vst [vmem:[#allocation2_spill] sm:$0xff] %v3156_v57  ;;  %v1679_v59 = vmax.f32 %v1677_v22, %v1678_v32  ;;  %v1954_v50 = vrot.slane %v1953_v40, 4  ;;  %v1686_v54 = vmax.f32 %v1684_v36, %v1685_v45  ;;  %v1693_v60 = vmax.f32 %v1691_v29, %v1692_v3 }
 0x150   : > { %v670_v61 = vmax.f32 %v638_v13, 0.0  ;;  %v3161_v0 = vsel %vm2548_vm3, %v2322_v43, %v2560_v20  ;;  %v3164_v8 = vsel %vm2289_vm1, %v1847_v48, -inf  ;;  %v3167_v7 = vsel %vm2289_vm1, %v1854_v5, -inf }
 0x151   : > { %v1960_v11 = vsel %vm1392_vm0, %v1075_v30, -inf  ;;  %v3171_v14 = vsel %vm2289_vm1, %v1861_v49, -inf  ;;  %v3174_v4 = vsel %vm2289_vm1, %v1868_v51, -inf  ;;  %v1699_v58 = vrot.slane %v1698_v12, 1 }
 0x152   : > { %3860 = vst [vmem:[#allocation3_spill] sm:$0xff] %v3174_v4  ;;  %v1967_v22 = vsel %vm1392_vm0, %v1074_v24, -inf  ;;  %v2339_v25 = vsel %vm2289_vm1, %v1679_v59, -inf  ;;  %v1955_v2 = vmax.f32 %v1953_v40, %v1954_v50  ;;  %v958_v36 = vcombine.high %v670_v61, %v670_v61 }
 0x153   : > { %v965_v29 = vrot.slane %v670_v61, %v2956_v52  ;;  %v2342_v42 = vsel %vm2289_vm1, %v1686_v54, -inf  ;;  %v3181_v31 = vsel %vm2289_vm1, %v1693_v60, -inf  ;;  %v1961_v37 = vrot.slane %v1960_v11, 4  ;;  %v565_v61 = vpop.permute.xlu1 %564 }
 0x154   : > { %v648_v28 = vadd.f32 %v577_v6, %v3014_v10  ;;  %v1076_v26 = vcombine.high %v1074_v24, %v1074_v24  ;;  %v1968_v33 = vrot.slane %v1967_v22, 4  ;;  %v972_v53 = vrot.slane %v958_v36, %v2956_v52 }
 0x155   : > { %v973_v39 = vcombine.high %v965_v29, %v965_v29  ;;  %v1700_v44 = vmax.f32 %v1698_v12, %v1699_v58  ;;  %v2340_v38 = vmax.f32 %v3077_v27, %v2339_v25  ;;  %v1785_v63 = vsel %vm1392_vm0, %v965_v29, -inf }
 0x156   : > { %v680_v43 = vmax.f32 %v648_v28, 0.0  ;;  %v2343_v32 = vmax.f32 %v3080_v34, %v2342_v42  ;;  %v2346_v45 = vmax.f32 %v3083_v35, %v3181_v31  ;;  %v974_v3 = vcombine.high %v972_v53, %v972_v53 }
 0x157   : > { %v1786_v40 = vrot.slane %v1785_v63, 4  ;;  %v1956_v13 = vrot.slane %v1955_v2, 2  ;;  %v1962_v10 = vmax.f32 %v1960_v11, %v1961_v37  ;;  %v1792_v20 = vsel %vm1392_vm0, %v973_v39, -inf }
 0x158   : > { %v1799_v48 = vsel %vm1392_vm0, %v972_v53, -inf  ;;  %v1969_v5 = vmax.f32 %v1967_v22, %v1968_v33  ;;  %v1793_v49 = vrot.slane %v1792_v20, 4  ;;  %v3193_v51 = vsel %vm2289_vm1, %v1700_v44, -inf }
 0x159   : > { %v1787_v30 = vmax.f32 %v1785_v63, %v1786_v40  ;;  %v1800_v27 = vrot.slane %v1799_v48, 4  ;;  %v1974_v34 = vsel %vm1392_vm0, %v1076_v26, -inf  ;;  %v1806_v12 = vsel %vm1392_vm0, %v974_v3, -inf }
 0x15a   : > { %v1128_v24 = vcombine.high %v680_v43, %v680_v43  ;;  %v3198_v59 = vsel %vm2546_vm2, %v2343_v32, %v2340_v38  ;;  %v1794_v54 = vmax.f32 %v1792_v20, %v1793_v49  ;;  %v1957_v11 = vmax.f32 %v1955_v2, %v1956_v13 }
 0x15b   : > { %v1788_v50 = vrot.slane %v1787_v30, 2  ;;  %v1801_v60 = vmax.f32 %v1799_v48, %v1800_v27  ;;  %v1807_v6 = vrot.slane %v1806_v12, 4  ;;  %v1135_v58 = vrot.slane %v680_v43, %v2956_v52 }
 0x15c   : > { %v1142_v22 = vrot.slane %v1128_v24, %v2956_v52  ;;  %v1975_v25 = vrot.slane %v1974_v34, 4  ;;  %v1795_v29 = vrot.slane %v1794_v54, 2  ;;  %v642_v33 = vadd.f32 %v565_v61, %v3020_v17 }
 0x15d   : > { %v1789_v36 = vmax.f32 %v1787_v30, %v1788_v50  ;;  %v1802_v42 = vrot.slane %v1801_v60, 2  ;;  %v1808_v28 = vmax.f32 %v1806_v12, %v1807_v6  ;;  %v1143_v26 = vcombine.high %v1135_v58, %v1135_v58 }
 0x15e   : > { %v1963_v53 = vrot.slane %v1962_v10, 2  ;;  %v1796_v44 = vmax.f32 %v1794_v54, %v1795_v29  ;;  %v1958_v38 = vrot.slane %v1957_v11, 1  ;;  %v1970_v63 = vrot.slane %v1969_v5, 2 }
 0x15f   : > { %v1790_v39 = vrot.slane %v1789_v36, 1  ;;  %v1803_v2 = vmax.f32 %v1801_v60, %v1802_v42  ;;  %v1809_v43 = vrot.slane %v1808_v28, 2  ;;  %v1144_v32 = vcombine.high %v1142_v22, %v1142_v22 }
 0x160   : > { %v1797_v40 = vrot.slane %v1796_v44, 1  ;;  %v2065_v20 = vsel %vm1392_vm0, %v1135_v58, -inf  ;;  %v1976_v48 = vmax.f32 %v1974_v34, %v1975_v25  ;;  %v2072_v49 = vsel %vm1392_vm0, %v1143_v26, -inf }
 0x161   : > { %v1791_v3 = vmax.f32 %v1789_v36, %v1790_v39  ;;  %v1804_v13 = vrot.slane %v1803_v2, 1  ;;  %v1810_v30 = vmax.f32 %v1808_v28, %v1809_v43  ;;  %v674_v27 = vmax.f32 %v642_v33, 0.0  ;;  %v585_v43 = vpop.permute.xlu0 %584 }
 0x162   : > { %v1798_v12 = vmax.f32 %v1796_v44, %v1797_v40  ;;  %v2079_v50 = vsel %vm1392_vm0, %v1142_v22, -inf  ;;  %v2066_v61 = vrot.slane %v2065_v20, 4  ;;  %v2086_v6 = vsel %vm1392_vm0, %v1144_v32, -inf }
 0x163   : > { %v1805_v17 = vmax.f32 %v1803_v2, %v1804_v13  ;;  %v2363_v24 = vsel %vm2289_vm1, %v1791_v3, -inf  ;;  %v1811_v54 = vrot.slane %v1810_v30, 1  ;;  %v1964_v36 = vmax.f32 %v1962_v10, %v1963_v53 }
 0x164   : > { %v2364_v60 = vmax.f32 %v3124_v1, %v2363_v24  ;;  %v2366_v58 = vsel %vm2289_vm1, %v1798_v12, -inf  ;;  %v2073_v25 = vrot.slane %v2072_v49, 4  ;;  %v2080_v26 = vrot.slane %v2079_v50, 4 }
 0x165   : > { %v2369_v34 = vsel %vm2289_vm1, %v1805_v17, -inf  ;;  %v1812_v29 = vmax.f32 %v1810_v30, %v1811_v54  ;;  %v2367_v42 = vmax.f32 %v3153_v46, %v2366_v58  ;;  %v1971_v33 = vmax.f32 %v1969_v5, %v1970_v63 }
 0x166   : > { %v2370_v28 = vmax.f32 %v3127_v16, %v2369_v34  ;;  %v1977_v22 = vrot.slane %v1976_v48, 2  ;;  %v2087_v39 = vrot.slane %v2086_v6, 4  ;;  %v1026_v44 = vcombine.high %v674_v27, %v674_v27 }
 0x167   : > { %v3216_v1 = vsel %vm2289_vm1, %v1812_v29, -inf  ;;  %v2574_v10 = vsel %vm2546_vm2, %v2367_v42, %v2364_v60  ;;  %v2067_v53 = vmax.f32 %v2065_v20, %v2066_v61  ;;  %v1033_v2 = vrot.slane %v674_v27, %v2956_v52 }
 0x168   : > { %3861 = vst [vmem:[#allocation4_spill] sm:$0xff] %v3216_v1  ;;  %v1959_v32 = vmax.f32 %v1957_v11, %v1958_v38  ;;  %v3223_v16 = vsel %vm2548_vm3, %v2370_v28, %v2574_v10  ;;  %v2074_v5 = vmax.f32 %v2072_v49, %v2073_v25  ;;  %v1965_v63 = vrot.slane %v1964_v36, 1 }
 0x169   : > { %v2081_v3 = vmax.f32 %v2079_v50, %v2080_v26  ;;  %v1040_v40 = vrot.slane %v1026_v44, %v2956_v52  ;;  %v1041_v13 = vcombine.high %v1033_v2, %v1033_v2  ;;  %v1972_v30 = vrot.slane %v1971_v33, 1 }
 0x16a   : > { %v2088_v12 = vmax.f32 %v2086_v6, %v2087_v39  ;;  %v1897_v20 = vsel %vm1392_vm0, %v1033_v2, -inf  ;;  %v652_v27 = vadd.f32 %v585_v43, %v3023_v18  ;;  %v1978_v17 = vmax.f32 %v1976_v48, %v1977_v22 }
 0x16b   : > { %v2068_v11 = vrot.slane %v2067_v53, 2  ;;  %v1042_v38 = vcombine.high %v1040_v40, %v1040_v40  ;;  %v1898_v24 = vrot.slane %v1897_v20, 4  ;;  %v2075_v54 = vrot.slane %v2074_v5, 2 }
 0x16c   : > { %v1904_v60 = vsel %vm1392_vm0, %v1041_v13, -inf  ;;  %v1911_v49 = vsel %vm1392_vm0, %v1040_v40, -inf  ;;  %v684_v61 = vmax.f32 %v652_v27, 0.0  ;;  %v1966_v50 = vmax.f32 %v1964_v36, %v1965_v63 }
 0x16d   : > { %v2082_v58 = vrot.slane %v2081_v3, 2  ;;  %v1899_v34 = vmax.f32 %v1897_v20, %v1898_v24  ;;  %v1905_v25 = vrot.slane %v1904_v60, 4  ;;  %v2089_v29 = vrot.slane %v2088_v12, 2 }
 0x16e   : > { %v1912_v6 = vrot.slane %v1911_v49, 4  ;;  %v1918_v42 = vsel %vm1392_vm0, %v1042_v38, -inf  ;;  %v1196_v28 = vcombine.high %v684_v61, %v684_v61  ;;  %v2069_v18 = vmax.f32 %v2067_v53, %v2068_v11 }
 0x16f   : > { %v1900_v48 = vrot.slane %v1899_v34, 2  ;;  %v1906_v26 = vmax.f32 %v1904_v60, %v1905_v25  ;;  %v1919_v22 = vrot.slane %v1918_v42, 4  ;;  %v2076_v39 = vmax.f32 %v2074_v5, %v2075_v54 }
 0x170   : > { %v1913_v44 = vmax.f32 %v1911_v49, %v1912_v6  ;;  %v1203_v10 = vrot.slane %v684_v61, %v2956_v52  ;;  %v1210_v2 = vrot.slane %v1196_v28, %v2956_v52  ;;  %v2083_v43 = vmax.f32 %v2081_v3, %v2082_v58 }
 0x171   : > { %v1901_v36 = vmax.f32 %v1899_v34, %v1900_v48  ;;  %v1907_v63 = vrot.slane %v1906_v26, 2  ;;  %v1920_v40 = vmax.f32 %v1918_v42, %v1919_v22  ;;  %v2090_v13 = vmax.f32 %v2088_v12, %v2089_v29 }
 0x172   : > { %v1914_v20 = vrot.slane %v1913_v44, 2  ;;  %v1211_v27 = vcombine.high %v1203_v10, %v1203_v10  ;;  %v2177_v38 = vsel %vm1392_vm0, %v1203_v10, -inf  ;;  %v3239_v53 = vsel %vm2548_vm3, %v2346_v45, %v3198_v59  ;;  %v573_v59 = vpop.permute.xlu1 %572 }
 0x173   : > { %v1979_v5 = vrot.slane %v1978_v17, 1  ;;  %v2070_v11 = vrot.slane %v2069_v18, 1  ;;  %v1908_v24 = vmax.f32 %v1906_v26, %v1907_v63  ;;  %v2077_v54 = vrot.slane %v2076_v39, 1 }
 0x174   : > { %v1921_v3 = vrot.slane %v1920_v40, 2  ;;  %v1212_v60 = vcombine.high %v1210_v2, %v1210_v2  ;;  %v2178_v49 = vrot.slane %v2177_v38, 4  ;;  %v1973_v61 = vmax.f32 %v1971_v33, %v1972_v30 }
 0x175   : > { %v3242_v12 = vsel %vm2289_vm1, %v1959_v32, -inf  ;;  %v2084_v58 = vrot.slane %v2083_v43, 1  ;;  %v1902_v34 = vrot.slane %v1901_v36, 1  ;;  %v3245_v25 = vsel %vm2289_vm1, %v1966_v50, -inf }
 0x176   : > { %v2091_v35 = vrot.slane %v2090_v13, 1  ;;  %v1915_v31 = vmax.f32 %v1913_v44, %v1914_v20  ;;  %v2184_v45 = vsel %vm1392_vm0, %v1211_v27, -inf  ;;  %v1980_v29 = vmax.f32 %v1978_v17, %v1979_v5  ;;  %v3254_v17 = vld [vmem:[%s3849_s3] ss:$0 sm:$0xff] }
 0x177   : > { %v2071_v6 = vmax.f32 %v2069_v18, %v2070_v11  ;;  %v1909_v42 = vrot.slane %v1908_v24, 1  ;;  %v2191_v28 = vsel %vm1392_vm0, %v1210_v2, -inf  ;;  %v2078_v48 = vmax.f32 %v2076_v39, %v2077_v54 }
 0x178   : > { %v1922_v33 = vmax.f32 %v1920_v40, %v1921_v3  ;;  %v2179_v30 = vmax.f32 %v2177_v38, %v2178_v49  ;;  %v2198_v32 = vsel %vm1392_vm0, %v1212_v60, -inf  ;;  %v2085_v26 = vmax.f32 %v2083_v43, %v2084_v58 }
 0x179   : > { %v1903_v22 = vmax.f32 %v1901_v36, %v1902_v34  ;;  %v2185_v10 = vrot.slane %v2184_v45, 4  ;;  %v646_v50 = vadd.f32 %v573_v59, %v3026_v19  ;;  %v2092_v63 = vmax.f32 %v2090_v13, %v2091_v35  ;;  %v531_v19 = vpop.permute.xlu0 %530 }
 0x17a   : > { %v1916_v44 = vrot.slane %v1915_v31, 1  ;;  %v2192_v20 = vrot.slane %v2191_v28, 4  ;;  %v351_v18 = vadd.f32 %v3254_v17, %v3029_v23  ;;  %v3259_v39 = vsel %vm2289_vm1, %v1973_v61, -inf }
 0x17b   : > { %v3262_v2 = vsel %vm2289_vm1, %v1980_v29, -inf  ;;  %v1910_v43 = vmax.f32 %v1908_v24, %v1909_v42  ;;  %v2199_v36 = vrot.slane %v2198_v32, 4  ;;  %v3265_v40 = vsel %vm2289_vm1, %v2071_v6, -inf }
 0x17c   : > { %3862 = vst [vmem:[#allocation5_spill] sm:$0xff] %v3262_v2  ;;  %v3268_v13 = vsel %vm2289_vm1, %v2078_v48, -inf  ;;  %v1923_v27 = vrot.slane %v1922_v33, 1  ;;  %v2180_v38 = vrot.slane %v2179_v30, 2  ;;  %v3271_v5 = vsel %vm2289_vm1, %v2085_v26, -inf }
 0x17d   : > { %v3274_v23 = vsel %vm2289_vm1, %v1903_v22, -inf  ;;  %v2186_v11 = vmax.f32 %v2184_v45, %v2185_v10  ;;  %v678_v54 = vmax.f32 %v646_v50, 0.0  ;;  %v3277_v24 = vsel %vm2289_vm1, %v2092_v63, -inf  ;;  %v298_v50 = vld [vmem:[%s2937_s11 + $0xd0] sm:$0xff] }
 0x17e   : > { %v1917_v3 = vmax.f32 %v1915_v31, %v1916_v44  ;;  %v2193_v60 = vmax.f32 %v2191_v28, %v2192_v20  ;;  %v625_v49 = vadd.f32 %v531_v19, %v351_v18  ;;  %v2390_v61 = vsel %vm2289_vm1, %v1910_v43, -inf }
 0x17f   : > { %v2200_v58 = vmax.f32 %v2198_v32, %v2199_v36  ;;  %v1094_v34 = vcombine.high %v678_v54, %v678_v54  ;;  %v1101_v35 = vrot.slane %v678_v54, %v2956_v52  ;;  %v1924_v59 = vmax.f32 %v1922_v33, %v1923_v27  ;;  %v3295_v27 = vld [vmem:[%s3848_s2] ss:$0 sm:$0xff] }
 0x180   : > { %v2388_v29 = vmax.f32 %v3164_v8, %v3274_v23  ;;  %v2181_v6 = vmax.f32 %v2179_v30, %v2180_v38  ;;  %v657_v45 = vmax.f32 %v625_v49, 0.0  ;;  %v2187_v42 = vrot.slane %v2186_v11, 2 }
 0x181   : > { %v1108_v48 = vrot.slane %v1094_v34, %v2956_v52  ;;  %v1109_v26 = vcombine.high %v1101_v35, %v1101_v35  ;;  %v2009_v31 = vsel %vm1392_vm0, %v1101_v35, -inf  ;;  %v2391_v28 = vmax.f32 %v3167_v7, %v2390_v61 }
 0x182   : > { %v2194_v22 = vrot.slane %v2193_v60, 2  ;;  %v2010_v10 = vrot.slane %v2009_v31, 4  ;;  %v737_v32 = vcombine.high %v657_v45, %v657_v45  ;;  %v2201_v63 = vrot.slane %v2200_v58, 2 }
 0x183   : > { %v1110_v44 = vcombine.high %v1108_v48, %v1108_v48  ;;  %v2016_v33 = vsel %vm1392_vm0, %v1109_v26, -inf  ;;  %v2023_v8 = vsel %vm1392_vm0, %v1108_v48, -inf  ;;  %v744_v43 = vrot.slane %v657_v45, %v2956_v52 }
 0x184   : > { %v2011_v30 = vmax.f32 %v2009_v31, %v2010_v10  ;;  %v2017_v20 = vrot.slane %v2016_v33, 4  ;;  %v2024_v18 = vrot.slane %v2023_v8, 4  ;;  %v2188_v36 = vmax.f32 %v2186_v11, %v2187_v42 }
 0x185   : > { %v2030_v19 = vsel %vm1392_vm0, %v1110_v44, -inf  ;;  %v751_v7 = vrot.slane %v737_v32, %v2956_v52  ;;  %v337_v38 = vmul.f32 %v3295_v27, %v298_v50  ;;  %v2195_v34 = vmax.f32 %v2193_v60, %v2194_v22 }
 0x186   : > { %v2012_v23 = vrot.slane %v2011_v30, 2  ;;  %v2018_v54 = vmax.f32 %v2016_v33, %v2017_v20  ;;  %v2025_v49 = vmax.f32 %v2023_v8, %v2024_v18  ;;  %v2031_v61 = vrot.slane %v2030_v19, 4 }
 0x187   : > { %v752_v35 = vcombine.high %v744_v43, %v744_v43  ;;  %v1421_v45 = vsel %vm1392_vm0, %v744_v43, -inf  ;;  %v1435_v11 = vsel %vm1392_vm0, %v751_v7, -inf  ;;  %v2202_v42 = vmax.f32 %v2200_v58, %v2201_v63  ;;  %v581_v58 = vpop.permute.xlu1 %580 }
 0x188   : > { %v2019_v48 = vrot.slane %v2018_v54, 2  ;;  %v2026_v26 = vrot.slane %v2025_v49, 2  ;;  %v2032_v31 = vmax.f32 %v2030_v19, %v2031_v61  ;;  %v2393_v10 = vsel %vm2289_vm1, %v1917_v3, -inf }
 0x189   : > { %v2013_v32 = vmax.f32 %v2011_v30, %v2012_v23  ;;  %v753_v44 = vcombine.high %v751_v7, %v751_v7  ;;  %v1422_v46 = vrot.slane %v1421_v45, 4  ;;  %v2182_v50 = vrot.slane %v2181_v6, 1 }
 0x18a   : > { %v2033_v37 = vrot.slane %v2032_v31, 2  ;;  %v1436_v33 = vrot.slane %v1435_v11, 4  ;;  %v376_v8 = vadd.f32 %v3254_v17, %v337_v38  ;;  %v2189_v60 = vrot.slane %v2188_v36, 1 }
 0x18b   : > { %v2196_v22 = vrot.slane %v2195_v34, 1  ;;  %v2020_v20 = vmax.f32 %v2018_v54, %v2019_v48  ;;  %v1428_v18 = vsel %vm1392_vm0, %v752_v35, -inf  ;;  %v2394_v63 = vmax.f32 %v3171_v14, %v2393_v10  ;;  %v277_v48 = vld [vmem:[%s2937_s11 + $0x28] sm:$0xff] }
 0x18c   : > { %v3305_v43 = vsel %vm2289_vm1, %v1924_v59, -inf  ;;  %v2203_v3 = vrot.slane %v2202_v42, 1  ;;  %v2027_v30 = vmax.f32 %v2025_v49, %v2026_v26  ;;  %v2581_v19 = vsel %vm2546_vm2, %v2391_v28, %v2388_v29  ;;  %v281_v59 = vld [vmem:[%s2937_s11 + $0x48] sm:$0xff] }
 0x18d   : > { %3863 = vst [vmem:[#allocation6_spill] sm:$0xff] %v3305_v43  ;;  %v2014_v7 = vrot.slane %v2013_v32, 1  ;;  %v1423_v23 = vmax.f32 %v1421_v45, %v1422_v46  ;;  %v1442_v38 = vsel %vm1392_vm0, %v753_v44, -inf  ;;  %v2034_v61 = vmax.f32 %v2032_v31, %v2033_v37 }
 0x18e   : > { %v1429_v9 = vrot.slane %v1428_v18, 4  ;;  %v1437_v41 = vmax.f32 %v1435_v11, %v1436_v33  ;;  %v650_v54 = vadd.f32 %v581_v58, %v376_v8  ;;  %v2183_v35 = vmax.f32 %v2181_v6, %v2182_v50 }
 0x18f   : > { %v2190_v1 = vmax.f32 %v2188_v36, %v2189_v60  ;;  %v2197_v57 = vmax.f32 %v2195_v34, %v2196_v22  ;;  %v2021_v14 = vrot.slane %v2020_v20, 1  ;;  %v2204_v10 = vmax.f32 %v2202_v42, %v2203_v3 }
 0x190   : > { %v2028_v49 = vrot.slane %v2027_v30, 1  ;;  %v1443_v26 = vrot.slane %v1442_v38, 4  ;;  %v3313_v29 = vsel %vm2548_vm3, %v2394_v63, %v2581_v19  ;;  %v2015_v46 = vmax.f32 %v2013_v32, %v2014_v7 }
 0x191   : > { %v1424_v28 = vrot.slane %v1423_v23, 2  ;;  %v316_v37 = vmul.f32 %v3295_v27, %v277_v48  ;;  %v2035_v45 = vrot.slane %v2034_v61, 1  ;;  %v1430_v11 = vmax.f32 %v1428_v18, %v1429_v9  ;;  %v539_v9 = vpop.permute.xlu0 %538 }
 0x192   : > { %v1438_v6 = vrot.slane %v1437_v41, 2  ;;  %v682_v36 = vmax.f32 %v650_v54, 0.0  ;;  %v3317_v34 = vsel %vm2289_vm1, %v2183_v35, -inf  ;;  %v3320_v31 = vsel %vm2289_vm1, %v2190_v1, -inf  ;;  %v302_v1 = vld [vmem:[%s2937_s11 + $0xf0] sm:$0xff] }
 0x193   : > { %v3323_v42 = vsel %vm2289_vm1, %v2197_v57, -inf  ;;  %v2022_v44 = vmax.f32 %v2020_v20, %v2021_v14  ;;  %v3326_v32 = vsel %vm2289_vm1, %v2204_v10, -inf  ;;  %v2029_v50 = vmax.f32 %v2027_v30, %v2028_v49 }
 0x194   : > { %v1444_v33 = vmax.f32 %v1442_v38, %v1443_v26  ;;  %v1162_v8 = vcombine.high %v682_v36, %v682_v36  ;;  %v2411_v60 = vsel %vm2289_vm1, %v2015_v46, -inf  ;;  %v1425_v22 = vmax.f32 %v1423_v23, %v1424_v28 }
 0x195   : > { %v1169_v18 = vrot.slane %v682_v36, %v2956_v52  ;;  %v355_v58 = vadd.f32 %v3254_v17, %v316_v37  ;;  %v2036_v63 = vmax.f32 %v2034_v61, %v2035_v45  ;;  %v1431_v3 = vrot.slane %v1430_v11, 2 }
 0x196   : > { %v1439_v57 = vmax.f32 %v1437_v41, %v1438_v6  ;;  %v1176_v20 = vrot.slane %v1162_v8, %v2956_v52  ;;  %v2414_v19 = vsel %vm2289_vm1, %v2022_v44, -inf  ;;  %v341_v35 = vmul.f32 %v3295_v27, %v302_v1 }
 0x197   : > { %v1177_v7 = vcombine.high %v1169_v18, %v1169_v18  ;;  %v2121_v30 = vsel %vm1392_vm0, %v1169_v18, -inf  ;;  %v629_v38 = vadd.f32 %v539_v9, %v355_v58  ;;  %v2417_v14 = vsel %vm2289_vm1, %v2029_v50, -inf }
 0x198   : > { %v1178_v54 = vcombine.high %v1176_v20, %v1176_v20  ;;  %v2122_v48 = vrot.slane %v2121_v30, 4  ;;  %v2135_v23 = vsel %vm1392_vm0, %v1176_v20, -inf  ;;  %v1445_v49 = vrot.slane %v1444_v33, 2 }
 0x199   : > { %v2128_v61 = vsel %vm1392_vm0, %v1177_v7, -inf  ;;  %v2136_v10 = vrot.slane %v2135_v23, 4  ;;  %v661_v41 = vmax.f32 %v629_v38, 0.0  ;;  %v1432_v44 = vmax.f32 %v1430_v11, %v1431_v3  ;;  %v589_v7 = vpop.permute.xlu1 %588 }
 0x19a   : > { %v2123_v26 = vmax.f32 %v2121_v30, %v2122_v48  ;;  %v2129_v46 = vrot.slane %v2128_v61, 4  ;;  %v2142_v28 = vsel %vm1392_vm0, %v1178_v54, -inf  ;;  %v380_v18 = vadd.f32 %v3254_v17, %v341_v35 }
 0x19b   : > { %v2137_v37 = vmax.f32 %v2135_v23, %v2136_v10  ;;  %v2143_v45 = vrot.slane %v2142_v28, 4  ;;  %v805_v6 = vcombine.high %v661_v41, %v661_v41  ;;  %v812_v36 = vrot.slane %v661_v41, %v2956_v52 }
 0x19c   : > { %v2124_v8 = vrot.slane %v2123_v26, 2  ;;  %v2130_v9 = vmax.f32 %v2128_v61, %v2129_v46  ;;  %v2415_v50 = vmax.f32 %v3245_v25, %v2414_v19  ;;  %v1426_v58 = vrot.slane %v1425_v22, 1 }
 0x19d   : > { %v2138_v1 = vrot.slane %v2137_v37, 2  ;;  %v2144_v20 = vmax.f32 %v2142_v28, %v2143_v45  ;;  %v1440_v30 = vrot.slane %v1439_v57, 1  ;;  %v1533_v54 = vsel %vm1392_vm0, %v812_v36, -inf }
 0x19e   : > { %v2125_v38 = vmax.f32 %v2123_v26, %v2124_v8  ;;  %v2131_v48 = vrot.slane %v2130_v9, 2  ;;  %v1446_v23 = vmax.f32 %v1444_v33, %v1445_v49  ;;  %v819_v11 = vrot.slane %v805_v6, %v2956_v52 }
 0x19f   : > { %v2145_v10 = vrot.slane %v2144_v20, 2  ;;  %v820_v3 = vcombine.high %v812_v36, %v812_v36  ;;  %v2412_v61 = vmax.f32 %v3242_v12, %v2411_v60  ;;  %v1433_v35 = vrot.slane %v1432_v44, 1 }
 0x1a0   : > { %v2139_v41 = vmax.f32 %v2137_v37, %v2138_v1  ;;  %v654_v25 = vadd.f32 %v589_v7, %v380_v18  ;;  %v2418_v19 = vmax.f32 %v3259_v39, %v2417_v14  ;;  %v3348_v46 = vsel %vm2289_vm1, %v2036_v63, -inf }
 0x1a1   : > { %3864 = vst [vmem:[#allocation7_spill] sm:$0xff] %v3348_v46  ;;  %v2126_v26 = vrot.slane %v2125_v38, 1  ;;  %v1534_v28 = vrot.slane %v1533_v54, 4  ;;  %v2588_v45 = vsel %vm2546_vm2, %v2415_v50, %v2412_v61  ;;  %v1427_v33 = vmax.f32 %v1425_v22, %v1426_v58 }
 0x1a2   : > { %v1441_v49 = vmax.f32 %v1439_v57, %v1440_v30  ;;  %v2132_v8 = vmax.f32 %v2130_v9, %v2131_v48  ;;  %v1447_v6 = vrot.slane %v1446_v23, 1  ;;  %v2146_v36 = vmax.f32 %v2144_v20, %v2145_v10 }
 0x1a3   : > { %v1540_v12 = vsel %vm1392_vm0, %v820_v3, -inf  ;;  %v1547_v60 = vsel %vm1392_vm0, %v819_v11, -inf  ;;  %v1434_v37 = vmax.f32 %v1432_v44, %v1433_v35  ;;  %v2140_v18 = vrot.slane %v2139_v41, 1 }
 0x1a4   : > { %v821_v39 = vcombine.high %v819_v11, %v819_v11  ;;  %v686_v14 = vmax.f32 %v654_v25, 0.0  ;;  %v2127_v1 = vmax.f32 %v2125_v38, %v2126_v26  ;;  %v1535_v7 = vmax.f32 %v1533_v54, %v1534_v28  ;;  %v547_v28 = vpop.permute.xlu0 %546 }
 0x1a5   : > { %v320_v22 = vmul.f32 %v3295_v27, %v281_v59  ;;  %v3358_v57 = vsel %vm2548_vm3, %v2418_v19, %v2588_v45  ;;  %v2133_v9 = vrot.slane %v2132_v8, 1  ;;  %v1541_v50 = vrot.slane %v1540_v12, 4 }
 0x1a6   : > { %3865 = vst [vmem:[#allocation8_spill] sm:$0xff] %v3358_v57  ;;  %v1548_v58 = vrot.slane %v1547_v60, 4  ;;  %v3360_v20 = vmax.f32 %v1446_v23, %v1447_v6  ;;  %v3363_v44 = vsel %vm2289_vm1, %v1427_v33, -inf  ;;  %v3366_v30 = vsel %vm2289_vm1, %v1441_v49, -inf }
 0x1a7   : > { %v2147_v48 = vrot.slane %v2146_v36, 1  ;;  %v3369_v38 = vsel %vm2289_vm1, %v1434_v37, -inf  ;;  %v2141_v54 = vmax.f32 %v2139_v41, %v2140_v18  ;;  %v1554_v59 = vsel %vm1392_vm0, %v821_v39, -inf }
 0x1a8   : > { %v1230_v10 = vcombine.high %v686_v14, %v686_v14  ;;  %v3373_v11 = vsel %vm2289_vm1, %v2127_v1, -inf  ;;  %v1536_v3 = vrot.slane %v1535_v7, 2  ;;  %v1237_v23 = vrot.slane %v686_v14, %v2956_v52 }
 0x1a9   : > { %v359_v61 = vadd.f32 %v3254_v17, %v320_v22  ;;  %v2134_v35 = vmax.f32 %v2132_v8, %v2133_v9  ;;  %v1542_v25 = vmax.f32 %v1540_v12, %v1541_v50  ;;  %v1549_v19 = vmax.f32 %v1547_v60, %v1548_v58 }
 0x1aa   : > { %v1244_v26 = vrot.slane %v1230_v10, %v2956_v52  ;;  %v2148_v45 = vmax.f32 %v2146_v36, %v2147_v48  ;;  %v1555_v33 = vrot.slane %v1554_v59, 4  ;;  %v1245_v41 = vcombine.high %v1237_v23, %v1237_v23 }
 0x1ab   : > { %v2233_v49 = vsel %vm1392_vm0, %v1237_v23, -inf  ;;  %v2436_v6 = vmax.f32 %v3265_v40, %v3373_v11  ;;  %v3382_v37 = vsel %vm2289_vm1, %v2141_v54, -inf  ;;  %v1537_v14 = vmax.f32 %v1535_v7, %v1536_v3 }
 0x1ac   : > { %v1246_v18 = vcombine.high %v1244_v26, %v1244_v26  ;;  %v2234_v39 = vrot.slane %v2233_v49, 4  ;;  %v2240_v8 = vsel %vm1392_vm0, %v1245_v41, -inf  ;;  %v2247_v12 = vsel %vm1392_vm0, %v1244_v26, -inf }
 0x1ad   : > { %v633_v60 = vadd.f32 %v547_v28, %v359_v61  ;;  %v2438_v36 = vsel %vm2289_vm1, %v2134_v35, -inf  ;;  %v1543_v1 = vrot.slane %v1542_v25, 2  ;;  %v2241_v9 = vrot.slane %v2240_v8, 4 }
 0x1ae   : > { %v2235_v22 = vmax.f32 %v2233_v49, %v2234_v39  ;;  %v2248_v40 = vrot.slane %v2247_v12, 4  ;;  %v2254_v58 = vsel %vm1392_vm0, %v1246_v18, -inf  ;;  %v1550_v54 = vrot.slane %v1549_v19, 2 }
 0x1af   : > { %v665_v48 = vmax.f32 %v633_v60, 0.0  ;;  %v1556_v10 = vmax.f32 %v1554_v59, %v1555_v33  ;;  %v2242_v7 = vmax.f32 %v2240_v8, %v2241_v9  ;;  %v2255_v11 = vrot.slane %v2254_v58, 4 }
 0x1b0   : > { %v2236_v3 = vrot.slane %v2235_v22, 2  ;;  %v2249_v23 = vmax.f32 %v2247_v12, %v2248_v40  ;;  %v2439_v35 = vmax.f32 %v3268_v13, %v2438_v36  ;;  %v1544_v28 = vmax.f32 %v1542_v25, %v1543_v1 }
 0x1b1   : > { %v873_v26 = vcombine.high %v665_v48, %v665_v48  ;;  %v880_v61 = vrot.slane %v665_v48, %v2956_v52  ;;  %v2243_v41 = vrot.slane %v2242_v7, 2  ;;  %v2256_v49 = vmax.f32 %v2254_v58, %v2255_v11 }
 0x1b2   : > { %v2250_v39 = vrot.slane %v2249_v23, 2  ;;  %v1557_v60 = vrot.slane %v1556_v10, 2  ;;  %v2237_v9 = vmax.f32 %v2235_v22, %v2236_v3  ;;  %v3397_v13 = vsel %vm2289_vm1, %v2148_v45, -inf }
 0x1b3   : > { %v887_v63 = vrot.slane %v873_v26, %v2956_v52  ;;  %v888_v50 = vcombine.high %v880_v61, %v880_v61  ;;  %v1645_v18 = vsel %vm1392_vm0, %v880_v61, -inf  ;;  %v2244_v59 = vmax.f32 %v2242_v7, %v2243_v41 }
 0x1b4   : > { %v2257_v33 = vrot.slane %v2256_v49, 2  ;;  %v1646_v8 = vrot.slane %v1645_v18, 4  ;;  %v2251_v25 = vmax.f32 %v2249_v23, %v2250_v39  ;;  %v1538_v7 = vrot.slane %v1537_v14, 1 }
 0x1b5   : > { %v889_v12 = vcombine.high %v887_v63, %v887_v63  ;;  %v1652_v40 = vsel %vm1392_vm0, %v888_v50, -inf  ;;  %v1659_v48 = vsel %vm1392_vm0, %v887_v63, -inf  ;;  %v2245_v58 = vrot.slane %v2244_v59, 1 }
 0x1b6   : > { %v2258_v36 = vmax.f32 %v2256_v49, %v2257_v33  ;;  %v1647_v1 = vmax.f32 %v1645_v18, %v1646_v8  ;;  %v1653_v11 = vrot.slane %v1652_v40, 4  ;;  %v1660_v26 = vrot.slane %v1659_v48, 4 }
 0x1b7   : > { %v1666_v61 = vsel %vm1392_vm0, %v889_v12, -inf  ;;  %v1545_v41 = vrot.slane %v1544_v28, 1  ;;  %v1551_v46 = vmax.f32 %v1549_v19, %v1550_v54  ;;  %v1558_v3 = vmax.f32 %v1556_v10, %v1557_v60 }
 0x1b8   : > { %v1648_v22 = vrot.slane %v1647_v1, 2  ;;  %v2238_v2 = vrot.slane %v2237_v9, 1  ;;  %v1654_v50 = vmax.f32 %v1652_v40, %v1653_v11  ;;  %v1661_v57 = vmax.f32 %v1659_v48, %v1660_v26 }
 0x1b9   : > { %v2595_v63 = vsel %vm2546_vm2, %v2439_v35, %v2436_v6  ;;  %v2252_v45 = vrot.slane %v2251_v25, 1  ;;  %v2259_v23 = vrot.slane %v2258_v36, 1  ;;  %v1667_v49 = vrot.slane %v1666_v61, 4  ;;  %v275_v35 = vld [vmem:[%s2937_s11 + $0x18] sm:$0xff] }
 0x1ba   : > { %v2246_v39 = vmax.f32 %v2244_v59, %v2245_v58  ;;  %v1649_v18 = vmax.f32 %v1647_v1, %v1648_v22  ;;  %v1655_v33 = vrot.slane %v1654_v50, 2  ;;  %v1662_v8 = vrot.slane %v1661_v57, 2  ;;  %v285_v1 = vld [vmem:[%s2937_s11 + $0x68] sm:$0xff]  ;;  %v555_v22 = vpop.permute.xlu0 %554 }
 0x1bb   : > { %v1539_v12 = vmax.f32 %v1537_v14, %v1538_v7  ;;  %v1546_v43 = vmax.f32 %v1544_v28, %v1545_v41  ;;  %v1552_v4 = vrot.slane %v1551_v46, 1  ;;  %v1668_v19 = vmax.f32 %v1666_v61, %v1667_v49  ;;  %v535_v7 = vpop.permute.xlu1 %534 }
 0x1bc   : > { %v3403_v54 = vsel %vm2289_vm1, %v3360_v20, -inf  ;;  %v1559_v10 = vrot.slane %v1558_v3, 1  ;;  %v2239_v60 = vmax.f32 %v2237_v9, %v2238_v2  ;;  %v1656_v6 = vmax.f32 %v1654_v50, %v1655_v33 }
 0x1bd   : > { %v2445_v40 = vmax.f32 %v3277_v24, %v3397_v13  ;;  %v3866_v59 = vmax.f32 %v3271_v5, %v3382_v37  ;;  %v2253_v14 = vmax.f32 %v2251_v25, %v2252_v45  ;;  %v2260_v28 = vmax.f32 %v2258_v36, %v2259_v23  ;;  %v279_v23 = vld [vmem:[%s2937_s11 + $0x38] sm:$0xff] }
 0x1be   : > { %v2462_v58 = vsel %vm2289_vm1, %v2246_v39, -inf  ;;  %v1650_v20 = vrot.slane %v1649_v18, 1  ;;  %v1663_v11 = vmax.f32 %v1661_v57, %v1662_v8  ;;  %v1669_v26 = vrot.slane %v1668_v19, 2 }
 0x1bf   : > { %v3412_v48 = vsel %vm2548_vm3, %v3866_v59, %v2595_v63  ;;  %v1553_v2 = vmax.f32 %v1551_v46, %v1552_v4  ;;  %v3417_v9 = vsel %vm2289_vm1, %v1539_v12, -inf  ;;  %v3420_v61 = vsel %vm2289_vm1, %v1546_v43, -inf }
 0x1c0   : > { %v314_v5 = vmul.f32 %v3295_v27, %v275_v35  ;;  %v1560_v37 = vmax.f32 %v1558_v3, %v1559_v10  ;;  %v2459_v25 = vsel %vm2289_vm1, %v2239_v60, -inf  ;;  %v1657_v36 = vrot.slane %v1656_v6, 1 }
 0x1c1   : > { %v324_v41 = vmul.f32 %v3295_v27, %v285_v1  ;;  %v2463_v57 = vmax.f32 %v3320_v31, %v2462_v58  ;;  %v3427_v4 = vsel %vm2289_vm1, %v2253_v14, -inf  ;;  %v3430_v46 = vsel %vm2289_vm1, %v2260_v28, -inf }
 0x1c2   : > { %v353_v43 = vadd.f32 %v3254_v17, %v314_v5  ;;  %v1651_v50 = vmax.f32 %v1649_v18, %v1650_v20  ;;  %v1664_v63 = vrot.slane %v1663_v11, 1  ;;  %v1670_v3 = vmax.f32 %v1668_v19, %v1669_v26 }
 0x1c3   : > { %v363_v45 = vadd.f32 %v3254_v17, %v324_v41  ;;  %v3436_v49 = vsel %vm2289_vm1, %v1553_v2, -inf  ;;  %v2460_v31 = vmax.f32 %v3317_v34, %v2459_v25  ;;  %v3440_v33 = vsel %vm2289_vm1, %v1560_v37, -inf  ;;  %v289_v34 = vld [vmem:[%s2937_s11 + $0x88] sm:$0xff] }
 0x1c4   : > { %v627_v39 = vadd.f32 %v535_v7, %v353_v43  ;;  %v2466_v8 = vmax.f32 %v3323_v42, %v3427_v4  ;;  %v1658_v18 = vmax.f32 %v1656_v6, %v1657_v36  ;;  %v2469_v19 = vmax.f32 %v3326_v32, %v3430_v46 }
 0x1c5   : > { %v637_v12 = vadd.f32 %v555_v22, %v363_v45  ;;  %v3447_v10 = vsel %vm2546_vm2, %v2463_v57, %v2460_v31  ;;  %v318_v35 = vmul.f32 %v3295_v27, %v279_v23  ;;  %v1665_v59 = vmax.f32 %v1663_v11, %v1664_v63  ;;  %v543_v57 = vpop.permute.xlu1 %542 }
 0x1c6   : > { %v659_v60 = vmax.f32 %v627_v39, 0.0  ;;  %v1671_v14 = vrot.slane %v1670_v3, 1  ;;  %v3452_v28 = vsel %vm2289_vm1, %v1651_v50, -inf  ;;  %v3867_v20 = vmax.f32 %v3074_v21, %v3103_v47 }
 0x1c7   : > { %v669_v1 = vmax.f32 %v637_v12, 0.0  ;;  %v3868_v2 = vmax.f32 %v3063_v56, %v3145_v15  ;;  %v3470_v5 = vsel %vm2289_vm1, %v1658_v18, -inf  ;;  %v328_v36 = vmul.f32 %v3295_v27, %v289_v34  ;;  %v283_v18 = vld [vmem:[%s2937_s11 + $0x58] sm:$0xff] }
 0x1c8   : > { %v771_v58 = vcombine.high %v659_v60, %v659_v60  ;;  %v778_v6 = vrot.slane %v659_v60, %v2956_v52  ;;  %v3460_v26 = vsel %vm2550_vm4, %v3867_v20, %v3118_v62  ;;  %v357_v7 = vadd.f32 %v3254_v17, %v318_v35 }
 0x1c9   : > { %v3467_v11 = vsel %vm2550_vm4, %v3868_v2, %v3161_v0  ;;  %v941_v37 = vcombine.high %v669_v1, %v669_v1  ;;  %v948_v25 = vrot.slane %v669_v1, %v2956_v52  ;;  %v1672_v56 = vmax.f32 %v1670_v3, %v1671_v14 }
 0x1ca   : > { %v785_v21 = vrot.slane %v771_v58, %v2956_v52  ;;  %v786_v47 = vcombine.high %v778_v6, %v778_v6  ;;  %v1477_v62 = vsel %vm1392_vm0, %v778_v6, -inf  ;;  %v3478_v15 = vsel %vm2289_vm1, %v1665_v59, -inf  ;;  %v563_v58 = vpop.permute.xlu0 %562 }
 0x1cb   : > { %v1478_v0 = vrot.slane %v1477_v62, 4  ;;  %v956_v41 = vcombine.high %v948_v25, %v948_v25  ;;  %v955_v63 = vrot.slane %v941_v37, %v2956_v52  ;;  %v1757_v39 = vsel %vm1392_vm0, %v948_v25, -inf }
 0x1cc   : > { %v787_v43 = vcombine.high %v785_v21, %v785_v21  ;;  %v1484_v22 = vsel %vm1392_vm0, %v786_v47, -inf  ;;  %v1491_v50 = vsel %vm1392_vm0, %v785_v21, -inf  ;;  %v631_v60 = vadd.f32 %v543_v57, %v357_v7  ;;  %v293_v7 = vld [vmem:[%s2937_s11 + $0xa8] sm:$0xff] }
 0x1cd   : > { %v1479_v45 = vmax.f32 %v1477_v62, %v1478_v0  ;;  %v1485_v23 = vrot.slane %v1484_v22, 4  ;;  %v1492_v31 = vrot.slane %v1491_v50, 4  ;;  %v1764_v12 = vsel %vm1392_vm0, %v956_v41, -inf }
 0x1ce   : > { %v1498_v3 = vsel %vm1392_vm0, %v787_v43, -inf  ;;  %v367_v35 = vadd.f32 %v3254_v17, %v328_v36  ;;  %v957_v6 = vcombine.high %v955_v63, %v955_v63  ;;  %v1758_v20 = vrot.slane %v1757_v39, 4 }
 0x1cf   : > { %v1480_v34 = vrot.slane %v1479_v45, 2  ;;  %v1486_v59 = vmax.f32 %v1484_v22, %v1485_v23  ;;  %v1493_v14 = vmax.f32 %v1491_v50, %v1492_v31  ;;  %v1499_v1 = vrot.slane %v1498_v3, 4 }
 0x1d0   : > { %v1771_v2 = vsel %vm1392_vm0, %v955_v63, -inf  ;;  %v322_v37 = vmul.f32 %v3295_v27, %v283_v18  ;;  %v1765_v36 = vrot.slane %v1764_v12, 4  ;;  %v663_v0 = vmax.f32 %v631_v60, 0.0 }
 0x1d1   : > { %v1481_v25 = vmax.f32 %v1479_v45, %v1480_v34  ;;  %v1487_v21 = vrot.slane %v1486_v59, 2  ;;  %v1494_v47 = vrot.slane %v1493_v14, 2  ;;  %v1500_v62 = vmax.f32 %v1498_v3, %v1499_v1 }
 0x1d2   : > { %v641_v41 = vadd.f32 %v563_v58, %v367_v35  ;;  %v3869_v57 = vmax.f32 %v3094_v55, %v3193_v51  ;;  %v1759_v23 = vmax.f32 %v1757_v39, %v1758_v20  ;;  %v1772_v31 = vrot.slane %v1771_v2, 4 }
 0x1d3   : > { %v1482_v22 = vrot.slane %v1481_v25, 1  ;;  %v1488_v50 = vmax.f32 %v1486_v59, %v1487_v21  ;;  %v1495_v63 = vmax.f32 %v1493_v14, %v1494_v47  ;;  %v1501_v45 = vrot.slane %v1500_v62, 2 }
 0x1d4   : > { %v3496_v43 = vsel %vm2550_vm4, %v3869_v57, %v3239_v53  ;;  %v1778_v18 = vsel %vm1392_vm0, %v957_v6, -inf  ;;  %v332_v3 = vmul.f32 %v3295_v27, %v293_v7  ;;  %v3501_v55 = vsel %vm2289_vm1, %v1672_v56, -inf }
 0x1d5   : > { %v1483_v60 = vmax.f32 %v1481_v25, %v1482_v22  ;;  %v1489_v35 = vrot.slane %v1488_v50, 1  ;;  %v1496_v34 = vrot.slane %v1495_v63, 1  ;;  %v1502_v1 = vmax.f32 %v1500_v62, %v1501_v45 }
 0x1d6   : > { %v1766_v51 = vmax.f32 %v1764_v12, %v1765_v36  ;;  %v839_v53 = vcombine.high %v663_v0, %v663_v0  ;;  %v673_v58 = vmax.f32 %v641_v41, 0.0  ;;  %v1760_v20 = vrot.slane %v1759_v23, 2 }
 0x1d7   : > { %v1490_v59 = vmax.f32 %v1488_v50, %v1489_v35  ;;  %v1497_v14 = vmax.f32 %v1495_v63, %v1496_v34  ;;  %v1503_v21 = vrot.slane %v1502_v1, 1  ;;  %v2303_v39 = vsel %vm2289_vm1, %v1483_v60, -inf }
 0x1d8   : > { %v2304_v6 = vmax.f32 %v3363_v44, %v2303_v39  ;;  %v1779_v47 = vrot.slane %v1778_v18, 4  ;;  %v846_v25 = vrot.slane %v663_v0, %v2956_v52  ;;  %v1773_v12 = vmax.f32 %v1771_v2, %v1772_v31 }
 0x1d9   : > { %v1504_v7 = vmax.f32 %v1502_v1, %v1503_v21  ;;  %v2306_v62 = vsel %vm2289_vm1, %v1490_v59, -inf  ;;  %v2309_v56 = vsel %vm2289_vm1, %v1497_v14, -inf  ;;  %v361_v44 = vadd.f32 %v3254_v17, %v322_v37  ;;  %v287_v21 = vld [vmem:[%s2937_s11 + $0x78] sm:$0xff] }
 0x1da   : > { %v2307_v36 = vmax.f32 %v3369_v38, %v2306_v62  ;;  %v2310_v41 = vmax.f32 %v3366_v30, %v2309_v56  ;;  %v2553_v57 = vsel %vm2552_vm5, %v2304_v6, %v3460_v26  ;;  %v1767_v50 = vrot.slane %v1766_v51, 2  ;;  %v551_v56 = vpop.permute.xlu1 %550 }
 0x1db   : > { %v2312_v22 = vsel %vm2289_vm1, %v1504_v7, -inf  ;;  %v853_v0 = vrot.slane %v839_v53, %v2956_v52  ;;  %v1009_v63 = vcombine.high %v673_v58, %v673_v58  ;;  %v1780_v26 = vmax.f32 %v1778_v18, %v1779_v47 }
 0x1dc   : > { %v2313_v38 = vmax.f32 %v3403_v54, %v2312_v22  ;;  %v2555_v30 = vsel %vm2554_vm6, %v2307_v36, %v2553_v57  ;;  %v854_v2 = vcombine.high %v846_v25, %v846_v25  ;;  %v1761_v45 = vmax.f32 %v1759_v23, %v1760_v20 }
 0x1dd   : > { %v2557_v37 = vsel %vm2556_vm7, %v2310_v41, %v2555_v30  ;;  %v1774_v31 = vrot.slane %v1773_v12, 2  ;;  %v855_v60 = vcombine.high %v853_v0, %v853_v0  ;;  %v1589_v34 = vsel %vm1392_vm0, %v846_v25, -inf }
 0x1de   : > { %v2559_v35 = vsel %vm2558_vm8, %v2313_v38, %v2557_v37  ;;  %v1596_v1 = vsel %vm1392_vm0, %v854_v2, -inf  ;;  %v1603_v53 = vsel %vm1392_vm0, %v853_v0, -inf  ;;  %v1590_v54 = vrot.slane %v1589_v34, 4 }
 0x1df   : > { %2617 = vst.msk [vmem:[%s3519_s24] sm:$0xff] %vm2289_vm1, %v2559_v35  ;;  %v1597_v59 = vrot.slane %v1596_v1, 4  ;;  %v1604_v14 = vrot.slane %v1603_v53, 4  ;;  %v3531_v18 = vadd.f32 %v3254_v17, %v332_v3  ;;  %v1768_v23 = vmax.f32 %v1766_v51, %v1767_v50 }
 0x1e0   : > { %v1781_v39 = vrot.slane %v1780_v26, 2  ;;  %v1610_v6 = vsel %vm1392_vm0, %v855_v60, -inf  ;;  %v1016_v20 = vrot.slane %v673_v58, %v2956_v52  ;;  %v1591_v47 = vmax.f32 %v1589_v34, %v1590_v54 }
 0x1e1   : > { %v1598_v25 = vmax.f32 %v1596_v1, %v1597_v59  ;;  %v1605_v7 = vmax.f32 %v1603_v53, %v1604_v14  ;;  %v1611_v62 = vrot.slane %v1610_v6, 4  ;;  %v1762_v36 = vrot.slane %v1761_v45, 1 }
 0x1e2   : > { %v1775_v41 = vmax.f32 %v1773_v12, %v1774_v31  ;;  %v1023_v57 = vrot.slane %v1009_v63, %v2956_v52  ;;  %v3538_v22 = vmul.f32 %v3295_v27, %v287_v21  ;;  %v1592_v17 = vrot.slane %v1591_v47, 2 }
 0x1e3   : > { %v1599_v3 = vrot.slane %v1598_v25, 2  ;;  %v1606_v51 = vrot.slane %v1605_v7, 2  ;;  %v1612_v50 = vmax.f32 %v1610_v6, %v1611_v62  ;;  %v1769_v0 = vrot.slane %v1768_v23, 1 }
 0x1e4   : > { %v1782_v38 = vmax.f32 %v1780_v26, %v1781_v39  ;;  %v1869_v58 = vsel %vm1392_vm0, %v1016_v20, -inf  ;;  %v635_v30 = vadd.f32 %v551_v56, %v361_v44  ;;  %v1593_v2 = vmax.f32 %v1591_v47, %v1592_v17 }
 0x1e5   : > { %v1600_v37 = vmax.f32 %v1598_v25, %v1599_v3  ;;  %v1607_v60 = vmax.f32 %v1605_v7, %v1606_v51  ;;  %v1613_v35 = vrot.slane %v1612_v50, 2  ;;  %v1763_v34 = vmax.f32 %v1761_v45, %v1762_v36 }
 0x1e6   : > { %v1776_v12 = vrot.slane %v1775_v41, 1  ;;  %v1024_v31 = vcombine.high %v1016_v20, %v1016_v20  ;;  %v1883_v63 = vsel %vm1392_vm0, %v1023_v57, -inf  ;;  %v1594_v27 = vrot.slane %v1593_v2, 1 }
 0x1e7   : > { %v1601_v1 = vrot.slane %v1600_v37, 1  ;;  %v1608_v53 = vrot.slane %v1607_v60, 1  ;;  %v1614_v54 = vmax.f32 %v1612_v50, %v1613_v35  ;;  %v1770_v59 = vmax.f32 %v1768_v23, %v1769_v0 }
 0x1e8   : > { %v1783_v14 = vrot.slane %v1782_v38, 1  ;;  %v1025_v21 = vcombine.high %v1023_v57, %v1023_v57  ;;  %v1870_v26 = vrot.slane %v1869_v58, 4  ;;  %v1595_v39 = vmax.f32 %v1593_v2, %v1594_v27 }
 0x1e9   : > { %v1602_v6 = vmax.f32 %v1600_v37, %v1601_v1  ;;  %v1609_v44 = vmax.f32 %v1607_v60, %v1608_v53  ;;  %v1615_v47 = vrot.slane %v1614_v54, 1  ;;  %v1777_v25 = vmax.f32 %v1775_v41, %v1776_v12  ;;  %v571_v53 = vpop.permute.xlu0 %570 }
 0x1ea   : > { %v1876_v7 = vsel %vm1392_vm0, %v1024_v31, -inf  ;;  %v1884_v45 = vrot.slane %v1883_v63, 4  ;;  %v667_v62 = vmax.f32 %v635_v30, 0.0  ;;  %v2327_v56 = vsel %vm2289_vm1, %v1595_v39, -inf }
 0x1eb   : > { %v1616_v20 = vmax.f32 %v1614_v54, %v1615_v47  ;;  %v2330_v36 = vsel %vm2289_vm1, %v1602_v6, -inf  ;;  %v2333_v17 = vsel %vm2289_vm1, %v1609_v44, -inf  ;;  %v2328_v23 = vmax.f32 %v3417_v9, %v2327_v56  ;;  %v559_v44 = vpop.permute.xlu1 %558 }
 0x1ec   : > { %v2331_v57 = vmax.f32 %v3420_v61, %v2330_v36  ;;  %v2334_v3 = vmax.f32 %v3436_v49, %v2333_v17  ;;  %v1890_v51 = vsel %vm1392_vm0, %v1025_v21, -inf  ;;  %v1784_v41 = vmax.f32 %v1782_v38, %v1783_v14 }
 0x1ed   : > { %v2336_v50 = vsel %vm2289_vm1, %v1616_v20, -inf  ;;  %v1871_v0 = vmax.f32 %v1869_v58, %v1870_v26  ;;  %v1877_v30 = vrot.slane %v1876_v7, 4  ;;  %v3552_v2 = vsel %vm2289_vm1, %v1763_v34, -inf }
 0x1ee   : > { %v2337_v37 = vmax.f32 %v3440_v33, %v2336_v50  ;;  %v2563_v9 = vsel %vm2552_vm5, %v2328_v23, %v3467_v11  ;;  %v907_v60 = vcombine.high %v667_v62, %v667_v62  ;;  %v3558_v61 = vsel %vm2289_vm1, %v1770_v59, -inf }
 0x1ef   : > { %v2564_v49 = vsel %vm2554_vm6, %v2331_v57, %v2563_v9  ;;  %v1885_v38 = vmax.f32 %v1883_v63, %v1884_v45  ;;  %v1891_v35 = vrot.slane %v1890_v51, 4  ;;  %v3562_v58 = vsel %vm2289_vm1, %v1777_v25, -inf  ;;  %v3583_v45 = vld [vmem:[%s3849_s3] ss:$0 sm:$0xff] }
 0x1f0   : > { %v2565_v34 = vsel %vm2556_vm7, %v2334_v3, %v2564_v49  ;;  %v914_v12 = vrot.slane %v667_v62, %v2956_v52  ;;  %v921_v33 = vrot.slane %v907_v60, %v2956_v52  ;;  %v3568_v31 = vsel %vm2289_vm1, %v1784_v41, -inf  ;;  %v3871_v41 = vld [vmem:[#allocation4_spill] sm:$0xff] }
 0x1f1   : > { %v2566_v11 = vsel %vm2558_vm8, %v2337_v37, %v2565_v34  ;;  %v1872_v27 = vrot.slane %v1871_v0, 2  ;;  %v1878_v1 = vmax.f32 %v1876_v7, %v1877_v30  ;;  %v1886_v21 = vrot.slane %v1885_v38, 2 }
 0x1f2   : > { %2618 = vst.msk [vmem:[%s3519_s24 + $0x8] sm:$0xff] %vm2289_vm1, %v2566_v11  ;;  %v922_v63 = vcombine.high %v914_v12, %v914_v12  ;;  %v923_v54 = vcombine.high %v921_v33, %v921_v33  ;;  %v1701_v59 = vsel %vm1392_vm0, %v914_v12, -inf  ;;  %v1715_v14 = vsel %vm1392_vm0, %v921_v33, -inf }
 0x1f3   : > { %v3575_v26 = vmax.f32 %v1890_v51, %v1891_v35  ;;  %v1702_v39 = vrot.slane %v1701_v59, 4  ;;  %v1716_v6 = vrot.slane %v1715_v14, 4  ;;  %v645_v7 = vadd.f32 %v571_v53, %v3531_v18  ;;  %v3870_v51 = vld [vmem:[#allocation2_spill] sm:$0xff] }
 0x1f4   : > { %v1708_v47 = vsel %vm1392_vm0, %v922_v63, -inf  ;;  %v1722_v25 = vsel %vm1392_vm0, %v923_v54, -inf  ;;  %v365_v62 = vadd.f32 %v3583_v45, %v3538_v22  ;;  %v1873_v23 = vmax.f32 %v1871_v0, %v1872_v27 }
 0x1f5   : > { %v1703_v20 = vmax.f32 %v1701_v59, %v1702_v39  ;;  %v1709_v56 = vrot.slane %v1708_v47, 4  ;;  %v1717_v36 = vmax.f32 %v1715_v14, %v1716_v6  ;;  %v1723_v17 = vrot.slane %v1722_v25, 4  ;;  %v297_v6 = vld [vmem:[%s2937_s11 + $0xc8] sm:$0xff] }
 0x1f6   : > { %v677_v57 = vmax.f32 %v645_v7, 0.0  ;;  %v639_v3 = vadd.f32 %v559_v44, %v365_v62  ;;  %v3872_v50 = vmax.f32 %v3870_v51, %v3871_v41  ;;  %v1879_v49 = vrot.slane %v1878_v1, 2 }
 0x1f7   : > { %v1704_v30 = vrot.slane %v1703_v20, 2  ;;  %v1710_v37 = vmax.f32 %v1708_v47, %v1709_v56  ;;  %v1718_v9 = vrot.slane %v1717_v36, 2  ;;  %v1724_v60 = vmax.f32 %v1722_v25, %v1723_v17 }
 0x1f8   : > { %v3592_v18 = vsel %vm2550_vm4, %v3872_v50, %v3223_v16  ;;  %v1887_v22 = vmax.f32 %v1885_v38, %v1886_v21  ;;  %v1077_v35 = vcombine.high %v677_v57, %v677_v57  ;;  %v1084_v34 = vrot.slane %v677_v57, %v2956_v52  ;;  %v3603_v57 = vld [vmem:[%s3848_s2] ss:$0 sm:$0xff] }
 0x1f9   : > { %v1705_v0 = vmax.f32 %v1703_v20, %v1704_v30  ;;  %v1711_v12 = vrot.slane %v1710_v37, 2  ;;  %v1719_v33 = vmax.f32 %v1717_v36, %v1718_v9  ;;  %v1725_v11 = vrot.slane %v1724_v60, 2 }
 0x1fa   : > { %v1893_v27 = vrot.slane %v3575_v26, 2  ;;  %v1092_v53 = vcombine.high %v1084_v34, %v1084_v34  ;;  %v1981_v16 = vsel %vm1392_vm0, %v1084_v34, -inf  ;;  %v671_v63 = vmax.f32 %v639_v3, 0.0 }
 0x1fb   : > { %v1706_v54 = vrot.slane %v1705_v0, 1  ;;  %v1712_v59 = vmax.f32 %v1710_v37, %v1711_v12  ;;  %v1720_v14 = vrot.slane %v1719_v33, 1  ;;  %v1726_v39 = vmax.f32 %v1724_v60, %v1725_v11 }
 0x1fc   : > { %v1874_v44 = vrot.slane %v1873_v23, 1  ;;  %v1880_v38 = vmax.f32 %v1878_v1, %v1879_v49  ;;  %v1091_v21 = vrot.slane %v1077_v35, %v2956_v52  ;;  %v1982_v47 = vrot.slane %v1981_v16, 4 }
 0x1fd   : > { %v1707_v25 = vmax.f32 %v1705_v0, %v1706_v54  ;;  %v1713_v7 = vrot.slane %v1712_v59, 1  ;;  %v1721_v62 = vmax.f32 %v1719_v33, %v1720_v14  ;;  %v1727_v20 = vrot.slane %v1726_v39, 1 }
 0x1fe   : > { %v1888_v56 = vrot.slane %v1887_v22, 1  ;;  %v1988_v36 = vsel %vm1392_vm0, %v1092_v53, -inf  ;;  %v975_v17 = vcombine.high %v671_v63, %v671_v63  ;;  %v336_v3 = vmul.f32 %v3603_v57, %v297_v6 }
 0x1ff   : > { %v1714_v51 = vmax.f32 %v1712_v59, %v1713_v7  ;;  %v1728_v1 = vmax.f32 %v1726_v39, %v1727_v20  ;;  %v2351_v41 = vsel %vm2289_vm1, %v1707_v25, -inf  ;;  %v2357_v50 = vsel %vm2289_vm1, %v1721_v62, -inf }
 0x200   : > { %v2352_v30 = vmax.f32 %v3452_v28, %v2351_v41  ;;  %v1093_v37 = vcombine.high %v1091_v21, %v1091_v21  ;;  %v1983_v9 = vmax.f32 %v1981_v16, %v1982_v47  ;;  %v1995_v60 = vsel %vm1392_vm0, %v1091_v21, -inf }
 0x201   : > { %v2354_v49 = vsel %vm2289_vm1, %v1714_v51, -inf  ;;  %v2358_v35 = vmax.f32 %v3478_v15, %v2357_v50  ;;  %v2360_v34 = vsel %vm2289_vm1, %v1728_v1, -inf  ;;  %v1989_v0 = vrot.slane %v1988_v36, 4  ;;  %v579_v15 = vpop.permute.xlu0 %578 }
 0x202   : > { %v2355_v12 = vmax.f32 %v3470_v5, %v2354_v49  ;;  %v2361_v33 = vmax.f32 %v3501_v55, %v2360_v34  ;;  %v2570_v11 = vsel %vm2552_vm5, %v2352_v30, %v3496_v43  ;;  %v375_v28 = vadd.f32 %v3583_v45, %v336_v3 }
 0x203   : > { %v1875_v53 = vmax.f32 %v1873_v23, %v1874_v44  ;;  %v1894_v16 = vmax.f32 %v3575_v26, %v1893_v27  ;;  %v1996_v54 = vrot.slane %v1995_v60, 4  ;;  %v982_v59 = vrot.slane %v671_v63, %v2956_v52 }
 0x204   : > { %v1881_v14 = vrot.slane %v1880_v38, 1  ;;  %v2571_v39 = vsel %vm2554_vm6, %v2355_v12, %v2570_v11  ;;  %v2002_v5 = vsel %vm1392_vm0, %v1093_v37, -inf  ;;  %v989_v55 = vrot.slane %v975_v17, %v2956_v52 }
 0x205   : > { %v3623_v6 = vmax.f32 %v1887_v22, %v1888_v56  ;;  %v2572_v43 = vsel %vm2556_vm7, %v2358_v35, %v2571_v39  ;;  %v1984_v21 = vrot.slane %v1983_v9, 2  ;;  %v1990_v23 = vmax.f32 %v1988_v36, %v1989_v0 }
 0x206   : > { %v2573_v26 = vsel %vm2558_vm8, %v2361_v33, %v2572_v43  ;;  %v990_v27 = vcombine.high %v982_v59, %v982_v59  ;;  %v991_v44 = vcombine.high %v989_v55, %v989_v55  ;;  %v649_v47 = vadd.f32 %v579_v15, %v375_v28 }
 0x207   : > { %v1895_v63 = vrot.slane %v1894_v16, 1  ;;  %2619 = vst.msk [vmem:[%s3519_s24 + $0x10] sm:$0xff] %vm2289_vm1, %v2573_v26  ;;  %v1997_v25 = vmax.f32 %v1995_v60, %v1996_v54  ;;  %v2003_v7 = vrot.slane %v2002_v5, 4  ;;  %v1813_v62 = vsel %vm1392_vm0, %v982_v59, -inf  ;;  %v291_v54 = vld [vmem:[%s2937_s11 + $0x98] sm:$0xff] }
 0x208   : > { %v3631_v20 = vsel %vm2289_vm1, %v1875_v53, -inf  ;;  %v1814_v22 = vrot.slane %v1813_v62, 4  ;;  %v1820_v56 = vsel %vm1392_vm0, %v990_v27, -inf  ;;  %v1827_v36 = vsel %vm1392_vm0, %v989_v55, -inf }
 0x209   : > { %v3635_v17 = vmax.f32 %v1880_v38, %v1881_v14  ;;  %v1985_v3 = vmax.f32 %v1983_v9, %v1984_v21  ;;  %v1991_v51 = vrot.slane %v1990_v23, 2  ;;  %v1821_v1 = vrot.slane %v1820_v56, 4 }
 0x20a   : > { %v1815_v41 = vmax.f32 %v1813_v62, %v1814_v22  ;;  %v1828_v50 = vrot.slane %v1827_v36, 4  ;;  %v1834_v30 = vsel %vm1392_vm0, %v991_v44, -inf  ;;  %v681_v37 = vmax.f32 %v649_v47, 0.0 }
 0x20b   : > { %v3638_v60 = vmax.f32 %v1894_v16, %v1895_v63  ;;  %v1998_v49 = vrot.slane %v1997_v25, 2  ;;  %v2004_v35 = vmax.f32 %v2002_v5, %v2003_v7  ;;  %v1822_v34 = vmax.f32 %v1820_v56, %v1821_v1 }
 0x20c   : > { %v1816_v0 = vrot.slane %v1815_v41, 2  ;;  %v1829_v12 = vmax.f32 %v1827_v36, %v1828_v50  ;;  %v1835_v33 = vrot.slane %v1834_v30, 4  ;;  %v1145_v11 = vcombine.high %v681_v37, %v681_v37 }
 0x20d   : > { %v1986_v38 = vrot.slane %v1985_v3, 1  ;;  %v1992_v28 = vmax.f32 %v1990_v23, %v1991_v51  ;;  %v1823_v9 = vrot.slane %v1822_v34, 2  ;;  %v1152_v53 = vrot.slane %v681_v37, %v2956_v52 }
 0x20e   : > { %v1817_v59 = vmax.f32 %v1815_v41, %v1816_v0  ;;  %v1830_v15 = vrot.slane %v1829_v12, 2  ;;  %v1836_v14 = vmax.f32 %v1834_v30, %v1835_v33  ;;  %v1159_v39 = vrot.slane %v1145_v11, %v2956_v52 }
 0x20f   : > { %v2005_v16 = vrot.slane %v2004_v35, 2  ;;  %v1824_v55 = vmax.f32 %v1822_v34, %v1823_v9  ;;  %v1160_v43 = vcombine.high %v1152_v53, %v1152_v53  ;;  %v2093_v5 = vsel %vm1392_vm0, %v1152_v53, -inf }
 0x210   : > { %v1818_v21 = vrot.slane %v1817_v59, 1  ;;  %v1831_v26 = vmax.f32 %v1829_v12, %v1830_v15  ;;  %v1837_v27 = vrot.slane %v1836_v14, 2  ;;  %v330_v44 = vmul.f32 %v3603_v57, %v291_v54 }
 0x211   : > { %v1825_v23 = vrot.slane %v1824_v55, 1  ;;  %v2094_v47 = vrot.slane %v2093_v5, 4  ;;  %v2100_v63 = vsel %vm1392_vm0, %v1160_v43, -inf  ;;  %v2107_v7 = vsel %vm1392_vm0, %v1159_v39, -inf }
 0x212   : > { %v1819_v62 = vmax.f32 %v1817_v59, %v1818_v21  ;;  %v1832_v22 = vrot.slane %v1831_v26, 1  ;;  %v1838_v56 = vmax.f32 %v1836_v14, %v1837_v27  ;;  %v2101_v36 = vrot.slane %v2100_v63, 4  ;;  %v301_v21 = vld [vmem:[%s2937_s11 + $0xe8] sm:$0xff] }
 0x213   : > { %v1993_v51 = vrot.slane %v1992_v28, 1  ;;  %v1999_v1 = vmax.f32 %v1997_v25, %v1998_v49  ;;  %v2006_v41 = vmax.f32 %v2004_v35, %v2005_v16  ;;  %v1826_v50 = vmax.f32 %v1824_v55, %v1825_v23  ;;  %v567_v16 = vpop.permute.xlu1 %566 }
 0x214   : > { %v1833_v30 = vmax.f32 %v1831_v26, %v1832_v22  ;;  %v1839_v37 = vrot.slane %v1838_v56, 1  ;;  %v2375_v34 = vsel %vm2289_vm1, %v1819_v62, -inf  ;;  %v369_v0 = vadd.f32 %v3583_v45, %v330_v44  ;;  %v587_v62 = vpop.permute.xlu0 %586 }
 0x215   : > { %v2376_v12 = vmax.f32 %v3552_v2, %v2375_v34  ;;  %v2378_v33 = vsel %vm2289_vm1, %v1826_v50, -inf  ;;  %v2095_v11 = vmax.f32 %v2093_v5, %v2094_v47  ;;  %v2108_v9 = vrot.slane %v2107_v7, 4 }
 0x216   : > { %v1840_v53 = vmax.f32 %v1838_v56, %v1839_v37  ;;  %v2379_v54 = vmax.f32 %v3558_v61, %v2378_v33  ;;  %v2381_v25 = vsel %vm2289_vm1, %v1833_v30, -inf  ;;  %v2102_v49 = vmax.f32 %v2100_v63, %v2101_v36 }
 0x217   : > { %v2000_v35 = vrot.slane %v1999_v1, 1  ;;  %v2007_v59 = vrot.slane %v2006_v41, 1  ;;  %v2382_v15 = vmax.f32 %v3562_v58, %v2381_v25  ;;  %v2577_v14 = vsel %vm2552_vm5, %v2376_v12, %v3592_v18 }
 0x218   : > { %v1987_v2 = vmax.f32 %v1985_v3, %v1986_v38  ;;  %v2384_v55 = vsel %vm2289_vm1, %v1840_v53, -inf  ;;  %v2578_v43 = vsel %vm2554_vm6, %v2379_v54, %v2577_v14  ;;  %v1161_v5 = vcombine.high %v1159_v39, %v1159_v39 }
 0x219   : > { %v2385_v61 = vmax.f32 %v3568_v31, %v2384_v55  ;;  %v2579_v26 = vsel %vm2556_vm7, %v2382_v15, %v2578_v43  ;;  %v2096_v27 = vrot.slane %v2095_v11, 2  ;;  %v2109_v44 = vmax.f32 %v2107_v7, %v2108_v9 }
 0x21a   : > { %v3663_v58 = vsel %vm2289_vm1, %v3623_v6, -inf  ;;  %v1994_v18 = vmax.f32 %v1992_v28, %v1993_v51  ;;  %v2103_v23 = vrot.slane %v2102_v49, 2  ;;  %v643_v3 = vadd.f32 %v567_v16, %v369_v0 }
 0x21b   : > { %v2001_v38 = vmax.f32 %v1999_v1, %v2000_v35  ;;  %v2008_v47 = vmax.f32 %v2006_v41, %v2007_v59  ;;  %v2580_v39 = vsel %vm2558_vm8, %v2385_v61, %v2579_v26  ;;  %v340_v63 = vmul.f32 %v3603_v57, %v301_v21  ;;  %v295_v1 = vld [vmem:[%s2937_s11 + $0xb8] sm:$0xff]  ;;  %v3873_v21 = vld [vmem:[#allocation3_spill] sm:$0xff]  ;;  %v3874_v61 = vld [vmem:[#allocation6_spill] sm:$0xff] }
 0x21c   : > { %v3669_v31 = vsel %vm2289_vm1, %v3635_v17, -inf  ;;  %v3673_v7 = vsel %vm2289_vm1, %v3638_v60, -inf  ;;  %2620 = vst.msk [vmem:[%s3519_s24 + $0x18] sm:$0xff] %vm2289_vm1, %v2580_v39  ;;  %v2114_v6 = vsel %vm1392_vm0, %v1161_v5, -inf  ;;  %v675_v28 = vmax.f32 %v643_v3, 0.0  ;;  %v575_v39 = vpop.permute.xlu1 %574 }
 0x21d   : > { %v3679_v22 = vsel %vm2289_vm1, %v1987_v2, -inf  ;;  %v2097_v56 = vmax.f32 %v2095_v11, %v2096_v27  ;;  %v2110_v36 = vrot.slane %v2109_v44, 2  ;;  %v379_v51 = vadd.f32 %v3583_v45, %v340_v63 }
 0x21e   : > { %v3684_v17 = vsel %vm2289_vm1, %v1994_v18, -inf  ;;  %v2104_v41 = vmax.f32 %v2102_v49, %v2103_v23  ;;  %v1043_v60 = vcombine.high %v675_v28, %v675_v28  ;;  %v1050_v50 = vrot.slane %v675_v28, %v2956_v52 }
 0x21f   : > { %v3688_v30 = vsel %vm2289_vm1, %v2001_v38, -inf  ;;  %v3691_v37 = vsel %vm2289_vm1, %v2008_v47, -inf  ;;  %v2115_v34 = vrot.slane %v2114_v6, 4  ;;  %v653_v0 = vadd.f32 %v587_v62, %v379_v51 }
 0x220   : > { %v1057_v12 = vrot.slane %v1043_v60, %v2956_v52  ;;  %v1058_v33 = vcombine.high %v1050_v50, %v1050_v50  ;;  %v1925_v11 = vsel %vm1392_vm0, %v1050_v50, -inf  ;;  %v334_v9 = vmul.f32 %v3603_v57, %v295_v1 }
 0x221   : > { %v2098_v53 = vrot.slane %v2097_v56, 1  ;;  %v2111_v54 = vmax.f32 %v2109_v44, %v2110_v36  ;;  %v1926_v25 = vrot.slane %v1925_v11, 4  ;;  %v685_v49 = vmax.f32 %v653_v0, 0.0 }
 0x222   : > { %v2105_v35 = vrot.slane %v2104_v41, 1  ;;  %v1059_v59 = vcombine.high %v1057_v12, %v1057_v12  ;;  %v1932_v15 = vsel %vm1392_vm0, %v1058_v33, -inf  ;;  %v1939_v14 = vsel %vm1392_vm0, %v1057_v12, -inf }
 0x223   : > { %v2116_v16 = vmax.f32 %v2114_v6, %v2115_v34  ;;  %v1927_v2 = vmax.f32 %v1925_v11, %v1926_v25  ;;  %v1933_v55 = vrot.slane %v1932_v15, 4  ;;  %v1940_v43 = vrot.slane %v1939_v14, 4  ;;  %v299_v25 = vld [vmem:[%s2937_s11 + $0xd8] sm:$0xff] }
 0x224   : > { %v1946_v5 = vsel %vm1392_vm0, %v1059_v59, -inf  ;;  %v3875_v26 = vmax.f32 %v3873_v21, %v3874_v61  ;;  %v1220_v44 = vrot.slane %v685_v49, %v2956_v52  ;;  %v373_v18 = vadd.f32 %v3583_v45, %v334_v9 }
 0x225   : > { %v1928_v23 = vrot.slane %v1927_v2, 2  ;;  %v1934_v3 = vmax.f32 %v1932_v15, %v1933_v55  ;;  %v1941_v38 = vmax.f32 %v1939_v14, %v1940_v43  ;;  %v1947_v47 = vrot.slane %v1946_v5, 4 }
 0x226   : > { %v2583_v27 = vsel %vm2550_vm4, %v3875_v26, %v3313_v29  ;;  %v2099_v63 = vmax.f32 %v2097_v56, %v2098_v53  ;;  %v2112_v6 = vrot.slane %v2111_v54, 1  ;;  %v1213_v28 = vcombine.high %v685_v49, %v685_v49 }
 0x227   : > { %v2205_v62 = vsel %vm1392_vm0, %v1220_v44, -inf  ;;  %v1929_v36 = vmax.f32 %v1927_v2, %v1928_v23  ;;  %v1935_v51 = vrot.slane %v1934_v3, 2  ;;  %v1942_v1 = vrot.slane %v1941_v38, 2 }
 0x228   : > { %v1948_v60 = vmax.f32 %v1946_v5, %v1947_v47  ;;  %v2106_v29 = vmax.f32 %v2104_v41, %v2105_v35  ;;  %v2117_v50 = vrot.slane %v2116_v16, 2  ;;  %v1228_v34 = vcombine.high %v1220_v44, %v1220_v44 }
 0x229   : > { %v647_v0 = vadd.f32 %v575_v39, %v373_v18  ;;  %v1930_v12 = vrot.slane %v1929_v36, 1  ;;  %v1936_v33 = vmax.f32 %v1934_v3, %v1935_v51  ;;  %v1943_v11 = vmax.f32 %v1941_v38, %v1942_v1  ;;  %v3876_v1 = vld [vmem:[#allocation8_spill] sm:$0xff] }
 0x22a   : > { %v1949_v9 = vrot.slane %v1948_v60, 2  ;;  %v2113_v59 = vmax.f32 %v2111_v54, %v2112_v6  ;;  %v3709_v56 = vsel %vm2289_vm1, %v2099_v63, -inf  ;;  %v1227_v53 = vrot.slane %v1213_v28, %v2956_v52 }
 0x22b   : > { %v2206_v49 = vrot.slane %v2205_v62, 4  ;;  %v1931_v15 = vmax.f32 %v1929_v36, %v1930_v12  ;;  %v1937_v14 = vrot.slane %v1936_v33, 1  ;;  %v1944_v2 = vrot.slane %v1943_v11, 1 }
 0x22c   : > { %v1950_v55 = vmax.f32 %v1948_v60, %v1949_v9  ;;  %v2118_v41 = vmax.f32 %v2116_v16, %v2117_v50  ;;  %v2212_v35 = vsel %vm1392_vm0, %v1228_v34, -inf  ;;  %v679_v43 = vmax.f32 %v647_v0, 0.0  ;;  %v3877_v60 = vld [vmem:[#allocation5_spill] sm:$0xff]  ;;  %v3878_v50 = vld [vmem:[#allocation7_spill] sm:$0xff] }
 0x22d   : > { %v338_v5 = vmul.f32 %v3603_v57, %v299_v25  ;;  %v1938_v21 = vmax.f32 %v1936_v33, %v1937_v14  ;;  %v1945_v61 = vmax.f32 %v1943_v11, %v1944_v2  ;;  %v2399_v54 = vsel %vm2289_vm1, %v1931_v15, -inf }
 0x22e   : > { %v1951_v26 = vrot.slane %v1950_v55, 1  ;;  %v2400_v44 = vmax.f32 %v3631_v20, %v2399_v54  ;;  %v1229_v18 = vcombine.high %v1227_v53, %v1227_v53  ;;  %v2207_v23 = vmax.f32 %v2205_v62, %v2206_v49 }
 0x22f   : > { %v2219_v3 = vsel %vm1392_vm0, %v1227_v53, -inf  ;;  %v2402_v47 = vsel %vm2289_vm1, %v1938_v21, -inf  ;;  %v2405_v16 = vsel %vm2289_vm1, %v1945_v61, -inf  ;;  %v2213_v39 = vrot.slane %v2212_v35, 4 }
 0x230   : > { %v1952_v38 = vmax.f32 %v1950_v55, %v1951_v26  ;;  %v2403_v63 = vmax.f32 %v3669_v31, %v2402_v47  ;;  %v2406_v6 = vmax.f32 %v3663_v58, %v2405_v16  ;;  %v2584_v28 = vsel %vm2552_vm5, %v2400_v44, %v2583_v27 }
 0x231   : > { %v1111_v36 = vcombine.high %v679_v43, %v679_v43  ;;  %v3723_v51 = vsel %vm2289_vm1, %v2106_v29, -inf  ;;  %v2220_v62 = vrot.slane %v2219_v3, 4  ;;  %v3879_v34 = vmax.f32 %v3877_v60, %v3878_v50 }
 0x232   : > { %v2408_v20 = vsel %vm2289_vm1, %v1952_v38, -inf  ;;  %v2585_v58 = vsel %vm2554_vm6, %v2403_v63, %v2584_v28  ;;  %v2226_v27 = vsel %vm1392_vm0, %v1229_v18, -inf  ;;  %v1118_v29 = vrot.slane %v679_v43, %v2956_v52  ;;  %v583_v43 = vpop.permute.xlu1 %582  ;;  %v303_v18 = vld [vmem:[%s2937_s11 + $0xf8] sm:$0xff] }
 0x233   : > { %v3731_v0 = vsel %vm2550_vm4, %v3879_v34, %v3876_v1  ;;  %v2409_v31 = vmax.f32 %v3673_v7, %v2408_v20  ;;  %v2119_v12 = vrot.slane %v2118_v41, 1  ;;  %v2586_v33 = vsel %vm2556_vm7, %v2406_v6, %v2585_v58 }
 0x234   : > { %v2208_v11 = vrot.slane %v2207_v23, 2  ;;  %v2214_v9 = vmax.f32 %v2212_v35, %v2213_v39  ;;  %v1125_v53 = vrot.slane %v1111_v36, %v2956_v52  ;;  %v1126_v49 = vcombine.high %v1118_v29, %v1118_v29 }
 0x235   : > { %v2587_v25 = vsel %vm2558_vm8, %v2409_v31, %v2586_v33  ;;  %v377_v15 = vadd.f32 %v3583_v45, %v338_v5  ;;  %v3742_v7 = vsel %vm2289_vm1, %v2113_v59, -inf  ;;  %v2221_v14 = vmax.f32 %v2219_v3, %v2220_v62 }
 0x236   : > { %2621 = vst.msk [vmem:[%s3519_s24 + $0x20] sm:$0xff] %vm2289_vm1, %v2587_v25  ;;  %v2227_v2 = vrot.slane %v2226_v27, 4  ;;  %v2037_v55 = vsel %vm1392_vm0, %v1118_v29, -inf  ;;  %v1127_v21 = vcombine.high %v1125_v53, %v1125_v53  ;;  %v2044_v61 = vsel %vm1392_vm0, %v1126_v49, -inf }
 0x237   : > { %v2038_v35 = vrot.slane %v2037_v55, 4  ;;  %v2051_v26 = vsel %vm1392_vm0, %v1125_v53, -inf  ;;  %v3749_v54 = vmax.f32 %v2118_v41, %v2119_v12  ;;  %v3751_v44 = vmax.f32 %v2207_v23, %v2208_v11 }
 0x238   : > { %v2215_v5 = vrot.slane %v2214_v9, 2  ;;  %v2045_v59 = vrot.slane %v2044_v61, 4  ;;  %v2052_v47 = vrot.slane %v2051_v26, 4  ;;  %v2058_v3 = vsel %vm1392_vm0, %v1127_v21, -inf }
 0x239   : > { %v2039_v38 = vmax.f32 %v2037_v55, %v2038_v35  ;;  %v651_v16 = vadd.f32 %v583_v43, %v377_v15  ;;  %v2222_v39 = vrot.slane %v2221_v14, 2  ;;  %v3755_v63 = vmax.f32 %v2226_v27, %v2227_v2  ;;  %v591_v27 = vpop.permute.xlu1 %590 }
 0x23a   : > { %v2046_v6 = vmax.f32 %v2044_v61, %v2045_v59  ;;  %v2059_v28 = vrot.slane %v2058_v3, 4  ;;  %v2053_v20 = vmax.f32 %v2051_v26, %v2052_v47  ;;  %v342_v41 = vmul.f32 %v3603_v57, %v303_v18 }
 0x23b   : > { %v2040_v36 = vrot.slane %v2039_v38, 2  ;;  %v683_v62 = vmax.f32 %v651_v16, 0.0  ;;  %v2210_v23 = vrot.slane %v3751_v44, 1  ;;  %v3759_v1 = vmax.f32 %v2214_v9, %v2215_v5 }
 0x23c   : > { %v2047_v60 = vrot.slane %v2046_v6, 2  ;;  %v2060_v50 = vmax.f32 %v2058_v3, %v2059_v28  ;;  %v2054_v31 = vrot.slane %v2053_v20, 2  ;;  %v3762_v12 = vmax.f32 %v2221_v14, %v2222_v39 }
 0x23d   : > { %v2041_v34 = vmax.f32 %v2039_v38, %v2040_v36  ;;  %v1179_v58 = vcombine.high %v683_v62, %v683_v62  ;;  %v1186_v29 = vrot.slane %v683_v62, %v2956_v52  ;;  %v381_v25 = vadd.f32 %v3583_v45, %v342_v41 }
 0x23e   : > { %v2048_v33 = vmax.f32 %v2046_v6, %v2047_v60  ;;  %v2061_v11 = vrot.slane %v2060_v50, 2  ;;  %v2055_v57 = vmax.f32 %v2053_v20, %v2054_v31 }
 0x23f   : > { %v2042_v53 = vrot.slane %v2041_v34, 1  ;;  %v1193_v49 = vrot.slane %v1179_v58, %v2956_v52  ;;  %v1194_v9 = vcombine.high %v1186_v29, %v1186_v29  ;;  %v2149_v55 = vsel %vm1392_vm0, %v1186_v29, -inf }
 0x240   : > { %v2049_v15 = vrot.slane %v2048_v33, 1  ;;  %v2062_v2 = vmax.f32 %v2060_v50, %v2061_v11  ;;  %v655_v43 = vadd.f32 %v591_v27, %v381_v25  ;;  %v2056_v35 = vrot.slane %v2055_v57, 1 }
 0x241   : > { %v2043_v21 = vmax.f32 %v2041_v34, %v2042_v53  ;;  %v1195_v61 = vcombine.high %v1193_v49, %v1193_v49  ;;  %v2150_v26 = vrot.slane %v2149_v55, 4  ;;  %v2156_v59 = vsel %vm1392_vm0, %v1194_v9, -inf }
 0x242   : > { %v2050_v14 = vmax.f32 %v2048_v33, %v2049_v15  ;;  %v2063_v5 = vrot.slane %v2062_v2, 1  ;;  %v2163_v45 = vsel %vm1392_vm0, %v1193_v49, -inf  ;;  %v2057_v18 = vmax.f32 %v2055_v57, %v2056_v35 }
 0x243   : > { %v2423_v38 = vsel %vm2289_vm1, %v2043_v21, -inf  ;;  %v2151_v47 = vmax.f32 %v2149_v55, %v2150_v26  ;;  %v2157_v3 = vrot.slane %v2156_v59, 4  ;;  %v2164_v28 = vrot.slane %v2163_v45, 4 }
 0x244   : > { %v2064_v16 = vmax.f32 %v2062_v2, %v2063_v5  ;;  %v2424_v39 = vmax.f32 %v3679_v22, %v2423_v38  ;;  %v2426_v6 = vsel %vm2289_vm1, %v2050_v14, -inf  ;;  %v2429_v20 = vsel %vm2289_vm1, %v2057_v18, -inf }
 0x245   : > { %v2427_v36 = vmax.f32 %v3684_v17, %v2426_v6  ;;  %v2152_v62 = vrot.slane %v2151_v47, 2  ;;  %v2158_v41 = vmax.f32 %v2156_v59, %v2157_v3  ;;  %v2430_v60 = vmax.f32 %v3688_v30, %v2429_v20 }
 0x246   : > { %v2432_v50 = vsel %vm2289_vm1, %v2064_v16, -inf  ;;  %v2591_v34 = vsel %vm2552_vm5, %v2424_v39, %v3731_v0  ;;  %v2165_v31 = vmax.f32 %v2163_v45, %v2164_v28  ;;  %v2170_v11 = vsel %vm1392_vm0, %v1195_v61, -inf }
 0x247   : > { %v2433_v22 = vmax.f32 %v3691_v37, %v2432_v50  ;;  %v2592_v58 = vsel %vm2554_vm6, %v2427_v36, %v2591_v34  ;;  %v2153_v29 = vmax.f32 %v2151_v47, %v2152_v62  ;;  %v2159_v27 = vrot.slane %v2158_v41, 2 }
 0x248   : > { %v2593_v17 = vsel %vm2556_vm7, %v2430_v60, %v2592_v58  ;;  %v2166_v33 = vrot.slane %v2165_v31, 2  ;;  %v687_v25 = vmax.f32 %v655_v43, 0.0  ;;  %v2171_v49 = vrot.slane %v2170_v11, 4 }
 0x249   : > { %v2594_v30 = vsel %vm2558_vm8, %v2433_v22, %v2593_v17  ;;  %v2154_v53 = vrot.slane %v2153_v29, 1  ;;  %v2160_v57 = vmax.f32 %v2158_v41, %v2159_v27  ;;  %v2229_v0 = vrot.slane %v3755_v63, 2 }
 0x24a   : > { %2622 = vst.msk [vmem:[%s3519_s24 + $0x28] sm:$0xff] %vm2289_vm1, %v2594_v30  ;;  %v2167_v37 = vmax.f32 %v2165_v31, %v2166_v33  ;;  %v1247_v9 = vcombine.high %v687_v25, %v687_v25  ;;  %v1254_v15 = vrot.slane %v687_v25, %v2956_v52  ;;  %v2172_v21 = vmax.f32 %v2170_v11, %v2171_v49 }
 0x24b   : > { %v2155_v2 = vmax.f32 %v2153_v29, %v2154_v53  ;;  %v2161_v55 = vrot.slane %v2160_v57, 1  ;;  %v2597_v43 = vsel %vm2550_vm4, %v2445_v40, %v3412_v48  ;;  %v2217_v41 = vrot.slane %v3759_v1, 1 }
 0x24c   : > { %v2168_v35 = vrot.slane %v2167_v37, 1  ;;  %v1261_v61 = vrot.slane %v1247_v9, %v2956_v52  ;;  %v1262_v26 = vcombine.high %v1254_v15, %v1254_v15  ;;  %v2261_v14 = vsel %vm1392_vm0, %v1254_v15, -inf }
 0x24d   : > { %v2162_v5 = vmax.f32 %v2160_v57, %v2161_v55  ;;  %v2173_v59 = vrot.slane %v2172_v21, 2  ;;  %v2447_v45 = vsel %vm2289_vm1, %v2155_v2, -inf  ;;  %v2262_v18 = vrot.slane %v2261_v14, 4 }
 0x24e   : > { %v2169_v38 = vmax.f32 %v2167_v37, %v2168_v35  ;;  %v2448_v47 = vmax.f32 %v3709_v56, %v2447_v45  ;;  %v1263_v3 = vcombine.high %v1261_v61, %v1261_v61  ;;  %v2268_v16 = vsel %vm1392_vm0, %v1262_v26, -inf }
 0x24f   : > { %v2174_v24 = vmax.f32 %v2172_v21, %v2173_v59  ;;  %v2450_v13 = vsel %vm2289_vm1, %v2162_v5, -inf  ;;  %v2263_v40 = vmax.f32 %v2261_v14, %v2262_v18  ;;  %v2269_v48 = vrot.slane %v2268_v16, 4 }
 0x250   : > { %v2451_v52 = vmax.f32 %v3723_v51, %v2450_v13  ;;  %v2453_v39 = vsel %vm2289_vm1, %v2169_v38, -inf  ;;  %v2598_v6 = vsel %vm2552_vm5, %v2448_v47, %v2597_v43  ;;  %v2275_v28 = vsel %vm1392_vm0, %v1261_v61, -inf }
 0x251   : > { %v2175_v36 = vrot.slane %v2174_v24, 1  ;;  %v2454_v20 = vmax.f32 %v3742_v7, %v2453_v39  ;;  %v2264_v56 = vrot.slane %v2263_v40, 2  ;;  %v2270_v62 = vmax.f32 %v2268_v16, %v2269_v48 }
 0x252   : > { %v2599_v60 = vsel %vm2554_vm6, %v2451_v52, %v2598_v6  ;;  %v2276_v50 = vrot.slane %v2275_v28, 4  ;;  %v2282_v34 = vsel %vm1392_vm0, %v1263_v3, -inf  ;;  %v2230_v51 = vmax.f32 %v3755_v63, %v2229_v0 }
 0x253   : > { %v2176_v31 = vmax.f32 %v2174_v24, %v2175_v36  ;;  %v2265_v22 = vmax.f32 %v2263_v40, %v2264_v56  ;;  %v2271_v58 = vrot.slane %v2270_v62, 2  ;;  %v2455_v29 = vsel %vm2289_vm1, %v3749_v54, -inf }
 0x254   : > { %v2211_v7 = vmax.f32 %v3751_v44, %v2210_v23  ;;  %v2277_v27 = vmax.f32 %v2275_v28, %v2276_v50  ;;  %v2283_v17 = vrot.slane %v2282_v34, 4  ;;  %v2600_v11 = vsel %vm2556_vm7, %v2454_v20, %v2599_v60 }
 0x255   : > { %v2456_v33 = vsel %vm2289_vm1, %v2176_v31, -inf  ;;  %v2266_v25 = vrot.slane %v2265_v22, 1  ;;  %v2272_v30 = vmax.f32 %v2270_v62, %v2271_v58  ;;  %v2224_v63 = vrot.slane %v3762_v12, 1 }
 0x256   : > { %v2457_v53 = vmax.f32 %v2455_v29, %v2456_v33  ;;  %v2278_v57 = vrot.slane %v2277_v27, 2  ;;  %v2284_v49 = vmax.f32 %v2282_v34, %v2283_v17  ;;  %v2218_v54 = vmax.f32 %v3759_v1, %v2217_v41 }
 0x257   : > { %v2231_v0 = vrot.slane %v2230_v51, 1  ;;  %v2267_v37 = vmax.f32 %v2265_v22, %v2266_v25  ;;  %v2273_v9 = vrot.slane %v2272_v30, 1  ;;  %v2603_v44 = vsel %vm2548_vm3, %v2466_v8, %v3447_v10 }
 0x258   : > { %v2601_v23 = vsel %vm2558_vm8, %v2457_v53, %v2600_v11  ;;  %v2279_v15 = vmax.f32 %v2277_v27, %v2278_v57  ;;  %v2285_v2 = vrot.slane %v2284_v49, 2  ;;  %v2470_v55 = vsel %vm2289_vm1, %v2211_v7, -inf }
 0x259   : > { %2623 = vst.msk [vmem:[%s3519_s24 + $0x30] sm:$0xff] %vm2289_vm1, %v2601_v23  ;;  %v2274_v21 = vmax.f32 %v2272_v30, %v2273_v9  ;;  %v2471_v1 = vsel %vm2289_vm1, %v2267_v37, -inf  ;;  %v2225_v43 = vmax.f32 %v3762_v12, %v2224_v63  ;;  %v2232_v14 = vmax.f32 %v2230_v51, %v2231_v0 }
 0x25a   : > { %v2280_v35 = vrot.slane %v2279_v15, 1  ;;  %v2286_v61 = vmax.f32 %v2284_v49, %v2285_v2  ;;  %v2472_v26 = vmax.f32 %v2470_v55, %v2471_v1  ;;  %v2473_v42 = vsel %vm2289_vm1, %v2218_v54, -inf }
 0x25b   : > { %v2474_v4 = vsel %vm2289_vm1, %v2274_v21, -inf  ;;  %v2604_v8 = vsel %vm2550_vm4, %v2469_v19, %v2603_v44  ;;  %v2476_v12 = vsel %vm2289_vm1, %v2225_v43, -inf  ;;  %v2479_v16 = vsel %vm2289_vm1, %v2232_v14, -inf }
 0x25c   : > { %v2281_v10 = vmax.f32 %v2279_v15, %v2280_v35  ;;  %v2287_v5 = vrot.slane %v2286_v61, 1  ;;  %v2475_v59 = vmax.f32 %v2473_v42, %v2474_v4  ;;  %v2605_v45 = vsel %vm2552_vm5, %v2472_v26, %v2604_v8 }
 0x25e   : > { %v2288_v18 = vmax.f32 %v2286_v61, %v2287_v5  ;;  %v2477_v38 = vsel %vm2289_vm1, %v2281_v10, -inf  ;;  %v2606_v47 = vsel %vm2554_vm6, %v2475_v59, %v2605_v45 }
 0x25f   : > { %v2478_v3 = vmax.f32 %v2476_v12, %v2477_v38 }
 0x260   : > { %v2480_v32 = vsel %vm2289_vm1, %v2288_v18, -inf }
 0x261   : > { %v2481_v46 = vmax.f32 %v2479_v16, %v2480_v32  ;;  %v2607_v19 = vsel %vm2556_vm7, %v2478_v3, %v2606_v47 }
 0x263   : > { %v2608_v24 = vsel %vm2558_vm8, %v2481_v46, %v2607_v19 }
 0x264   : > { %2624 = vst.msk [vmem:[%s3519_s24 + $0x38] sm:$0xff] %vm2289_vm1, %v2608_v24 }
 0x265 PF: > { %s16_s21 = sadd.s32 1, %s2733_s21  }
 0x266   : > { %p13_p4 = scmp.ge.s32.totalorder %s16_s21, 4  }
 0x268   :  { %15 = sbr.rel (!%p13_p4) target bundleno = 1 (0x1), region = 77 }

// kernel: down_forward.3
= control target key start
LH: loop header
LB: loop body
LE: loop exit
PB: predicated region body
PF: predicated region fallthrough
CT: control target
= control target key end

     0   :  { %s2847_s12 = smov 0   ;;  %s4003_s0 = inlined_call_operand.vmem [shape: f32[2,18,18,4], index: 0, kind: input, shape index: {}]   ;;  %s4004_s1 = inlined_call_operand.vmem [shape: f32[36,16], index: 1, kind: input, shape index: {}]   ;;  %s4005_s2 = inlined_call_operand.vmem [shape: f32[2,256,16], index: 2, kind: output, shape index: {0}]   ;;  %s4006_s3 = inlined_call_operand.vmem [shape: f32[2,2,16], index: 3, kind: output, shape index: {1}]  }
   0x1 LB: > { %s2448_s13 = sadd.s32 4294967295, %s2817_s12   ;;  %p2452_p0 = scmp.ge.s32.totalorder %s2817_s12, 1  ;;  %s2817_s12 = sphi %s2847_s12, %s14_s12  }
   0x2   : > { %p140_p1 = scmp.lt.s32.totalorder %s2817_s12, 3 }
   0x4   : > { %p141_p2 = pnand %p2452_p0, %p140_p1 }
   0x5   : > { %p168_p3 = scmp.lt.s32.totalorder (!%p141_p2), %s2448_s13, 1  ;;  %s2819_s18 = smov (!%p141_p2), 4   ;;  %vm214_vm0 = vcmask (!%p141_p2), 31744   ;;  %vm407_vm1 = vcmask (!%p141_p2), 64544   ;;  %vm1927_vm2 = vcmask (!%p141_p2), 1043456   ;;  %vm600_vm3 = vcmask (!%p141_p2), 97344  }
   0x6   : > { %144 = sbr.rel (%p141_p2) target bundleno = 883 (0x373), region = 28  ;;  %s2820_s19 = smov (!%p141_p2), 8   ;;  %vm794_vm4 = vcmask (!%p141_p2), 130144   ;;  %vm987_vm5 = vcmask (!%p141_p2), 162944   ;;  %vm1180_vm6 = vcmask (!%p141_p2), 195744   ;;  %vm1374_vm7 = vcmask (!%p141_p2), 228544  }
   0x7   : > { %s2821_s20 = smov (!%p141_p2), 12   ;;  %s2822_s21 = smov (!%p141_p2), 16   ;;  %vm1567_vm8 = vcmask (!%p141_p2), 261344   ;;  %vm1760_vm9 = vcmask (!%p141_p2), 294144   ;;  %vm1830_vm10 = vcmask (!%p141_p2), 293888   ;;  %vm2156_vm11 = vcmask (!%p141_p2), 130048  }
   0x8   : > { %s2823_s22 = smov (!%p141_p2), 20   ;;  %s2824_s27 = smov (!%p141_p2), 24   ;;  %vm2258_vm12 = vcmask (!%p141_p2), 122880  }
   0x9   : > { %s2825_s5 = smov (!%p141_p2), 28   ;;  %s2826_s8 = smov (!%p141_p2), 32  }
   0xd   : > { %s4008_s13 = smov (!%p168_p3, %s2448_s13), 1 }
   0xe   : > { %s2794_s14 = smul.u32 432, %s4008_s13  ;;  %s2684_s9 = sshll.u32 %s4008_s13, 8 }
   0xf   : > { %s2456_s15 = sshll.u32 %s4008_s13, 1 }
  0x10   : > { %s2861_s17 = scalar_lea.vmem %s4003_s0, %s2794_s14  ;;  %s3790_s14 = scalar_lea.vmem %s4005_s2, %s2684_s9 }
  0x11   : > { %v2864_v0 = vld [vmem:[%s2861_s17 + $0x19] sm:$0xff]  ;;  %v247_v1 = vld [vmem:[%s2861_s17 + $0x1] sm:$0xff]  ;;  %v248_v3 = vld [vmem:[%s2861_s17 + $0x9] sm:$0xff] }
  0x12   : > { %315 = vrot.lane.b32.xlu1 %v2864_v0, %s2819_s18  ;;  %311 = vrot.lane.b32.xlu0 %v247_v1, %s2819_s18  ;;  %v2871_v2 = vld [vmem:[%s2861_s17 + $0x21] sm:$0xff]  ;;  %v2878_v4 = vld [vmem:[%s2861_s17 + $0x39] sm:$0xff] }
  0x13   : > { %v2881_v5 = vld [vmem:[%s2861_s17 + $0x31] sm:$0xff]  ;;  %v2891_v7 = vld [vmem:[%s2861_s17 + $0x49] sm:$0xff]  ;;  %v2901_v9 = vld [vmem:[%s2861_s17 + $0x61] sm:$0xff] }
  0x14   : > { %v2888_v6 = vld [vmem:[%s2861_s17 + $0x51] sm:$0xff]  ;;  %v2898_v8 = vld [vmem:[%s2861_s17 + $0x69] sm:$0xff]  ;;  %v2908_v10 = vld [vmem:[%s2861_s17 + $0x81] sm:$0xff] }
  0x15   : > { %v2911_v11 = vld [vmem:[%s2861_s17 + $0x79] sm:$0xff]  ;;  %v2925_v15 = vld [vmem:[%s2861_s17 + $0x91] sm:$0xff]  ;;  %v183_v17 = vld [vmem:[%s2861_s17 + $0x8] sm:$0xff] }
  0x16   : > { %317 = vrot.lane.b32.xlu1 %v2871_v2, %s2819_s18  ;;  %313 = vrot.lane.b32.xlu0 %v248_v3, %s2819_s18  ;;  %v2918_v12 = vld [vmem:[%s2861_s17 + $0x18] sm:$0xff]  ;;  %v182_v13 = vld [vmem:[%s2861_s17] sm:$0xff]  ;;  %216 = vst.msk [vmem:[#allocation2 + $0x8] sm:$0xff] %vm214_vm0, %v183_v17 }
  0x17   : > { %v2922_v14 = vld [vmem:[%s2861_s17 + $0x99] sm:$0xff]  ;;  %217 = vst.msk [vmem:[#allocation2 + $0x10] sm:$0xff] %vm214_vm0, %v2918_v12  ;;  %215 = vst.msk [vmem:[#allocation2] sm:$0xff] %vm214_vm0, %v182_v13  ;;  %v2937_v18 = vld [vmem:[%s2861_s17 + $0xb1] sm:$0xff] }
  0x18   : > { %v2931_v16 = vld [vmem:[%s2861_s17 + $0x20] sm:$0xff]  ;;  %v2941_v19 = vld [vmem:[%s2861_s17 + $0x38] sm:$0xff]  ;;  %v2944_v20 = vld [vmem:[%s2861_s17 + $0x30] sm:$0xff] }
  0x19   : > { %218 = vst.msk [vmem:[#allocation2 + $0x18] sm:$0xff] %vm214_vm0, %v2931_v16  ;;  %v2951_v21 = vld [vmem:[%s2861_s17 + $0xa9] sm:$0xff]  ;;  %220 = vst.msk [vmem:[#allocation2 + $0x28] sm:$0xff] %vm214_vm0, %v2941_v19  ;;  %v2969_v25 = vld [vmem:[%s2861_s17 + $0x60] sm:$0xff] }
  0x1a   : > { %321 = vrot.lane.b32.xlu1 %v2878_v4, %s2819_s18  ;;  %319 = vrot.lane.b32.xlu0 %v2881_v5, %s2819_s18  ;;  %219 = vst.msk [vmem:[#allocation2 + $0x20] sm:$0xff] %vm214_vm0, %v2944_v20  ;;  %v2958_v22 = vld [vmem:[%s2861_s17 + $0x50] sm:$0xff]  ;;  %v2963_v23 = vld [vmem:[%s2861_s17 + $0x48] sm:$0xff]  ;;  %223 = vst.msk [vmem:[#allocation2 + $0x40] sm:$0xff] %vm214_vm0, %v2969_v25 }
  0x1b   : > { %222 = vst.msk [vmem:[#allocation2 + $0x38] sm:$0xff] %vm214_vm0, %v2958_v22  ;;  %v2966_v24 = vld [vmem:[%s2861_s17 + $0x68] sm:$0xff]  ;;  %221 = vst.msk [vmem:[#allocation2 + $0x30] sm:$0xff] %vm214_vm0, %v2963_v23  ;;  %v2978_v26 = vld [vmem:[%s2861_s17 + $0x80] sm:$0xff] }
  0x1c   : > { %224 = vst.msk [vmem:[#allocation2 + $0x48] sm:$0xff] %vm214_vm0, %v2966_v24  ;;  %v2981_v27 = vld [vmem:[%s2861_s17 + $0x78] sm:$0xff]  ;;  %v264_v29 = vld [vmem:[%s2861_s17 + $0xc9] sm:$0xff]  ;;  %v263_v30 = vld [vmem:[%s2861_s17 + $0xc1] sm:$0xff] }
  0x1d   : > { %v2984_v28 = vld [vmem:[%s2861_s17 + $0x98] sm:$0xff]  ;;  %226 = vst.msk [vmem:[#allocation2 + $0x58] sm:$0xff] %vm214_vm0, %v2978_v26  ;;  %225 = vst.msk [vmem:[#allocation2 + $0x50] sm:$0xff] %vm214_vm0, %v2981_v27  ;;  %v2995_v31 = vld [vmem:[%s2861_s17 + $0x90] sm:$0xff] }
  0x1e   : > { %325 = vrot.lane.b32.xlu1 %v2888_v6, %s2819_s18  ;;  %323 = vrot.lane.b32.xlu0 %v2891_v7, %s2819_s18  ;;  %228 = vst.msk [vmem:[#allocation2 + $0x68] sm:$0xff] %vm214_vm0, %v2984_v28  ;;  %v2998_v32 = vld [vmem:[%s2861_s17 + $0xb0] sm:$0xff]  ;;  %v3001_v33 = vld [vmem:[%s2861_s17 + $0xa8] sm:$0xff]  ;;  %227 = vst.msk [vmem:[#allocation2 + $0x60] sm:$0xff] %vm214_vm0, %v2995_v31 }
  0x1f   : > { %230 = vst.msk [vmem:[#allocation2 + $0x78] sm:$0xff] %vm214_vm0, %v2998_v32  ;;  %229 = vst.msk [vmem:[#allocation2 + $0x70] sm:$0xff] %vm214_vm0, %v3001_v33  ;;  %v3014_v34 = vld [vmem:[%s2861_s17 + $0xc8] sm:$0xff]  ;;  %v3017_v35 = vld [vmem:[%s2861_s17 + $0xc0] sm:$0xff] }
  0x20   : > { %232 = vst.msk [vmem:[#allocation2 + $0x88] sm:$0xff] %vm214_vm0, %v3014_v34  ;;  %231 = vst.msk [vmem:[#allocation2 + $0x80] sm:$0xff] %vm214_vm0, %v3017_v35  ;;  %v3024_v36 = vld [vmem:[%s2861_s17 + $0xe0] sm:$0xff]  ;;  %v3027_v37 = vld [vmem:[%s2861_s17 + $0xd8] sm:$0xff] }
  0x21   : > { %v3030_v38 = vld [vmem:[%s2861_s17 + $0xf8] sm:$0xff]  ;;  %234 = vst.msk [vmem:[#allocation2 + $0x98] sm:$0xff] %vm214_vm0, %v3024_v36  ;;  %233 = vst.msk [vmem:[#allocation2 + $0x90] sm:$0xff] %vm214_vm0, %v3027_v37  ;;  %v3039_v39 = vld [vmem:[%s2861_s17 + $0xf0] sm:$0xff] }
  0x22   : > { %329 = vrot.lane.b32.xlu1 %v2898_v8, %s2819_s18  ;;  %327 = vrot.lane.b32.xlu0 %v2901_v9, %s2819_s18  ;;  %236 = vst.msk [vmem:[#allocation2 + $0xa8] sm:$0xff] %vm214_vm0, %v3030_v38  ;;  %v3042_v40 = vld [vmem:[%s2861_s17 + $0x110] sm:$0xff]  ;;  %v3045_v41 = vld [vmem:[%s2861_s17 + $0x108] sm:$0xff]  ;;  %235 = vst.msk [vmem:[#allocation2 + $0xa0] sm:$0xff] %vm214_vm0, %v3039_v39 }
  0x23   : > { %238 = vst.msk [vmem:[#allocation2 + $0xb8] sm:$0xff] %vm214_vm0, %v3042_v40  ;;  %237 = vst.msk [vmem:[#allocation2 + $0xb0] sm:$0xff] %vm214_vm0, %v3045_v41  ;;  %v266_v42 = vld [vmem:[%s2861_s17 + $0xe1] sm:$0xff]  ;;  %v265_v43 = vld [vmem:[%s2861_s17 + $0xd9] sm:$0xff] }
  0x24   : > { %v3058_v44 = vld [vmem:[%s2861_s17 + $0x120] sm:$0xff]  ;;  %v3061_v45 = vld [vmem:[%s2861_s17 + $0x128] sm:$0xff]  ;;  %v267_v47 = vld [vmem:[%s2861_s17 + $0xf1] sm:$0xff] }
  0x25   : > { %239 = vst.msk [vmem:[#allocation2 + $0xc0] sm:$0xff] %vm214_vm0, %v3058_v44  ;;  %240 = vst.msk [vmem:[#allocation2 + $0xc8] sm:$0xff] %vm214_vm0, %v3061_v45  ;;  %v268_v46 = vld [vmem:[%s2861_s17 + $0xf9] sm:$0xff]  ;;  %v270_v50 = vld [vmem:[%s2861_s17 + $0x111] sm:$0xff] }
  0x26   : > { %333 = vrot.lane.b32.xlu1 %v2908_v10, %s2819_s18  ;;  %331 = vrot.lane.b32.xlu0 %v2911_v11, %s2819_s18  ;;  %v208_v48 = vld [vmem:[%s2861_s17 + $0x138] sm:$0xff]  ;;  %v209_v49 = vld [vmem:[%s2861_s17 + $0x140] sm:$0xff] }
  0x27   : > { %241 = vst.msk [vmem:[#allocation2 + $0xd0] sm:$0xff] %vm214_vm0, %v208_v48  ;;  %242 = vst.msk [vmem:[#allocation2 + $0xd8] sm:$0xff] %vm214_vm0, %v209_v49  ;;  %v269_v51 = vld [vmem:[%s2861_s17 + $0x109] sm:$0xff]  ;;  %v211_v53 = vld [vmem:[%s2861_s17 + $0x158] sm:$0xff] }
  0x28   : > { %v210_v52 = vld [vmem:[%s2861_s17 + $0x150] sm:$0xff]  ;;  %244 = vst.msk [vmem:[#allocation2 + $0xe8] sm:$0xff] %vm214_vm0, %v211_v53  ;;  %v271_v55 = vld [vmem:[%s2861_s17 + $0x121] sm:$0xff]  ;;  %v273_v59 = vld [vmem:[%s2861_s17 + $0x139] sm:$0xff] }
  0x29   : > { %243 = vst.msk [vmem:[#allocation2 + $0xe0] sm:$0xff] %vm214_vm0, %v210_v52  ;;  %v272_v54 = vld [vmem:[%s2861_s17 + $0x129] sm:$0xff]  ;;  %v274_v58 = vld [vmem:[%s2861_s17 + $0x141] sm:$0xff]  ;;  %v276_v60 = vld [vmem:[%s2861_s17 + $0x159] sm:$0xff] }
  0x2a   : > { %337 = vrot.lane.b32.xlu1 %v2922_v14, %s2819_s18  ;;  %335 = vrot.lane.b32.xlu0 %v2925_v15, %s2819_s18  ;;  %v212_v56 = vld [vmem:[%s2861_s17 + $0x168] sm:$0xff]  ;;  %v213_v57 = vld [vmem:[%s2861_s17 + $0x170] sm:$0xff] }
  0x2b   : > { %245 = vst.msk [vmem:[#allocation2 + $0xf0] sm:$0xff] %vm214_vm0, %v212_v56  ;;  %246 = vst.msk [vmem:[#allocation2 + $0xf8] sm:$0xff] %vm214_vm0, %v213_v57  ;;  %v275_v61 = vld [vmem:[%s2861_s17 + $0x151] sm:$0xff]  ;;  %v277_v63 = vld [vmem:[%s2861_s17 + $0x169] sm:$0xff] }
  0x2c   : > { %v278_v62 = vld [vmem:[%s2861_s17 + $0x171] sm:$0xff]  ;;  %v440_v3 = vld [vmem:[%s2861_s17 + $0x2] sm:$0xff]  ;;  %v3113_v17 = vld [vmem:[%s2861_s17 + $0x1a] sm:$0xff] }
  0x2d   : > { %v441_v1 = vld [vmem:[%s2861_s17 + $0xa] sm:$0xff]  ;;  %v3110_v13 = vld [vmem:[%s2861_s17 + $0x22] sm:$0xff]  ;;  %v3153_v49 = vld [vmem:[%s2861_s17 + $0x7a] sm:$0xff] }
  0x2e   : > { %341 = vrot.lane.b32.xlu1 %v2937_v18, %s2819_s18  ;;  %339 = vrot.lane.b32.xlu0 %v2951_v21, %s2819_s18  ;;  %v3150_v48 = vld [vmem:[%s2861_s17 + $0x82] sm:$0xff]  ;;  %v3170_v52 = vld [vmem:[%s2861_s17 + $0xb2] sm:$0xff] }
  0x2f   : > { %v3173_v53 = vld [vmem:[%s2861_s17 + $0xaa] sm:$0xff]  ;;  %v459_v56 = vld [vmem:[%s2861_s17 + $0xe2] sm:$0xff]  ;;  %v458_v57 = vld [vmem:[%s2861_s17 + $0xda] sm:$0xff] }
  0x32   : > { %345 = vrot.lane.b32.xlu1 %v264_v29, %s2819_s18  ;;  %343 = vrot.lane.b32.xlu0 %v263_v30, %s2819_s18  ;;  %v3120_v29 = vld [vmem:[%s2861_s17 + $0x3a] sm:$0xff]  ;;  %v3123_v30 = vld [vmem:[%s2861_s17 + $0x32] sm:$0xff] }
  0x36   : > { %349 = vrot.lane.b32.xlu1 %v266_v42, %s2819_s18  ;;  %347 = vrot.lane.b32.xlu0 %v265_v43, %s2819_s18  ;;  %v3130_v42 = vld [vmem:[%s2861_s17 + $0x52] sm:$0xff]  ;;  %v3133_v43 = vld [vmem:[%s2861_s17 + $0x4a] sm:$0xff] }
  0x3a   : > { %353 = vrot.lane.b32.xlu1 %v268_v46, %s2819_s18  ;;  %351 = vrot.lane.b32.xlu0 %v267_v47, %s2819_s18  ;;  %v3140_v46 = vld [vmem:[%s2861_s17 + $0x6a] sm:$0xff]  ;;  %v3143_v47 = vld [vmem:[%s2861_s17 + $0x62] sm:$0xff] }
  0x3e   : > { %357 = vrot.lane.b32.xlu1 %v270_v50, %s2819_s18  ;;  %355 = vrot.lane.b32.xlu0 %v269_v51, %s2819_s18  ;;  %v3160_v50 = vld [vmem:[%s2861_s17 + $0x9a] sm:$0xff]  ;;  %v3163_v51 = vld [vmem:[%s2861_s17 + $0x92] sm:$0xff] }
  0x42   : > { %361 = vrot.lane.b32.xlu1 %v272_v54, %s2819_s18  ;;  %359 = vrot.lane.b32.xlu0 %v271_v55, %s2819_s18  ;;  %v3180_v54 = vld [vmem:[%s2861_s17 + $0xca] sm:$0xff]  ;;  %v3183_v55 = vld [vmem:[%s2861_s17 + $0xc2] sm:$0xff] }
  0x46   : > { %365 = vrot.lane.b32.xlu1 %v274_v58, %s2819_s18  ;;  %363 = vrot.lane.b32.xlu0 %v273_v59, %s2819_s18  ;;  %v461_v58 = vld [vmem:[%s2861_s17 + $0xfa] sm:$0xff]  ;;  %v460_v59 = vld [vmem:[%s2861_s17 + $0xf2] sm:$0xff] }
  0x4a   : > { %369 = vrot.lane.b32.xlu1 %v276_v60, %s2819_s18  ;;  %367 = vrot.lane.b32.xlu0 %v275_v61, %s2819_s18  ;;  %v463_v60 = vld [vmem:[%s2861_s17 + $0x112] sm:$0xff]  ;;  %v462_v61 = vld [vmem:[%s2861_s17 + $0x10a] sm:$0xff] }
  0x4e   : > { %373 = vrot.lane.b32.xlu1 %v278_v62, %s2819_s18  ;;  %371 = vrot.lane.b32.xlu0 %v277_v63, %s2819_s18  ;;  %v465_v62 = vld [vmem:[%s2861_s17 + $0x12a] sm:$0xff]  ;;  %v464_v63 = vld [vmem:[%s2861_s17 + $0x122] sm:$0xff]  ;;  %s181_s18 = scalar_lea.vmem %s4006_s3, %s2456_s15 }
  0x52   : > { %506 = vrot.lane.b32.xlu1 %v441_v1, %s2820_s19  ;;  %504 = vrot.lane.b32.xlu0 %v440_v3, %s2820_s19  ;;  %v467_v1 = vld [vmem:[%s2861_s17 + $0x142] sm:$0xff]  ;;  %v466_v3 = vld [vmem:[%s2861_s17 + $0x13a] sm:$0xff] }
  0x56   : > { %510 = vrot.lane.b32.xlu1 %v3110_v13, %s2820_s19  ;;  %508 = vrot.lane.b32.xlu0 %v3113_v17, %s2820_s19 }
  0x5a   : > { %514 = vrot.lane.b32.xlu1 %v3120_v29, %s2820_s19  ;;  %512 = vrot.lane.b32.xlu0 %v3123_v30, %s2820_s19 }
  0x5e   : > { %518 = vrot.lane.b32.xlu1 %v3130_v42, %s2820_s19  ;;  %516 = vrot.lane.b32.xlu0 %v3133_v43, %s2820_s19 }
  0x62   : > { %522 = vrot.lane.b32.xlu1 %v3140_v46, %s2820_s19  ;;  %520 = vrot.lane.b32.xlu0 %v3143_v47, %s2820_s19 }
  0x66   : > { %526 = vrot.lane.b32.xlu1 %v3150_v48, %s2820_s19  ;;  %524 = vrot.lane.b32.xlu0 %v3153_v49, %s2820_s19 }
  0x6a   : > { %530 = vrot.lane.b32.xlu1 %v3160_v50, %s2820_s19  ;;  %528 = vrot.lane.b32.xlu0 %v3163_v51, %s2820_s19 }
  0x6e   : > { %534 = vrot.lane.b32.xlu1 %v3170_v52, %s2820_s19  ;;  %532 = vrot.lane.b32.xlu0 %v3173_v53, %s2820_s19 }
  0x72   : > { %538 = vrot.lane.b32.xlu1 %v3180_v54, %s2820_s19  ;;  %536 = vrot.lane.b32.xlu0 %v3183_v55, %s2820_s19 }
  0x76   : > { %542 = vrot.lane.b32.xlu1 %v459_v56, %s2820_s19  ;;  %540 = vrot.lane.b32.xlu0 %v458_v57, %s2820_s19 }
  0x7a   : > { %546 = vrot.lane.b32.xlu1 %v461_v58, %s2820_s19  ;;  %544 = vrot.lane.b32.xlu0 %v460_v59, %s2820_s19  ;;  %v469_v58 = vld [vmem:[%s2861_s17 + $0x15a] sm:$0xff]  ;;  %v468_v59 = vld [vmem:[%s2861_s17 + $0x152] sm:$0xff] }
  0x7e   : > { %550 = vrot.lane.b32.xlu1 %v463_v60, %s2820_s19  ;;  %548 = vrot.lane.b32.xlu0 %v462_v61, %s2820_s19 }
  0x82   : > { %554 = vrot.lane.b32.xlu1 %v465_v62, %s2820_s19  ;;  %552 = vrot.lane.b32.xlu0 %v464_v63, %s2820_s19  ;;  %v471_v62 = vld [vmem:[%s2861_s17 + $0x172] sm:$0xff]  ;;  %v470_v63 = vld [vmem:[%s2861_s17 + $0x16a] sm:$0xff] }
  0x84   : > { %v316_v56 = vpop.permute.xlu1 %315  ;;  %v312_v57 = vpop.permute.xlu0 %311 }
  0x85   : > { %410 = vst.msk [vmem:[#allocation2 + $0x10] sm:$0xff] %vm407_vm1, %v316_v56  ;;  %408 = vst.msk [vmem:[#allocation2] sm:$0xff] %vm407_vm1, %v312_v57 }
  0x86   : > { %558 = vrot.lane.b32.xlu1 %v467_v1, %s2820_s19  ;;  %556 = vrot.lane.b32.xlu0 %v466_v3, %s2820_s19 }
  0x88   : > { %v318_v60 = vpop.permute.xlu1 %317  ;;  %v314_v61 = vpop.permute.xlu0 %313 }
  0x89   : > { %411 = vst.msk [vmem:[#allocation2 + $0x18] sm:$0xff] %vm407_vm1, %v318_v60  ;;  %409 = vst.msk [vmem:[#allocation2 + $0x8] sm:$0xff] %vm407_vm1, %v314_v61 }
  0x8a   : > { %562 = vrot.lane.b32.xlu1 %v469_v58, %s2820_s19  ;;  %560 = vrot.lane.b32.xlu0 %v468_v59, %s2820_s19 }
  0x8c   : > { %v322_v56 = vpop.permute.xlu1 %321  ;;  %v320_v57 = vpop.permute.xlu0 %319 }
  0x8d   : > { %413 = vst.msk [vmem:[#allocation2 + $0x28] sm:$0xff] %vm407_vm1, %v322_v56  ;;  %412 = vst.msk [vmem:[#allocation2 + $0x20] sm:$0xff] %vm407_vm1, %v320_v57 }
  0x8e   : > { %566 = vrot.lane.b32.xlu1 %v471_v62, %s2820_s19  ;;  %564 = vrot.lane.b32.xlu0 %v470_v63, %s2820_s19 }
  0x90   : > { %v326_v1 = vpop.permute.xlu1 %325  ;;  %v324_v3 = vpop.permute.xlu0 %323 }
  0x91   : > { %415 = vst.msk [vmem:[#allocation2 + $0x38] sm:$0xff] %vm407_vm1, %v326_v1  ;;  %414 = vst.msk [vmem:[#allocation2 + $0x30] sm:$0xff] %vm407_vm1, %v324_v3 }
  0x92   : > { %700 = vrot.lane.b32.xlu1 %v2931_v16, %s2821_s20  ;;  %698 = vrot.lane.b32.xlu0 %v2918_v12, %s2821_s20 }
  0x94   : > { %v330_v58 = vpop.permute.xlu1 %329  ;;  %v328_v59 = vpop.permute.xlu0 %327 }
  0x95   : > { %417 = vst.msk [vmem:[#allocation2 + $0x48] sm:$0xff] %vm407_vm1, %v330_v58  ;;  %416 = vst.msk [vmem:[#allocation2 + $0x40] sm:$0xff] %vm407_vm1, %v328_v59 }
  0x96   : > { %704 = vrot.lane.b32.xlu1 %v2941_v19, %s2821_s20  ;;  %702 = vrot.lane.b32.xlu0 %v2944_v20, %s2821_s20 }
  0x98   : > { %v334_v60 = vpop.permute.xlu1 %333  ;;  %v332_v61 = vpop.permute.xlu0 %331 }
  0x99   : > { %419 = vst.msk [vmem:[#allocation2 + $0x58] sm:$0xff] %vm407_vm1, %v334_v60  ;;  %418 = vst.msk [vmem:[#allocation2 + $0x50] sm:$0xff] %vm407_vm1, %v332_v61  ;;  %v1826_v60 = vld [vmem:[%s4004_s1 + $0x8] sm:$0xff] }
  0x9a   : > { %708 = vrot.lane.b32.xlu1 %v2958_v22, %s2821_s20  ;;  %706 = vrot.lane.b32.xlu0 %v2963_v23, %s2821_s20 }
  0x9c   : > { %v338_v12 = vpop.permute.xlu1 %337  ;;  %v336_v16 = vpop.permute.xlu0 %335 }
  0x9d   : > { %421 = vst.msk [vmem:[#allocation2 + $0x68] sm:$0xff] %vm407_vm1, %v338_v12  ;;  %420 = vst.msk [vmem:[#allocation2 + $0x60] sm:$0xff] %vm407_vm1, %v336_v16  ;;  %v1827_v12 = vld [vmem:[%s4004_s1 + $0x10] sm:$0xff]  ;;  %v1828_v16 = vld [vmem:[%s4004_s1 + $0x18] sm:$0xff] }
  0x9e   : > { %712 = vrot.lane.b32.xlu1 %v2966_v24, %s2821_s20  ;;  %710 = vrot.lane.b32.xlu0 %v2969_v25, %s2821_s20 }
  0xa0   : > { %v342_v62 = vpop.permute.xlu1 %341  ;;  %v340_v63 = vpop.permute.xlu0 %339 }
  0xa1   : > { %423 = vst.msk [vmem:[#allocation2 + $0x78] sm:$0xff] %vm407_vm1, %v342_v62  ;;  %422 = vst.msk [vmem:[#allocation2 + $0x70] sm:$0xff] %vm407_vm1, %v340_v63 }
  0xa2   : > { %716 = vrot.lane.b32.xlu1 %v2978_v26, %s2821_s20  ;;  %714 = vrot.lane.b32.xlu0 %v2981_v27, %s2821_s20 }
  0xa4   : > { %v346_v56 = vpop.permute.xlu1 %345  ;;  %v344_v57 = vpop.permute.xlu0 %343 }
  0xa5   : > { %425 = vst.msk [vmem:[#allocation2 + $0x88] sm:$0xff] %vm407_vm1, %v346_v56  ;;  %424 = vst.msk [vmem:[#allocation2 + $0x80] sm:$0xff] %vm407_vm1, %v344_v57 }
  0xa6   : > { %891 = vrot.lane.b32.xlu1 %v2864_v0, %s2822_s21  ;;  %718 = vrot.lane.b32.xlu0 %v2995_v31, %s2821_s20  ;;  %v1825_v0 = vld [vmem:[%s4004_s1] sm:$0xff] }
  0xa7   : > { %v2780_v61 = vpack.c.bf16 %v1826_v60, %v1825_v0 }
  0xa8   : > { %v350_v1 = vpop.permute.xlu1 %349  ;;  %v348_v3 = vpop.permute.xlu0 %347 }
  0xa9   : > { %427 = vst.msk [vmem:[#allocation2 + $0x98] sm:$0xff] %vm407_vm1, %v350_v1  ;;  %426 = vst.msk [vmem:[#allocation2 + $0x90] sm:$0xff] %vm407_vm1, %v348_v3  ;;  %2781 = vmatprep.subr.bf16.mxu0 %v2780_v61  ;;  %2788 = vmatprep.subr.bf16.mxu1 %v2780_v61 }
  0xaa   : > { %1084 = vrot.lane.b32.xlu1 %v3113_v17, %s2823_s22  ;;  %893 = vrot.lane.b32.xlu0 %v2871_v2, %s2822_s21 }
  0xab   : > { %2783 = vmatpush3.bf16.msra.mxu0 %v2780_v61  ;;  %2791 = vmatpush3.bf16.msra.mxu1 %v2780_v61 }
  0xac   : > { %v354_v58 = vpop.permute.xlu1 %353  ;;  %v352_v59 = vpop.permute.xlu0 %351 }
  0xad   : > { %429 = vst.msk [vmem:[#allocation2 + $0xa8] sm:$0xff] %vm407_vm1, %v354_v58  ;;  %428 = vst.msk [vmem:[#allocation2 + $0xa0] sm:$0xff] %vm407_vm1, %v352_v59 }
  0xae   : > { %1278 = vrot.lane.b32.xlu1 %v2944_v20, %s2824_s27  ;;  %1086 = vrot.lane.b32.xlu0 %v3110_v13, %s2823_s22  ;;  %v2784_v20 = vpack.c.bf16 %v1828_v16, %v1827_v12 }
  0xb0   : > { %v358_v2 = vpop.permute.xlu1 %357  ;;  %v356_v17 = vpop.permute.xlu0 %355  ;;  %2785 = vmatprep.subr.bf16.mxu0 %v2784_v20  ;;  %2789 = vmatprep.subr.bf16.mxu1 %v2784_v20 }
  0xb1   : > { %431 = vst.msk [vmem:[#allocation2 + $0xb8] sm:$0xff] %vm407_vm1, %v358_v2  ;;  %430 = vst.msk [vmem:[#allocation2 + $0xb0] sm:$0xff] %vm407_vm1, %v356_v17  ;;  %2787 = vmatpush3.bf16.msra.mxu0 %v2784_v20  ;;  %2792 = vmatpush3.bf16.msra.mxu1 %v2784_v20 }
  0xb2   : > { %1471 = vrot.lane.b32.xlu1 %v2881_v5, %s2825_s5  ;;  %1280 = vrot.lane.b32.xlu0 %v2941_v19, %s2824_s27  ;;  %v1829_v19 = vld [vmem:[%s4004_s1 + $0x20] sm:$0xf] }
  0xb3   : > { %2730 = vmatprep.subr.msk.mxu0 %vm1927_vm2, %v1829_v19  ;;  %2790 = vmatprep.subr.msk.mxu1 %vm1927_vm2, %v1829_v19 }
  0xb4   : > { %v362_v13 = vpop.permute.xlu1 %361  ;;  %v360_v62 = vpop.permute.xlu0 %359 }
  0xb5   : > { %433 = vst.msk [vmem:[#allocation2 + $0xc8] sm:$0xff] %vm407_vm1, %v362_v13  ;;  %432 = vst.msk [vmem:[#allocation2 + $0xc0] sm:$0xff] %vm407_vm1, %v360_v62  ;;  %2731 = vmatpush3.msk.msra.mxu0 %vm1927_vm2, %v1829_v19  ;;  %2793 = vmatpush3.msk.msra.mxu1 %vm1927_vm2, %v1829_v19 }
  0xb6   : > { %1473 = vrot.lane.b32.xlu1 %v2878_v4, %s2825_s5  ;;  %895 = vrot.lane.b32.xlu0 %v2881_v5, %s2822_s21 }
  0xb8   : > { %v366_v63 = vpop.permute.xlu1 %365  ;;  %v364_v56 = vpop.permute.xlu0 %363 }
  0xb9   : > { %435 = vst.msk [vmem:[#allocation2 + $0xd8] sm:$0xff] %vm407_vm1, %v366_v63  ;;  %434 = vst.msk [vmem:[#allocation2 + $0xd0] sm:$0xff] %vm407_vm1, %v364_v56 }
  0xba   : > { %897 = vrot.lane.b32.xlu1 %v2878_v4, %s2822_s21  ;;  %1664 = vrot.lane.b32.xlu0 %v3123_v30, %s2826_s8 }
  0xbc   : > { %v370_v5 = vpop.permute.xlu1 %369  ;;  %v368_v57 = vpop.permute.xlu0 %367 }
  0xbd   : > { %437 = vst.msk [vmem:[#allocation2 + $0xe8] sm:$0xff] %vm407_vm1, %v370_v5  ;;  %436 = vst.msk [vmem:[#allocation2 + $0xe0] sm:$0xff] %vm407_vm1, %v368_v57 }
  0xbe   : > { %1666 = vrot.lane.b32.xlu1 %v3120_v29, %s2826_s8  ;;  %1088 = vrot.lane.b32.xlu0 %v3123_v30, %s2823_s22 }
  0xc0   : > { %v374_v1 = vpop.permute.xlu1 %373  ;;  %v372_v3 = vpop.permute.xlu0 %371 }
  0xc1   : > { %439 = vst.msk [vmem:[#allocation2 + $0xf8] sm:$0xff] %vm407_vm1, %v374_v1  ;;  %438 = vst.msk [vmem:[#allocation2 + $0xf0] sm:$0xff] %vm407_vm1, %v372_v3 }
  0xc2   : > { %1282 = vrot.lane.b32.xlu1 %v2963_v23, %s2824_s27  ;;  %1090 = vrot.lane.b32.xlu0 %v3120_v29, %s2823_s22 }
  0xc4   : > { %v507_v4 = vpop.permute.xlu1 %506  ;;  %v505_v58 = vpop.permute.xlu0 %504 }
  0xc5   : > { %602 = vst.msk [vmem:[#allocation2 + $0x8] sm:$0xff] %vm600_vm3, %v507_v4  ;;  %601 = vst.msk [vmem:[#allocation2] sm:$0xff] %vm600_vm3, %v505_v58 }
  0xc6   : > { %1475 = vrot.lane.b32.xlu1 %v2891_v7, %s2825_s5  ;;  %1284 = vrot.lane.b32.xlu0 %v2958_v22, %s2824_s27 }
  0xc8   : > { %v511_v30 = vpop.permute.xlu1 %510  ;;  %v509_v59 = vpop.permute.xlu0 %508 }
  0xc9   : > { %604 = vst.msk [vmem:[#allocation2 + $0x18] sm:$0xff] %vm600_vm3, %v511_v30  ;;  %603 = vst.msk [vmem:[#allocation2 + $0x10] sm:$0xff] %vm600_vm3, %v509_v59 }
  0xca   : > { %1477 = vrot.lane.b32.xlu1 %v2888_v6, %s2825_s5  ;;  %899 = vrot.lane.b32.xlu0 %v2891_v7, %s2822_s21 }
  0xcc   : > { %v515_v23 = vpop.permute.xlu1 %514  ;;  %v513_v29 = vpop.permute.xlu0 %512 }
  0xcd   : > { %606 = vst.msk [vmem:[#allocation2 + $0x28] sm:$0xff] %vm600_vm3, %v515_v23  ;;  %605 = vst.msk [vmem:[#allocation2 + $0x20] sm:$0xff] %vm600_vm3, %v513_v29 }
  0xce   : > { %901 = vrot.lane.b32.xlu1 %v2888_v6, %s2822_s21  ;;  %1668 = vrot.lane.b32.xlu0 %v3133_v43, %s2826_s8 }
  0xd0   : > { %v519_v22 = vpop.permute.xlu1 %518  ;;  %v517_v0 = vpop.permute.xlu0 %516 }
  0xd1   : > { %608 = vst.msk [vmem:[#allocation2 + $0x38] sm:$0xff] %vm600_vm3, %v519_v22  ;;  %607 = vst.msk [vmem:[#allocation2 + $0x30] sm:$0xff] %vm600_vm3, %v517_v0 }
  0xd2   : > { %1670 = vrot.lane.b32.xlu1 %v3130_v42, %s2826_s8  ;;  %1092 = vrot.lane.b32.xlu0 %v3133_v43, %s2823_s22 }
  0xd4   : > { %v523_v7 = vpop.permute.xlu1 %522  ;;  %v521_v60 = vpop.permute.xlu0 %520 }
  0xd5   : > { %610 = vst.msk [vmem:[#allocation2 + $0x48] sm:$0xff] %vm600_vm3, %v523_v7  ;;  %609 = vst.msk [vmem:[#allocation2 + $0x40] sm:$0xff] %vm600_vm3, %v521_v60 }
  0xd6   : > { %1286 = vrot.lane.b32.xlu1 %v2969_v25, %s2824_s27  ;;  %1094 = vrot.lane.b32.xlu0 %v3130_v42, %s2823_s22 }
  0xd8   : > { %v527_v6 = vpop.permute.xlu1 %526  ;;  %v525_v61 = vpop.permute.xlu0 %524 }
  0xd9   : > { %612 = vst.msk [vmem:[#allocation2 + $0x58] sm:$0xff] %vm600_vm3, %v527_v6  ;;  %611 = vst.msk [vmem:[#allocation2 + $0x50] sm:$0xff] %vm600_vm3, %v525_v61 }
  0xda   : > { %1479 = vrot.lane.b32.xlu1 %v2901_v9, %s2825_s5  ;;  %1288 = vrot.lane.b32.xlu0 %v2966_v24, %s2824_s27 }
  0xdc   : > { %v531_v43 = vpop.permute.xlu1 %530  ;;  %v529_v2 = vpop.permute.xlu0 %528 }
  0xdd   : > { %614 = vst.msk [vmem:[#allocation2 + $0x68] sm:$0xff] %vm600_vm3, %v531_v43  ;;  %613 = vst.msk [vmem:[#allocation2 + $0x60] sm:$0xff] %vm600_vm3, %v529_v2 }
  0xde   : > { %1481 = vrot.lane.b32.xlu1 %v2898_v8, %s2825_s5  ;;  %903 = vrot.lane.b32.xlu0 %v2901_v9, %s2822_s21 }
  0xe0   : > { %v535_v25 = vpop.permute.xlu1 %534  ;;  %v533_v42 = vpop.permute.xlu0 %532 }
  0xe1   : > { %616 = vst.msk [vmem:[#allocation2 + $0x78] sm:$0xff] %vm600_vm3, %v535_v25  ;;  %615 = vst.msk [vmem:[#allocation2 + $0x70] sm:$0xff] %vm600_vm3, %v533_v42 }
  0xe2   : > { %905 = vrot.lane.b32.xlu1 %v2898_v8, %s2822_s21  ;;  %1672 = vrot.lane.b32.xlu0 %v3143_v47, %s2826_s8 }
  0xe4   : > { %v539_v24 = vpop.permute.xlu1 %538  ;;  %v537_v17 = vpop.permute.xlu0 %536 }
  0xe5   : > { %618 = vst.msk [vmem:[#allocation2 + $0x88] sm:$0xff] %vm600_vm3, %v539_v24  ;;  %617 = vst.msk [vmem:[#allocation2 + $0x80] sm:$0xff] %vm600_vm3, %v537_v17 }
  0xe6   : > { %1674 = vrot.lane.b32.xlu1 %v3140_v46, %s2826_s8  ;;  %1096 = vrot.lane.b32.xlu0 %v3143_v47, %s2823_s22 }
  0xe8   : > { %v543_v9 = vpop.permute.xlu1 %542  ;;  %v541_v12 = vpop.permute.xlu0 %540 }
  0xe9   : > { %620 = vst.msk [vmem:[#allocation2 + $0x98] sm:$0xff] %vm600_vm3, %v543_v9  ;;  %619 = vst.msk [vmem:[#allocation2 + $0x90] sm:$0xff] %vm600_vm3, %v541_v12 }
  0xea   : > { %1290 = vrot.lane.b32.xlu1 %v2981_v27, %s2824_s27  ;;  %1098 = vrot.lane.b32.xlu0 %v3140_v46, %s2823_s22 }
  0xec   : > { %v547_v8 = vpop.permute.xlu1 %546  ;;  %v545_v16 = vpop.permute.xlu0 %544 }
  0xed   : > { %622 = vst.msk [vmem:[#allocation2 + $0xa8] sm:$0xff] %vm600_vm3, %v547_v8  ;;  %621 = vst.msk [vmem:[#allocation2 + $0xa0] sm:$0xff] %vm600_vm3, %v545_v16  ;;  %v2600_v8 = vld [vmem:[%s2861_s17 + $0xe1] sm:$0xff] }
  0xee   : > { %1483 = vrot.lane.b32.xlu1 %v2911_v11, %s2825_s5  ;;  %1292 = vrot.lane.b32.xlu0 %v2978_v26, %s2824_s27  ;;  %v2631_v16 = vld [vmem:[%s2861_s17 + $0xda] sm:$0xff] }
  0xf0   : > { %v551_v47 = vpop.permute.xlu1 %550  ;;  %v549_v20 = vpop.permute.xlu0 %548 }
  0xf1   : > { %624 = vst.msk [vmem:[#allocation2 + $0xb8] sm:$0xff] %vm600_vm3, %v551_v47  ;;  %623 = vst.msk [vmem:[#allocation2 + $0xb0] sm:$0xff] %vm600_vm3, %v549_v20 }
  0xf2   : > { %1485 = vrot.lane.b32.xlu1 %v2908_v10, %s2825_s5  ;;  %907 = vrot.lane.b32.xlu0 %v2911_v11, %s2822_s21 }
  0xf4   : > { %v555_v27 = vpop.permute.xlu1 %554  ;;  %v553_v46 = vpop.permute.xlu0 %552 }
  0xf5   : > { %626 = vst.msk [vmem:[#allocation2 + $0xc8] sm:$0xff] %vm600_vm3, %v555_v27  ;;  %625 = vst.msk [vmem:[#allocation2 + $0xc0] sm:$0xff] %vm600_vm3, %v553_v46 }
  0xf6   : > { %909 = vrot.lane.b32.xlu1 %v2908_v10, %s2822_s21  ;;  %1676 = vrot.lane.b32.xlu0 %v3153_v49, %s2826_s8 }
  0xf8   : > { %v559_v26 = vpop.permute.xlu1 %558  ;;  %v557_v13 = vpop.permute.xlu0 %556 }
  0xf9   : > { %628 = vst.msk [vmem:[#allocation2 + $0xd8] sm:$0xff] %vm600_vm3, %v559_v26  ;;  %627 = vst.msk [vmem:[#allocation2 + $0xd0] sm:$0xff] %vm600_vm3, %v557_v13 }
  0xfa   : > { %1678 = vrot.lane.b32.xlu1 %v3150_v48, %s2826_s8  ;;  %1100 = vrot.lane.b32.xlu0 %v3153_v49, %s2823_s22 }
  0xfc   : > { %v563_v11 = vpop.permute.xlu1 %562  ;;  %v561_v62 = vpop.permute.xlu0 %560 }
  0xfd   : > { %630 = vst.msk [vmem:[#allocation2 + $0xe8] sm:$0xff] %vm600_vm3, %v563_v11  ;;  %629 = vst.msk [vmem:[#allocation2 + $0xe0] sm:$0xff] %vm600_vm3, %v561_v62 }
  0xfe   : > { %1102 = vrot.lane.b32.xlu0 %v3150_v48, %s2823_s22  ;;  %1294 = vrot.lane.b32.xlu1 %v2995_v31, %s2824_s27 }
 0x100   : > { %v567_v10 = vpop.permute.xlu1 %566  ;;  %v565_v19 = vpop.permute.xlu0 %564 }
 0x101   : > { %632 = vst.msk [vmem:[#allocation2 + $0xf8] sm:$0xff] %vm600_vm3, %v567_v10  ;;  %631 = vst.msk [vmem:[#allocation2 + $0xf0] sm:$0xff] %vm600_vm3, %v565_v19  ;;  %v2601_v19 = vld [vmem:[%s2861_s17 + $0xf1] sm:$0xff] }
 0x102   : > { %1296 = vrot.lane.b32.xlu0 %v2984_v28, %s2824_s27  ;;  %1487 = vrot.lane.b32.xlu1 %v2925_v15, %s2825_s5 }
 0x104   : > { %v701_v49 = vpop.permute.xlu1 %700  ;;  %v699_v63 = vpop.permute.xlu0 %698 }
 0x105   : > { %796 = vst.msk [vmem:[#allocation2 + $0x8] sm:$0xff] %vm794_vm4, %v701_v49  ;;  %795 = vst.msk [vmem:[#allocation2] sm:$0xff] %vm794_vm4, %v699_v63 }
 0x106   : > { %720 = vrot.lane.b32.xlu0 %v2984_v28, %s2821_s20  ;;  %911 = vrot.lane.b32.xlu1 %v2925_v15, %s2822_s21 }
 0x108   : > { %v705_v31 = vpop.permute.xlu1 %704  ;;  %v703_v48 = vpop.permute.xlu0 %702 }
 0x109   : > { %798 = vst.msk [vmem:[#allocation2 + $0x18] sm:$0xff] %vm794_vm4, %v705_v31  ;;  %797 = vst.msk [vmem:[#allocation2 + $0x10] sm:$0xff] %vm794_vm4, %v703_v48 }
 0x10a   : > { %1489 = vrot.lane.b32.xlu0 %v2922_v14, %s2825_s5  ;;  %1680 = vrot.lane.b32.xlu1 %v3163_v51, %s2826_s8 }
 0x10c   : > { %v709_v56 = vpop.permute.xlu1 %708  ;;  %v707_v5 = vpop.permute.xlu0 %706 }
 0x10d   : > { %800 = vst.msk [vmem:[#allocation2 + $0x28] sm:$0xff] %vm794_vm4, %v709_v56  ;;  %799 = vst.msk [vmem:[#allocation2 + $0x20] sm:$0xff] %vm794_vm4, %v707_v5  ;;  %v2633_v5 = vld [vmem:[%s2861_s17 + $0xf2] sm:$0xff] }
 0x10e   : > { %913 = vrot.lane.b32.xlu0 %v2922_v14, %s2822_s21  ;;  %1104 = vrot.lane.b32.xlu1 %v3163_v51, %s2823_s22 }
 0x110   : > { %v713_v15 = vpop.permute.xlu1 %712  ;;  %v711_v28 = vpop.permute.xlu0 %710 }
 0x111   : > { %802 = vst.msk [vmem:[#allocation2 + $0x38] sm:$0xff] %vm794_vm4, %v713_v15  ;;  %801 = vst.msk [vmem:[#allocation2 + $0x30] sm:$0xff] %vm794_vm4, %v711_v28 }
 0x112   : > { %1682 = vrot.lane.b32.xlu0 %v3160_v50, %s2826_s8  ;;  %1106 = vrot.lane.b32.xlu1 %v3160_v50, %s2823_s22 }
 0x114   : > { %v717_v57 = vpop.permute.xlu1 %716  ;;  %v715_v1 = vpop.permute.xlu0 %714 }
 0x115   : > { %804 = vst.msk [vmem:[#allocation2 + $0x48] sm:$0xff] %vm794_vm4, %v717_v57  ;;  %803 = vst.msk [vmem:[#allocation2 + $0x40] sm:$0xff] %vm794_vm4, %v715_v1 }
 0x116   : > { %1298 = vrot.lane.b32.xlu0 %v3001_v33, %s2824_s27  ;;  %722 = vrot.lane.b32.xlu1 %v3001_v33, %s2821_s20 }
 0x118   : > { %v892_v14 = vpop.permute.xlu1 %891  ;;  %v719_v51 = vpop.permute.xlu0 %718 }
 0x119   : > { %988 = vst.msk [vmem:[#allocation2] sm:$0xff] %vm987_vm5, %v892_v14 }
 0x11a   : > { %805 = vst.msk [vmem:[#allocation2 + $0x50] sm:$0xff] %vm794_vm4, %v719_v51  ;;  %1300 = vrot.lane.b32.xlu0 %v2998_v32, %s2824_s27  ;;  %1491 = vrot.lane.b32.xlu1 %v2951_v21, %s2825_s5 }
 0x11c   : > { %v1085_v50 = vpop.permute.xlu1 %1084  ;;  %v894_v3 = vpop.permute.xlu0 %893 }
 0x11d   : > { %1181 = vst.msk [vmem:[#allocation2] sm:$0xff] %vm1180_vm6, %v1085_v50 }
 0x11e   : > { %989 = vst.msk [vmem:[#allocation2 + $0x8] sm:$0xff] %vm987_vm5, %v894_v3  ;;  %724 = vrot.lane.b32.xlu0 %v2998_v32, %s2821_s20  ;;  %915 = vrot.lane.b32.xlu1 %v2951_v21, %s2822_s21 }
 0x120   : > { %v1279_v33 = vpop.permute.xlu1 %1278  ;;  %v1087_v4 = vpop.permute.xlu0 %1086 }
 0x121   : > { %1375 = vst.msk [vmem:[#allocation2] sm:$0xff] %vm1374_vm7, %v1279_v33 }
 0x122   : > { %1182 = vst.msk [vmem:[#allocation2 + $0x8] sm:$0xff] %vm1180_vm6, %v1087_v4  ;;  %1493 = vrot.lane.b32.xlu0 %v2937_v18, %s2825_s5  ;;  %1684 = vrot.lane.b32.xlu1 %v3173_v53, %s2826_s8 }
 0x124   : > { %v1472_v58 = vpop.permute.xlu1 %1471  ;;  %v1281_v30 = vpop.permute.xlu0 %1280 }
 0x125   : > { %1568 = vst.msk [vmem:[#allocation2] sm:$0xff] %vm1567_vm8, %v1472_v58  ;;  %v2603_v58 = vld [vmem:[%s2861_s17 + $0x109] sm:$0xff] }
 0x126   : > { %1376 = vst.msk [vmem:[#allocation2 + $0x8] sm:$0xff] %vm1374_vm7, %v1281_v30  ;;  %917 = vrot.lane.b32.xlu0 %v2937_v18, %s2822_s21  ;;  %1108 = vrot.lane.b32.xlu1 %v3173_v53, %s2823_s22  ;;  %v2597_v18 = vld [vmem:[%s2861_s17 + $0xc1] sm:$0xff] }
 0x128   : > { %v1474_v21 = vpop.permute.xlu1 %1473  ;;  %v896_v32 = vpop.permute.xlu0 %895 }
 0x129   : > { %1569 = vst.msk [vmem:[#allocation2 + $0x8] sm:$0xff] %vm1567_vm8, %v1474_v21 }
 0x12a   : > { %990 = vst.msk [vmem:[#allocation2 + $0x10] sm:$0xff] %vm987_vm5, %v896_v32  ;;  %1686 = vrot.lane.b32.xlu0 %v3170_v52, %s2826_s8  ;;  %1110 = vrot.lane.b32.xlu1 %v3170_v52, %s2823_s22 }
 0x12c   : > { %v898_v59 = vpop.permute.xlu1 %897  ;;  %v1665_v23 = vpop.permute.xlu0 %1664 }
 0x12d   : > { %991 = vst.msk [vmem:[#allocation2 + $0x18] sm:$0xff] %vm987_vm5, %v898_v59 }
 0x12e   : > { %1761 = vst.msk [vmem:[#allocation2] sm:$0xff] %vm1760_vm9, %v1665_v23  ;;  %1302 = vrot.lane.b32.xlu0 %v3017_v35, %s2824_s27  ;;  %726 = vrot.lane.b32.xlu1 %v3017_v35, %s2821_s20  ;;  %v2598_v35 = vld [vmem:[%s2861_s17 + $0xc9] sm:$0xff] }
 0x12f   : > { %v2635_v23 = vld [vmem:[%s2861_s17 + $0x10a] sm:$0xff] }
 0x130   : > { %v1667_v53 = vpop.permute.xlu1 %1666  ;;  %v1089_v29 = vpop.permute.xlu0 %1088 }
 0x131   : > { %1762 = vst.msk [vmem:[#allocation2 + $0x8] sm:$0xff] %vm1760_vm9, %v1667_v53 }
 0x132   : > { %1183 = vst.msk [vmem:[#allocation2 + $0x10] sm:$0xff] %vm1180_vm6, %v1089_v29  ;;  %1304 = vrot.lane.b32.xlu0 %v3014_v34, %s2824_s27  ;;  %1495 = vrot.lane.b32.xlu1 %v2597_v18, %s2825_s5 }
 0x134   : > { %v1283_v52 = vpop.permute.xlu1 %1282  ;;  %v1091_v22 = vpop.permute.xlu0 %1090 }
 0x135   : > { %v1793_v0 = vld [vmem:[#allocation2] sm:$0xff]  ;;  %1377 = vst.msk [vmem:[#allocation2 + $0x10] sm:$0xff] %vm1374_vm7, %v1283_v52 }
 0x136   : > { %1184 = vst.msk [vmem:[#allocation2 + $0x18] sm:$0xff] %vm1180_vm6, %v1091_v22  ;;  %2732 = vmatprep.mubr.msk.f32.mxu0 %vm1830_vm10, %v1793_v0  ;;  %728 = vrot.lane.b32.xlu0 %v3014_v34, %s2821_s20 }
 0x137   : > { %919 = vrot.lane.b32.xlu1 %v2597_v18, %s2822_s21 }
 0x138   : > { %v1476_v7 = vpop.permute.xlu1 %1475  ;;  %v1285_v60 = vpop.permute.xlu0 %1284  ;;  %v1794_v6 = vld [vmem:[#allocation2 + $0x8] sm:$0xff] }
 0x139   : > { %1570 = vst.msk [vmem:[#allocation2 + $0x10] sm:$0xff] %vm1567_vm8, %v1476_v7  ;;  %2733 = vmatmul.mubr.msk.f32.vlgmr.msra.gmra.mrb[0].mxu0 %vm1830_vm10, %v1794_v6 }
 0x13a   : > { %1378 = vst.msk [vmem:[#allocation2 + $0x18] sm:$0xff] %vm1374_vm7, %v1285_v60  ;;  %1497 = vrot.lane.b32.xlu0 %v2598_v35, %s2825_s5 }
 0x13b   : > { %1688 = vrot.lane.b32.xlu1 %v3183_v55, %s2826_s8 }
 0x13c   : > { %v1478_v61 = vpop.permute.xlu1 %1477  ;;  %v900_v43 = vpop.permute.xlu0 %899 }
 0x13d   : > { %1571 = vst.msk [vmem:[#allocation2 + $0x18] sm:$0xff] %vm1567_vm8, %v1478_v61  ;;  %v2605_v61 = vld [vmem:[%s2861_s17 + $0x121] sm:$0xff] }
 0x13e   : > { %992 = vst.msk [vmem:[#allocation2 + $0x20] sm:$0xff] %vm987_vm5, %v900_v43  ;;  %921 = vrot.lane.b32.xlu0 %v2598_v35, %s2822_s21 }
 0x13f   : > { %1112 = vrot.lane.b32.xlu1 %v3183_v55, %s2823_s22  ;;  %v2599_v55 = vld [vmem:[%s2861_s17 + $0xd9] sm:$0xff] }
 0x140   : > { %v902_v34 = vpop.permute.xlu1 %901  ;;  %v1669_v2 = vpop.permute.xlu0 %1668 }
 0x141   : > { %993 = vst.msk [vmem:[#allocation2 + $0x28] sm:$0xff] %vm987_vm5, %v902_v34 }
 0x142   : > { %1763 = vst.msk [vmem:[#allocation2 + $0x10] sm:$0xff] %vm1760_vm9, %v1669_v2  ;;  %1690 = vrot.lane.b32.xlu0 %v3180_v54, %s2826_s8 }
 0x143   : > { %1114 = vrot.lane.b32.xlu1 %v3180_v54, %s2823_s22 }
 0x144   : > { %v1671_v25 = vpop.permute.xlu1 %1670  ;;  %v1093_v42 = vpop.permute.xlu0 %1092 }
 0x145   : > { %1764 = vst.msk [vmem:[#allocation2 + $0x18] sm:$0xff] %vm1760_vm9, %v1671_v25 }
 0x146   : > { %1185 = vst.msk [vmem:[#allocation2 + $0x20] sm:$0xff] %vm1180_vm6, %v1093_v42  ;;  %1306 = vrot.lane.b32.xlu0 %v3027_v37, %s2824_s27  ;;  %v2637_v42 = vld [vmem:[%s2861_s17 + $0x122] sm:$0xff] }
 0x147   : > { %730 = vrot.lane.b32.xlu1 %v3027_v37, %s2821_s20 }
 0x148   : > { %v1287_v24 = vpop.permute.xlu1 %1286  ;;  %v1095_v17 = vpop.permute.xlu0 %1094 }
 0x149   : > { %v1795_v9 = vld [vmem:[#allocation2 + $0x10] sm:$0xff]  ;;  %1379 = vst.msk [vmem:[#allocation2 + $0x20] sm:$0xff] %vm1374_vm7, %v1287_v24 }
 0x14a   : > { %1186 = vst.msk [vmem:[#allocation2 + $0x28] sm:$0xff] %vm1180_vm6, %v1095_v17  ;;  %2735 = vmatprep.mubr.msk.f32.mxu0 %vm1830_vm10, %v1795_v9  ;;  %1308 = vrot.lane.b32.xlu0 %v3024_v36, %s2824_s27 }
 0x14b   : > { %1499 = vrot.lane.b32.xlu1 %v2599_v55, %s2825_s5 }
 0x14c   : > { %v1480_v54 = vpop.permute.xlu1 %1479  ;;  %v1289_v12 = vpop.permute.xlu0 %1288  ;;  %v1796_v37 = vld [vmem:[#allocation2 + $0x18] sm:$0xff] }
 0x14d   : > { %1572 = vst.msk [vmem:[#allocation2 + $0x20] sm:$0xff] %vm1567_vm8, %v1480_v54  ;;  %2736 = vmatmul.mubr.msk.f32.gmra.mrb[2].mxu0 %vm1830_vm10, %v1796_v37 }
 0x14e   : > { %1380 = vst.msk [vmem:[#allocation2 + $0x28] sm:$0xff] %vm1374_vm7, %v1289_v12  ;;  %732 = vrot.lane.b32.xlu0 %v3024_v36, %s2821_s20  ;;  %v2632_v36 = vld [vmem:[%s2861_s17 + $0xe2] sm:$0xff] }
 0x14f   : > { %923 = vrot.lane.b32.xlu1 %v2599_v55, %s2822_s21 }
 0x150   : > { %v1482_v47 = vpop.permute.xlu1 %1481  ;;  %v904_v20 = vpop.permute.xlu0 %903 }
 0x151   : > { %1573 = vst.msk [vmem:[#allocation2 + $0x28] sm:$0xff] %vm1567_vm8, %v1482_v47 }
 0x152   : > { %994 = vst.msk [vmem:[#allocation2 + $0x30] sm:$0xff] %vm987_vm5, %v904_v20  ;;  %1501 = vrot.lane.b32.xlu0 %v2600_v8, %s2825_s5 }
 0x153   : > { %1692 = vrot.lane.b32.xlu1 %v2631_v16, %s2826_s8 }
 0x154   : > { %v906_v27 = vpop.permute.xlu1 %905  ;;  %v1673_v46 = vpop.permute.xlu0 %1672 }
 0x155   : > { %995 = vst.msk [vmem:[#allocation2 + $0x38] sm:$0xff] %vm987_vm5, %v906_v27  ;;  %v2576_v27 = vld [vmem:[%s2861_s17 + $0x140] sm:$0xff] }
 0x156   : > { %1765 = vst.msk [vmem:[#allocation2 + $0x20] sm:$0xff] %vm1760_vm9, %v1673_v46  ;;  %925 = vrot.lane.b32.xlu0 %v2600_v8, %s2822_s21  ;;  %v2575_v8 = vld [vmem:[%s2861_s17 + $0x138] sm:$0xff] }
 0x157   : > { %1116 = vrot.lane.b32.xlu1 %v2631_v16, %s2823_s22  ;;  %v2607_v46 = vld [vmem:[%s2861_s17 + $0x139] sm:$0xff] }
 0x158   : > { %v1675_v26 = vpop.permute.xlu1 %1674  ;;  %v1097_v13 = vpop.permute.xlu0 %1096 }
 0x159   : > { %1766 = vst.msk [vmem:[#allocation2 + $0x28] sm:$0xff] %vm1760_vm9, %v1675_v26 }
 0x15a   : > { %1187 = vst.msk [vmem:[#allocation2 + $0x30] sm:$0xff] %vm1180_vm6, %v1097_v13  ;;  %1694 = vrot.lane.b32.xlu0 %v2632_v36, %s2826_s8 }
 0x15b   : > { %1118 = vrot.lane.b32.xlu1 %v2632_v36, %s2823_s22 }
 0x15c   : > { %v1291_v11 = vpop.permute.xlu1 %1290  ;;  %v1099_v62 = vpop.permute.xlu0 %1098 }
 0x15d   : > { %v1797_v10 = vld [vmem:[#allocation2 + $0x20] sm:$0xff]  ;;  %1381 = vst.msk [vmem:[#allocation2 + $0x30] sm:$0xff] %vm1374_vm7, %v1291_v11 }
 0x15e   : > { %1188 = vst.msk [vmem:[#allocation2 + $0x38] sm:$0xff] %vm1180_vm6, %v1099_v62  ;;  %2738 = vmatprep.mubr.msk.f32.mxu0 %vm1830_vm10, %v1797_v10  ;;  %1310 = vrot.lane.b32.xlu0 %v3039_v39, %s2824_s27  ;;  %v2608_v62 = vld [vmem:[%s2861_s17 + $0x141] sm:$0xff] }
 0x15f   : > { %734 = vrot.lane.b32.xlu1 %v3039_v39, %s2821_s20  ;;  %v2602_v39 = vld [vmem:[%s2861_s17 + $0xf9] sm:$0xff] }
 0x160   : > { %v1484_v49 = vpop.permute.xlu1 %1483  ;;  %v1293_v63 = vpop.permute.xlu0 %1292  ;;  %v1798_v31 = vld [vmem:[#allocation2 + $0x28] sm:$0xff]  ;;  %v2639_v10 = vld [vmem:[%s2861_s17 + $0x13a] sm:$0xff] }
 0x161   : > { %1574 = vst.msk [vmem:[#allocation2 + $0x30] sm:$0xff] %vm1567_vm8, %v1484_v49  ;;  %2739 = vmatmul.mubr.msk.f32.gmra.mrb[4].mxu0 %vm1830_vm10, %v1798_v31 }
 0x162   : > { %1382 = vst.msk [vmem:[#allocation2 + $0x38] sm:$0xff] %vm1374_vm7, %v1293_v63  ;;  %1312 = vrot.lane.b32.xlu0 %v3030_v38, %s2824_s27 }
 0x163   : > { %1503 = vrot.lane.b32.xlu1 %v2601_v19, %s2825_s5 }
 0x164   : > { %v1486_v48 = vpop.permute.xlu1 %1485  ;;  %v908_v56 = vpop.permute.xlu0 %907 }
 0x165   : > { %1575 = vst.msk [vmem:[#allocation2 + $0x38] sm:$0xff] %vm1567_vm8, %v1486_v48 }
 0x166   : > { %996 = vst.msk [vmem:[#allocation2 + $0x40] sm:$0xff] %vm987_vm5, %v908_v56  ;;  %736 = vrot.lane.b32.xlu0 %v3030_v38, %s2821_s20  ;;  %v2634_v38 = vld [vmem:[%s2861_s17 + $0xfa] sm:$0xff]  ;;  %v2640_v56 = vld [vmem:[%s2861_s17 + $0x142] sm:$0xff] }
 0x167   : > { %927 = vrot.lane.b32.xlu1 %v2601_v19, %s2822_s21 }
 0x168   : > { %v910_v15 = vpop.permute.xlu1 %909  ;;  %v1677_v28 = vpop.permute.xlu0 %1676 }
 0x169   : > { %997 = vst.msk [vmem:[#allocation2 + $0x48] sm:$0xff] %vm987_vm5, %v910_v15  ;;  %v2577_v15 = vld [vmem:[%s2861_s17 + $0x150] sm:$0xff] }
 0x16a   : > { %1767 = vst.msk [vmem:[#allocation2 + $0x30] sm:$0xff] %vm1760_vm9, %v1677_v28  ;;  %1505 = vrot.lane.b32.xlu0 %v2602_v39, %s2825_s5 }
 0x16b   : > { %1696 = vrot.lane.b32.xlu1 %v2633_v5, %s2826_s8 }
 0x16c   : > { %v1679_v57 = vpop.permute.xlu1 %1678  ;;  %v1101_v1 = vpop.permute.xlu0 %1100 }
 0x16d   : > { %1768 = vst.msk [vmem:[#allocation2 + $0x38] sm:$0xff] %vm1760_vm9, %v1679_v57 }
 0x16e   : > { %1189 = vst.msk [vmem:[#allocation2 + $0x40] sm:$0xff] %vm1180_vm6, %v1101_v1  ;;  %929 = vrot.lane.b32.xlu0 %v2602_v39, %s2822_s21 }
 0x16f   : > { %1120 = vrot.lane.b32.xlu1 %v2633_v5, %s2823_s22 }
 0x170   : > { %v1103_v14 = vpop.permute.xlu0 %1102  ;;  %v1295_v51 = vpop.permute.xlu1 %1294 }
 0x171   : > { %v1799_v50 = vld [vmem:[#allocation2 + $0x30] sm:$0xff]  ;;  %1190 = vst.msk [vmem:[#allocation2 + $0x48] sm:$0xff] %vm1180_vm6, %v1103_v14 }
 0x172   : > { %1383 = vst.msk [vmem:[#allocation2 + $0x40] sm:$0xff] %vm1374_vm7, %v1295_v51  ;;  %2741 = vmatprep.mubr.msk.f32.mxu0 %vm1830_vm10, %v1799_v50  ;;  %1698 = vrot.lane.b32.xlu0 %v2634_v38, %s2826_s8  ;;  %v2609_v14 = vld [vmem:[%s2861_s17 + $0x151] sm:$0xff] }
 0x173   : > { %1122 = vrot.lane.b32.xlu1 %v2634_v38, %s2823_s22  ;;  %v2578_v38 = vld [vmem:[%s2861_s17 + $0x158] sm:$0xff] }
 0x174   : > { %v1297_v3 = vpop.permute.xlu0 %1296  ;;  %v1488_v33 = vpop.permute.xlu1 %1487  ;;  %v1800_v4 = vld [vmem:[#allocation2 + $0x38] sm:$0xff] }
 0x175   : > { %1384 = vst.msk [vmem:[#allocation2 + $0x48] sm:$0xff] %vm1374_vm7, %v1297_v3  ;;  %2742 = vmatmul.mubr.msk.f32.gmra.mrb[6].mxu0 %vm1830_vm10, %v1800_v4  ;;  %v2610_v4 = vld [vmem:[%s2861_s17 + $0x159] sm:$0xff] }
 0x176   : > { %1576 = vst.msk [vmem:[#allocation2 + $0x40] sm:$0xff] %vm1567_vm8, %v1488_v33  ;;  %1314 = vrot.lane.b32.xlu0 %v3045_v41, %s2824_s27 }
 0x177   : > { %738 = vrot.lane.b32.xlu1 %v3045_v41, %s2821_s20  ;;  %v2604_v41 = vld [vmem:[%s2861_s17 + $0x111] sm:$0xff] }
 0x178   : > { %v721_v30 = vpop.permute.xlu0 %720  ;;  %v912_v21 = vpop.permute.xlu1 %911 }
 0x179   : > { %806 = vst.msk [vmem:[#allocation2 + $0x58] sm:$0xff] %vm794_vm4, %v721_v30 }
 0x17a   : > { %998 = vst.msk [vmem:[#allocation2 + $0x50] sm:$0xff] %vm987_vm5, %v912_v21  ;;  %1316 = vrot.lane.b32.xlu0 %v3042_v40, %s2824_s27 }
 0x17b   : > { %1507 = vrot.lane.b32.xlu1 %v2603_v58, %s2825_s5 }
 0x17c   : > { %v1490_v32 = vpop.permute.xlu0 %1489  ;;  %v1681_v59 = vpop.permute.xlu1 %1680 }
 0x17d   : > { %1577 = vst.msk [vmem:[#allocation2 + $0x48] sm:$0xff] %vm1567_vm8, %v1490_v32 }
 0x17e   : > { %1769 = vst.msk [vmem:[#allocation2 + $0x40] sm:$0xff] %vm1760_vm9, %v1681_v59  ;;  %740 = vrot.lane.b32.xlu0 %v3042_v40, %s2821_s20  ;;  %v2636_v40 = vld [vmem:[%s2861_s17 + $0x112] sm:$0xff] }
 0x17f   : > { %931 = vrot.lane.b32.xlu1 %v2603_v58, %s2822_s21  ;;  %v2641_v58 = vld [vmem:[%s2861_s17 + $0x152] sm:$0xff] }
 0x180   : > { %v914_v18 = vpop.permute.xlu0 %913  ;;  %v1105_v53 = vpop.permute.xlu1 %1104 }
 0x181   : > { %999 = vst.msk [vmem:[#allocation2 + $0x58] sm:$0xff] %vm987_vm5, %v914_v18 }
 0x182   : > { %1191 = vst.msk [vmem:[#allocation2 + $0x50] sm:$0xff] %vm1180_vm6, %v1105_v53  ;;  %1509 = vrot.lane.b32.xlu0 %v2604_v41, %s2825_s5 }
 0x183   : > { %1700 = vrot.lane.b32.xlu1 %v2635_v23, %s2826_s8 }
 0x184   : > { %v1683_v29 = vpop.permute.xlu0 %1682  ;;  %v1107_v52 = vpop.permute.xlu1 %1106 }
 0x185   : > { %v1801_v22 = vld [vmem:[#allocation2 + $0x40] sm:$0xff]  ;;  %1770 = vst.msk [vmem:[#allocation2 + $0x48] sm:$0xff] %vm1760_vm9, %v1683_v29  ;;  %v2579_v29 = vld [vmem:[%s2861_s17 + $0x168] sm:$0xff] }
 0x186   : > { %1192 = vst.msk [vmem:[#allocation2 + $0x58] sm:$0xff] %vm1180_vm6, %v1107_v52  ;;  %2744 = vmatprep.mubr.msk.f32.mxu0 %vm1830_vm10, %v1801_v22  ;;  %933 = vrot.lane.b32.xlu0 %v2604_v41, %s2822_s21 }
 0x187   : > { %1124 = vrot.lane.b32.xlu1 %v2635_v23, %s2823_s22  ;;  %v2642_v23 = vld [vmem:[%s2861_s17 + $0x15a] sm:$0xff] }
 0x188   : > { %v1299_v0 = vpop.permute.xlu0 %1298  ;;  %v723_v35 = vpop.permute.xlu1 %722 }
 0x189   : > { %1385 = vst.msk [vmem:[#allocation2 + $0x50] sm:$0xff] %vm1374_vm7, %v1299_v0  ;;  %v2580_v0 = vld [vmem:[%s2861_s17 + $0x170] sm:$0xff] }
 0x18a   : > { %807 = vst.msk [vmem:[#allocation2 + $0x60] sm:$0xff] %vm794_vm4, %v723_v35  ;;  %1702 = vrot.lane.b32.xlu0 %v2636_v40, %s2826_s8  ;;  %v2611_v35 = vld [vmem:[%s2861_s17 + $0x169] sm:$0xff] }
 0x18b   : > { %1126 = vrot.lane.b32.xlu1 %v2636_v40, %s2823_s22 }
 0x18c   : > { %v1301_v7 = vpop.permute.xlu0 %1300  ;;  %v1492_v60 = vpop.permute.xlu1 %1491  ;;  %v1802_v6 = vld [vmem:[#allocation2 + $0x48] sm:$0xff] }
 0x18d   : > { %1386 = vst.msk [vmem:[#allocation2 + $0x58] sm:$0xff] %vm1374_vm7, %v1301_v7  ;;  %2745 = vmatmul.mubr.msk.f32.gmra.mrb[8].mxu0 %vm1830_vm10, %v1802_v6 }
 0x18e   : > { %1578 = vst.msk [vmem:[#allocation2 + $0x50] sm:$0xff] %vm1567_vm8, %v1492_v60  ;;  %1318 = vrot.lane.b32.xlu0 %v3058_v44, %s2824_s27 }
 0x18f   : > { %742 = vrot.lane.b32.xlu1 %v3058_v44, %s2821_s20  ;;  %v2606_v44 = vld [vmem:[%s2861_s17 + $0x129] sm:$0xff] }
 0x190   : > { %v725_v43 = vpop.permute.xlu0 %724  ;;  %v916_v34 = vpop.permute.xlu1 %915 }
 0x191   : > { %808 = vst.msk [vmem:[#allocation2 + $0x68] sm:$0xff] %vm794_vm4, %v725_v43  ;;  %v2612_v43 = vld [vmem:[%s2861_s17 + $0x171] sm:$0xff] }
 0x192   : > { %1000 = vst.msk [vmem:[#allocation2 + $0x60] sm:$0xff] %vm987_vm5, %v916_v34  ;;  %1320 = vrot.lane.b32.xlu0 %v3061_v45, %s2824_s27  ;;  %v2643_v34 = vld [vmem:[%s2861_s17 + $0x16a] sm:$0xff] }
 0x193   : > { %1511 = vrot.lane.b32.xlu1 %v2605_v61, %s2825_s5 }
 0x194   : > { %v1494_v2 = vpop.permute.xlu0 %1493  ;;  %v1685_v25 = vpop.permute.xlu1 %1684 }
 0x195   : > { %1579 = vst.msk [vmem:[#allocation2 + $0x58] sm:$0xff] %vm1567_vm8, %v1494_v2 }
 0x196   : > { %1771 = vst.msk [vmem:[#allocation2 + $0x50] sm:$0xff] %vm1760_vm9, %v1685_v25  ;;  %744 = vrot.lane.b32.xlu0 %v3061_v45, %s2821_s20  ;;  %v2638_v45 = vld [vmem:[%s2861_s17 + $0x12a] sm:$0xff] }
 0x197   : > { %935 = vrot.lane.b32.xlu1 %v2605_v61, %s2822_s21 }
 0x198   : > { %v918_v55 = vpop.permute.xlu0 %917  ;;  %v1109_v24 = vpop.permute.xlu1 %1108 }
 0x199   : > { %1001 = vst.msk [vmem:[#allocation2 + $0x68] sm:$0xff] %vm987_vm5, %v918_v55 }
 0x19a   : > { %1193 = vst.msk [vmem:[#allocation2 + $0x60] sm:$0xff] %vm1180_vm6, %v1109_v24  ;;  %1513 = vrot.lane.b32.xlu0 %v2606_v44, %s2825_s5  ;;  %v2644_v24 = vld [vmem:[%s2861_s17 + $0x172] sm:$0xff] }
 0x19b   : > { %1704 = vrot.lane.b32.xlu1 %v2637_v42, %s2826_s8 }
 0x19c   : > { %v1687_v17 = vpop.permute.xlu0 %1686  ;;  %v1111_v9 = vpop.permute.xlu1 %1110 }
 0x19d   : > { %v1803_v54 = vld [vmem:[#allocation2 + $0x50] sm:$0xff]  ;;  %1772 = vst.msk [vmem:[#allocation2 + $0x58] sm:$0xff] %vm1760_vm9, %v1687_v17 }
 0x19e   : > { %1194 = vst.msk [vmem:[#allocation2 + $0x68] sm:$0xff] %vm1180_vm6, %v1111_v9  ;;  %2747 = vmatprep.mubr.msk.f32.mxu0 %vm1830_vm10, %v1803_v54  ;;  %937 = vrot.lane.b32.xlu0 %v2606_v44, %s2822_s21  ;;  %v2581_v54 = vld [vmem:[%s2861_s17 + $0x180] sm:$0xff] }
 0x19f   : > { %1128 = vrot.lane.b32.xlu1 %v2637_v42, %s2823_s22 }
 0x1a0   : > { %v1303_v12 = vpop.permute.xlu0 %1302  ;;  %v727_v37 = vpop.permute.xlu1 %726 }
 0x1a1   : > { %1387 = vst.msk [vmem:[#allocation2 + $0x60] sm:$0xff] %vm1374_vm7, %v1303_v12 }
 0x1a2   : > { %809 = vst.msk [vmem:[#allocation2 + $0x70] sm:$0xff] %vm794_vm4, %v727_v37  ;;  %1706 = vrot.lane.b32.xlu0 %v2638_v45, %s2826_s8 }
 0x1a3   : > { %1130 = vrot.lane.b32.xlu1 %v2638_v45, %s2823_s22 }
 0x1a4   : > { %v1305_v16 = vpop.permute.xlu0 %1304  ;;  %v1496_v47 = vpop.permute.xlu1 %1495  ;;  %v1804_v20 = vld [vmem:[#allocation2 + $0x58] sm:$0xff] }
 0x1a5   : > { %1388 = vst.msk [vmem:[#allocation2 + $0x68] sm:$0xff] %vm1374_vm7, %v1305_v16  ;;  %2748 = vmatmul.mubr.msk.f32.gmra.mrb[10].mxu0 %vm1830_vm10, %v1804_v20  ;;  %v2613_v16 = vld [vmem:[%s2861_s17 + $0x181] sm:$0xff] }
 0x1a6   : > { %1580 = vst.msk [vmem:[#allocation2 + $0x60] sm:$0xff] %vm1567_vm8, %v1496_v47  ;;  %1322 = vrot.lane.b32.xlu0 %v2575_v8, %s2824_s27 }
 0x1a7   : > { %746 = vrot.lane.b32.xlu1 %v2575_v8, %s2821_s20  ;;  %v2582_v8 = vld [vmem:[%s2861_s17 + $0x188] sm:$0xff] }
 0x1a8   : > { %v729_v36 = vpop.permute.xlu0 %728 }
 0x1a9   : > { %v920_v26 = vpop.permute.xlu1 %919  ;;  %810 = vst.msk [vmem:[#allocation2 + $0x78] sm:$0xff] %vm794_vm4, %v729_v36  ;;  %v2614_v36 = vld [vmem:[%s2861_s17 + $0x189] sm:$0xff] }
 0x1aa   : > { %1002 = vst.msk [vmem:[#allocation2 + $0x70] sm:$0xff] %vm987_vm5, %v920_v26  ;;  %1324 = vrot.lane.b32.xlu0 %v2576_v27, %s2824_s27  ;;  %v2645_v26 = vld [vmem:[%s2861_s17 + $0x182] sm:$0xff] }
 0x1ab   : > { %1515 = vrot.lane.b32.xlu1 %v2607_v46, %s2825_s5 }
 0x1ac   : > { %v1498_v13 = vpop.permute.xlu0 %1497 }
 0x1ad   : > { %v1689_v11 = vpop.permute.xlu1 %1688  ;;  %1581 = vst.msk [vmem:[#allocation2 + $0x68] sm:$0xff] %vm1567_vm8, %v1498_v13 }
 0x1ae   : > { %1773 = vst.msk [vmem:[#allocation2 + $0x60] sm:$0xff] %vm1760_vm9, %v1689_v11  ;;  %748 = vrot.lane.b32.xlu0 %v2576_v27, %s2821_s20 }
 0x1af   : > { %939 = vrot.lane.b32.xlu1 %v2607_v46, %s2822_s21 }
 0x1b0   : > { %v922_v19 = vpop.permute.xlu0 %921 }
 0x1b1   : > { %v1113_v49 = vpop.permute.xlu1 %1112  ;;  %1003 = vst.msk [vmem:[#allocation2 + $0x78] sm:$0xff] %vm987_vm5, %v922_v19 }
 0x1b2   : > { %1195 = vst.msk [vmem:[#allocation2 + $0x70] sm:$0xff] %vm1180_vm6, %v1113_v49  ;;  %1517 = vrot.lane.b32.xlu0 %v2608_v62, %s2825_s5  ;;  %v2646_v49 = vld [vmem:[%s2861_s17 + $0x18a] sm:$0xff] }
 0x1b3   : > { %1708 = vrot.lane.b32.xlu1 %v2639_v10, %s2826_s8 }
 0x1b4   : > { %v1691_v63 = vpop.permute.xlu0 %1690 }
 0x1b5   : > { %v1115_v31 = vpop.permute.xlu1 %1114  ;;  %v1805_v48 = vld [vmem:[#allocation2 + $0x60] sm:$0xff]  ;;  %1774 = vst.msk [vmem:[#allocation2 + $0x68] sm:$0xff] %vm1760_vm9, %v1691_v63 }
 0x1b6   : > { %1196 = vst.msk [vmem:[#allocation2 + $0x78] sm:$0xff] %vm1180_vm6, %v1115_v31  ;;  %2750 = vmatprep.mubr.msk.f32.mxu0 %vm1830_vm10, %v1805_v48  ;;  %941 = vrot.lane.b32.xlu0 %v2608_v62, %s2822_s21  ;;  %v2583_v48 = vld [vmem:[%s2861_s17 + $0x198] sm:$0xff] }
 0x1b7   : > { %1132 = vrot.lane.b32.xlu1 %v2639_v10, %s2823_s22 }
 0x1b8   : > { %v1307_v39 = vpop.permute.xlu0 %1306 }
 0x1b9   : > { %v731_v5 = vpop.permute.xlu1 %730  ;;  %1389 = vst.msk [vmem:[#allocation2 + $0x70] sm:$0xff] %vm1374_vm7, %v1307_v39 }
 0x1ba   : > { %811 = vst.msk [vmem:[#allocation2 + $0x80] sm:$0xff] %vm794_vm4, %v731_v5  ;;  %1710 = vrot.lane.b32.xlu0 %v2640_v56, %s2826_s8 }
 0x1bb   : > { %1134 = vrot.lane.b32.xlu1 %v2640_v56, %s2823_s22  ;;  %v2584_v56 = vld [vmem:[%s2861_s17 + $0x1a0] sm:$0xff] }
 0x1bc   : > { %v1309_v28 = vpop.permute.xlu0 %1308  ;;  %v1806_v1 = vld [vmem:[#allocation2 + $0x68] sm:$0xff] }
 0x1bd   : > { %v1500_v57 = vpop.permute.xlu1 %1499  ;;  %1390 = vst.msk [vmem:[#allocation2 + $0x78] sm:$0xff] %vm1374_vm7, %v1309_v28  ;;  %2751 = vmatmul.mubr.msk.f32.gmra.mrb[12].mxu0 %vm1830_vm10, %v1806_v1  ;;  %v2615_v28 = vld [vmem:[%s2861_s17 + $0x199] sm:$0xff] }
 0x1be   : > { %1582 = vst.msk [vmem:[#allocation2 + $0x70] sm:$0xff] %vm1567_vm8, %v1500_v57  ;;  %1326 = vrot.lane.b32.xlu0 %v2577_v15, %s2824_s27  ;;  %v2616_v57 = vld [vmem:[%s2861_s17 + $0x1a1] sm:$0xff] }
 0x1bf   : > { %750 = vrot.lane.b32.xlu1 %v2577_v15, %s2821_s20 }
 0x1c0   : > { %v733_v51 = vpop.permute.xlu0 %732 }
 0x1c1   : > { %v924_v50 = vpop.permute.xlu1 %923  ;;  %812 = vst.msk [vmem:[#allocation2 + $0x88] sm:$0xff] %vm794_vm4, %v733_v51  ;;  %v2648_v51 = vld [vmem:[%s2861_s17 + $0x1a2] sm:$0xff] }
 0x1c2   : > { %1004 = vst.msk [vmem:[#allocation2 + $0x80] sm:$0xff] %vm987_vm5, %v924_v50  ;;  %1328 = vrot.lane.b32.xlu0 %v2578_v38, %s2824_s27 }
 0x1c3   : > { %1519 = vrot.lane.b32.xlu1 %v2609_v14, %s2825_s5 }
 0x1c4   : > { %v1502_v3 = vpop.permute.xlu0 %1501 }
 0x1c5   : > { %v1693_v33 = vpop.permute.xlu1 %1692  ;;  %1583 = vst.msk [vmem:[#allocation2 + $0x78] sm:$0xff] %vm1567_vm8, %v1502_v3 }
 0x1c6   : > { %1775 = vst.msk [vmem:[#allocation2 + $0x70] sm:$0xff] %vm1760_vm9, %v1693_v33  ;;  %752 = vrot.lane.b32.xlu0 %v2578_v38, %s2821_s20 }
 0x1c7   : > { %943 = vrot.lane.b32.xlu1 %v2609_v14, %s2822_s21  ;;  %v2647_v14 = vld [vmem:[%s2861_s17 + $0x19a] sm:$0xff] }
 0x1c8   : > { %v926_v30 = vpop.permute.xlu0 %925 }
 0x1c9   : > { %v1117_v21 = vpop.permute.xlu1 %1116  ;;  %1005 = vst.msk [vmem:[#allocation2 + $0x88] sm:$0xff] %vm987_vm5, %v926_v30 }
 0x1ca   : > { %1197 = vst.msk [vmem:[#allocation2 + $0x80] sm:$0xff] %vm1180_vm6, %v1117_v21  ;;  %1521 = vrot.lane.b32.xlu0 %v2610_v4, %s2825_s5 }
 0x1cb   : > { %1712 = vrot.lane.b32.xlu1 %v2641_v58, %s2826_s8 }
 0x1cc   : > { %v1695_v32 = vpop.permute.xlu0 %1694 }
 0x1cd   : > { %v1119_v59 = vpop.permute.xlu1 %1118  ;;  %v1807_v41 = vld [vmem:[#allocation2 + $0x70] sm:$0xff]  ;;  %1776 = vst.msk [vmem:[#allocation2 + $0x78] sm:$0xff] %vm1760_vm9, %v1695_v32 }
 0x1ce   : > { %1198 = vst.msk [vmem:[#allocation2 + $0x88] sm:$0xff] %vm1180_vm6, %v1119_v59  ;;  %2753 = vmatprep.mubr.msk.f32.mxu0 %vm1830_vm10, %v1807_v41  ;;  %945 = vrot.lane.b32.xlu0 %v2610_v4, %s2822_s21 }
 0x1cf   : > { %1136 = vrot.lane.b32.xlu1 %v2641_v58, %s2823_s22 }
 0x1d0   : > { %v1311_v18 = vpop.permute.xlu0 %1310 }
 0x1d1   : > { %v735_v53 = vpop.permute.xlu1 %734  ;;  %1391 = vst.msk [vmem:[#allocation2 + $0x80] sm:$0xff] %vm1374_vm7, %v1311_v18 }
 0x1d2   : > { %813 = vst.msk [vmem:[#allocation2 + $0x90] sm:$0xff] %vm794_vm4, %v735_v53  ;;  %1714 = vrot.lane.b32.xlu0 %v2642_v23, %s2826_s8 }
 0x1d3   : > { %1138 = vrot.lane.b32.xlu1 %v2642_v23, %s2823_s22 }
 0x1d4   : > { %v1313_v52 = vpop.permute.xlu0 %1312  ;;  %v1808_v40 = vld [vmem:[#allocation2 + $0x78] sm:$0xff] }
 0x1d5   : > { %v1504_v22 = vpop.permute.xlu1 %1503  ;;  %1392 = vst.msk [vmem:[#allocation2 + $0x88] sm:$0xff] %vm1374_vm7, %v1313_v52  ;;  %2754 = vmatmul.mubr.msk.f32.gmra.mrb[14].mxu0 %vm1830_vm10, %v1808_v40 }
 0x1d6   : > { %1584 = vst.msk [vmem:[#allocation2 + $0x80] sm:$0xff] %vm1567_vm8, %v1504_v22  ;;  %1330 = vrot.lane.b32.xlu0 %v2579_v29, %s2824_s27 }
 0x1d7   : > { %754 = vrot.lane.b32.xlu1 %v2579_v29, %s2821_s20 }
 0x1d8   : > { %v737_v7 = vpop.permute.xlu0 %736 }
 0x1d9   : > { %v928_v60 = vpop.permute.xlu1 %927  ;;  %814 = vst.msk [vmem:[#allocation2 + $0x98] sm:$0xff] %vm794_vm4, %v737_v7 }
 0x1da   : > { %1006 = vst.msk [vmem:[#allocation2 + $0x90] sm:$0xff] %vm987_vm5, %v928_v60  ;;  %1332 = vrot.lane.b32.xlu0 %v2580_v0, %s2824_s27 }
 0x1db   : > { %1523 = vrot.lane.b32.xlu1 %v2611_v35, %s2825_s5 }
 0x1dc   : > { %v1506_v6 = vpop.permute.xlu0 %1505 }
 0x1dd   : > { %v1697_v61 = vpop.permute.xlu1 %1696  ;;  %1585 = vst.msk [vmem:[#allocation2 + $0x88] sm:$0xff] %vm1567_vm8, %v1506_v6 }
 0x1de   : > { %1777 = vst.msk [vmem:[#allocation2 + $0x80] sm:$0xff] %vm1760_vm9, %v1697_v61  ;;  %756 = vrot.lane.b32.xlu0 %v2580_v0, %s2821_s20 }
 0x1df   : > { %947 = vrot.lane.b32.xlu1 %v2611_v35, %s2822_s21 }
 0x1e0   : > { %v930_v2 = vpop.permute.xlu0 %929 }
 0x1e1   : > { %v1121_v25 = vpop.permute.xlu1 %1120  ;;  %1007 = vst.msk [vmem:[#allocation2 + $0x98] sm:$0xff] %vm987_vm5, %v930_v2 }
 0x1e2   : > { %1199 = vst.msk [vmem:[#allocation2 + $0x90] sm:$0xff] %vm1180_vm6, %v1121_v25  ;;  %1525 = vrot.lane.b32.xlu0 %v2612_v43, %s2825_s5 }
 0x1e3   : > { %1716 = vrot.lane.b32.xlu1 %v2643_v34, %s2826_s8 }
 0x1e4   : > { %v1699_v44 = vpop.permute.xlu0 %1698 }
 0x1e5   : > { %v1123_v42 = vpop.permute.xlu1 %1122  ;;  %v1809_v55 = vld [vmem:[#allocation2 + $0x80] sm:$0xff]  ;;  %1778 = vst.msk [vmem:[#allocation2 + $0x88] sm:$0xff] %vm1760_vm9, %v1699_v44 }
 0x1e6   : > { %1200 = vst.msk [vmem:[#allocation2 + $0x98] sm:$0xff] %vm1180_vm6, %v1123_v42  ;;  %2756 = vmatprep.mubr.msk.f32.mxu1 %vm1830_vm10, %v1809_v55  ;;  %949 = vrot.lane.b32.xlu0 %v2612_v43, %s2822_s21 }
 0x1e7   : > { %1140 = vrot.lane.b32.xlu1 %v2643_v34, %s2823_s22 }
 0x1e8   : > { %v1315_v17 = vpop.permute.xlu0 %1314 }
 0x1e9   : > { %v739_v9 = vpop.permute.xlu1 %738  ;;  %1393 = vst.msk [vmem:[#allocation2 + $0x90] sm:$0xff] %vm1374_vm7, %v1315_v17 }
 0x1ea   : > { %815 = vst.msk [vmem:[#allocation2 + $0xa0] sm:$0xff] %vm794_vm4, %v739_v9  ;;  %1718 = vrot.lane.b32.xlu0 %v2644_v24, %s2826_s8 }
 0x1eb   : > { %1142 = vrot.lane.b32.xlu1 %v2644_v24, %s2823_s22 }
 0x1ec   : > { %v1317_v45 = vpop.permute.xlu0 %1316  ;;  %v1810_v37 = vld [vmem:[#allocation2 + $0x88] sm:$0xff] }
 0x1ed   : > { %v1508_v12 = vpop.permute.xlu1 %1507  ;;  %1394 = vst.msk [vmem:[#allocation2 + $0x98] sm:$0xff] %vm1374_vm7, %v1317_v45  ;;  %2757 = vmatmul.mubr.msk.f32.vlgmr.msra.gmra.mrb[0].mxu1 %vm1830_vm10, %v1810_v37 }
 0x1ee   : > { %1586 = vst.msk [vmem:[#allocation2 + $0x90] sm:$0xff] %vm1567_vm8, %v1508_v12  ;;  %1334 = vrot.lane.b32.xlu0 %v2581_v54, %s2824_s27 }
 0x1ef   : > { %758 = vrot.lane.b32.xlu1 %v2581_v54, %s2821_s20 }
 0x1f0   : > { %v741_v47 = vpop.permute.xlu0 %740 }
 0x1f1   : > { %v932_v20 = vpop.permute.xlu1 %931  ;;  %816 = vst.msk [vmem:[#allocation2 + $0xa8] sm:$0xff] %vm794_vm4, %v741_v47 }
 0x1f2   : > { %1008 = vst.msk [vmem:[#allocation2 + $0xa0] sm:$0xff] %vm987_vm5, %v932_v20  ;;  %1336 = vrot.lane.b32.xlu0 %v2582_v8, %s2824_s27 }
 0x1f3   : > { %1527 = vrot.lane.b32.xlu1 %v2613_v16, %s2825_s5 }
 0x1f4   : > { %v1510_v27 = vpop.permute.xlu0 %1509 }
 0x1f5   : > { %v1701_v46 = vpop.permute.xlu1 %1700  ;;  %1587 = vst.msk [vmem:[#allocation2 + $0x98] sm:$0xff] %vm1567_vm8, %v1510_v27 }
 0x1f6   : > { %1779 = vst.msk [vmem:[#allocation2 + $0x90] sm:$0xff] %vm1760_vm9, %v1701_v46  ;;  %760 = vrot.lane.b32.xlu0 %v2582_v8, %s2821_s20 }
 0x1f7   : > { %951 = vrot.lane.b32.xlu1 %v2613_v16, %s2822_s21 }
 0x1f8   : > { %v934_v13 = vpop.permute.xlu0 %933 }
 0x1f9   : > { %v1125_v11 = vpop.permute.xlu1 %1124  ;;  %1009 = vst.msk [vmem:[#allocation2 + $0xa8] sm:$0xff] %vm987_vm5, %v934_v13 }
 0x1fa   : > { %1201 = vst.msk [vmem:[#allocation2 + $0xa0] sm:$0xff] %vm1180_vm6, %v1125_v11  ;;  %1529 = vrot.lane.b32.xlu0 %v2614_v36, %s2825_s5 }
 0x1fb   : > { %1720 = vrot.lane.b32.xlu1 %v2645_v26, %s2826_s8 }
 0x1fc   : > { %v1703_v62 = vpop.permute.xlu0 %1702 }
 0x1fd   : > { %v1127_v10 = vpop.permute.xlu1 %1126  ;;  %v1811_v19 = vld [vmem:[#allocation2 + $0x90] sm:$0xff]  ;;  %1780 = vst.msk [vmem:[#allocation2 + $0x98] sm:$0xff] %vm1760_vm9, %v1703_v62 }
 0x1fe   : > { %1202 = vst.msk [vmem:[#allocation2 + $0xa8] sm:$0xff] %vm1180_vm6, %v1127_v10  ;;  %2759 = vmatprep.mubr.msk.f32.mxu1 %vm1830_vm10, %v1811_v19  ;;  %953 = vrot.lane.b32.xlu0 %v2614_v36, %s2822_s21 }
 0x1ff   : > { %1144 = vrot.lane.b32.xlu1 %v2645_v26, %s2823_s22 }
 0x200   : > { %v1319_v63 = vpop.permute.xlu0 %1318 }
 0x201   : > { %v743_v31 = vpop.permute.xlu1 %742  ;;  %1395 = vst.msk [vmem:[#allocation2 + $0xa0] sm:$0xff] %vm1374_vm7, %v1319_v63 }
 0x202   : > { %817 = vst.msk [vmem:[#allocation2 + $0xb0] sm:$0xff] %vm794_vm4, %v743_v31  ;;  %1722 = vrot.lane.b32.xlu0 %v2646_v49, %s2826_s8 }
 0x203   : > { %1146 = vrot.lane.b32.xlu1 %v2646_v49, %s2823_s22 }
 0x204   : > { %v1321_v39 = vpop.permute.xlu0 %1320  ;;  %v1812_v15 = vld [vmem:[#allocation2 + $0x98] sm:$0xff] }
 0x205   : > { %v1512_v5 = vpop.permute.xlu1 %1511  ;;  %1396 = vst.msk [vmem:[#allocation2 + $0xa8] sm:$0xff] %vm1374_vm7, %v1321_v39  ;;  %2760 = vmatmul.mubr.msk.f32.gmra.mrb[2].mxu1 %vm1830_vm10, %v1812_v15 }
 0x206   : > { %1588 = vst.msk [vmem:[#allocation2 + $0xa0] sm:$0xff] %vm1567_vm8, %v1512_v5  ;;  %1338 = vrot.lane.b32.xlu0 %v2583_v48, %s2824_s27 }
 0x207   : > { %1340 = vrot.lane.b32.xlu1 %v2584_v56, %s2824_s27 }
 0x208   : > { %v745_v1 = vpop.permute.xlu0 %744 }
 0x209   : > { %v936_v38 = vpop.permute.xlu1 %935  ;;  %818 = vst.msk [vmem:[#allocation2 + $0xb8] sm:$0xff] %vm794_vm4, %v745_v1 }
 0x20a   : > { %1010 = vst.msk [vmem:[#allocation2 + $0xb0] sm:$0xff] %vm987_vm5, %v936_v38  ;;  %1531 = vrot.lane.b32.xlu0 %v2615_v28, %s2825_s5 }
 0x20b   : > { %1533 = vrot.lane.b32.xlu1 %v2616_v57, %s2825_s5 }
 0x20c   : > { %v1514_v50 = vpop.permute.xlu0 %1513  ;;  %v2734_v3 = vpop.f32.mrb[0].mxu0 }
 0x20d   : > { %1589 = vst.msk [vmem:[#allocation2 + $0xa8] sm:$0xff] %vm1567_vm8, %v1514_v50  ;;  %v2190_v33 = vsel %vm2156_vm11, %v2734_v3, 0.0  ;;  %v2261_v4 = vmul.f32 %v2734_v3, %v2734_v3  ;;  %v1705_v58 = vpop.permute.xlu1 %1704  ;;  %v1997_v30 = vpop.f32.mrb[1].mxu0 }
 0x20e   : > { %2158 = vst.msk [vmem:[%s3790_s14 + $0x8] sm:$0xff] %vm2156_vm11, %v2734_v3  ;;  %2157 = vst.msk [vmem:[%s3790_s14] sm:$0xff] %vm2156_vm11, %v1997_v30  ;;  %v2189_v21 = vsel %vm2156_vm11, %v1997_v30, 0.0  ;;  %v2260_v32 = vmul.f32 %v1997_v30, %v1997_v30  ;;  %1724 = vrot.lane.b32.xlu0 %v2647_v14, %s2826_s8 }
 0x20f   : > { %1781 = vst.msk [vmem:[#allocation2 + $0xa0] sm:$0xff] %vm1760_vm9, %v1705_v58  ;;  %1726 = vrot.lane.b32.xlu1 %v2648_v51, %s2826_s8  ;;  %v2293_v59 = vsel %vm2156_vm11, %v2261_v4, 0.0  ;;  %v2191_v41 = vadd.f32 %v2190_v33, %v2189_v21 }
 0x210   : > { %v2292_v23 = vsel %vm2156_vm11, %v2260_v32, 0.0  ;;  %v938_v18 = vpop.permute.xlu0 %937 }
 0x211   : > { %v2294_v53 = vadd.f32 %v2293_v59, %v2292_v23  ;;  %1011 = vst.msk [vmem:[#allocation2 + $0xb8] sm:$0xff] %vm987_vm5, %v938_v18  ;;  %v1129_v29 = vpop.permute.xlu1 %1128 }
 0x212   : > { %1203 = vst.msk [vmem:[#allocation2 + $0xb0] sm:$0xff] %vm1180_vm6, %v1129_v29 }
 0x214   : > { %v1707_v52 = vpop.permute.xlu0 %1706 }
 0x215   : > { %1782 = vst.msk [vmem:[#allocation2 + $0xa8] sm:$0xff] %vm1760_vm9, %v1707_v52  ;;  %v1131_v22 = vpop.permute.xlu1 %1130 }
 0x216   : > { %v1813_v40 = vld [vmem:[#allocation2 + $0xa0] sm:$0xff]  ;;  %1204 = vst.msk [vmem:[#allocation2 + $0xb8] sm:$0xff] %vm1180_vm6, %v1131_v22 }
 0x217   : > { %2762 = vmatprep.mubr.msk.f32.mxu1 %vm1830_vm10, %v1813_v40 }
 0x218   : > { %v1323_v0 = vpop.permute.xlu0 %1322 }
 0x219   : > { %1397 = vst.msk [vmem:[#allocation2 + $0xb0] sm:$0xff] %vm1374_vm7, %v1323_v0  ;;  %v747_v35 = vpop.permute.xlu1 %746 }
 0x21a   : > { %819 = vst.msk [vmem:[#allocation2 + $0xc0] sm:$0xff] %vm794_vm4, %v747_v35 }
 0x21c   : > { %v1325_v7 = vpop.permute.xlu0 %1324  ;;  %v1814_v60 = vld [vmem:[#allocation2 + $0xa8] sm:$0xff] }
 0x21d   : > { %1398 = vst.msk [vmem:[#allocation2 + $0xb8] sm:$0xff] %vm1374_vm7, %v1325_v7  ;;  %v1516_v6 = vpop.permute.xlu1 %1515  ;;  %2763 = vmatmul.mubr.msk.f32.gmra.mrb[4].mxu1 %vm1830_vm10, %v1814_v60 }
 0x21e   : > { %1590 = vst.msk [vmem:[#allocation2 + $0xb0] sm:$0xff] %vm1567_vm8, %v1516_v6 }
 0x220   : > { %v749_v61 = vpop.permute.xlu0 %748  ;;  %v2737_v43 = vpop.f32.mrb[2].mxu0 }
 0x221   : > { %820 = vst.msk [vmem:[#allocation2 + $0xc8] sm:$0xff] %vm794_vm4, %v749_v61  ;;  %v940_v34 = vpop.permute.xlu1 %939  ;;  %v2007_v2 = vpop.f32.mrb[3].mxu0  ;;  %v2263_v25 = vmul.f32 %v2737_v43, %v2737_v43  ;;  %v2194_v24 = vsel %vm2156_vm11, %v2737_v43, 0.0 }
 0x222   : > { %2160 = vst.msk [vmem:[%s3790_s14 + $0x18] sm:$0xff] %vm2156_vm11, %v2737_v43  ;;  %2159 = vst.msk [vmem:[%s3790_s14 + $0x10] sm:$0xff] %vm2156_vm11, %v2007_v2  ;;  %v2192_v44 = vsel %vm2156_vm11, %v2007_v2, 0.0  ;;  %v2262_v42 = vmul.f32 %v2007_v2, %v2007_v2 }
 0x223   : > { %1012 = vst.msk [vmem:[#allocation2 + $0xc0] sm:$0xff] %vm987_vm5, %v940_v34  ;;  %v2193_v55 = vadd.f32 %v2192_v44, %v2191_v41  ;;  %v2297_v37 = vsel %vm2156_vm11, %v2263_v25, 0.0 }
 0x224   : > { %v2295_v17 = vsel %vm2156_vm11, %v2262_v42, 0.0  ;;  %v1518_v9 = vpop.permute.xlu0 %1517 }
 0x225   : > { %v2296_v54 = vadd.f32 %v2295_v17, %v2294_v53  ;;  %1591 = vst.msk [vmem:[#allocation2 + $0xb8] sm:$0xff] %vm1567_vm8, %v1518_v9  ;;  %v1709_v45 = vpop.permute.xlu1 %1708  ;;  %v2195_v12 = vadd.f32 %v2194_v24, %v2193_v55 }
 0x226   : > { %1783 = vst.msk [vmem:[#allocation2 + $0xb0] sm:$0xff] %vm1760_vm9, %v1709_v45 }
 0x227   : > { %v2298_v8 = vadd.f32 %v2297_v37, %v2296_v54 }
 0x228   : > { %v942_v16 = vpop.permute.xlu0 %941 }
 0x229   : > { %1013 = vst.msk [vmem:[#allocation2 + $0xc8] sm:$0xff] %vm987_vm5, %v942_v16  ;;  %v1133_v47 = vpop.permute.xlu1 %1132 }
 0x22a   : > { %1205 = vst.msk [vmem:[#allocation2 + $0xc0] sm:$0xff] %vm1180_vm6, %v1133_v47 }
 0x22c   : > { %v1711_v20 = vpop.permute.xlu0 %1710 }
 0x22d   : > { %1784 = vst.msk [vmem:[#allocation2 + $0xb8] sm:$0xff] %vm1760_vm9, %v1711_v20  ;;  %v1135_v27 = vpop.permute.xlu1 %1134  ;;  %v1815_v46 = vld [vmem:[#allocation2 + $0xb0] sm:$0xff] }
 0x22e   : > { %1206 = vst.msk [vmem:[#allocation2 + $0xc8] sm:$0xff] %vm1180_vm6, %v1135_v27  ;;  %2765 = vmatprep.mubr.msk.f32.mxu1 %vm1830_vm10, %v1815_v46 }
 0x230   : > { %v1327_v36 = vpop.permute.xlu0 %1326 }
 0x231   : > { %1399 = vst.msk [vmem:[#allocation2 + $0xc0] sm:$0xff] %vm1374_vm7, %v1327_v36  ;;  %v751_v26 = vpop.permute.xlu1 %750 }
 0x232   : > { %821 = vst.msk [vmem:[#allocation2 + $0xd0] sm:$0xff] %vm794_vm4, %v751_v26 }
 0x234   : > { %v1329_v13 = vpop.permute.xlu0 %1328  ;;  %v2740_v11 = vpop.f32.mrb[4].mxu0  ;;  %v1816_v62 = vld [vmem:[#allocation2 + $0xb8] sm:$0xff] }
 0x235   : > { %1400 = vst.msk [vmem:[#allocation2 + $0xc8] sm:$0xff] %vm1374_vm7, %v1329_v13  ;;  %v1520_v10 = vpop.permute.xlu1 %1519  ;;  %v2017_v19 = vpop.f32.mrb[5].mxu0  ;;  %2766 = vmatmul.mubr.msk.f32.gmra.mrb[6].mxu1 %vm1830_vm10, %v1816_v62  ;;  %v2265_v49 = vmul.f32 %v2740_v11, %v2740_v11  ;;  %v2198_v56 = vsel %vm2156_vm11, %v2740_v11, 0.0 }
 0x236   : > { %2162 = vst.msk [vmem:[%s3790_s14 + $0x28] sm:$0xff] %vm2156_vm11, %v2740_v11  ;;  %2161 = vst.msk [vmem:[%s3790_s14 + $0x20] sm:$0xff] %vm2156_vm11, %v2017_v19  ;;  %v2196_v63 = vsel %vm2156_vm11, %v2017_v19, 0.0  ;;  %v2264_v31 = vmul.f32 %v2017_v19, %v2017_v19 }
 0x237   : > { %1592 = vst.msk [vmem:[#allocation2 + $0xc0] sm:$0xff] %vm1567_vm8, %v1520_v10  ;;  %v2197_v48 = vadd.f32 %v2196_v63, %v2195_v12  ;;  %v2301_v1 = vsel %vm2156_vm11, %v2265_v49, 0.0 }
 0x238   : > { %v2299_v39 = vsel %vm2156_vm11, %v2264_v31, 0.0  ;;  %v753_v5 = vpop.permute.xlu0 %752 }
 0x239   : > { %v2300_v15 = vadd.f32 %v2299_v39, %v2298_v8  ;;  %822 = vst.msk [vmem:[#allocation2 + $0xd8] sm:$0xff] %vm794_vm4, %v753_v5  ;;  %v944_v28 = vpop.permute.xlu1 %943  ;;  %v2199_v57 = vadd.f32 %v2198_v56, %v2197_v48 }
 0x23a   : > { %1014 = vst.msk [vmem:[#allocation2 + $0xd0] sm:$0xff] %vm987_vm5, %v944_v28 }
 0x23b   : > { %v2302_v38 = vadd.f32 %v2301_v1, %v2300_v15 }
 0x23c   : > { %v1522_v14 = vpop.permute.xlu0 %1521 }
 0x23d   : > { %1593 = vst.msk [vmem:[#allocation2 + $0xc8] sm:$0xff] %vm1567_vm8, %v1522_v14  ;;  %v1713_v51 = vpop.permute.xlu1 %1712 }
 0x23e   : > { %1785 = vst.msk [vmem:[#allocation2 + $0xc0] sm:$0xff] %vm1760_vm9, %v1713_v51 }
 0x240   : > { %v946_v50 = vpop.permute.xlu0 %945 }
 0x241   : > { %1015 = vst.msk [vmem:[#allocation2 + $0xd8] sm:$0xff] %vm987_vm5, %v946_v50  ;;  %v1137_v3 = vpop.permute.xlu1 %1136 }
 0x242   : > { %1207 = vst.msk [vmem:[#allocation2 + $0xd0] sm:$0xff] %vm1180_vm6, %v1137_v3 }
 0x244   : > { %v1715_v33 = vpop.permute.xlu0 %1714 }
 0x245   : > { %1786 = vst.msk [vmem:[#allocation2 + $0xc8] sm:$0xff] %vm1760_vm9, %v1715_v33  ;;  %v1139_v4 = vpop.permute.xlu1 %1138  ;;  %v1817_v58 = vld [vmem:[#allocation2 + $0xc0] sm:$0xff] }
 0x246   : > { %1208 = vst.msk [vmem:[#allocation2 + $0xd8] sm:$0xff] %vm1180_vm6, %v1139_v4  ;;  %2768 = vmatprep.mubr.msk.f32.mxu1 %vm1830_vm10, %v1817_v58 }
 0x248   : > { %v1331_v30 = vpop.permute.xlu0 %1330  ;;  %v2743_v21 = vpop.f32.mrb[6].mxu0 }
 0x249   : > { %1401 = vst.msk [vmem:[#allocation2 + $0xd0] sm:$0xff] %vm1374_vm7, %v1331_v30  ;;  %v755_v32 = vpop.permute.xlu1 %754  ;;  %v2027_v59 = vpop.f32.mrb[7].mxu0  ;;  %v2267_v41 = vmul.f32 %v2743_v21, %v2743_v21  ;;  %v2202_v29 = vsel %vm2156_vm11, %v2743_v21, 0.0 }
 0x24a   : > { %2164 = vst.msk [vmem:[%s3790_s14 + $0x38] sm:$0xff] %vm2156_vm11, %v2743_v21  ;;  %2163 = vst.msk [vmem:[%s3790_s14 + $0x30] sm:$0xff] %vm2156_vm11, %v2027_v59  ;;  %v2200_v23 = vsel %vm2156_vm11, %v2027_v59, 0.0  ;;  %v2266_v18 = vmul.f32 %v2027_v59, %v2027_v59 }
 0x24b   : > { %823 = vst.msk [vmem:[#allocation2 + $0xe0] sm:$0xff] %vm794_vm4, %v755_v32  ;;  %v2201_v53 = vadd.f32 %v2200_v23, %v2199_v57  ;;  %v2305_v60 = vsel %vm2156_vm11, %v2267_v41, 0.0 }
 0x24c   : > { %v2303_v52 = vsel %vm2156_vm11, %v2266_v18, 0.0  ;;  %v1333_v22 = vpop.permute.xlu0 %1332  ;;  %v1818_v40 = vld [vmem:[#allocation2 + $0xc8] sm:$0xff] }
 0x24d   : > { %v2304_v0 = vadd.f32 %v2303_v52, %v2302_v38  ;;  %1402 = vst.msk [vmem:[#allocation2 + $0xd8] sm:$0xff] %vm1374_vm7, %v1333_v22  ;;  %v1524_v35 = vpop.permute.xlu1 %1523  ;;  %2769 = vmatmul.mubr.msk.f32.gmra.mrb[8].mxu1 %vm1830_vm10, %v1818_v40  ;;  %v2203_v7 = vadd.f32 %v2202_v29, %v2201_v53 }
 0x24e   : > { %1594 = vst.msk [vmem:[#allocation2 + $0xd0] sm:$0xff] %vm1567_vm8, %v1524_v35 }
 0x24f   : > { %v2306_v6 = vadd.f32 %v2305_v60, %v2304_v0 }
 0x250   : > { %v757_v61 = vpop.permute.xlu0 %756 }
 0x251   : > { %824 = vst.msk [vmem:[#allocation2 + $0xe8] sm:$0xff] %vm794_vm4, %v757_v61  ;;  %v948_v43 = vpop.permute.xlu1 %947 }
 0x252   : > { %1016 = vst.msk [vmem:[#allocation2 + $0xe0] sm:$0xff] %vm987_vm5, %v948_v43 }
 0x254   : > { %v1526_v34 = vpop.permute.xlu0 %1525 }
 0x255   : > { %1595 = vst.msk [vmem:[#allocation2 + $0xd8] sm:$0xff] %vm1567_vm8, %v1526_v34  ;;  %v1717_v2 = vpop.permute.xlu1 %1716 }
 0x256   : > { %1787 = vst.msk [vmem:[#allocation2 + $0xd0] sm:$0xff] %vm1760_vm9, %v1717_v2 }
 0x258   : > { %v950_v25 = vpop.permute.xlu0 %949 }
 0x259   : > { %1017 = vst.msk [vmem:[#allocation2 + $0xe8] sm:$0xff] %vm987_vm5, %v950_v25  ;;  %v1141_v44 = vpop.permute.xlu1 %1140 }
 0x25a   : > { %1209 = vst.msk [vmem:[#allocation2 + $0xe0] sm:$0xff] %vm1180_vm6, %v1141_v44 }
 0x25c   : > { %v1719_v42 = vpop.permute.xlu0 %1718 }
 0x25d   : > { %1788 = vst.msk [vmem:[#allocation2 + $0xd8] sm:$0xff] %vm1760_vm9, %v1719_v42  ;;  %v1143_v55 = vpop.permute.xlu1 %1142  ;;  %v1819_v24 = vld [vmem:[#allocation2 + $0xd0] sm:$0xff] }
 0x25e   : > { %1210 = vst.msk [vmem:[#allocation2 + $0xe8] sm:$0xff] %vm1180_vm6, %v1143_v55  ;;  %2771 = vmatprep.mubr.msk.f32.mxu1 %vm1830_vm10, %v1819_v24 }
 0x260   : > { %v1335_v17 = vpop.permute.xlu0 %1334  ;;  %v2746_v9 = vpop.f32.mrb[8].mxu0 }
 0x261   : > { %1403 = vst.msk [vmem:[#allocation2 + $0xe0] sm:$0xff] %vm1374_vm7, %v1335_v17  ;;  %v759_v54 = vpop.permute.xlu1 %758  ;;  %v2037_v45 = vpop.f32.mrb[9].mxu0  ;;  %v2269_v12 = vmul.f32 %v2746_v9, %v2746_v9  ;;  %v2206_v47 = vsel %vm2156_vm11, %v2746_v9, 0.0 }
 0x262   : > { %2166 = vst.msk [vmem:[%s3790_s14 + $0x48] sm:$0xff] %vm2156_vm11, %v2746_v9  ;;  %2165 = vst.msk [vmem:[%s3790_s14 + $0x40] sm:$0xff] %vm2156_vm11, %v2037_v45  ;;  %v2204_v37 = vsel %vm2156_vm11, %v2037_v45, 0.0  ;;  %v2268_v8 = vmul.f32 %v2037_v45, %v2037_v45 }
 0x263   : > { %825 = vst.msk [vmem:[#allocation2 + $0xf0] sm:$0xff] %vm794_vm4, %v759_v54  ;;  %v2205_v16 = vadd.f32 %v2204_v37, %v2203_v7  ;;  %v2309_v11 = vsel %vm2156_vm11, %v2269_v12, 0.0 }
 0x264   : > { %v2307_v20 = vsel %vm2156_vm11, %v2268_v8, 0.0  ;;  %v1337_v27 = vpop.permute.xlu0 %1336  ;;  %v1820_v46 = vld [vmem:[#allocation2 + $0xd8] sm:$0xff] }
 0x265   : > { %v2308_v36 = vadd.f32 %v2307_v20, %v2306_v6  ;;  %1404 = vst.msk [vmem:[#allocation2 + $0xe8] sm:$0xff] %vm1374_vm7, %v1337_v27  ;;  %v1528_v26 = vpop.permute.xlu1 %1527  ;;  %2772 = vmatmul.mubr.msk.f32.gmra.mrb[10].mxu1 %vm1830_vm10, %v1820_v46  ;;  %v2207_v13 = vadd.f32 %v2206_v47, %v2205_v16 }
 0x266   : > { %1596 = vst.msk [vmem:[#allocation2 + $0xe0] sm:$0xff] %vm1567_vm8, %v1528_v26 }
 0x267   : > { %v2310_v62 = vadd.f32 %v2309_v11, %v2308_v36 }
 0x268   : > { %v761_v10 = vpop.permute.xlu0 %760 }
 0x269   : > { %826 = vst.msk [vmem:[#allocation2 + $0xf8] sm:$0xff] %vm794_vm4, %v761_v10  ;;  %v952_v19 = vpop.permute.xlu1 %951 }
 0x26a   : > { %1018 = vst.msk [vmem:[#allocation2 + $0xf0] sm:$0xff] %vm987_vm5, %v952_v19 }
 0x26c   : > { %v1530_v49 = vpop.permute.xlu0 %1529 }
 0x26d   : > { %1597 = vst.msk [vmem:[#allocation2 + $0xe8] sm:$0xff] %vm1567_vm8, %v1530_v49  ;;  %v1721_v63 = vpop.permute.xlu1 %1720 }
 0x26e   : > { %1789 = vst.msk [vmem:[#allocation2 + $0xe0] sm:$0xff] %vm1760_vm9, %v1721_v63 }
 0x270   : > { %v954_v31 = vpop.permute.xlu0 %953 }
 0x271   : > { %1019 = vst.msk [vmem:[#allocation2 + $0xf8] sm:$0xff] %vm987_vm5, %v954_v31  ;;  %v1145_v48 = vpop.permute.xlu1 %1144 }
 0x272   : > { %1211 = vst.msk [vmem:[#allocation2 + $0xf0] sm:$0xff] %vm1180_vm6, %v1145_v48 }
 0x274   : > { %v1723_v56 = vpop.permute.xlu0 %1722 }
 0x275   : > { %1790 = vst.msk [vmem:[#allocation2 + $0xe8] sm:$0xff] %vm1760_vm9, %v1723_v56  ;;  %v1147_v39 = vpop.permute.xlu1 %1146  ;;  %v1821_v5 = vld [vmem:[#allocation2 + $0xe0] sm:$0xff] }
 0x276   : > { %1212 = vst.msk [vmem:[#allocation2 + $0xf8] sm:$0xff] %vm1180_vm6, %v1147_v39  ;;  %2774 = vmatprep.mubr.msk.f32.mxu1 %vm1830_vm10, %v1821_v5 }
 0x278   : > { %v1339_v15 = vpop.permute.xlu0 %1338  ;;  %v2749_v28 = vpop.f32.mrb[10].mxu0 }
 0x279   : > { %1405 = vst.msk [vmem:[#allocation2 + $0xf0] sm:$0xff] %vm1374_vm7, %v1339_v15  ;;  %v1341_v57 = vpop.permute.xlu1 %1340  ;;  %v2047_v1 = vpop.f32.mrb[11].mxu0  ;;  %v2271_v38 = vmul.f32 %v2749_v28, %v2749_v28  ;;  %v2210_v3 = vsel %vm2156_vm11, %v2749_v28, 0.0 }
 0x27a   : > { %2168 = vst.msk [vmem:[%s3790_s14 + $0x58] sm:$0xff] %vm2156_vm11, %v2749_v28  ;;  %2167 = vst.msk [vmem:[%s3790_s14 + $0x50] sm:$0xff] %vm2156_vm11, %v2047_v1  ;;  %v2208_v14 = vsel %vm2156_vm11, %v2047_v1, 0.0  ;;  %v2270_v51 = vmul.f32 %v2047_v1, %v2047_v1 }
 0x27b   : > { %1406 = vst.msk [vmem:[#allocation2 + $0xf8] sm:$0xff] %vm1374_vm7, %v1341_v57  ;;  %v2209_v50 = vadd.f32 %v2208_v14, %v2207_v13  ;;  %v2313_v59 = vsel %vm2156_vm11, %v2271_v38, 0.0 }
 0x27c   : > { %v2311_v33 = vsel %vm2156_vm11, %v2270_v51, 0.0  ;;  %v1532_v4 = vpop.permute.xlu0 %1531  ;;  %v1822_v58 = vld [vmem:[#allocation2 + $0xe8] sm:$0xff] }
 0x27d   : > { %v2312_v30 = vadd.f32 %v2311_v33, %v2310_v62  ;;  %1598 = vst.msk [vmem:[#allocation2 + $0xf0] sm:$0xff] %vm1567_vm8, %v1532_v4  ;;  %v1534_v21 = vpop.permute.xlu1 %1533  ;;  %2775 = vmatmul.mubr.msk.f32.gmra.mrb[12].mxu1 %vm1830_vm10, %v1822_v58  ;;  %v2211_v32 = vadd.f32 %v2210_v3, %v2209_v50 }
 0x27e   : > { %1599 = vst.msk [vmem:[#allocation2 + $0xf8] sm:$0xff] %vm1567_vm8, %v1534_v21 }
 0x27f   : > { %v2314_v41 = vadd.f32 %v2313_v59, %v2312_v30 }
 0x280   : > { %v1725_v23 = vpop.permute.xlu0 %1724 }
 0x281   : > { %1791 = vst.msk [vmem:[#allocation2 + $0xf0] sm:$0xff] %vm1760_vm9, %v1725_v23  ;;  %v1727_v18 = vpop.permute.xlu1 %1726 }
 0x282   : > { %1792 = vst.msk [vmem:[#allocation2 + $0xf8] sm:$0xff] %vm1760_vm9, %v1727_v18 }
 0x288   : > { %v1823_v53 = vld [vmem:[#allocation2 + $0xf0] sm:$0xff] }
 0x289   : > { %2777 = vmatprep.mubr.msk.f32.mxu1 %vm1830_vm10, %v1823_v53  ;;  %v1824_v29 = vld [vmem:[#allocation2 + $0xf8] sm:$0xff] }
 0x28a   : > { %2778 = vmatmul.mubr.msk.f32.gmra.mrb[14].mxu1 %vm1830_vm10, %v1824_v29 }
 0x290   : > { %v2752_v52 = vpop.f32.mrb[12].mxu0 }
 0x291   : > { %2170 = vst.msk [vmem:[%s3790_s14 + $0x68] sm:$0xff] %vm2156_vm11, %v2752_v52  ;;  %v2057_v22 = vpop.f32.mrb[13].mxu0  ;;  %v2273_v40 = vmul.f32 %v2752_v52, %v2752_v52  ;;  %v2214_v60 = vsel %vm2156_vm11, %v2752_v52, 0.0 }
 0x292   : > { %2169 = vst.msk [vmem:[%s3790_s14 + $0x60] sm:$0xff] %vm2156_vm11, %v2057_v22  ;;  %v2212_v0 = vsel %vm2156_vm11, %v2057_v22, 0.0  ;;  %v2272_v35 = vmul.f32 %v2057_v22, %v2057_v22 }
 0x293   : > { %v2213_v7 = vadd.f32 %v2212_v0, %v2211_v32  ;;  %v2317_v34 = vsel %vm2156_vm11, %v2273_v40, 0.0 }
 0x294   : > { %v2315_v6 = vsel %vm2156_vm11, %v2272_v35, 0.0 }
 0x295   : > { %v2316_v61 = vadd.f32 %v2315_v6, %v2314_v41  ;;  %v2215_v43 = vadd.f32 %v2214_v60, %v2213_v7 }
 0x297   : > { %v2318_v2 = vadd.f32 %v2317_v34, %v2316_v61 }
 0x2a8   : > { %v2755_v25 = vpop.f32.mrb[14].mxu0 }
 0x2a9   : > { %2172 = vst.msk [vmem:[%s3790_s14 + $0x78] sm:$0xff] %vm2156_vm11, %v2755_v25  ;;  %v2067_v44 = vpop.f32.mrb[15].mxu0  ;;  %v2275_v42 = vmul.f32 %v2755_v25, %v2755_v25  ;;  %v2218_v9 = vsel %vm2156_vm11, %v2755_v25, 0.0 }
 0x2aa   : > { %2171 = vst.msk [vmem:[%s3790_s14 + $0x70] sm:$0xff] %vm2156_vm11, %v2067_v44  ;;  %v2216_v55 = vsel %vm2156_vm11, %v2067_v44, 0.0  ;;  %v2274_v24 = vmul.f32 %v2067_v44, %v2067_v44 }
 0x2ab   : > { %v2217_v17 = vadd.f32 %v2216_v55, %v2215_v43  ;;  %v2321_v37 = vsel %vm2156_vm11, %v2275_v42, 0.0 }
 0x2ac   : > { %v2319_v54 = vsel %vm2156_vm11, %v2274_v24, 0.0 }
 0x2ad   : > { %v2219_v45 = vadd.f32 %v2218_v9, %v2217_v17  ;;  %v2320_v12 = vadd.f32 %v2319_v54, %v2318_v2 }
 0x2af   : > { %v2322_v8 = vadd.f32 %v2321_v37, %v2320_v12 }
 0x2c0   : > { %v2758_v16 = vpop.f32.mrb[0].mxu1 }
 0x2c1   : > { %2174 = vst.msk [vmem:[%s3790_s14 + $0x88] sm:$0xff] %vm2156_vm11, %v2758_v16  ;;  %v2077_v47 = vpop.f32.mrb[1].mxu1  ;;  %v2277_v20 = vmul.f32 %v2758_v16, %v2758_v16  ;;  %v2222_v26 = vsel %vm2156_vm11, %v2758_v16, 0.0 }
 0x2c2   : > { %2173 = vst.msk [vmem:[%s3790_s14 + $0x80] sm:$0xff] %vm2156_vm11, %v2077_v47  ;;  %v2220_v27 = vsel %vm2156_vm11, %v2077_v47, 0.0  ;;  %v2276_v46 = vmul.f32 %v2077_v47, %v2077_v47 }
 0x2c3   : > { %v2221_v36 = vadd.f32 %v2220_v27, %v2219_v45  ;;  %v2325_v10 = vsel %vm2156_vm11, %v2277_v20, 0.0 }
 0x2c4   : > { %v2323_v13 = vsel %vm2156_vm11, %v2276_v46, 0.0 }
 0x2c5   : > { %v2324_v11 = vadd.f32 %v2323_v13, %v2322_v8  ;;  %v2223_v62 = vadd.f32 %v2222_v26, %v2221_v36 }
 0x2c7   : > { %v2326_v19 = vadd.f32 %v2325_v10, %v2324_v11 }
 0x2d8   : > { %v2761_v49 = vpop.f32.mrb[2].mxu1 }
 0x2d9   : > { %2176 = vst.msk [vmem:[%s3790_s14 + $0x98] sm:$0xff] %vm2156_vm11, %v2761_v49  ;;  %v2087_v63 = vpop.f32.mrb[3].mxu1  ;;  %v2279_v31 = vmul.f32 %v2761_v49, %v2761_v49  ;;  %v2226_v5 = vsel %vm2156_vm11, %v2761_v49, 0.0 }
 0x2da   : > { %2175 = vst.msk [vmem:[%s3790_s14 + $0x90] sm:$0xff] %vm2156_vm11, %v2087_v63  ;;  %v2224_v48 = vsel %vm2156_vm11, %v2087_v63, 0.0  ;;  %v2278_v56 = vmul.f32 %v2087_v63, %v2087_v63 }
 0x2db   : > { %v2225_v39 = vadd.f32 %v2224_v48, %v2223_v62  ;;  %v2329_v1 = vsel %vm2156_vm11, %v2279_v31, 0.0 }
 0x2dc   : > { %v2327_v15 = vsel %vm2156_vm11, %v2278_v56, 0.0 }
 0x2dd   : > { %v2328_v28 = vadd.f32 %v2327_v15, %v2326_v19  ;;  %v2227_v57 = vadd.f32 %v2226_v5, %v2225_v39 }
 0x2df   : > { %v2330_v38 = vadd.f32 %v2329_v1, %v2328_v28 }
 0x2f0   : > { %v2764_v14 = vpop.f32.mrb[4].mxu1 }
 0x2f1   : > { %2178 = vst.msk [vmem:[%s3790_s14 + $0xa8] sm:$0xff] %vm2156_vm11, %v2764_v14  ;;  %v2097_v51 = vpop.f32.mrb[5].mxu1  ;;  %v2281_v50 = vmul.f32 %v2764_v14, %v2764_v14  ;;  %v2230_v58 = vsel %vm2156_vm11, %v2764_v14, 0.0 }
 0x2f2   : > { %2177 = vst.msk [vmem:[%s3790_s14 + $0xa0] sm:$0xff] %vm2156_vm11, %v2097_v51  ;;  %v2228_v3 = vsel %vm2156_vm11, %v2097_v51, 0.0  ;;  %v2280_v33 = vmul.f32 %v2097_v51, %v2097_v51 }
 0x2f3   : > { %v2229_v4 = vadd.f32 %v2228_v3, %v2227_v57  ;;  %v2333_v59 = vsel %vm2156_vm11, %v2281_v50, 0.0 }
 0x2f4   : > { %v2331_v30 = vsel %vm2156_vm11, %v2280_v33, 0.0 }
 0x2f5   : > { %v2332_v21 = vadd.f32 %v2331_v30, %v2330_v38  ;;  %v2231_v32 = vadd.f32 %v2230_v58, %v2229_v4 }
 0x2f7   : > { %v2334_v41 = vadd.f32 %v2333_v59, %v2332_v21 }
 0x308   : > { %v2767_v23 = vpop.f32.mrb[6].mxu1 }
 0x309   : > { %2180 = vst.msk [vmem:[%s3790_s14 + $0xb8] sm:$0xff] %vm2156_vm11, %v2767_v23  ;;  %v2107_v18 = vpop.f32.mrb[7].mxu1  ;;  %v2283_v53 = vmul.f32 %v2767_v23, %v2767_v23  ;;  %v2234_v40 = vsel %vm2156_vm11, %v2767_v23, 0.0 }
 0x30a   : > { %2179 = vst.msk [vmem:[%s3790_s14 + $0xb0] sm:$0xff] %vm2156_vm11, %v2107_v18  ;;  %v2232_v29 = vsel %vm2156_vm11, %v2107_v18, 0.0  ;;  %v2282_v52 = vmul.f32 %v2107_v18, %v2107_v18 }
 0x30b   : > { %v2233_v22 = vadd.f32 %v2232_v29, %v2231_v32  ;;  %v2337_v60 = vsel %vm2156_vm11, %v2283_v53, 0.0 }
 0x30c   : > { %v2335_v0 = vsel %vm2156_vm11, %v2282_v52, 0.0 }
 0x30d   : > { %v2336_v35 = vadd.f32 %v2335_v0, %v2334_v41  ;;  %v2235_v7 = vadd.f32 %v2234_v40, %v2233_v22 }
 0x30f   : > { %v2338_v6 = vadd.f32 %v2337_v60, %v2336_v35 }
 0x320   : > { %v2770_v61 = vpop.f32.mrb[8].mxu1 }
 0x321   : > { %2182 = vst.msk [vmem:[%s3790_s14 + $0xc8] sm:$0xff] %vm2156_vm11, %v2770_v61  ;;  %v2117_v43 = vpop.f32.mrb[9].mxu1  ;;  %v2285_v34 = vmul.f32 %v2770_v61, %v2770_v61  ;;  %v2238_v42 = vsel %vm2156_vm11, %v2770_v61, 0.0 }
 0x322   : > { %2181 = vst.msk [vmem:[%s3790_s14 + $0xc0] sm:$0xff] %vm2156_vm11, %v2117_v43  ;;  %v2236_v2 = vsel %vm2156_vm11, %v2117_v43, 0.0  ;;  %v2284_v25 = vmul.f32 %v2117_v43, %v2117_v43 }
 0x323   : > { %v2237_v44 = vadd.f32 %v2236_v2, %v2235_v7  ;;  %v2341_v9 = vsel %vm2156_vm11, %v2285_v34, 0.0 }
 0x324   : > { %v2339_v55 = vsel %vm2156_vm11, %v2284_v25, 0.0 }
 0x325   : > { %v2340_v24 = vadd.f32 %v2339_v55, %v2338_v6  ;;  %v2239_v17 = vadd.f32 %v2238_v42, %v2237_v44 }
 0x327   : > { %v2342_v54 = vadd.f32 %v2341_v9, %v2340_v24 }
 0x338   : > { %v2773_v45 = vpop.f32.mrb[10].mxu1 }
 0x339   : > { %2184 = vst.msk [vmem:[%s3790_s14 + $0xd8] sm:$0xff] %vm2156_vm11, %v2773_v45  ;;  %v2127_v12 = vpop.f32.mrb[11].mxu1  ;;  %v2287_v37 = vmul.f32 %v2773_v45, %v2773_v45  ;;  %v2242_v20 = vsel %vm2156_vm11, %v2773_v45, 0.0 }
 0x33a   : > { %2183 = vst.msk [vmem:[%s3790_s14 + $0xd0] sm:$0xff] %vm2156_vm11, %v2127_v12  ;;  %v2240_v8 = vsel %vm2156_vm11, %v2127_v12, 0.0  ;;  %v2286_v16 = vmul.f32 %v2127_v12, %v2127_v12 }
 0x33b   : > { %v2241_v47 = vadd.f32 %v2240_v8, %v2239_v17  ;;  %v2345_v26 = vsel %vm2156_vm11, %v2287_v37, 0.0 }
 0x33c   : > { %v2343_v27 = vsel %vm2156_vm11, %v2286_v16, 0.0 }
 0x33d   : > { %v2344_v46 = vadd.f32 %v2343_v27, %v2342_v54  ;;  %v2243_v36 = vadd.f32 %v2242_v20, %v2241_v47 }
 0x33f   : > { %v2346_v13 = vadd.f32 %v2345_v26, %v2344_v46 }
 0x350   : > { %v2776_v11 = vpop.f32.mrb[12].mxu1 }
 0x351   : > { %2186 = vst.msk [vmem:[%s3790_s14 + $0xe8] sm:$0xff] %vm2156_vm11, %v2776_v11  ;;  %v2137_v62 = vpop.f32.mrb[13].mxu1  ;;  %v2289_v10 = vmul.f32 %v2776_v11, %v2776_v11  ;;  %v2246_v31 = vsel %vm2156_vm11, %v2776_v11, 0.0 }
 0x352   : > { %2185 = vst.msk [vmem:[%s3790_s14 + $0xe0] sm:$0xff] %vm2156_vm11, %v2137_v62  ;;  %v2244_v19 = vsel %vm2156_vm11, %v2137_v62, 0.0  ;;  %v2288_v49 = vmul.f32 %v2137_v62, %v2137_v62 }
 0x353   : > { %v2245_v63 = vadd.f32 %v2244_v19, %v2243_v36  ;;  %v2349_v5 = vsel %vm2156_vm11, %v2289_v10, 0.0 }
 0x354   : > { %v2347_v48 = vsel %vm2156_vm11, %v2288_v49, 0.0 }
 0x355   : > { %v2348_v56 = vadd.f32 %v2347_v48, %v2346_v13  ;;  %v2247_v39 = vadd.f32 %v2246_v31, %v2245_v63 }
 0x357   : > { %v2350_v15 = vadd.f32 %v2349_v5, %v2348_v56 }
 0x35d   : > { %v2779_v28 = vpop.f32.mrb[14].mxu1 }
 0x35e   : > { %2188 = vst.msk [vmem:[%s3790_s14 + $0xf8] sm:$0xff] %vm2156_vm11, %v2779_v28  ;;  %v2147_v57 = vpop.f32.mrb[15].mxu1  ;;  %v2291_v1 = vmul.f32 %v2779_v28, %v2779_v28  ;;  %v2250_v50 = vsel %vm2156_vm11, %v2779_v28, 0.0 }
 0x35f   : > { %2187 = vst.msk [vmem:[%s3790_s14 + $0xf0] sm:$0xff] %vm2156_vm11, %v2147_v57  ;;  %v2248_v38 = vsel %vm2156_vm11, %v2147_v57, 0.0  ;;  %v2290_v14 = vmul.f32 %v2147_v57, %v2147_v57 }
 0x360   : > { %v2249_v51 = vadd.f32 %v2248_v38, %v2247_v39  ;;  %v2353_v58 = vsel %vm2156_vm11, %v2291_v1, 0.0 }
 0x361   : > { %v2351_v3 = vsel %vm2156_vm11, %v2290_v14, 0.0 }
 0x362   : > { %v2251_v33 = vadd.f32 %v2250_v50, %v2249_v51  ;;  %v2352_v4 = vadd.f32 %v2351_v3, %v2350_v15 }
 0x364   : > { %v2252_v30 = vrot.slane %v2251_v33, 4  ;;  %v2354_v21 = vadd.f32 %v2353_v58, %v2352_v4 }
 0x366   : > { %v2253_v32 = vadd.f32 %v2252_v30, %v2251_v33  ;;  %v2355_v59 = vrot.slane %v2354_v21, 4 }
 0x368   : > { %v2254_v41 = vrot.slane %v2253_v32, 2  ;;  %v2356_v23 = vadd.f32 %v2355_v59, %v2354_v21 }
 0x36a   : > { %v2255_v18 = vadd.f32 %v2254_v41, %v2253_v32  ;;  %v2357_v53 = vrot.slane %v2356_v23, 2 }
 0x36c   : > { %v2256_v29 = vrot.slane %v2255_v18, 1  ;;  %v2358_v52 = vadd.f32 %v2357_v53, %v2356_v23 }
 0x36e   : > { %v2257_v22 = vadd.f32 %v2256_v29, %v2255_v18  ;;  %v2359_v40 = vrot.slane %v2358_v52, 1 }
 0x370   : > { %2259 = vst.msk [vmem:[%s181_s18] sm:$0x1] %vm2258_vm12, %v2257_v22  ;;  %v2360_v0 = vadd.f32 %v2359_v40, %v2358_v52 }
 0x372   : > { %2361 = vst.msk [vmem:[%s181_s18 + $0x1] sm:$0x1] %vm2258_vm12, %v2360_v0 }
 0x373 PF: > { %s14_s12 = sadd.s32 1, %s2817_s12  }
 0x374   : > { %p11_p4 = scmp.ge.s32.totalorder %s14_s12, 4  }
 0x376   :  { %13 = sbr.rel (!%p11_p4) target bundleno = 1 (0x1), region = 72 }

// kernel: down_forward.4
= control target key start
LH: loop header
LB: loop body
LE: loop exit
PB: predicated region body
PF: predicated region fallthrough
CT: control target
= control target key end

     0   :  { %s2977_s18 = smov 0   ;;  %s4191_s0 = inlined_call_operand.vmem [shape: f32[2,256,16], index: 0, kind: input, shape index: {}]   ;;  %s4192_s1 = inlined_call_operand.vmem [shape: f32[1,8], index: 1, kind: input, shape index: {}]   ;;  %s4193_s2 = inlined_call_operand.vmem [shape: f32[1,8], index: 2, kind: input, shape index: {}]   ;;  %s4194_s3 = inlined_call_operand.vmem [shape: f32[72,8], index: 3, kind: input, shape index: {}]   ;;  %s4195_s4 = inlined_call_operand.vmem [shape: f32[2,256,8], index: 4, kind: output, shape index: {0}]   ;;  %s4196_s5 = inlined_call_operand.vmem [shape: f32[2,2,8], index: 5, kind: output, shape index: {1}]  }
   0x1 LB: > { %s2730_s19 = sadd.s32 4294967295, %s2936_s18   ;;  %p2734_p0 = scmp.ge.s32.totalorder %s2936_s18, 1  ;;  %s2936_s18 = sphi %s2977_s18, %s16_s18  }
   0x2   : > { %p190_p1 = scmp.lt.s32.totalorder %s2936_s18, 3 }
   0x4   : > { %p191_p2 = pnand %p2734_p0, %p190_p1 }
   0x5   : > { %vm378_vm0 = vcmask (!%p191_p2), 64512   ;;  %vm381_vm1 = vcmask (!%p191_p2), 58368   ;;  %p2987_p3 = scmp.lt.s32.totalorder (!%p191_p2), %s2730_s19, 1  ;;  %v2938_v0 = vmov (!%p191_p2), 0.0   ;;  %v3055_v1 = vld [vmem:[%s4192_s1] ss:$0 sm:$0xff] (!%p191_p2) }
   0x6   : > { %194 = sbr.rel (%p191_p2) target bundleno = 905 (0x389), region = 36  ;;  %379 = vst.msk [vmem:[#allocation2] sm:$0xff] (!%p191_p2), %vm378_vm0, %v2938_v0  ;;  %380 = vst.msk [vmem:[#allocation2 + $0x8] sm:$0xff] (!%p191_p2), %vm378_vm0, %v2938_v0  ;;  %v3067_v2 = vld [vmem:[%s4193_s2] ss:$0 sm:$0xff] (!%p191_p2)  ;;  %s2939_s29 = smov (!%p191_p2), 8  }
   0x7   : > { %383 = vst.msk [vmem:[#allocation2 + $0x18] sm:$0xff] (!%p191_p2), %vm378_vm0, %v2938_v0  ;;  %384 = vst.msk [vmem:[#allocation2 + $0x20] sm:$0xff] (!%p191_p2), %vm378_vm0, %v2938_v0  ;;  %s2940_s30 = smov (!%p191_p2), 16   ;;  %vm691_vm2 = vcmask (!%p191_p2), 130112   ;;  %s2941_s6 = smov (!%p191_p2), 24   ;;  %vm884_vm3 = vcmask (!%p191_p2), 195712  }
   0x8   : > { %386 = vst.msk [vmem:[#allocation2 + $0x30] sm:$0xff] (!%p191_p2), %vm378_vm0, %v2938_v0  ;;  %387 = vst.msk [vmem:[#allocation2 + $0x38] sm:$0xff] (!%p191_p2), %vm378_vm0, %v2938_v0  ;;  %s2942_s7 = smov (!%p191_p2), 32   ;;  %s2943_s12 = smov (!%p191_p2), 40   ;;  %vm1077_vm4 = vcmask (!%p191_p2), 261312   ;;  %vm1270_vm5 = vcmask (!%p191_p2), 326912  }
   0x9   : > { %389 = vst.msk [vmem:[#allocation2 + $0x48] sm:$0xff] (!%p191_p2), %vm378_vm0, %v2938_v0  ;;  %390 = vst.msk [vmem:[#allocation2 + $0x50] sm:$0xff] (!%p191_p2), %vm378_vm0, %v2938_v0  ;;  %s2944_s17 = smov (!%p191_p2), 48   ;;  %s2946_s8 = smov (!%p191_p2), 64   ;;  %vm1463_vm6 = vcmask (!%p191_p2), 392512   ;;  %vm1657_vm7 = vcmask (!%p191_p2), 458112  }
   0xa   : > { %392 = vst.msk [vmem:[#allocation2 + $0x60] sm:$0xff] (!%p191_p2), %vm378_vm0, %v2938_v0  ;;  %393 = vst.msk [vmem:[#allocation2 + $0x68] sm:$0xff] (!%p191_p2), %vm378_vm0, %v2938_v0  ;;  %vm1850_vm8 = vcmask (!%p191_p2), 523712   ;;  %vm2043_vm9 = vcmask (!%p191_p2), 589312   ;;  %vm2117_vm10 = vcmask (!%p191_p2), 588800   ;;  %vm2540_vm11 = vcmask (!%p191_p2), 57344  }
   0xb   : > { %395 = vst.msk [vmem:[#allocation2 + $0x78] sm:$0xff] (!%p191_p2), %vm378_vm0, %v2938_v0  ;;  %396 = vst.msk [vmem:[#allocation2 + $0x80] sm:$0xff] (!%p191_p2), %vm378_vm0, %v2938_v0 }
   0xc   : > { %398 = vst.msk [vmem:[#allocation2 + $0x90] sm:$0xff] (!%p191_p2), %vm378_vm0, %v2938_v0  ;;  %399 = vst.msk [vmem:[#allocation2 + $0x98] sm:$0xff] (!%p191_p2), %vm378_vm0, %v2938_v0 }
   0xd   : > { %401 = vst.msk [vmem:[#allocation2 + $0xa8] sm:$0xff] %vm378_vm0, %v2938_v0  ;;  %402 = vst.msk [vmem:[#allocation2 + $0xb0] sm:$0xff] %vm378_vm0, %v2938_v0  ;;  %s4199_s19 = smov (!%p2987_p3, %s2730_s19), 1  ;;  %v531_v12 = vld [vmem:[#allocation2 + $0x1] sm:$0xff] }
   0xe   : > { %404 = vst.msk [vmem:[#allocation2 + $0xc0] sm:$0xff] %vm378_vm0, %v2938_v0  ;;  %405 = vst.msk [vmem:[#allocation2 + $0xc8] sm:$0xff] %vm378_vm0, %v2938_v0  ;;  %s2776_s21 = sshll.u32 %s4199_s19, 8  ;;  %595 = vrot.lane.b32.xlu0 %v531_v12, %s2939_s29 }
   0xf   : > { %407 = vst.msk [vmem:[#allocation2 + $0xd8] sm:$0xff] %vm378_vm0, %v2938_v0  ;;  %408 = vst.msk [vmem:[#allocation2 + $0xe0] sm:$0xff] %vm378_vm0, %v2938_v0  ;;  %s3062_s26 = scalar_lea.vmem %s4191_s0, %s2776_s21 }
  0x10   : > { %410 = vst.msk [vmem:[#allocation2 + $0xf0] sm:$0xff] %vm378_vm0, %v2938_v0  ;;  %411 = vst.msk [vmem:[#allocation2 + $0xf8] sm:$0xff] %vm378_vm0, %v2938_v0  ;;  %v236_v3 = vld [vmem:[%s3062_s26] sm:$0xff]  ;;  %v238_v4 = vld [vmem:[%s3062_s26 + $0x10] sm:$0xff] }
  0x11   : > { %413 = vst.msk [vmem:[#allocation2 + $0x108] sm:$0xff] %vm378_vm0, %v2938_v0  ;;  %414 = vst.msk [vmem:[#allocation2 + $0x110] sm:$0xff] %vm378_vm0, %v2938_v0  ;;  %v237_v5 = vld [vmem:[%s3062_s26 + $0x8] sm:$0xff]  ;;  %v275_v6 = vmul.f32 %v3055_v1, %v236_v3  ;;  %v277_v7 = vmul.f32 %v3055_v1, %v238_v4  ;;  %v240_v9 = vld [vmem:[%s3062_s26 + $0x20] sm:$0xff] }
  0x12   : > { %416 = vst.msk [vmem:[#allocation2 + $0x120] sm:$0xff] %vm378_vm0, %v2938_v0  ;;  %417 = vst.msk [vmem:[#allocation2 + $0x128] sm:$0xff] %vm378_vm0, %v2938_v0  ;;  %v276_v8 = vmul.f32 %v3055_v1, %v237_v5  ;;  %v239_v10 = vld [vmem:[%s3062_s26 + $0x18] sm:$0xff]  ;;  %v242_v11 = vld [vmem:[%s3062_s26 + $0x30] sm:$0xff]  ;;  %v279_v13 = vmul.f32 %v3055_v1, %v240_v9 }
  0x13   : > { %419 = vst.msk [vmem:[#allocation2 + $0x138] sm:$0xff] %vm378_vm0, %v2938_v0  ;;  %420 = vst.msk [vmem:[#allocation2 + $0x140] sm:$0xff] %vm378_vm0, %v2938_v0  ;;  %v278_v14 = vmul.f32 %v3055_v1, %v239_v10  ;;  %v281_v15 = vmul.f32 %v3055_v1, %v242_v11  ;;  %v241_v16 = vld [vmem:[%s3062_s26 + $0x28] sm:$0xff]  ;;  %v314_v18 = vadd.f32 %v3067_v2, %v275_v6  ;;  %v244_v22 = vld [vmem:[%s3062_s26 + $0x40] sm:$0xff] }
  0x14   : > { %422 = vst.msk [vmem:[#allocation2 + $0x150] sm:$0xff] %vm378_vm0, %v2938_v0  ;;  %423 = vst.msk [vmem:[#allocation2 + $0x158] sm:$0xff] %vm378_vm0, %v2938_v0  ;;  %v316_v19 = vadd.f32 %v3067_v2, %v277_v7  ;;  %v315_v20 = vadd.f32 %v3067_v2, %v276_v8  ;;  %v280_v21 = vmul.f32 %v3055_v1, %v241_v16  ;;  %v243_v27 = vld [vmem:[%s3062_s26 + $0x38] sm:$0xff]  ;;  %v246_v28 = vld [vmem:[%s3062_s26 + $0x50] sm:$0xff] }
  0x15   : > { %425 = vst.msk [vmem:[#allocation2 + $0x168] sm:$0xff] %vm378_vm0, %v2938_v0  ;;  %426 = vst.msk [vmem:[#allocation2 + $0x170] sm:$0xff] %vm378_vm0, %v2938_v0  ;;  %v318_v23 = vadd.f32 %v3067_v2, %v279_v13  ;;  %v317_v24 = vadd.f32 %v3067_v2, %v278_v14  ;;  %v320_v25 = vadd.f32 %v3067_v2, %v281_v15  ;;  %v245_v29 = vld [vmem:[%s3062_s26 + $0x48] sm:$0xff]  ;;  %v346_v30 = vmax.f32 %v314_v18, 0.0  ;;  %v248_v34 = vld [vmem:[%s3062_s26 + $0x60] sm:$0xff] }
  0x16   : > { %428 = vst.msk [vmem:[#allocation2 + $0x180] sm:$0xff] %vm378_vm0, %v2938_v0  ;;  %429 = vst.msk [vmem:[#allocation2 + $0x188] sm:$0xff] %vm378_vm0, %v2938_v0  ;;  %v283_v26 = vmul.f32 %v3055_v1, %v244_v22  ;;  %v348_v31 = vmax.f32 %v316_v19, 0.0  ;;  %v347_v32 = vmax.f32 %v315_v20, 0.0  ;;  %v319_v33 = vadd.f32 %v3067_v2, %v280_v21  ;;  %v247_v35 = vld [vmem:[%s3062_s26 + $0x58] sm:$0xff]  ;;  %v250_v36 = vld [vmem:[%s3062_s26 + $0x70] sm:$0xff] }
  0x17   : > { %431 = vst.msk [vmem:[#allocation2 + $0x198] sm:$0xff] %vm378_vm0, %v2938_v0  ;;  %432 = vst.msk [vmem:[#allocation2 + $0x1a0] sm:$0xff] %vm378_vm0, %v2938_v0  ;;  %v350_v37 = vmax.f32 %v318_v23, 0.0  ;;  %v349_v38 = vmax.f32 %v317_v24, 0.0  ;;  %v352_v39 = vmax.f32 %v320_v25, 0.0  ;;  %v249_v41 = vld [vmem:[%s3062_s26 + $0x68] sm:$0xff]  ;;  %v282_v43 = vmul.f32 %v3055_v1, %v243_v27 }
  0x18   : > { %382 = vst.msk [vmem:[#allocation2 + $0x10] sm:$0x3] %vm381_vm1, %v2938_v0  ;;  %385 = vst.msk [vmem:[#allocation2 + $0x28] sm:$0x3] %vm381_vm1, %v2938_v0  ;;  %v322_v40 = vadd.f32 %v3067_v2, %v283_v26  ;;  %v351_v42 = vmax.f32 %v319_v33, 0.0  ;;  %v285_v44 = vmul.f32 %v3055_v1, %v246_v28  ;;  %v284_v45 = vmul.f32 %v3055_v1, %v245_v29  ;;  %v252_v46 = vld [vmem:[%s3062_s26 + $0x80] sm:$0xff] }
  0x19   : > { %388 = vst.msk [vmem:[#allocation2 + $0x40] sm:$0x3] %vm381_vm1, %v2938_v0  ;;  %391 = vst.msk [vmem:[#allocation2 + $0x58] sm:$0x3] %vm381_vm1, %v2938_v0  ;;  %v287_v48 = vmul.f32 %v3055_v1, %v248_v34  ;;  %v286_v49 = vmul.f32 %v3055_v1, %v247_v35  ;;  %v289_v50 = vmul.f32 %v3055_v1, %v250_v36  ;;  %v251_v55 = vld [vmem:[%s3062_s26 + $0x78] sm:$0xff]  ;;  %v254_v56 = vld [vmem:[%s3062_s26 + $0x90] sm:$0xff] }
  0x1a   : > { %394 = vst.msk [vmem:[#allocation2 + $0x70] sm:$0x3] %vm381_vm1, %v2938_v0  ;;  %397 = vst.msk [vmem:[#allocation2 + $0x88] sm:$0x3] %vm381_vm1, %v2938_v0  ;;  %v354_v47 = vmax.f32 %v322_v40, 0.0  ;;  %v321_v51 = vadd.f32 %v3067_v2, %v282_v43  ;;  %v324_v52 = vadd.f32 %v3067_v2, %v285_v44  ;;  %v323_v53 = vadd.f32 %v3067_v2, %v284_v45  ;;  %v253_v61 = vld [vmem:[%s3062_s26 + $0x88] sm:$0xff] }
  0x1b   : > { %400 = vst.msk [vmem:[#allocation2 + $0xa0] sm:$0x3] %vm381_vm1, %v2938_v0  ;;  %403 = vst.msk [vmem:[#allocation2 + $0xb8] sm:$0x3] %vm381_vm1, %v2938_v0  ;;  %v288_v54 = vmul.f32 %v3055_v1, %v249_v41  ;;  %v326_v57 = vadd.f32 %v3067_v2, %v287_v48  ;;  %v325_v58 = vadd.f32 %v3067_v2, %v286_v49  ;;  %v256_v62 = vld [vmem:[%s3062_s26 + $0xa0] sm:$0xff]  ;;  %v255_v63 = vld [vmem:[%s3062_s26 + $0x98] sm:$0xff] }
  0x1c   : > { %406 = vst.msk [vmem:[#allocation2 + $0xd0] sm:$0x3] %vm381_vm1, %v2938_v0  ;;  %409 = vst.msk [vmem:[#allocation2 + $0xe8] sm:$0x3] %vm381_vm1, %v2938_v0  ;;  %v328_v59 = vadd.f32 %v3067_v2, %v289_v50  ;;  %v291_v60 = vmul.f32 %v3055_v1, %v252_v46  ;;  %v356_v3 = vmax.f32 %v324_v52, 0.0  ;;  %v355_v4 = vmax.f32 %v323_v53, 0.0 }
  0x1d   : > { %412 = vst.msk [vmem:[#allocation2 + $0x100] sm:$0x3] %vm381_vm1, %v2938_v0  ;;  %415 = vst.msk [vmem:[#allocation2 + $0x118] sm:$0x3] %vm381_vm1, %v2938_v0  ;;  %v327_v5 = vadd.f32 %v3067_v2, %v288_v54  ;;  %v258_v6 = vld [vmem:[%s3062_s26 + $0xb0] sm:$0xff]  ;;  %v467_v7 = vld [vmem:[#allocation2] sm:$0xff]  ;;  %v290_v14 = vmul.f32 %v3055_v1, %v251_v55  ;;  %v293_v15 = vmul.f32 %v3055_v1, %v254_v56 }
  0x1e   : > { %418 = vst.msk [vmem:[#allocation2 + $0x130] sm:$0x3] %vm381_vm1, %v2938_v0  ;;  %421 = vst.msk [vmem:[#allocation2 + $0x148] sm:$0x3] %vm381_vm1, %v2938_v0  ;;  %v468_v8 = vld [vmem:[#allocation2 + $0x8] sm:$0xff]  ;;  %v358_v9 = vmax.f32 %v326_v57, 0.0  ;;  %v330_v12 = vadd.f32 %v3067_v2, %v291_v60  ;;  %v292_v16 = vmul.f32 %v3055_v1, %v253_v61  ;;  %v295_v21 = vmul.f32 %v3055_v1, %v256_v62 }
  0x1f   : > { %424 = vst.msk [vmem:[#allocation2 + $0x160] sm:$0x3] %vm381_vm1, %v2938_v0  ;;  %427 = vst.msk [vmem:[#allocation2 + $0x178] sm:$0x3] %vm381_vm1, %v2938_v0  ;;  %v532_v17 = vld [vmem:[#allocation2 + $0x9] sm:$0xff]  ;;  %v357_v10 = vmax.f32 %v325_v58, 0.0  ;;  %v294_v22 = vmul.f32 %v3055_v1, %v255_v63  ;;  %v297_v23 = vmul.f32 %v3055_v1, %v258_v6  ;;  %v329_v25 = vadd.f32 %v3067_v2, %v290_v14 }
  0x20   : > { %430 = vst.msk [vmem:[#allocation2 + $0x190] sm:$0x3] %vm381_vm1, %v2938_v0  ;;  %433 = vst.msk [vmem:[#allocation2 + $0x1a8] sm:$0x3] %vm381_vm1, %v2938_v0  ;;  %597 = vrot.lane.b32.xlu0 %v532_v17, %s2939_s29  ;;  %v353_v0 = vmax.f32 %v321_v51, 0.0  ;;  %v360_v11 = vmax.f32 %v328_v59, 0.0  ;;  %v332_v26 = vadd.f32 %v3067_v2, %v293_v15  ;;  %v331_v27 = vadd.f32 %v3067_v2, %v292_v16 }
  0x21   : > { %435 = vst.msk [vmem:[#allocation2 + $0x19] sm:$0xff] %vm378_vm0, %v346_v30  ;;  %437 = vst.msk [vmem:[#allocation2 + $0x31] sm:$0xff] %vm378_vm0, %v348_v31  ;;  %v359_v13 = vmax.f32 %v327_v5, 0.0  ;;  %v257_v17 = vld [vmem:[%s3062_s26 + $0xa8] sm:$0xff]  ;;  %v362_v20 = vmax.f32 %v330_v12, 0.0  ;;  %v260_v24 = vld [vmem:[%s3062_s26 + $0xc0] sm:$0xff]  ;;  %v334_v31 = vadd.f32 %v3067_v2, %v295_v21  ;;  %v336_v33 = vadd.f32 %v3067_v2, %v297_v23 }
  0x22   : > { %436 = vst.msk [vmem:[#allocation2 + $0x21] sm:$0xff] %vm378_vm0, %v347_v32  ;;  %439 = vst.msk [vmem:[#allocation2 + $0x49] sm:$0xff] %vm378_vm0, %v350_v37  ;;  %v259_v28 = vld [vmem:[%s3062_s26 + $0xb8] sm:$0xff]  ;;  %v333_v32 = vadd.f32 %v3067_v2, %v294_v22  ;;  %v296_v34 = vmul.f32 %v3055_v1, %v257_v17  ;;  %v262_v35 = vld [vmem:[%s3062_s26 + $0xd0] sm:$0xff]  ;;  %v361_v36 = vmax.f32 %v329_v25, 0.0  ;;  %v364_v37 = vmax.f32 %v332_v26, 0.0 }
  0x23   : > { %438 = vst.msk [vmem:[#allocation2 + $0x39] sm:$0xff] %vm378_vm0, %v349_v38  ;;  %441 = vst.msk [vmem:[#allocation2 + $0x61] sm:$0xff] %vm378_vm0, %v352_v39  ;;  %v363_v38 = vmax.f32 %v331_v27, 0.0  ;;  %v299_v39 = vmul.f32 %v3055_v1, %v260_v24  ;;  %v261_v40 = vld [vmem:[%s3062_s26 + $0xc8] sm:$0xff]  ;;  %v264_v41 = vld [vmem:[%s3062_s26 + $0xe0] sm:$0xff]  ;;  %v366_v43 = vmax.f32 %v334_v31, 0.0  ;;  %v298_v50 = vmul.f32 %v3055_v1, %v259_v28 }
  0x24   : > { %440 = vst.msk [vmem:[#allocation2 + $0x51] sm:$0xff] %vm378_vm0, %v351_v42  ;;  %443 = vst.msk [vmem:[#allocation2 + $0x79] sm:$0xff] %vm378_vm0, %v354_v47  ;;  %v263_v42 = vld [vmem:[%s3062_s26 + $0xd8] sm:$0xff]  ;;  %v365_v44 = vmax.f32 %v333_v32, 0.0  ;;  %v368_v45 = vmax.f32 %v336_v33, 0.0  ;;  %v335_v46 = vadd.f32 %v3067_v2, %v296_v34  ;;  %v265_v47 = vld [vmem:[%s3062_s26 + $0xe8] sm:$0xff]  ;;  %v301_v51 = vmul.f32 %v3055_v1, %v262_v35 }
  0x25   : > { %499 = vst.msk [vmem:[#allocation3] sm:$0xff] %vm378_vm0, %v467_v7  ;;  %500 = vst.msk [vmem:[#allocation3 + $0x8] sm:$0xff] %vm378_vm0, %v468_v8  ;;  %v338_v49 = vadd.f32 %v3067_v2, %v299_v39  ;;  %v300_v58 = vmul.f32 %v3055_v1, %v261_v40  ;;  %v303_v59 = vmul.f32 %v3055_v1, %v264_v41 }
  0x26   : > { %442 = vst.msk [vmem:[#allocation2 + $0x69] sm:$0xff] %vm378_vm0, %v353_v0  ;;  %445 = vst.msk [vmem:[#allocation2 + $0x91] sm:$0xff] %vm378_vm0, %v356_v3  ;;  %v367_v57 = vmax.f32 %v335_v46, 0.0  ;;  %v302_v60 = vmul.f32 %v3055_v1, %v263_v42  ;;  %v337_v62 = vadd.f32 %v3067_v2, %v298_v50  ;;  %v340_v63 = vadd.f32 %v3067_v2, %v301_v51 }
  0x27   : > { %444 = vst.msk [vmem:[#allocation2 + $0x81] sm:$0xff] %vm378_vm0, %v355_v4  ;;  %447 = vst.msk [vmem:[#allocation2 + $0xa9] sm:$0xff] %vm378_vm0, %v358_v9  ;;  %v370_v61 = vmax.f32 %v338_v49, 0.0  ;;  %v304_v0 = vmul.f32 %v3055_v1, %v265_v47  ;;  %v339_v3 = vadd.f32 %v3067_v2, %v300_v58  ;;  %v342_v4 = vadd.f32 %v3067_v2, %v303_v59 }
  0x28   : > { %v3142_v18 = vld [vmem:[#allocation2 + $0x19] sm:$0xff]  ;;  %v3144_v19 = vld [vmem:[#allocation2 + $0x31] sm:$0xff]  ;;  %446 = vst.msk [vmem:[#allocation2 + $0x99] sm:$0xff] %vm378_vm0, %v357_v10  ;;  %449 = vst.msk [vmem:[#allocation2 + $0xc1] sm:$0xff] %vm378_vm0, %v360_v11  ;;  %v341_v5 = vadd.f32 %v3067_v2, %v302_v60  ;;  %v369_v6 = vmax.f32 %v337_v62, 0.0  ;;  %v372_v7 = vmax.f32 %v340_v63, 0.0 }
  0x29   : > { %599 = vrot.lane.b32.xlu1 %v3142_v18, %s2939_s29  ;;  %603 = vrot.lane.b32.xlu0 %v3144_v19, %s2939_s29  ;;  %448 = vst.msk [vmem:[#allocation2 + $0xb1] sm:$0xff] %vm378_vm0, %v359_v13  ;;  %v3162_v29 = vld [vmem:[#allocation2 + $0x21] sm:$0xff]  ;;  %v3164_v30 = vld [vmem:[#allocation2 + $0x49] sm:$0xff]  ;;  %451 = vst.msk [vmem:[#allocation2 + $0xd9] sm:$0xff] %vm378_vm0, %v362_v20  ;;  %v343_v1 = vadd.f32 %v3067_v2, %v304_v0  ;;  %v371_v10 = vmax.f32 %v339_v3, 0.0  ;;  %v374_v11 = vmax.f32 %v342_v4, 0.0 }
  0x2a   : > { %v3178_v48 = vld [vmem:[#allocation2 + $0x18] sm:$0xff]  ;;  %450 = vst.msk [vmem:[#allocation2 + $0xc9] sm:$0xff] %vm378_vm0, %v361_v36  ;;  %453 = vst.msk [vmem:[#allocation2 + $0xf1] sm:$0xff] %vm378_vm0, %v364_v37  ;;  %v3192_v52 = vld [vmem:[#allocation2 + $0x30] sm:$0xff]  ;;  %v373_v12 = vmax.f32 %v341_v5, 0.0 }
  0x2b   : > { %452 = vst.msk [vmem:[#allocation2 + $0xe1] sm:$0xff] %vm378_vm0, %v363_v38  ;;  %501 = vst.msk [vmem:[#allocation3 + $0x10] sm:$0xff] %vm378_vm0, %v3178_v48  ;;  %v3194_v53 = vld [vmem:[#allocation2 + $0x20] sm:$0xff]  ;;  %v3196_v54 = vld [vmem:[#allocation2 + $0x48] sm:$0xff]  ;;  %v375_v13 = vmax.f32 %v343_v1, 0.0 }
  0x2c   : > { %v3198_v55 = vld [vmem:[#allocation2 + $0x39] sm:$0xff]  ;;  %v3200_v56 = vld [vmem:[#allocation2 + $0x61] sm:$0xff]  ;;  %455 = vst.msk [vmem:[#allocation2 + $0x109] sm:$0xff] %vm378_vm0, %v366_v43  ;;  %454 = vst.msk [vmem:[#allocation2 + $0xf9] sm:$0xff] %vm378_vm0, %v365_v44 }
  0x2d   : > { %601 = vrot.lane.b32.xlu1 %v3162_v29, %s2939_s29  ;;  %607 = vrot.lane.b32.xlu0 %v3164_v30, %s2939_s29  ;;  %457 = vst.msk [vmem:[#allocation2 + $0x121] sm:$0xff] %vm378_vm0, %v368_v45  ;;  %503 = vst.msk [vmem:[#allocation3 + $0x20] sm:$0xff] %vm378_vm0, %v3192_v52  ;;  %v3227_v8 = vld [vmem:[#allocation2 + $0x51] sm:$0xff]  ;;  %v3229_v9 = vld [vmem:[#allocation2 + $0x79] sm:$0xff] }
  0x2e   : > { %502 = vst.msk [vmem:[#allocation3 + $0x18] sm:$0xff] %vm378_vm0, %v3194_v53  ;;  %505 = vst.msk [vmem:[#allocation3 + $0x30] sm:$0xff] %vm378_vm0, %v3196_v54  ;;  %v3233_v14 = vld [vmem:[#allocation2 + $0x38] sm:$0xff]  ;;  %v3235_v15 = vld [vmem:[#allocation2 + $0x60] sm:$0xff] }
  0x2f   : > { %456 = vst.msk [vmem:[#allocation2 + $0x111] sm:$0xff] %vm378_vm0, %v367_v57  ;;  %459 = vst.msk [vmem:[#allocation2 + $0x139] sm:$0xff] %vm378_vm0, %v370_v61  ;;  %v3249_v2 = vld [vmem:[#allocation2 + $0x69] sm:$0xff]  ;;  %v543_v16 = vld [vmem:[#allocation2 + $0x91] sm:$0xff] }
  0x30   : > { %458 = vst.msk [vmem:[#allocation2 + $0x129] sm:$0xff] %vm378_vm0, %v369_v6  ;;  %461 = vst.msk [vmem:[#allocation2 + $0x151] sm:$0xff] %vm378_vm0, %v372_v7  ;;  %v3254_v17 = vld [vmem:[#allocation2 + $0x50] sm:$0xff]  ;;  %v3256_v20 = vld [vmem:[#allocation2 + $0x78] sm:$0xff] }
  0x31   : > { %605 = vrot.lane.b32.xlu1 %v3198_v55, %s2939_s29  ;;  %611 = vrot.lane.b32.xlu0 %v3200_v56, %s2939_s29  ;;  %460 = vst.msk [vmem:[#allocation2 + $0x141] sm:$0xff] %vm378_vm0, %v371_v10  ;;  %463 = vst.msk [vmem:[#allocation2 + $0x169] sm:$0xff] %vm378_vm0, %v374_v11  ;;  %v3258_v21 = vld [vmem:[#allocation2 + $0x81] sm:$0xff]  ;;  %v545_v22 = vld [vmem:[#allocation2 + $0xa9] sm:$0xff] }
  0x32   : > { %462 = vst.msk [vmem:[#allocation2 + $0x159] sm:$0xff] %vm378_vm0, %v373_v12  ;;  %504 = vst.msk [vmem:[#allocation3 + $0x28] sm:$0xff] %vm378_vm0, %v3233_v14  ;;  %v3267_v23 = vld [vmem:[#allocation2 + $0x99] sm:$0xff]  ;;  %v547_v24 = vld [vmem:[#allocation2 + $0xc1] sm:$0xff] }
  0x33   : > { %507 = vst.msk [vmem:[#allocation3 + $0x40] sm:$0xff] %vm378_vm0, %v3235_v15  ;;  %464 = vst.msk [vmem:[#allocation2 + $0x171] sm:$0xff] %vm378_vm0, %v375_v13  ;;  %v3269_v25 = vld [vmem:[#allocation2 + $0x68] sm:$0xff]  ;;  %v3273_v26 = vld [vmem:[#allocation2 + $0x90] sm:$0xff] }
  0x34   : > { %506 = vst.msk [vmem:[#allocation3 + $0x38] sm:$0xff] %vm378_vm0, %v3254_v17  ;;  %509 = vst.msk [vmem:[#allocation3 + $0x50] sm:$0xff] %vm378_vm0, %v3256_v20  ;;  %v3275_v27 = vld [vmem:[#allocation2 + $0x80] sm:$0xff]  ;;  %v3277_v28 = vld [vmem:[#allocation2 + $0xa8] sm:$0xff] }
  0x35   : > { %609 = vrot.lane.b32.xlu1 %v3227_v8, %s2939_s29  ;;  %615 = vrot.lane.b32.xlu0 %v3229_v9, %s2939_s29  ;;  %508 = vst.msk [vmem:[#allocation3 + $0x48] sm:$0xff] %vm378_vm0, %v3269_v25  ;;  %v546_v31 = vld [vmem:[#allocation2 + $0xb1] sm:$0xff]  ;;  %v549_v32 = vld [vmem:[#allocation2 + $0xd9] sm:$0xff]  ;;  %511 = vst.msk [vmem:[#allocation3 + $0x60] sm:$0xff] %vm378_vm0, %v3273_v26 }
  0x36   : > { %510 = vst.msk [vmem:[#allocation3 + $0x58] sm:$0xff] %vm378_vm0, %v3275_v27  ;;  %513 = vst.msk [vmem:[#allocation3 + $0x70] sm:$0xff] %vm378_vm0, %v3277_v28  ;;  %v3285_v33 = vld [vmem:[#allocation2 + $0x98] sm:$0xff]  ;;  %v3287_v34 = vld [vmem:[#allocation2 + $0xc0] sm:$0xff] }
  0x37   : > { %v3289_v35 = vld [vmem:[#allocation2 + $0xb0] sm:$0xff]  ;;  %512 = vst.msk [vmem:[#allocation3 + $0x68] sm:$0xff] %vm378_vm0, %v3285_v33  ;;  %515 = vst.msk [vmem:[#allocation3 + $0x80] sm:$0xff] %vm378_vm0, %v3287_v34  ;;  %v3300_v36 = vld [vmem:[#allocation2 + $0xd8] sm:$0xff] }
  0x38   : > { %514 = vst.msk [vmem:[#allocation3 + $0x78] sm:$0xff] %vm378_vm0, %v3289_v35  ;;  %v3302_v37 = vld [vmem:[#allocation2 + $0xc8] sm:$0xff]  ;;  %v3304_v38 = vld [vmem:[#allocation2 + $0xf0] sm:$0xff]  ;;  %517 = vst.msk [vmem:[#allocation3 + $0x90] sm:$0xff] %vm378_vm0, %v3300_v36 }
  0x39   : > { %613 = vrot.lane.b32.xlu1 %v3249_v2, %s2939_s29  ;;  %619 = vrot.lane.b32.xlu0 %v543_v16, %s2939_s29  ;;  %516 = vst.msk [vmem:[#allocation3 + $0x88] sm:$0xff] %vm378_vm0, %v3302_v37  ;;  %519 = vst.msk [vmem:[#allocation3 + $0xa0] sm:$0xff] %vm378_vm0, %v3304_v38  ;;  %v3312_v39 = vld [vmem:[#allocation2 + $0xe0] sm:$0xff]  ;;  %v3314_v40 = vld [vmem:[#allocation2 + $0x108] sm:$0xff] }
  0x3a   : > { %v3316_v41 = vld [vmem:[#allocation2 + $0xf8] sm:$0xff]  ;;  %518 = vst.msk [vmem:[#allocation3 + $0x98] sm:$0xff] %vm378_vm0, %v3312_v39  ;;  %521 = vst.msk [vmem:[#allocation3 + $0xb0] sm:$0xff] %vm378_vm0, %v3314_v40  ;;  %v3324_v42 = vld [vmem:[#allocation2 + $0x120] sm:$0xff] }
  0x3b   : > { %520 = vst.msk [vmem:[#allocation3 + $0xa8] sm:$0xff] %vm378_vm0, %v3316_v41  ;;  %523 = vst.msk [vmem:[#allocation3 + $0xc0] sm:$0xff] %vm378_vm0, %v3324_v42  ;;  %v3330_v43 = vld [vmem:[#allocation2 + $0x110] sm:$0xff]  ;;  %v493_v46 = vld [vmem:[#allocation2 + $0x138] sm:$0xff] }
  0x3c   : > { %v548_v44 = vld [vmem:[#allocation2 + $0xc9] sm:$0xff]  ;;  %v551_v45 = vld [vmem:[#allocation2 + $0xf1] sm:$0xff]  ;;  %522 = vst.msk [vmem:[#allocation3 + $0xb8] sm:$0xff] %vm378_vm0, %v3330_v43  ;;  %525 = vst.msk [vmem:[#allocation3 + $0xd0] sm:$0xff] %vm378_vm0, %v493_v46 }
  0x3d   : > { %617 = vrot.lane.b32.xlu1 %v3258_v21, %s2939_s29  ;;  %623 = vrot.lane.b32.xlu0 %v545_v22, %s2939_s29  ;;  %v3337_v47 = vld [vmem:[#allocation2 + $0x128] sm:$0xff]  ;;  %v495_v51 = vld [vmem:[#allocation2 + $0x150] sm:$0xff]  ;;  %v494_v57 = vld [vmem:[#allocation2 + $0x140] sm:$0xff] }
  0x3e   : > { %v550_v49 = vld [vmem:[#allocation2 + $0xe1] sm:$0xff]  ;;  %v553_v50 = vld [vmem:[#allocation2 + $0x109] sm:$0xff]  ;;  %524 = vst.msk [vmem:[#allocation3 + $0xc8] sm:$0xff] %vm378_vm0, %v3337_v47  ;;  %527 = vst.msk [vmem:[#allocation3 + $0xe0] sm:$0xff] %vm378_vm0, %v495_v51 }
  0x3f   : > { %v552_v58 = vld [vmem:[#allocation2 + $0xf9] sm:$0xff]  ;;  %v555_v59 = vld [vmem:[#allocation2 + $0x121] sm:$0xff]  ;;  %526 = vst.msk [vmem:[#allocation3 + $0xd8] sm:$0xff] %vm378_vm0, %v494_v57  ;;  %v554_v62 = vld [vmem:[#allocation2 + $0x111] sm:$0xff] }
  0x40   : > { %v497_v60 = vld [vmem:[#allocation2 + $0x168] sm:$0xff]  ;;  %v496_v61 = vld [vmem:[#allocation2 + $0x158] sm:$0xff]  ;;  %v498_v0 = vld [vmem:[#allocation2 + $0x170] sm:$0xff] }
  0x41   : > { %621 = vrot.lane.b32.xlu1 %v3267_v23, %s2939_s29  ;;  %627 = vrot.lane.b32.xlu0 %v547_v24, %s2939_s29  ;;  %529 = vst.msk [vmem:[#allocation3 + $0xf0] sm:$0xff] %vm378_vm0, %v497_v60  ;;  %v557_v63 = vld [vmem:[#allocation2 + $0x139] sm:$0xff]  ;;  %528 = vst.msk [vmem:[#allocation3 + $0xe8] sm:$0xff] %vm378_vm0, %v496_v61  ;;  %v556_v3 = vld [vmem:[#allocation2 + $0x129] sm:$0xff] }
  0x42   : > { %v559_v4 = vld [vmem:[#allocation2 + $0x151] sm:$0xff]  ;;  %530 = vst.msk [vmem:[#allocation3 + $0xf8] sm:$0xff] %vm378_vm0, %v498_v0  ;;  %v558_v5 = vld [vmem:[#allocation2 + $0x141] sm:$0xff]  ;;  %v561_v6 = vld [vmem:[#allocation2 + $0x169] sm:$0xff] }
  0x43   : > { %v560_v7 = vld [vmem:[#allocation2 + $0x159] sm:$0xff]  ;;  %v724_v1 = vld [vmem:[#allocation2 + $0x2] sm:$0xff]  ;;  %v562_v10 = vld [vmem:[#allocation2 + $0x171] sm:$0xff] }
  0x44   : > { %v3358_v11 = vld [vmem:[#allocation2 + $0x1a] sm:$0xff]  ;;  %v725_v12 = vld [vmem:[#allocation2 + $0xa] sm:$0xff]  ;;  %v3363_v13 = vld [vmem:[#allocation2 + $0x32] sm:$0xff] }
  0x45   : > { %625 = vrot.lane.b32.xlu1 %v546_v31, %s2939_s29  ;;  %631 = vrot.lane.b32.xlu0 %v549_v32, %s2939_s29  ;;  %v3368_v16 = vld [vmem:[#allocation2 + $0x22] sm:$0xff]  ;;  %v3370_v22 = vld [vmem:[#allocation2 + $0x4a] sm:$0xff]  ;;  %v3376_v24 = vld [vmem:[#allocation2 + $0x3a] sm:$0xff] }
  0x46   : > { %v3378_v31 = vld [vmem:[#allocation2 + $0x62] sm:$0xff]  ;;  %v3384_v32 = vld [vmem:[#allocation2 + $0x52] sm:$0xff]  ;;  %v3408_v51 = vld [vmem:[#allocation2 + $0x9a] sm:$0xff] }
  0x47   : > { %v3394_v46 = vld [vmem:[#allocation2 + $0x92] sm:$0xff]  ;;  %v3410_v57 = vld [vmem:[#allocation2 + $0xc2] sm:$0xff]  ;;  %v3421_v60 = vld [vmem:[#allocation2 + $0xca] sm:$0xff] }
  0x48   : > { %v744_v61 = vld [vmem:[#allocation2 + $0xf2] sm:$0xff]  ;;  %v745_v0 = vld [vmem:[#allocation2 + $0xfa] sm:$0xff] }
  0x49   : > { %629 = vrot.lane.b32.xlu1 %v548_v44, %s2939_s29  ;;  %635 = vrot.lane.b32.xlu0 %v551_v45, %s2939_s29  ;;  %v3386_v44 = vld [vmem:[#allocation2 + $0x7a] sm:$0xff]  ;;  %v3392_v45 = vld [vmem:[#allocation2 + $0x6a] sm:$0xff] }
  0x4d   : > { %633 = vrot.lane.b32.xlu1 %v550_v49, %s2939_s29  ;;  %639 = vrot.lane.b32.xlu0 %v553_v50, %s2939_s29  ;;  %v3400_v49 = vld [vmem:[#allocation2 + $0x82] sm:$0xff]  ;;  %v3402_v50 = vld [vmem:[#allocation2 + $0xaa] sm:$0xff] }
  0x51   : > { %637 = vrot.lane.b32.xlu1 %v552_v58, %s2939_s29  ;;  %643 = vrot.lane.b32.xlu0 %v555_v59, %s2939_s29  ;;  %v3416_v58 = vld [vmem:[#allocation2 + $0xb2] sm:$0xff]  ;;  %v742_v59 = vld [vmem:[#allocation2 + $0xda] sm:$0xff] }
  0x55   : > { %641 = vrot.lane.b32.xlu1 %v554_v62, %s2939_s29  ;;  %647 = vrot.lane.b32.xlu0 %v557_v63, %s2939_s29  ;;  %v743_v62 = vld [vmem:[#allocation2 + $0xe2] sm:$0xff]  ;;  %v746_v63 = vld [vmem:[#allocation2 + $0x10a] sm:$0xff] }
  0x59   : > { %645 = vrot.lane.b32.xlu1 %v556_v3, %s2939_s29  ;;  %651 = vrot.lane.b32.xlu0 %v559_v4, %s2939_s29  ;;  %v748_v3 = vld [vmem:[#allocation2 + $0x122] sm:$0xff] }
  0x5d   : > { %649 = vrot.lane.b32.xlu1 %v558_v5, %s2939_s29  ;;  %655 = vrot.lane.b32.xlu0 %v561_v6, %s2939_s29  ;;  %v747_v5 = vld [vmem:[#allocation2 + $0x112] sm:$0xff]  ;;  %v750_v6 = vld [vmem:[#allocation2 + $0x13a] sm:$0xff] }
  0x61   : > { %653 = vrot.lane.b32.xlu1 %v560_v7, %s2939_s29  ;;  %788 = vrot.lane.b32.xlu0 %v724_v1, %s2940_s30  ;;  %v749_v1 = vld [vmem:[#allocation2 + $0x12a] sm:$0xff] }
  0x65   : > { %657 = vrot.lane.b32.xlu1 %v562_v10, %s2939_s29  ;;  %792 = vrot.lane.b32.xlu0 %v3358_v11, %s2940_s30  ;;  %v752_v10 = vld [vmem:[#allocation2 + $0x152] sm:$0xff] }
  0x69   : > { %790 = vrot.lane.b32.xlu1 %v725_v12, %s2940_s30  ;;  %796 = vrot.lane.b32.xlu0 %v3363_v13, %s2940_s30  ;;  %v751_v12 = vld [vmem:[#allocation2 + $0x142] sm:$0xff] }
  0x6d   : > { %794 = vrot.lane.b32.xlu1 %v3368_v16, %s2940_s30  ;;  %800 = vrot.lane.b32.xlu0 %v3370_v22, %s2940_s30 }
  0x71   : > { %798 = vrot.lane.b32.xlu1 %v3376_v24, %s2940_s30  ;;  %804 = vrot.lane.b32.xlu0 %v3378_v31, %s2940_s30 }
  0x75   : > { %802 = vrot.lane.b32.xlu1 %v3384_v32, %s2940_s30  ;;  %808 = vrot.lane.b32.xlu0 %v3386_v44, %s2940_s30 }
  0x79   : > { %806 = vrot.lane.b32.xlu1 %v3392_v45, %s2940_s30  ;;  %812 = vrot.lane.b32.xlu0 %v3394_v46, %s2940_s30 }
  0x7d   : > { %810 = vrot.lane.b32.xlu1 %v3400_v49, %s2940_s30  ;;  %816 = vrot.lane.b32.xlu0 %v3402_v50, %s2940_s30 }
  0x80   : > { %v596_v4 = vpop.permute.xlu0 %595 }
  0x81   : > { %814 = vrot.lane.b32.xlu1 %v3408_v51, %s2940_s30  ;;  %820 = vrot.lane.b32.xlu0 %v3410_v57, %s2940_s30  ;;  %692 = vst.msk [vmem:[#allocation3] sm:$0xff] %vm691_vm2, %v596_v4  ;;  %v755_v4 = vld [vmem:[#allocation2 + $0x172] sm:$0xff] }
  0x85   : > { %818 = vrot.lane.b32.xlu1 %v3416_v58, %s2940_s30  ;;  %824 = vrot.lane.b32.xlu0 %v742_v59, %s2940_s30  ;;  %v754_v59 = vld [vmem:[#allocation2 + $0x16a] sm:$0xff] }
  0x89   : > { %822 = vrot.lane.b32.xlu1 %v3421_v60, %s2940_s30  ;;  %828 = vrot.lane.b32.xlu0 %v744_v61, %s2940_s30 }
  0x8d   : > { %826 = vrot.lane.b32.xlu1 %v743_v62, %s2940_s30  ;;  %832 = vrot.lane.b32.xlu0 %v746_v63, %s2940_s30  ;;  %v753_v63 = vld [vmem:[#allocation2 + $0x15a] sm:$0xff] }
  0x91   : > { %830 = vrot.lane.b32.xlu1 %v745_v0, %s2940_s30  ;;  %836 = vrot.lane.b32.xlu0 %v748_v3, %s2940_s30 }
  0x92   : > { %v598_v7 = vpop.permute.xlu0 %597 }
  0x93   : > { %693 = vst.msk [vmem:[#allocation3 + $0x8] sm:$0xff] %vm691_vm2, %v598_v7 }
  0x95   : > { %834 = vrot.lane.b32.xlu1 %v747_v5, %s2940_s30  ;;  %840 = vrot.lane.b32.xlu0 %v750_v6, %s2940_s30 }
  0x99   : > { %838 = vrot.lane.b32.xlu1 %v749_v1, %s2940_s30  ;;  %844 = vrot.lane.b32.xlu0 %v752_v10, %s2940_s30 }
  0x9b   : > { %v600_v61 = vpop.permute.xlu1 %599  ;;  %v604_v62 = vpop.permute.xlu0 %603 }
  0x9c   : > { %694 = vst.msk [vmem:[#allocation3 + $0x10] sm:$0xff] %vm691_vm2, %v600_v61  ;;  %696 = vst.msk [vmem:[#allocation3 + $0x20] sm:$0xff] %vm691_vm2, %v604_v62 }
  0x9d   : > { %842 = vrot.lane.b32.xlu1 %v751_v12, %s2940_s30  ;;  %848 = vrot.lane.b32.xlu0 %v754_v59, %s2940_s30 }
  0x9f   : > { %v602_v0 = vpop.permute.xlu1 %601  ;;  %v608_v3 = vpop.permute.xlu0 %607 }
  0xa0   : > { %695 = vst.msk [vmem:[#allocation3 + $0x18] sm:$0xff] %vm691_vm2, %v602_v0  ;;  %698 = vst.msk [vmem:[#allocation3 + $0x30] sm:$0xff] %vm691_vm2, %v608_v3 }
  0xa1   : > { %846 = vrot.lane.b32.xlu1 %v753_v63, %s2940_s30  ;;  %981 = vrot.lane.b32.xlu0 %v3178_v48, %s2941_s6 }
  0xa3   : > { %v606_v5 = vpop.permute.xlu1 %605  ;;  %v612_v6 = vpop.permute.xlu0 %611 }
  0xa4   : > { %697 = vst.msk [vmem:[#allocation3 + $0x28] sm:$0xff] %vm691_vm2, %v606_v5  ;;  %700 = vst.msk [vmem:[#allocation3 + $0x40] sm:$0xff] %vm691_vm2, %v612_v6  ;;  %v2109_v5 = vld [vmem:[%s4194_s3 + $0x8] sm:$0xff] }
  0xa5   : > { %850 = vrot.lane.b32.xlu1 %v755_v4, %s2940_s30  ;;  %985 = vrot.lane.b32.xlu0 %v3192_v52, %s2941_s6  ;;  %v2108_v4 = vld [vmem:[%s4194_s3] sm:$0xff]  ;;  %s2945_s30 = smov 56  }
  0xa6   : > { %v2885_v6 = vpack.c.bf16 %v2109_v5, %v2108_v4 }
  0xa7   : > { %v610_v7 = vpop.permute.xlu1 %609  ;;  %v616_v1 = vpop.permute.xlu0 %615 }
  0xa8   : > { %699 = vst.msk [vmem:[#allocation3 + $0x38] sm:$0xff] %vm691_vm2, %v610_v7  ;;  %702 = vst.msk [vmem:[#allocation3 + $0x50] sm:$0xff] %vm691_vm2, %v616_v1  ;;  %2886 = vmatprep.subr.bf16.mxu0 %v2885_v6  ;;  %2901 = vmatprep.subr.bf16.mxu1 %v2885_v6  ;;  %v2110_v1 = vld [vmem:[%s4194_s3 + $0x10] sm:$0xff] }
  0xa9   : > { %983 = vrot.lane.b32.xlu1 %v3194_v53, %s2941_s6  ;;  %989 = vrot.lane.b32.xlu0 %v3196_v54, %s2941_s6 }
  0xaa   : > { %2888 = vmatpush3.bf16.msra.mxu0 %v2885_v6  ;;  %2906 = vmatpush3.bf16.msra.mxu1 %v2885_v6 }
  0xab   : > { %v614_v48 = vpop.permute.xlu1 %613  ;;  %v620_v10 = vpop.permute.xlu0 %619 }
  0xac   : > { %701 = vst.msk [vmem:[#allocation3 + $0x48] sm:$0xff] %vm691_vm2, %v614_v48  ;;  %704 = vst.msk [vmem:[#allocation3 + $0x60] sm:$0xff] %vm691_vm2, %v620_v10  ;;  %v2111_v48 = vld [vmem:[%s4194_s3 + $0x18] sm:$0xff] }
  0xad   : > { %987 = vrot.lane.b32.xlu1 %v3233_v14, %s2941_s6  ;;  %993 = vrot.lane.b32.xlu0 %v3235_v15, %s2941_s6 }
  0xaf   : > { %v618_v12 = vpop.permute.xlu1 %617  ;;  %v624_v59 = vpop.permute.xlu0 %623 }
  0xb0   : > { %703 = vst.msk [vmem:[#allocation3 + $0x58] sm:$0xff] %vm691_vm2, %v618_v12  ;;  %706 = vst.msk [vmem:[#allocation3 + $0x70] sm:$0xff] %vm691_vm2, %v624_v59  ;;  %v2112_v12 = vld [vmem:[%s4194_s3 + $0x20] sm:$0xff]  ;;  %v2113_v59 = vld [vmem:[%s4194_s3 + $0x28] sm:$0xff] }
  0xb1   : > { %991 = vrot.lane.b32.xlu1 %v3254_v17, %s2941_s6  ;;  %997 = vrot.lane.b32.xlu0 %v3256_v20, %s2941_s6 }
  0xb3   : > { %v622_v53 = vpop.permute.xlu1 %621  ;;  %v628_v61 = vpop.permute.xlu0 %627 }
  0xb4   : > { %705 = vst.msk [vmem:[#allocation3 + $0x68] sm:$0xff] %vm691_vm2, %v622_v53  ;;  %708 = vst.msk [vmem:[#allocation3 + $0x80] sm:$0xff] %vm691_vm2, %v628_v61  ;;  %v2114_v61 = vld [vmem:[%s4194_s3 + $0x30] sm:$0xff] }
  0xb5   : > { %995 = vrot.lane.b32.xlu1 %v3269_v25, %s2941_s6  ;;  %1001 = vrot.lane.b32.xlu0 %v3273_v26, %s2941_s6 }
  0xb7   : > { %v626_v62 = vpop.permute.xlu1 %625  ;;  %v632_v63 = vpop.permute.xlu0 %631 }
  0xb8   : > { %707 = vst.msk [vmem:[#allocation3 + $0x78] sm:$0xff] %vm691_vm2, %v626_v62  ;;  %710 = vst.msk [vmem:[#allocation3 + $0x90] sm:$0xff] %vm691_vm2, %v632_v63  ;;  %v2115_v62 = vld [vmem:[%s4194_s3 + $0x38] sm:$0xff] }
  0xb9   : > { %999 = vrot.lane.b32.xlu1 %v3275_v27, %s2941_s6  ;;  %1176 = vrot.lane.b32.xlu0 %v3162_v29, %s2942_s7 }
  0xbb   : > { %v630_v0 = vpop.permute.xlu1 %629  ;;  %v636_v3 = vpop.permute.xlu0 %635 }
  0xbc   : > { %709 = vst.msk [vmem:[#allocation3 + $0x88] sm:$0xff] %vm691_vm2, %v630_v0  ;;  %712 = vst.msk [vmem:[#allocation3 + $0xa0] sm:$0xff] %vm691_vm2, %v636_v3 }
  0xbd   : > { %1174 = vrot.lane.b32.xlu1 %v3142_v18, %s2942_s7  ;;  %1369 = vrot.lane.b32.xlu0 %v3368_v16, %s2943_s12  ;;  %v2889_v18 = vpack.c.bf16 %v2111_v48, %v2110_v1 }
  0xbf   : > { %v634_v29 = vpop.permute.xlu1 %633  ;;  %v640_v7 = vpop.permute.xlu0 %639  ;;  %2890 = vmatprep.subr.bf16.mxu0 %v2889_v18  ;;  %2902 = vmatprep.subr.bf16.mxu1 %v2889_v18 }
  0xc0   : > { %711 = vst.msk [vmem:[#allocation3 + $0x98] sm:$0xff] %vm691_vm2, %v634_v29  ;;  %714 = vst.msk [vmem:[#allocation3 + $0xb0] sm:$0xff] %vm691_vm2, %v640_v7  ;;  %2892 = vmatpush3.bf16.msra.mxu0 %v2889_v18  ;;  %2907 = vmatpush3.bf16.msra.mxu1 %v2889_v18 }
  0xc1   : > { %1367 = vrot.lane.b32.xlu1 %v3358_v11, %s2943_s12  ;;  %1563 = vrot.lane.b32.xlu0 %v3233_v14, %s2944_s17  ;;  %v2893_v11 = vpack.c.bf16 %v2113_v59, %v2112_v12 }
  0xc3   : > { %v638_v16 = vpop.permute.xlu1 %637  ;;  %v644_v10 = vpop.permute.xlu0 %643  ;;  %2894 = vmatprep.subr.bf16.mxu0 %v2893_v11  ;;  %2903 = vmatprep.subr.bf16.mxu1 %v2893_v11 }
  0xc4   : > { %713 = vst.msk [vmem:[#allocation3 + $0xa8] sm:$0xff] %vm691_vm2, %v638_v16  ;;  %716 = vst.msk [vmem:[#allocation3 + $0xc0] sm:$0xff] %vm691_vm2, %v644_v10  ;;  %2896 = vmatpush3.bf16.msra.mxu0 %v2893_v11  ;;  %2908 = vmatpush3.bf16.msra.mxu1 %v2893_v11 }
  0xc5   : > { %1561 = vrot.lane.b32.xlu1 %v3192_v52, %s2944_s17  ;;  %1178 = vrot.lane.b32.xlu0 %v3144_v19, %s2942_s7  ;;  %v2897_v52 = vpack.c.bf16 %v2115_v62, %v2114_v61 }
  0xc7   : > { %v642_v14 = vpop.permute.xlu1 %641  ;;  %v648_v53 = vpop.permute.xlu0 %647  ;;  %2898 = vmatprep.subr.bf16.mxu0 %v2897_v52  ;;  %2904 = vmatprep.subr.bf16.mxu1 %v2897_v52 }
  0xc8   : > { %715 = vst.msk [vmem:[#allocation3 + $0xb8] sm:$0xff] %vm691_vm2, %v642_v14  ;;  %718 = vst.msk [vmem:[#allocation3 + $0xd0] sm:$0xff] %vm691_vm2, %v648_v53  ;;  %2900 = vmatpush3.bf16.msra.mxu0 %v2897_v52  ;;  %2909 = vmatpush3.bf16.msra.mxu1 %v2897_v52 }
  0xc9   : > { %1754 = vrot.lane.b32.xlu1 %v3144_v19, %s2945_s30  ;;  %1947 = vrot.lane.b32.xlu0 %v3363_v13, %s2946_s8  ;;  %v2116_v19 = vld [vmem:[%s4194_s3 + $0x40] sm:$0xff] }
  0xca   : > { %2835 = vmatprep.subr.mxu0 %v2116_v19  ;;  %2905 = vmatprep.subr.mxu1 %v2116_v19 }
  0xcb   : > { %v646_v63 = vpop.permute.xlu1 %645  ;;  %v652_v0 = vpop.permute.xlu0 %651 }
  0xcc   : > { %717 = vst.msk [vmem:[#allocation3 + $0xc8] sm:$0xff] %vm691_vm2, %v646_v63  ;;  %720 = vst.msk [vmem:[#allocation3 + $0xe0] sm:$0xff] %vm691_vm2, %v652_v0  ;;  %2836 = vmatpush3.msra.mxu0 %v2116_v19  ;;  %2910 = vmatpush3.msra.mxu1 %v2116_v19 }
  0xcd   : > { %1756 = vrot.lane.b32.xlu1 %v3198_v55, %s2945_s30  ;;  %1371 = vrot.lane.b32.xlu0 %v3363_v13, %s2943_s12 }
  0xcf   : > { %v650_v3 = vpop.permute.xlu1 %649  ;;  %v656_v4 = vpop.permute.xlu0 %655 }
  0xd0   : > { %719 = vst.msk [vmem:[#allocation3 + $0xd8] sm:$0xff] %vm691_vm2, %v650_v3  ;;  %722 = vst.msk [vmem:[#allocation3 + $0xf0] sm:$0xff] %vm691_vm2, %v656_v4 }
  0xd1   : > { %1180 = vrot.lane.b32.xlu1 %v3198_v55, %s2942_s7  ;;  %1373 = vrot.lane.b32.xlu0 %v3376_v24, %s2943_s12 }
  0xd3   : > { %v654_v13 = vpop.permute.xlu1 %653  ;;  %v789_v5 = vpop.permute.xlu0 %788 }
  0xd4   : > { %721 = vst.msk [vmem:[#allocation3 + $0xe8] sm:$0xff] %vm691_vm2, %v654_v13 }
  0xd5   : > { %885 = vst.msk [vmem:[#allocation3] sm:$0xff] %vm884_vm3, %v789_v5  ;;  %1949 = vrot.lane.b32.xlu1 %v3376_v24, %s2946_s8  ;;  %1567 = vrot.lane.b32.xlu0 %v3254_v17, %s2944_s17 }
  0xd7   : > { %v658_v6 = vpop.permute.xlu1 %657  ;;  %v793_v29 = vpop.permute.xlu0 %792 }
  0xd8   : > { %723 = vst.msk [vmem:[#allocation3 + $0xf8] sm:$0xff] %vm691_vm2, %v658_v6  ;;  %v1701_v6 = vld [vmem:[#allocation2 + $0xb1] sm:$0xff] }
  0xd9   : > { %887 = vst.msk [vmem:[#allocation3 + $0x10] sm:$0xff] %vm884_vm3, %v793_v29  ;;  %1565 = vrot.lane.b32.xlu1 %v3196_v54, %s2944_s17  ;;  %1182 = vrot.lane.b32.xlu0 %v3164_v30, %s2942_s7 }
  0xdb   : > { %v791_v55 = vpop.permute.xlu1 %790  ;;  %v797_v7 = vpop.permute.xlu0 %796 }
  0xdc   : > { %886 = vst.msk [vmem:[#allocation3 + $0x8] sm:$0xff] %vm884_vm3, %v791_v55  ;;  %889 = vst.msk [vmem:[#allocation3 + $0x20] sm:$0xff] %vm884_vm3, %v797_v7 }
  0xdd   : > { %1758 = vrot.lane.b32.xlu1 %v3164_v30, %s2945_s30  ;;  %1951 = vrot.lane.b32.xlu0 %v3370_v22, %s2946_s8 }
  0xdf   : > { %v795_v17 = vpop.permute.xlu1 %794  ;;  %v801_v24 = vpop.permute.xlu0 %800 }
  0xe0   : > { %888 = vst.msk [vmem:[#allocation3 + $0x18] sm:$0xff] %vm884_vm3, %v795_v17  ;;  %891 = vst.msk [vmem:[#allocation3 + $0x30] sm:$0xff] %vm884_vm3, %v801_v24 }
  0xe1   : > { %1760 = vrot.lane.b32.xlu1 %v3227_v8, %s2945_s30  ;;  %1375 = vrot.lane.b32.xlu0 %v3370_v22, %s2943_s12 }
  0xe3   : > { %v799_v54 = vpop.permute.xlu1 %798  ;;  %v805_v1 = vpop.permute.xlu0 %804 }
  0xe4   : > { %890 = vst.msk [vmem:[#allocation3 + $0x28] sm:$0xff] %vm884_vm3, %v799_v54  ;;  %893 = vst.msk [vmem:[#allocation3 + $0x40] sm:$0xff] %vm884_vm3, %v805_v1 }
  0xe5   : > { %1184 = vrot.lane.b32.xlu1 %v3227_v8, %s2942_s7  ;;  %1377 = vrot.lane.b32.xlu0 %v3384_v32, %s2943_s12 }
  0xe7   : > { %v803_v30 = vpop.permute.xlu1 %802  ;;  %v809_v48 = vpop.permute.xlu0 %808 }
  0xe8   : > { %892 = vst.msk [vmem:[#allocation3 + $0x38] sm:$0xff] %vm884_vm3, %v803_v30  ;;  %895 = vst.msk [vmem:[#allocation3 + $0x50] sm:$0xff] %vm884_vm3, %v809_v48 }
  0xe9   : > { %1953 = vrot.lane.b32.xlu1 %v3384_v32, %s2946_s8  ;;  %1571 = vrot.lane.b32.xlu0 %v3269_v25, %s2944_s17 }
  0xeb   : > { %v807_v22 = vpop.permute.xlu1 %806  ;;  %v813_v18 = vpop.permute.xlu0 %812 }
  0xec   : > { %894 = vst.msk [vmem:[#allocation3 + $0x48] sm:$0xff] %vm884_vm3, %v807_v22  ;;  %897 = vst.msk [vmem:[#allocation3 + $0x60] sm:$0xff] %vm884_vm3, %v813_v18  ;;  %v1702_v22 = vld [vmem:[#allocation2 + $0xc1] sm:$0xff]  ;;  %v1703_v18 = vld [vmem:[#allocation2 + $0xc9] sm:$0xff] }
  0xed   : > { %1569 = vrot.lane.b32.xlu1 %v3235_v15, %s2944_s17  ;;  %1186 = vrot.lane.b32.xlu0 %v3200_v56, %s2942_s7 }
  0xef   : > { %v811_v8 = vpop.permute.xlu1 %810  ;;  %v817_v16 = vpop.permute.xlu0 %816 }
  0xf0   : > { %896 = vst.msk [vmem:[#allocation3 + $0x58] sm:$0xff] %vm884_vm3, %v811_v8  ;;  %899 = vst.msk [vmem:[#allocation3 + $0x70] sm:$0xff] %vm884_vm3, %v817_v16 }
  0xf1   : > { %1762 = vrot.lane.b32.xlu1 %v3200_v56, %s2945_s30  ;;  %1955 = vrot.lane.b32.xlu0 %v3378_v31, %s2946_s8 }
  0xf3   : > { %v815_v25 = vpop.permute.xlu1 %814  ;;  %v821_v32 = vpop.permute.xlu0 %820 }
  0xf4   : > { %898 = vst.msk [vmem:[#allocation3 + $0x68] sm:$0xff] %vm884_vm3, %v815_v25  ;;  %901 = vst.msk [vmem:[#allocation3 + $0x80] sm:$0xff] %vm884_vm3, %v821_v32 }
  0xf5   : > { %1764 = vrot.lane.b32.xlu1 %v3249_v2, %s2945_s30  ;;  %1379 = vrot.lane.b32.xlu0 %v3378_v31, %s2943_s12 }
  0xf7   : > { %v819_v15 = vpop.permute.xlu1 %818  ;;  %v825_v10 = vpop.permute.xlu0 %824 }
  0xf8   : > { %900 = vst.msk [vmem:[#allocation3 + $0x78] sm:$0xff] %vm884_vm3, %v819_v15  ;;  %903 = vst.msk [vmem:[#allocation3 + $0x90] sm:$0xff] %vm884_vm3, %v825_v10 }
  0xf9   : > { %1188 = vrot.lane.b32.xlu1 %v3249_v2, %s2942_s7  ;;  %1381 = vrot.lane.b32.xlu0 %v3392_v45, %s2943_s12 }
  0xfb   : > { %v823_v56 = vpop.permute.xlu1 %822  ;;  %v829_v12 = vpop.permute.xlu0 %828 }
  0xfc   : > { %902 = vst.msk [vmem:[#allocation3 + $0x88] sm:$0xff] %vm884_vm3, %v823_v56  ;;  %905 = vst.msk [vmem:[#allocation3 + $0xa0] sm:$0xff] %vm884_vm3, %v829_v12 }
  0xfd   : > { %1957 = vrot.lane.b32.xlu1 %v3392_v45, %s2946_s8  ;;  %1575 = vrot.lane.b32.xlu0 %v3275_v27, %s2944_s17 }
  0xff   : > { %v827_v31 = vpop.permute.xlu1 %826  ;;  %v833_v59 = vpop.permute.xlu0 %832 }
 0x100   : > { %904 = vst.msk [vmem:[#allocation3 + $0x98] sm:$0xff] %vm884_vm3, %v827_v31  ;;  %907 = vst.msk [vmem:[#allocation3 + $0xb0] sm:$0xff] %vm884_vm3, %v833_v59 }
 0x101   : > { %1573 = vrot.lane.b32.xlu1 %v3256_v20, %s2944_s17  ;;  %1190 = vrot.lane.b32.xlu0 %v3229_v9, %s2942_s7 }
 0x103   : > { %v831_v2 = vpop.permute.xlu1 %830  ;;  %v837_v11 = vpop.permute.xlu0 %836 }
 0x104   : > { %906 = vst.msk [vmem:[#allocation3 + $0xa8] sm:$0xff] %vm884_vm3, %v831_v2  ;;  %909 = vst.msk [vmem:[#allocation3 + $0xc0] sm:$0xff] %vm884_vm3, %v837_v11  ;;  %v1704_v2 = vld [vmem:[#allocation2 + $0xd9] sm:$0xff]  ;;  %v1705_v11 = vld [vmem:[#allocation2 + $0xe1] sm:$0xff] }
 0x105   : > { %1766 = vrot.lane.b32.xlu1 %v3229_v9, %s2945_s30  ;;  %1959 = vrot.lane.b32.xlu0 %v3386_v44, %s2946_s8 }
 0x107   : > { %v835_v27 = vpop.permute.xlu1 %834  ;;  %v841_v45 = vpop.permute.xlu0 %840 }
 0x108   : > { %908 = vst.msk [vmem:[#allocation3 + $0xb8] sm:$0xff] %vm884_vm3, %v835_v27  ;;  %911 = vst.msk [vmem:[#allocation3 + $0xd0] sm:$0xff] %vm884_vm3, %v841_v45 }
 0x109   : > { %1768 = vrot.lane.b32.xlu1 %v3258_v21, %s2945_s30  ;;  %1383 = vrot.lane.b32.xlu0 %v3386_v44, %s2943_s12 }
 0x10b   : > { %v839_v20 = vpop.permute.xlu1 %838  ;;  %v845_v14 = vpop.permute.xlu0 %844 }
 0x10c   : > { %910 = vst.msk [vmem:[#allocation3 + $0xc8] sm:$0xff] %vm884_vm3, %v839_v20  ;;  %913 = vst.msk [vmem:[#allocation3 + $0xe0] sm:$0xff] %vm884_vm3, %v845_v14 }
 0x10d   : > { %1192 = vrot.lane.b32.xlu1 %v3258_v21, %s2942_s7  ;;  %1385 = vrot.lane.b32.xlu0 %v3400_v49, %s2943_s12  ;;  %v1698_v21 = vld [vmem:[#allocation2 + $0x91] sm:$0xff] }
 0x10f   : > { %v843_v9 = vpop.permute.xlu1 %842  ;;  %v849_v53 = vpop.permute.xlu0 %848 }
 0x110   : > { %912 = vst.msk [vmem:[#allocation3 + $0xd8] sm:$0xff] %vm884_vm3, %v843_v9  ;;  %915 = vst.msk [vmem:[#allocation3 + $0xf0] sm:$0xff] %vm884_vm3, %v849_v53 }
 0x111   : > { %1961 = vrot.lane.b32.xlu1 %v3400_v49, %s2946_s8  ;;  %1579 = vrot.lane.b32.xlu0 %v3285_v33, %s2944_s17  ;;  %v1121_v49 = vld [vmem:[#allocation2 + $0x99] sm:$0xff] }
 0x113   : > { %v847_v44 = vpop.permute.xlu1 %846  ;;  %v982_v61 = vpop.permute.xlu0 %981 }
 0x114   : > { %914 = vst.msk [vmem:[#allocation3 + $0xe8] sm:$0xff] %vm884_vm3, %v847_v44 }
 0x115   : > { %1078 = vst.msk [vmem:[#allocation3] sm:$0xff] %vm1077_vm4, %v982_v61  ;;  %1577 = vrot.lane.b32.xlu1 %v3273_v26, %s2944_s17  ;;  %1003 = vrot.lane.b32.xlu0 %v3285_v33, %s2941_s6 }
 0x117   : > { %v851_v62 = vpop.permute.xlu1 %850  ;;  %v986_v52 = vpop.permute.xlu0 %985 }
 0x118   : > { %916 = vst.msk [vmem:[#allocation3 + $0xf8] sm:$0xff] %vm884_vm3, %v851_v62 }
 0x119   : > { %1080 = vst.msk [vmem:[#allocation3 + $0x10] sm:$0xff] %vm1077_vm4, %v986_v52  ;;  %1770 = vrot.lane.b32.xlu1 %v1698_v21, %s2945_s30  ;;  %1772 = vrot.lane.b32.xlu0 %v3267_v23, %s2945_s30 }
 0x11b   : > { %v984_v63 = vpop.permute.xlu1 %983  ;;  %v990_v0 = vpop.permute.xlu0 %989 }
 0x11c   : > { %1079 = vst.msk [vmem:[#allocation3 + $0x8] sm:$0xff] %vm1077_vm4, %v984_v63  ;;  %1082 = vst.msk [vmem:[#allocation3 + $0x20] sm:$0xff] %vm1077_vm4, %v990_v0  ;;  %v2928_v63 = vld [vmem:[%s4192_s1] ss:$0 sm:$0xff] }
 0x11d   : > { %1194 = vrot.lane.b32.xlu1 %v1698_v21, %s2942_s7  ;;  %1196 = vrot.lane.b32.xlu0 %v1121_v49, %s2942_s7  ;;  %v266_v49 = vld [vmem:[%s3062_s26 + $0xf0] sm:$0xff] }
 0x11e   : > { %v305_v0 = vmul.f32 %v2928_v63, %v266_v49  ;;  %v1519_v49 = vld [vmem:[#allocation2 + $0x138] sm:$0xff] }
 0x11f   : > { %v988_v26 = vpop.permute.xlu1 %987  ;;  %v994_v33 = vpop.permute.xlu0 %993 }
 0x120   : > { %1081 = vst.msk [vmem:[#allocation3 + $0x18] sm:$0xff] %vm1077_vm4, %v988_v26  ;;  %1084 = vst.msk [vmem:[#allocation3 + $0x30] sm:$0xff] %vm1077_vm4, %v994_v33  ;;  %v2929_v26 = vld [vmem:[%s4193_s2] ss:$0 sm:$0xff] }
 0x121   : > { %1963 = vrot.lane.b32.xlu1 %v3394_v46, %s2946_s8  ;;  %1965 = vrot.lane.b32.xlu0 %v3408_v51, %s2946_s8  ;;  %v344_v33 = vadd.f32 %v2929_v26, %v305_v0 }
 0x123   : > { %v992_v23 = vpop.permute.xlu1 %991  ;;  %v998_v19 = vpop.permute.xlu0 %997 }
 0x124   : > { %1083 = vst.msk [vmem:[#allocation3 + $0x28] sm:$0xff] %vm1077_vm4, %v992_v23  ;;  %1086 = vst.msk [vmem:[#allocation3 + $0x40] sm:$0xff] %vm1077_vm4, %v998_v19 }
 0x125   : > { %1387 = vrot.lane.b32.xlu1 %v3394_v46, %s2943_s12  ;;  %1581 = vrot.lane.b32.xlu0 %v3277_v28, %s2944_s17  ;;  %v1700_v46 = vld [vmem:[#allocation2 + $0xa9] sm:$0xff] }
 0x127   : > { %v996_v3 = vpop.permute.xlu1 %995  ;;  %v1002_v4 = vpop.permute.xlu0 %1001 }
 0x128   : > { %1085 = vst.msk [vmem:[#allocation3 + $0x38] sm:$0xff] %vm1077_vm4, %v996_v3  ;;  %1088 = vst.msk [vmem:[#allocation3 + $0x50] sm:$0xff] %vm1077_vm4, %v1002_v4  ;;  %v267_v3 = vld [vmem:[%s3062_s26 + $0xf8] sm:$0xff]  ;;  %v376_v4 = vmax.f32 %v344_v33, 0.0 }
 0x129   : > { %1389 = vrot.lane.b32.xlu1 %v3408_v51, %s2943_s12  ;;  %1583 = vrot.lane.b32.xlu0 %v3289_v35, %s2944_s17 }
 0x12a   : > { %465 = vst.msk [vmem:[#allocation2 + $0x181] sm:$0xff] %vm378_vm0, %v376_v4 }
 0x12b   : > { %v1000_v13 = vpop.permute.xlu1 %999  ;;  %v1177_v5 = vpop.permute.xlu0 %1176 }
 0x12c   : > { %1087 = vst.msk [vmem:[#allocation3 + $0x48] sm:$0xff] %vm1077_vm4, %v1000_v13  ;;  %v306_v13 = vmul.f32 %v2928_v63, %v267_v3 }
 0x12d   : > { %1272 = vst.msk [vmem:[#allocation3 + $0x8] sm:$0xff] %vm1270_vm5, %v1177_v5  ;;  %1005 = vrot.lane.b32.xlu1 %v3277_v28, %s2941_s6  ;;  %1007 = vrot.lane.b32.xlu0 %v3289_v35, %s2941_s6  ;;  %v1706_v5 = vld [vmem:[#allocation2 + $0xf1] sm:$0xff] }
 0x12f   : > { %v1175_v29 = vpop.permute.xlu1 %1174  ;;  %v1370_v51 = vpop.permute.xlu0 %1369 }
 0x130   : > { %1271 = vst.msk [vmem:[#allocation3] sm:$0xff] %vm1270_vm5, %v1175_v29 }
 0x131   : > { %1465 = vst.msk [vmem:[#allocation3 + $0x8] sm:$0xff] %vm1463_vm6, %v1370_v51  ;;  %1774 = vrot.lane.b32.xlu1 %v1700_v46, %s2945_s30  ;;  %1776 = vrot.lane.b32.xlu0 %v1701_v6, %s2945_s30 }
 0x133   : > { %v1368_v55 = vpop.permute.xlu1 %1367  ;;  %v1564_v7 = vpop.permute.xlu0 %1563 }
 0x134   : > { %1464 = vst.msk [vmem:[#allocation3] sm:$0xff] %vm1463_vm6, %v1368_v55 }
 0x135   : > { %1659 = vst.msk [vmem:[#allocation3 + $0x8] sm:$0xff] %vm1657_vm7, %v1564_v7  ;;  %1198 = vrot.lane.b32.xlu1 %v1700_v46, %s2942_s7  ;;  %1200 = vrot.lane.b32.xlu0 %v1701_v6, %s2942_s7  ;;  %v1707_v46 = vld [vmem:[#allocation2 + $0xf9] sm:$0xff]  ;;  %v345_v6 = vadd.f32 %v2929_v26, %v306_v13  ;;  %v1713_v13 = vld [vmem:[#allocation2 + $0x141] sm:$0xff] }
 0x136   : > { %v1520_v26 = vld [vmem:[#allocation2 + $0x140] sm:$0xff] }
 0x137   : > { %v1562_v28 = vpop.permute.xlu1 %1561  ;;  %v1179_v35 = vpop.permute.xlu0 %1178  ;;  %v377_v7 = vmax.f32 %v345_v6, 0.0  ;;  %v1905_v6 = vld [vmem:[#allocation2 + $0x13a] sm:$0xff] }
 0x138   : > { %1658 = vst.msk [vmem:[#allocation3] sm:$0xff] %vm1657_vm7, %v1562_v28  ;;  %v1899_v28 = vld [vmem:[#allocation2 + $0xf2] sm:$0xff] }
 0x139   : > { %1273 = vst.msk [vmem:[#allocation3 + $0x10] sm:$0xff] %vm1270_vm5, %v1179_v35  ;;  %1967 = vrot.lane.b32.xlu1 %v3402_v50, %s2946_s8  ;;  %1969 = vrot.lane.b32.xlu0 %v3416_v58, %s2946_s8  ;;  %v1900_v35 = vld [vmem:[#allocation2 + $0xfa] sm:$0xff] }
 0x13a   : > { %466 = vst.msk [vmem:[#allocation2 + $0x189] sm:$0xff] %vm378_vm0, %v377_v7 }
 0x13b   : > { %v1755_v17 = vpop.permute.xlu1 %1754  ;;  %v1948_v24 = vpop.permute.xlu0 %1947 }
 0x13c   : > { %1851 = vst.msk [vmem:[#allocation3] sm:$0xff] %vm1850_vm8, %v1755_v17 }
 0x13d   : > { %2044 = vst.msk [vmem:[#allocation3] sm:$0xff] %vm2043_vm9, %v1948_v24  ;;  %1391 = vrot.lane.b32.xlu1 %v3402_v50, %s2943_s12  ;;  %1585 = vrot.lane.b32.xlu0 %v3287_v34, %s2944_s17 }
 0x13f   : > { %v1757_v54 = vpop.permute.xlu1 %1756  ;;  %v1372_v1 = vpop.permute.xlu0 %1371 }
 0x140   : > { %1852 = vst.msk [vmem:[#allocation3 + $0x8] sm:$0xff] %vm1850_vm8, %v1757_v54 }
 0x141   : > { %1466 = vst.msk [vmem:[#allocation3 + $0x10] sm:$0xff] %vm1463_vm6, %v1372_v1  ;;  %1393 = vrot.lane.b32.xlu1 %v3416_v58, %s2943_s12  ;;  %1587 = vrot.lane.b32.xlu0 %v3302_v37, %s2944_s17 }
 0x143   : > { %v1181_v30 = vpop.permute.xlu1 %1180  ;;  %v1374_v48 = vpop.permute.xlu0 %1373 }
 0x144   : > { %1274 = vst.msk [vmem:[#allocation3 + $0x18] sm:$0xff] %vm1270_vm5, %v1181_v30  ;;  %v2076_v50 = vld [vmem:[#allocation3] sm:$0xff] }
 0x145   : > { %1467 = vst.msk [vmem:[#allocation3 + $0x18] sm:$0xff] %vm1463_vm6, %v1374_v48  ;;  %1009 = vrot.lane.b32.xlu1 %v3287_v34, %s2941_s6  ;;  %1011 = vrot.lane.b32.xlu0 %v3302_v37, %s2941_s6 }
 0x146   : > { %2837 = vmatprep.mubr.msk.f32.mxu0 %vm2117_vm10, %v2076_v50 }
 0x147   : > { %v1950_v58 = vpop.permute.xlu1 %1949  ;;  %v1568_v8 = vpop.permute.xlu0 %1567 }
 0x148   : > { %2045 = vst.msk [vmem:[#allocation3 + $0x8] sm:$0xff] %vm2043_vm9, %v1950_v58 }
 0x149   : > { %1661 = vst.msk [vmem:[#allocation3 + $0x18] sm:$0xff] %vm1657_vm7, %v1568_v8  ;;  %1778 = vrot.lane.b32.xlu1 %v1702_v22, %s2945_s30  ;;  %1780 = vrot.lane.b32.xlu0 %v1703_v18, %s2945_s30  ;;  %v1708_v8 = vld [vmem:[#allocation2 + $0x109] sm:$0xff] }
 0x14b   : > { %v1566_v16 = vpop.permute.xlu1 %1565  ;;  %v1183_v25 = vpop.permute.xlu0 %1182 }
 0x14c   : > { %1660 = vst.msk [vmem:[#allocation3 + $0x10] sm:$0xff] %vm1657_vm7, %v1566_v16  ;;  %v1709_v16 = vld [vmem:[#allocation2 + $0x111] sm:$0xff] }
 0x14d   : > { %1275 = vst.msk [vmem:[#allocation3 + $0x20] sm:$0xff] %vm1270_vm5, %v1183_v25  ;;  %1202 = vrot.lane.b32.xlu1 %v1702_v22, %s2942_s7  ;;  %1204 = vrot.lane.b32.xlu0 %v1703_v18, %s2942_s7 }
 0x14f   : > { %v1759_v34 = vpop.permute.xlu1 %1758  ;;  %v1952_v37 = vpop.permute.xlu0 %1951  ;;  %v2077_v32 = vld [vmem:[#allocation3 + $0x8] sm:$0xff] }
 0x150   : > { %1853 = vst.msk [vmem:[#allocation3 + $0x10] sm:$0xff] %vm1850_vm8, %v1759_v34  ;;  %2838 = vmatmul.mubr.msk.f32.vlgmr.msra.gmra.mrb[0].mxu0 %vm2117_vm10, %v2077_v32 }
 0x151   : > { %2046 = vst.msk [vmem:[#allocation3 + $0x10] sm:$0xff] %vm2043_vm9, %v1952_v37  ;;  %1971 = vrot.lane.b32.xlu1 %v3410_v57, %s2946_s8  ;;  %1973 = vrot.lane.b32.xlu0 %v3421_v60, %s2946_s8 }
 0x153   : > { %v1761_v15 = vpop.permute.xlu1 %1760  ;;  %v1376_v10 = vpop.permute.xlu0 %1375 }
 0x154   : > { %1854 = vst.msk [vmem:[#allocation3 + $0x18] sm:$0xff] %vm1850_vm8, %v1761_v15 }
 0x155   : > { %1468 = vst.msk [vmem:[#allocation3 + $0x20] sm:$0xff] %vm1463_vm6, %v1376_v10  ;;  %1395 = vrot.lane.b32.xlu1 %v3410_v57, %s2943_s12  ;;  %1589 = vrot.lane.b32.xlu0 %v3300_v36, %s2944_s17 }
 0x157   : > { %v1185_v56 = vpop.permute.xlu1 %1184  ;;  %v1378_v12 = vpop.permute.xlu0 %1377 }
 0x158   : > { %1276 = vst.msk [vmem:[#allocation3 + $0x28] sm:$0xff] %vm1270_vm5, %v1185_v56  ;;  %v2078_v31 = vld [vmem:[#allocation3 + $0x10] sm:$0xff] }
 0x159   : > { %1469 = vst.msk [vmem:[#allocation3 + $0x28] sm:$0xff] %vm1463_vm6, %v1378_v12  ;;  %1397 = vrot.lane.b32.xlu1 %v3421_v60, %s2943_s12  ;;  %1591 = vrot.lane.b32.xlu0 %v3312_v39, %s2944_s17 }
 0x15a   : > { %2840 = vmatprep.mubr.msk.f32.mxu0 %vm2117_vm10, %v2078_v31 }
 0x15b   : > { %v1954_v59 = vpop.permute.xlu1 %1953  ;;  %v1572_v57 = vpop.permute.xlu0 %1571 }
 0x15c   : > { %2047 = vst.msk [vmem:[#allocation3 + $0x18] sm:$0xff] %vm2043_vm9, %v1954_v59 }
 0x15d   : > { %1663 = vst.msk [vmem:[#allocation3 + $0x28] sm:$0xff] %vm1657_vm7, %v1572_v57  ;;  %1013 = vrot.lane.b32.xlu1 %v3300_v36, %s2941_s6  ;;  %1015 = vrot.lane.b32.xlu0 %v3312_v39, %s2941_s6  ;;  %v1897_v36 = vld [vmem:[#allocation2 + $0xda] sm:$0xff]  ;;  %v1898_v39 = vld [vmem:[#allocation2 + $0xe2] sm:$0xff] }
 0x15f   : > { %v1570_v60 = vpop.permute.xlu1 %1569  ;;  %v1187_v27 = vpop.permute.xlu0 %1186 }
 0x160   : > { %1662 = vst.msk [vmem:[#allocation3 + $0x20] sm:$0xff] %vm1657_vm7, %v1570_v60 }
 0x161   : > { %1277 = vst.msk [vmem:[#allocation3 + $0x30] sm:$0xff] %vm1270_vm5, %v1187_v27  ;;  %1782 = vrot.lane.b32.xlu1 %v1704_v2, %s2945_s30  ;;  %1784 = vrot.lane.b32.xlu0 %v1705_v11, %s2945_s30 }
 0x163   : > { %v1763_v45 = vpop.permute.xlu1 %1762  ;;  %v1956_v20 = vpop.permute.xlu0 %1955  ;;  %v2079_v14 = vld [vmem:[#allocation3 + $0x18] sm:$0xff] }
 0x164   : > { %1855 = vst.msk [vmem:[#allocation3 + $0x20] sm:$0xff] %vm1850_vm8, %v1763_v45  ;;  %2841 = vmatmul.mubr.msk.f32.gmra.mrb[2].mxu0 %vm2117_vm10, %v2079_v14  ;;  %v1711_v14 = vld [vmem:[#allocation2 + $0x129] sm:$0xff] }
 0x165   : > { %2048 = vst.msk [vmem:[#allocation3 + $0x20] sm:$0xff] %vm2043_vm9, %v1956_v20  ;;  %1206 = vrot.lane.b32.xlu1 %v1704_v2, %s2942_s7  ;;  %1208 = vrot.lane.b32.xlu0 %v1705_v11, %s2942_s7  ;;  %v939_v11 = vld [vmem:[#allocation2 + $0x120] sm:$0xff] }
 0x167   : > { %v1765_v9 = vpop.permute.xlu1 %1764  ;;  %v1380_v53 = vpop.permute.xlu0 %1379 }
 0x168   : > { %1856 = vst.msk [vmem:[#allocation3 + $0x28] sm:$0xff] %vm1850_vm8, %v1765_v9 }
 0x169   : > { %1470 = vst.msk [vmem:[#allocation3 + $0x30] sm:$0xff] %vm1463_vm6, %v1380_v53  ;;  %1975 = vrot.lane.b32.xlu1 %v1897_v36, %s2946_s8  ;;  %1977 = vrot.lane.b32.xlu0 %v1898_v39, %s2946_s8 }
 0x16b   : > { %v1189_v44 = vpop.permute.xlu1 %1188  ;;  %v1382_v61 = vpop.permute.xlu0 %1381 }
 0x16c   : > { %1278 = vst.msk [vmem:[#allocation3 + $0x38] sm:$0xff] %vm1270_vm5, %v1189_v44  ;;  %v2080_v21 = vld [vmem:[#allocation3 + $0x20] sm:$0xff] }
 0x16d   : > { %1471 = vst.msk [vmem:[#allocation3 + $0x38] sm:$0xff] %vm1463_vm6, %v1382_v61  ;;  %1399 = vrot.lane.b32.xlu1 %v1897_v36, %s2943_s12  ;;  %1593 = vrot.lane.b32.xlu0 %v3304_v38, %s2944_s17  ;;  %v1904_v44 = vld [vmem:[#allocation2 + $0x12a] sm:$0xff] }
 0x16e   : > { %2843 = vmatprep.mubr.msk.f32.mxu0 %vm2117_vm10, %v2080_v21 }
 0x16f   : > { %v1958_v62 = vpop.permute.xlu1 %1957  ;;  %v1576_v52 = vpop.permute.xlu0 %1575 }
 0x170   : > { %2049 = vst.msk [vmem:[#allocation3 + $0x28] sm:$0xff] %vm2043_vm9, %v1958_v62 }
 0x171   : > { %1665 = vst.msk [vmem:[#allocation3 + $0x38] sm:$0xff] %vm1657_vm7, %v1576_v52  ;;  %1401 = vrot.lane.b32.xlu1 %v1898_v39, %s2943_s12  ;;  %1595 = vrot.lane.b32.xlu0 %v3316_v41, %s2944_s17 }
 0x173   : > { %v1574_v23 = vpop.permute.xlu1 %1573  ;;  %v1191_v19 = vpop.permute.xlu0 %1190 }
 0x174   : > { %1664 = vst.msk [vmem:[#allocation3 + $0x30] sm:$0xff] %vm1657_vm7, %v1574_v23 }
 0x175   : > { %1279 = vst.msk [vmem:[#allocation3 + $0x40] sm:$0xff] %vm1270_vm5, %v1191_v19  ;;  %1017 = vrot.lane.b32.xlu1 %v3304_v38, %s2941_s6  ;;  %1019 = vrot.lane.b32.xlu0 %v3316_v41, %s2941_s6  ;;  %v1712_v19 = vld [vmem:[#allocation2 + $0x139] sm:$0xff] }
 0x177   : > { %v1767_v29 = vpop.permute.xlu1 %1766  ;;  %v1960_v51 = vpop.permute.xlu0 %1959  ;;  %v2081_v55 = vld [vmem:[#allocation3 + $0x28] sm:$0xff] }
 0x178   : > { %1857 = vst.msk [vmem:[#allocation3 + $0x30] sm:$0xff] %vm1850_vm8, %v1767_v29  ;;  %2844 = vmatmul.mubr.msk.f32.gmra.mrb[4].mxu0 %vm2117_vm10, %v2081_v55  ;;  %v1906_v55 = vld [vmem:[#allocation2 + $0x142] sm:$0xff] }
 0x179   : > { %2050 = vst.msk [vmem:[#allocation3 + $0x30] sm:$0xff] %vm2043_vm9, %v1960_v51  ;;  %1786 = vrot.lane.b32.xlu1 %v1706_v5, %s2945_s30  ;;  %1788 = vrot.lane.b32.xlu0 %v1707_v46, %s2945_s30 }
 0x17b   : > { %v1769_v38 = vpop.permute.xlu1 %1768  ;;  %v1384_v41 = vpop.permute.xlu0 %1383 }
 0x17c   : > { %1858 = vst.msk [vmem:[#allocation3 + $0x38] sm:$0xff] %vm1850_vm8, %v1769_v38 }
 0x17d   : > { %1472 = vst.msk [vmem:[#allocation3 + $0x40] sm:$0xff] %vm1463_vm6, %v1384_v41  ;;  %1210 = vrot.lane.b32.xlu1 %v1706_v5, %s2942_s7  ;;  %1212 = vrot.lane.b32.xlu0 %v1707_v46, %s2942_s7 }
 0x17f   : > { %v1193_v17 = vpop.permute.xlu1 %1192  ;;  %v1386_v24 = vpop.permute.xlu0 %1385 }
 0x180   : > { %1280 = vst.msk [vmem:[#allocation3 + $0x48] sm:$0xff] %vm1270_vm5, %v1193_v17  ;;  %v2082_v54 = vld [vmem:[#allocation3 + $0x30] sm:$0xff] }
 0x181   : > { %1473 = vst.msk [vmem:[#allocation3 + $0x48] sm:$0xff] %vm1463_vm6, %v1386_v24  ;;  %1979 = vrot.lane.b32.xlu1 %v1899_v28, %s2946_s8  ;;  %1981 = vrot.lane.b32.xlu0 %v1900_v35, %s2946_s8 }
 0x182   : > { %2846 = vmatprep.mubr.msk.f32.mxu0 %vm2117_vm10, %v2082_v54  ;;  %v1522_v54 = vld [vmem:[#allocation2 + $0x158] sm:$0xff] }
 0x183   : > { %v1962_v1 = vpop.permute.xlu1 %1961  ;;  %v1580_v30 = vpop.permute.xlu0 %1579 }
 0x184   : > { %2051 = vst.msk [vmem:[#allocation3 + $0x38] sm:$0xff] %vm2043_vm9, %v1962_v1 }
 0x185   : > { %1667 = vst.msk [vmem:[#allocation3 + $0x48] sm:$0xff] %vm1657_vm7, %v1580_v30  ;;  %1403 = vrot.lane.b32.xlu1 %v1899_v28, %s2943_s12  ;;  %1597 = vrot.lane.b32.xlu0 %v3314_v40, %s2944_s17 }
 0x187   : > { %v1578_v48 = vpop.permute.xlu1 %1577  ;;  %v1004_v50 = vpop.permute.xlu0 %1003 }
 0x188   : > { %1666 = vst.msk [vmem:[#allocation3 + $0x40] sm:$0xff] %vm1657_vm7, %v1578_v48  ;;  %v1714_v48 = vld [vmem:[#allocation2 + $0x151] sm:$0xff] }
 0x189   : > { %1089 = vst.msk [vmem:[#allocation3 + $0x58] sm:$0xff] %vm1077_vm4, %v1004_v50  ;;  %1405 = vrot.lane.b32.xlu1 %v1900_v35, %s2943_s12  ;;  %1599 = vrot.lane.b32.xlu0 %v3330_v43, %s2944_s17  ;;  %v1521_v35 = vld [vmem:[#allocation2 + $0x150] sm:$0xff] }
 0x18b   : > { %v1771_v22 = vpop.permute.xlu1 %1770  ;;  %v1773_v18 = vpop.permute.xlu0 %1772  ;;  %v2083_v58 = vld [vmem:[#allocation3 + $0x38] sm:$0xff] }
 0x18c   : > { %1859 = vst.msk [vmem:[#allocation3 + $0x40] sm:$0xff] %vm1850_vm8, %v1771_v22  ;;  %1860 = vst.msk [vmem:[#allocation3 + $0x48] sm:$0xff] %vm1850_vm8, %v1773_v18  ;;  %2847 = vmatmul.mubr.msk.f32.gmra.mrb[6].mxu0 %vm2117_vm10, %v2083_v58  ;;  %v1715_v18 = vld [vmem:[#allocation2 + $0x159] sm:$0xff] }
 0x18d   : > { %1021 = vrot.lane.b32.xlu1 %v3314_v40, %s2941_s6  ;;  %1023 = vrot.lane.b32.xlu0 %v3330_v43, %s2941_s6  ;;  %v1901_v40 = vld [vmem:[#allocation2 + $0x10a] sm:$0xff]  ;;  %v1902_v43 = vld [vmem:[#allocation2 + $0x112] sm:$0xff] }
 0x18f   : > { %v1195_v25 = vpop.permute.xlu1 %1194  ;;  %v1197_v34 = vpop.permute.xlu0 %1196 }
 0x190   : > { %1281 = vst.msk [vmem:[#allocation3 + $0x50] sm:$0xff] %vm1270_vm5, %v1195_v25  ;;  %1282 = vst.msk [vmem:[#allocation3 + $0x58] sm:$0xff] %vm1270_vm5, %v1197_v34 }
 0x191   : > { %1790 = vrot.lane.b32.xlu1 %v1708_v8, %s2945_s30  ;;  %1792 = vrot.lane.b32.xlu0 %v1709_v16, %s2945_s30 }
 0x193   : > { %v1964_v37 = vpop.permute.xlu1 %1963  ;;  %v1966_v32 = vpop.permute.xlu0 %1965 }
 0x194   : > { %2052 = vst.msk [vmem:[#allocation3 + $0x40] sm:$0xff] %vm2043_vm9, %v1964_v37  ;;  %2053 = vst.msk [vmem:[#allocation3 + $0x48] sm:$0xff] %vm2043_vm9, %v1966_v32  ;;  %v1908_v37 = vld [vmem:[#allocation2 + $0x15a] sm:$0xff] }
 0x195   : > { %1214 = vrot.lane.b32.xlu1 %v1708_v8, %s2942_s7  ;;  %1216 = vrot.lane.b32.xlu0 %v1709_v16, %s2942_s7  ;;  %v1907_v16 = vld [vmem:[#allocation2 + $0x152] sm:$0xff] }
 0x197   : > { %v1388_v15 = vpop.permute.xlu1 %1387  ;;  %v1582_v10 = vpop.permute.xlu0 %1581 }
 0x198   : > { %1474 = vst.msk [vmem:[#allocation3 + $0x50] sm:$0xff] %vm1463_vm6, %v1388_v15 }
 0x199   : > { %1668 = vst.msk [vmem:[#allocation3 + $0x50] sm:$0xff] %vm1657_vm7, %v1582_v10  ;;  %1983 = vrot.lane.b32.xlu1 %v1901_v40, %s2946_s8  ;;  %1985 = vrot.lane.b32.xlu0 %v1902_v43, %s2946_s8  ;;  %v1523_v10 = vld [vmem:[#allocation2 + $0x168] sm:$0xff] }
 0x19b   : > { %v1390_v56 = vpop.permute.xlu1 %1389  ;;  %v1584_v12 = vpop.permute.xlu0 %1583  ;;  %v2084_v31 = vld [vmem:[#allocation3 + $0x40] sm:$0xff]  ;;  %v2085_v59 = vld [vmem:[#allocation3 + $0x48] sm:$0xff] }
 0x19c   : > { %1475 = vst.msk [vmem:[#allocation3 + $0x58] sm:$0xff] %vm1463_vm6, %v1390_v56  ;;  %2849 = vmatprep.mubr.msk.f32.mxu0 %vm2117_vm10, %v2084_v31  ;;  %v1524_v31 = vld [vmem:[#allocation2 + $0x170] sm:$0xff] }
 0x19d   : > { %1669 = vst.msk [vmem:[#allocation3 + $0x58] sm:$0xff] %vm1657_vm7, %v1584_v12  ;;  %1407 = vrot.lane.b32.xlu1 %v1901_v40, %s2943_s12  ;;  %2850 = vmatmul.mubr.msk.f32.gmra.mrb[8].mxu0 %vm2117_vm10, %v2085_v59 }
 0x19e   : > { %1601 = vrot.lane.b32.xlu0 %v3324_v42, %s2944_s17  ;;  %v1710_v42 = vld [vmem:[#allocation2 + $0x121] sm:$0xff] }
 0x19f   : > { %v1006_v57 = vpop.permute.xlu1 %1005  ;;  %v1008_v2 = vpop.permute.xlu0 %1007 }
 0x1a0   : > { %1090 = vst.msk [vmem:[#allocation3 + $0x60] sm:$0xff] %vm1077_vm4, %v1006_v57  ;;  %1091 = vst.msk [vmem:[#allocation3 + $0x68] sm:$0xff] %vm1077_vm4, %v1008_v2  ;;  %v1716_v2 = vld [vmem:[#allocation2 + $0x169] sm:$0xff] }
 0x1a1   : > { %1409 = vrot.lane.b32.xlu1 %v1902_v43, %s2943_s12 }
 0x1a2   : > { %1603 = vrot.lane.b32.xlu0 %v3337_v47, %s2944_s17 }
 0x1a3   : > { %v1775_v60 = vpop.permute.xlu1 %1774  ;;  %v1777_v27 = vpop.permute.xlu0 %1776 }
 0x1a4   : > { %1861 = vst.msk [vmem:[#allocation3 + $0x50] sm:$0xff] %vm1850_vm8, %v1775_v60  ;;  %1862 = vst.msk [vmem:[#allocation3 + $0x58] sm:$0xff] %vm1850_vm8, %v1777_v27  ;;  %v1717_v27 = vld [vmem:[#allocation2 + $0x171] sm:$0xff] }
 0x1a5   : > { %1025 = vrot.lane.b32.xlu1 %v939_v11, %s2941_s6 }
 0x1a6   : > { %1027 = vrot.lane.b32.xlu0 %v3337_v47, %s2941_s6  ;;  %v1903_v47 = vld [vmem:[#allocation2 + $0x122] sm:$0xff] }
 0x1a7   : > { %v1199_v45 = vpop.permute.xlu1 %1198  ;;  %v1201_v20 = vpop.permute.xlu0 %1200 }
 0x1a8   : > { %1283 = vst.msk [vmem:[#allocation3 + $0x60] sm:$0xff] %vm1270_vm5, %v1199_v45  ;;  %1284 = vst.msk [vmem:[#allocation3 + $0x68] sm:$0xff] %vm1270_vm5, %v1201_v20  ;;  %v1909_v20 = vld [vmem:[#allocation2 + $0x16a] sm:$0xff] }
 0x1a9   : > { %1794 = vrot.lane.b32.xlu1 %v1710_v42, %s2945_s30 }
 0x1aa   : > { %1796 = vrot.lane.b32.xlu0 %v1711_v14, %s2945_s30 }
 0x1ab   : > { %v1968_v36 = vpop.permute.xlu1 %1967  ;;  %v1970_v39 = vpop.permute.xlu0 %1969 }
 0x1ac   : > { %2054 = vst.msk [vmem:[#allocation3 + $0x50] sm:$0xff] %vm2043_vm9, %v1968_v36  ;;  %2055 = vst.msk [vmem:[#allocation3 + $0x58] sm:$0xff] %vm2043_vm9, %v1970_v39  ;;  %v1910_v39 = vld [vmem:[#allocation2 + $0x172] sm:$0xff] }
 0x1ad   : > { %1218 = vrot.lane.b32.xlu1 %v1710_v42, %s2942_s7 }
 0x1ae   : > { %1220 = vrot.lane.b32.xlu0 %v1711_v14, %s2942_s7 }
 0x1af   : > { %v1392_v9 = vpop.permute.xlu1 %1391  ;;  %v1586_v53 = vpop.permute.xlu0 %1585 }
 0x1b0   : > { %1476 = vst.msk [vmem:[#allocation3 + $0x60] sm:$0xff] %vm1463_vm6, %v1392_v9 }
 0x1b1   : > { %1670 = vst.msk [vmem:[#allocation3 + $0x60] sm:$0xff] %vm1657_vm7, %v1586_v53  ;;  %1987 = vrot.lane.b32.xlu1 %v1903_v47, %s2946_s8 }
 0x1b2   : > { %1989 = vrot.lane.b32.xlu0 %v1904_v44, %s2946_s8 }
 0x1b3   : > { %v1394_v61 = vpop.permute.xlu1 %1393  ;;  %v1588_v21 = vpop.permute.xlu0 %1587  ;;  %v2086_v62 = vld [vmem:[#allocation3 + $0x50] sm:$0xff]  ;;  %v2087_v52 = vld [vmem:[#allocation3 + $0x58] sm:$0xff] }
 0x1b4   : > { %1477 = vst.msk [vmem:[#allocation3 + $0x68] sm:$0xff] %vm1463_vm6, %v1394_v61  ;;  %2852 = vmatprep.mubr.msk.f32.mxu0 %vm2117_vm10, %v2086_v62  ;;  %v1525_v61 = vld [vmem:[#allocation2 + $0x180] sm:$0xff] }
 0x1b5   : > { %1671 = vst.msk [vmem:[#allocation3 + $0x68] sm:$0xff] %vm1657_vm7, %v1588_v21  ;;  %1411 = vrot.lane.b32.xlu1 %v1903_v47, %s2943_s12  ;;  %2853 = vmatmul.mubr.msk.f32.gmra.mrb[10].mxu0 %vm2117_vm10, %v2087_v52  ;;  %v1526_v52 = vld [vmem:[#allocation2 + $0x188] sm:$0xff] }
 0x1b6   : > { %1605 = vrot.lane.b32.xlu0 %v1519_v49, %s2944_s17 }
 0x1b7   : > { %v1010_v63 = vpop.permute.xlu1 %1009  ;;  %v1012_v0 = vpop.permute.xlu0 %1011 }
 0x1b8   : > { %1092 = vst.msk [vmem:[#allocation3 + $0x70] sm:$0xff] %vm1077_vm4, %v1010_v63  ;;  %1093 = vst.msk [vmem:[#allocation3 + $0x78] sm:$0xff] %vm1077_vm4, %v1012_v0  ;;  %v1718_v0 = vld [vmem:[#allocation2 + $0x181] sm:$0xff] }
 0x1b9   : > { %1413 = vrot.lane.b32.xlu1 %v1904_v44, %s2943_s12 }
 0x1ba   : > { %1607 = vrot.lane.b32.xlu0 %v1520_v26, %s2944_s17 }
 0x1bb   : > { %v1779_v33 = vpop.permute.xlu1 %1778  ;;  %v1781_v23 = vpop.permute.xlu0 %1780 }
 0x1bc   : > { %1863 = vst.msk [vmem:[#allocation3 + $0x60] sm:$0xff] %vm1850_vm8, %v1779_v33  ;;  %1864 = vst.msk [vmem:[#allocation3 + $0x68] sm:$0xff] %vm1850_vm8, %v1781_v23  ;;  %v1719_v23 = vld [vmem:[#allocation2 + $0x189] sm:$0xff] }
 0x1bd   : > { %1029 = vrot.lane.b32.xlu1 %v1519_v49, %s2941_s6 }
 0x1be   : > { %1031 = vrot.lane.b32.xlu0 %v1520_v26, %s2941_s6 }
 0x1bf   : > { %v1203_v3 = vpop.permute.xlu1 %1202  ;;  %v1205_v4 = vpop.permute.xlu0 %1204 }
 0x1c0   : > { %1285 = vst.msk [vmem:[#allocation3 + $0x70] sm:$0xff] %vm1270_vm5, %v1203_v3  ;;  %1286 = vst.msk [vmem:[#allocation3 + $0x78] sm:$0xff] %vm1270_vm5, %v1205_v4  ;;  %v1911_v4 = vld [vmem:[#allocation2 + $0x182] sm:$0xff] }
 0x1c1   : > { %1798 = vrot.lane.b32.xlu1 %v1712_v19, %s2945_s30 }
 0x1c2   : > { %1800 = vrot.lane.b32.xlu0 %v1713_v13, %s2945_s30 }
 0x1c3   : > { %v1972_v5 = vpop.permute.xlu1 %1971  ;;  %v1974_v46 = vpop.permute.xlu0 %1973 }
 0x1c4   : > { %2056 = vst.msk [vmem:[#allocation3 + $0x60] sm:$0xff] %vm2043_vm9, %v1972_v5  ;;  %2057 = vst.msk [vmem:[#allocation3 + $0x68] sm:$0xff] %vm2043_vm9, %v1974_v46  ;;  %v1912_v5 = vld [vmem:[#allocation2 + $0x18a] sm:$0xff] }
 0x1c5   : > { %1222 = vrot.lane.b32.xlu1 %v1712_v19, %s2942_s7 }
 0x1c6   : > { %1224 = vrot.lane.b32.xlu0 %v1713_v13, %s2942_s7 }
 0x1c7   : > { %v1396_v29 = vpop.permute.xlu1 %1395  ;;  %v1590_v51 = vpop.permute.xlu0 %1589 }
 0x1c8   : > { %1478 = vst.msk [vmem:[#allocation3 + $0x70] sm:$0xff] %vm1463_vm6, %v1396_v29 }
 0x1c9   : > { %1672 = vst.msk [vmem:[#allocation3 + $0x70] sm:$0xff] %vm1657_vm7, %v1590_v51  ;;  %1991 = vrot.lane.b32.xlu1 %v1905_v6, %s2946_s8 }
 0x1ca   : > { %1993 = vrot.lane.b32.xlu0 %v1906_v55, %s2946_s8 }
 0x1cb   : > { %v1398_v7 = vpop.permute.xlu1 %1397  ;;  %v1592_v38 = vpop.permute.xlu0 %1591  ;;  %v2088_v41 = vld [vmem:[#allocation3 + $0x60] sm:$0xff]  ;;  %v2089_v28 = vld [vmem:[#allocation3 + $0x68] sm:$0xff] }
 0x1cc   : > { %1479 = vst.msk [vmem:[#allocation3 + $0x78] sm:$0xff] %vm1463_vm6, %v1398_v7  ;;  %2855 = vmatprep.mubr.msk.f32.mxu0 %vm2117_vm10, %v2088_v41  ;;  %v1720_v41 = vld [vmem:[#allocation2 + $0x199] sm:$0xff] }
 0x1cd   : > { %1673 = vst.msk [vmem:[#allocation3 + $0x78] sm:$0xff] %vm1657_vm7, %v1592_v38  ;;  %1415 = vrot.lane.b32.xlu1 %v1905_v6, %s2943_s12  ;;  %2856 = vmatmul.mubr.msk.f32.gmra.mrb[12].mxu0 %vm2117_vm10, %v2089_v28 }
 0x1ce   : > { %1609 = vrot.lane.b32.xlu0 %v1521_v35, %s2944_s17 }
 0x1cf   : > { %v1014_v17 = vpop.permute.xlu1 %1013  ;;  %v1016_v24 = vpop.permute.xlu0 %1015 }
 0x1d0   : > { %1094 = vst.msk [vmem:[#allocation3 + $0x80] sm:$0xff] %vm1077_vm4, %v1014_v17  ;;  %1095 = vst.msk [vmem:[#allocation3 + $0x88] sm:$0xff] %vm1077_vm4, %v1016_v24  ;;  %v1913_v24 = vld [vmem:[#allocation2 + $0x19a] sm:$0xff] }
 0x1d1   : > { %1417 = vrot.lane.b32.xlu1 %v1906_v55, %s2943_s12  ;;  %v1527_v55 = vld [vmem:[#allocation2 + $0x198] sm:$0xff] }
 0x1d2   : > { %1611 = vrot.lane.b32.xlu0 %v1522_v54, %s2944_s17 }
 0x1d3   : > { %v1783_v1 = vpop.permute.xlu1 %1782  ;;  %v1785_v30 = vpop.permute.xlu0 %1784 }
 0x1d4   : > { %1865 = vst.msk [vmem:[#allocation3 + $0x70] sm:$0xff] %vm1850_vm8, %v1783_v1  ;;  %1866 = vst.msk [vmem:[#allocation3 + $0x78] sm:$0xff] %vm1850_vm8, %v1785_v30  ;;  %v1721_v1 = vld [vmem:[#allocation2 + $0x1a1] sm:$0xff] }
 0x1d5   : > { %1033 = vrot.lane.b32.xlu1 %v1521_v35, %s2941_s6  ;;  %v1528_v35 = vld [vmem:[#allocation2 + $0x1a0] sm:$0xff] }
 0x1d6   : > { %1035 = vrot.lane.b32.xlu0 %v1522_v54, %s2941_s6 }
 0x1d7   : > { %v1207_v50 = vpop.permute.xlu1 %1206  ;;  %v1209_v22 = vpop.permute.xlu0 %1208 }
 0x1d8   : > { %1287 = vst.msk [vmem:[#allocation3 + $0x80] sm:$0xff] %vm1270_vm5, %v1207_v50  ;;  %1288 = vst.msk [vmem:[#allocation3 + $0x88] sm:$0xff] %vm1270_vm5, %v1209_v22  ;;  %v1914_v50 = vld [vmem:[#allocation2 + $0x1a2] sm:$0xff] }
 0x1d9   : > { %1802 = vrot.lane.b32.xlu1 %v1714_v48, %s2945_s30 }
 0x1da   : > { %1804 = vrot.lane.b32.xlu0 %v1715_v18, %s2945_s30 }
 0x1db   : > { %v1976_v58 = vpop.permute.xlu1 %1975  ;;  %v1978_v8 = vpop.permute.xlu0 %1977 }
 0x1dc   : > { %2058 = vst.msk [vmem:[#allocation3 + $0x70] sm:$0xff] %vm2043_vm9, %v1976_v58  ;;  %2059 = vst.msk [vmem:[#allocation3 + $0x78] sm:$0xff] %vm2043_vm9, %v1978_v8 }
 0x1dd   : > { %1226 = vrot.lane.b32.xlu1 %v1714_v48, %s2942_s7 }
 0x1de   : > { %1228 = vrot.lane.b32.xlu0 %v1715_v18, %s2942_s7 }
 0x1df   : > { %v1400_v25 = vpop.permute.xlu1 %1399  ;;  %v1594_v34 = vpop.permute.xlu0 %1593 }
 0x1e0   : > { %1480 = vst.msk [vmem:[#allocation3 + $0x80] sm:$0xff] %vm1463_vm6, %v1400_v25 }
 0x1e1   : > { %1674 = vst.msk [vmem:[#allocation3 + $0x80] sm:$0xff] %vm1657_vm7, %v1594_v34  ;;  %1995 = vrot.lane.b32.xlu1 %v1907_v16, %s2946_s8 }
 0x1e2   : > { %1997 = vrot.lane.b32.xlu0 %v1908_v37, %s2946_s8 }
 0x1e3   : > { %v1402_v32 = vpop.permute.xlu1 %1401  ;;  %v1596_v40 = vpop.permute.xlu0 %1595  ;;  %v2090_v43 = vld [vmem:[#allocation3 + $0x70] sm:$0xff]  ;;  %v2091_v15 = vld [vmem:[#allocation3 + $0x78] sm:$0xff] }
 0x1e4   : > { %1481 = vst.msk [vmem:[#allocation3 + $0x88] sm:$0xff] %vm1463_vm6, %v1402_v32  ;;  %2858 = vmatprep.mubr.msk.f32.mxu0 %vm2117_vm10, %v2090_v43 }
 0x1e5   : > { %1675 = vst.msk [vmem:[#allocation3 + $0x88] sm:$0xff] %vm1657_vm7, %v1596_v40  ;;  %1419 = vrot.lane.b32.xlu1 %v1907_v16, %s2943_s12  ;;  %2859 = vmatmul.mubr.msk.f32.gmra.mrb[14].mxu0 %vm2117_vm10, %v2091_v15 }
 0x1e6   : > { %1613 = vrot.lane.b32.xlu0 %v1523_v10, %s2944_s17 }
 0x1e7   : > { %v1018_v56 = vpop.permute.xlu1 %1017  ;;  %v1020_v12 = vpop.permute.xlu0 %1019 }
 0x1e8   : > { %1096 = vst.msk [vmem:[#allocation3 + $0x90] sm:$0xff] %vm1077_vm4, %v1018_v56  ;;  %1097 = vst.msk [vmem:[#allocation3 + $0x98] sm:$0xff] %vm1077_vm4, %v1020_v12 }
 0x1e9   : > { %1421 = vrot.lane.b32.xlu1 %v1908_v37, %s2943_s12 }
 0x1ea   : > { %1615 = vrot.lane.b32.xlu0 %v1524_v31, %s2944_s17 }
 0x1eb   : > { %v1787_v59 = vpop.permute.xlu1 %1786  ;;  %v1789_v57 = vpop.permute.xlu0 %1788 }
 0x1ec   : > { %1867 = vst.msk [vmem:[#allocation3 + $0x80] sm:$0xff] %vm1850_vm8, %v1787_v59  ;;  %1868 = vst.msk [vmem:[#allocation3 + $0x88] sm:$0xff] %vm1850_vm8, %v1789_v57 }
 0x1ed   : > { %1037 = vrot.lane.b32.xlu1 %v1523_v10, %s2941_s6 }
 0x1ee   : > { %1039 = vrot.lane.b32.xlu0 %v1524_v31, %s2941_s6 }
 0x1ef   : > { %v1211_v11 = vpop.permute.xlu1 %1210  ;;  %v1213_v60 = vpop.permute.xlu0 %1212 }
 0x1f0   : > { %1289 = vst.msk [vmem:[#allocation3 + $0x90] sm:$0xff] %vm1270_vm5, %v1211_v11  ;;  %1290 = vst.msk [vmem:[#allocation3 + $0x98] sm:$0xff] %vm1270_vm5, %v1213_v60 }
 0x1f1   : > { %1806 = vrot.lane.b32.xlu1 %v1716_v2, %s2945_s30 }
 0x1f2   : > { %1808 = vrot.lane.b32.xlu0 %v1717_v27, %s2945_s30 }
 0x1f3   : > { %v1980_v42 = vpop.permute.xlu1 %1979  ;;  %v1982_v45 = vpop.permute.xlu0 %1981 }
 0x1f4   : > { %2060 = vst.msk [vmem:[#allocation3 + $0x80] sm:$0xff] %vm2043_vm9, %v1980_v42  ;;  %2061 = vst.msk [vmem:[#allocation3 + $0x88] sm:$0xff] %vm2043_vm9, %v1982_v45 }
 0x1f5   : > { %1230 = vrot.lane.b32.xlu1 %v1716_v2, %s2942_s7 }
 0x1f6   : > { %1232 = vrot.lane.b32.xlu0 %v1717_v27, %s2942_s7 }
 0x1f7   : > { %v1404_v14 = vpop.permute.xlu1 %1403  ;;  %v1598_v36 = vpop.permute.xlu0 %1597 }
 0x1f8   : > { %1482 = vst.msk [vmem:[#allocation3 + $0x90] sm:$0xff] %vm1463_vm6, %v1404_v14 }
 0x1f9   : > { %1676 = vst.msk [vmem:[#allocation3 + $0x90] sm:$0xff] %vm1657_vm7, %v1598_v36  ;;  %1999 = vrot.lane.b32.xlu1 %v1909_v20, %s2946_s8 }
 0x1fa   : > { %2001 = vrot.lane.b32.xlu0 %v1910_v39, %s2946_s8 }
 0x1fb   : > { %v1406_v47 = vpop.permute.xlu1 %1405  ;;  %v1600_v9 = vpop.permute.xlu0 %1599  ;;  %v2092_v53 = vld [vmem:[#allocation3 + $0x80] sm:$0xff]  ;;  %v2093_v44 = vld [vmem:[#allocation3 + $0x88] sm:$0xff] }
 0x1fc   : > { %1483 = vst.msk [vmem:[#allocation3 + $0x98] sm:$0xff] %vm1463_vm6, %v1406_v47  ;;  %2861 = vmatprep.mubr.msk.f32.mxu1 %vm2117_vm10, %v2092_v53 }
 0x1fd   : > { %1677 = vst.msk [vmem:[#allocation3 + $0x98] sm:$0xff] %vm1657_vm7, %v1600_v9  ;;  %1423 = vrot.lane.b32.xlu1 %v1909_v20, %s2943_s12  ;;  %2862 = vmatmul.mubr.msk.f32.vlgmr.msra.gmra.mrb[0].mxu1 %vm2117_vm10, %v2093_v44 }
 0x1fe   : > { %1617 = vrot.lane.b32.xlu0 %v1525_v61, %s2944_s17 }
 0x1ff   : > { %v1022_v21 = vpop.permute.xlu1 %1021  ;;  %v1024_v62 = vpop.permute.xlu0 %1023 }
 0x200   : > { %1098 = vst.msk [vmem:[#allocation3 + $0xa0] sm:$0xff] %vm1077_vm4, %v1022_v21  ;;  %1099 = vst.msk [vmem:[#allocation3 + $0xa8] sm:$0xff] %vm1077_vm4, %v1024_v62 }
 0x201   : > { %1425 = vrot.lane.b32.xlu1 %v1910_v39, %s2943_s12 }
 0x202   : > { %1619 = vrot.lane.b32.xlu0 %v1526_v52, %s2944_s17 }
 0x203   : > { %v1791_v49 = vpop.permute.xlu1 %1790  ;;  %v1793_v63 = vpop.permute.xlu0 %1792 }
 0x204   : > { %1869 = vst.msk [vmem:[#allocation3 + $0x90] sm:$0xff] %vm1850_vm8, %v1791_v49  ;;  %1870 = vst.msk [vmem:[#allocation3 + $0x98] sm:$0xff] %vm1850_vm8, %v1793_v63 }
 0x205   : > { %1041 = vrot.lane.b32.xlu1 %v1525_v61, %s2941_s6 }
 0x206   : > { %1043 = vrot.lane.b32.xlu0 %v1526_v52, %s2941_s6 }
 0x207   : > { %v1215_v26 = vpop.permute.xlu1 %1214  ;;  %v1217_v33 = vpop.permute.xlu0 %1216 }
 0x208   : > { %1291 = vst.msk [vmem:[#allocation3 + $0xa0] sm:$0xff] %vm1270_vm5, %v1215_v26  ;;  %1292 = vst.msk [vmem:[#allocation3 + $0xa8] sm:$0xff] %vm1270_vm5, %v1217_v33 }
 0x209   : > { %1810 = vrot.lane.b32.xlu1 %v1718_v0, %s2945_s30 }
 0x20a   : > { %1812 = vrot.lane.b32.xlu0 %v1719_v23, %s2945_s30 }
 0x20b   : > { %v1984_v19 = vpop.permute.xlu1 %1983  ;;  %v1986_v3 = vpop.permute.xlu0 %1985 }
 0x20c   : > { %2062 = vst.msk [vmem:[#allocation3 + $0x90] sm:$0xff] %vm2043_vm9, %v1984_v19  ;;  %2063 = vst.msk [vmem:[#allocation3 + $0x98] sm:$0xff] %vm2043_vm9, %v1986_v3 }
 0x20d   : > { %1234 = vrot.lane.b32.xlu1 %v1718_v0, %s2942_s7 }
 0x20e   : > { %1236 = vrot.lane.b32.xlu0 %v1719_v23, %s2942_s7  ;;  %s3983_s7 = scalar_lea.vmem %s4195_s4, %s2776_s21  ;;  %s2739_s21 = sshll.u32 %s4199_s19, 1 }
 0x20f   : > { %v1408_v13 = vpop.permute.xlu1 %1407 }
 0x210   : > { %1484 = vst.msk [vmem:[#allocation3 + $0xa0] sm:$0xff] %vm1463_vm6, %v1408_v13  ;;  %v1602_v46 = vpop.permute.xlu0 %1601 }
 0x211   : > { %1678 = vst.msk [vmem:[#allocation3 + $0xa0] sm:$0xff] %vm1657_vm7, %v1602_v46  ;;  %2003 = vrot.lane.b32.xlu1 %v1911_v4, %s2946_s8 }
 0x212   : > { %2005 = vrot.lane.b32.xlu0 %v1912_v5, %s2946_s8 }
 0x213   : > { %v1410_v6 = vpop.permute.xlu1 %1409  ;;  %v2094_v29 = vld [vmem:[#allocation3 + $0x90] sm:$0xff]  ;;  %v2095_v51 = vld [vmem:[#allocation3 + $0x98] sm:$0xff] }
 0x214   : > { %1485 = vst.msk [vmem:[#allocation3 + $0xa8] sm:$0xff] %vm1463_vm6, %v1410_v6  ;;  %v1604_v7 = vpop.permute.xlu0 %1603  ;;  %2864 = vmatprep.mubr.msk.f32.mxu1 %vm2117_vm10, %v2094_v29 }
 0x215   : > { %1679 = vst.msk [vmem:[#allocation3 + $0xa8] sm:$0xff] %vm1657_vm7, %v1604_v7  ;;  %1427 = vrot.lane.b32.xlu1 %v1911_v4, %s2943_s12  ;;  %2865 = vmatmul.mubr.msk.f32.gmra.mrb[2].mxu1 %vm2117_vm10, %v2095_v51 }
 0x216   : > { %1621 = vrot.lane.b32.xlu0 %v1527_v55, %s2944_s17 }
 0x217   : > { %v1026_v38 = vpop.permute.xlu1 %1025 }
 0x218   : > { %1100 = vst.msk [vmem:[#allocation3 + $0xb0] sm:$0xff] %vm1077_vm4, %v1026_v38  ;;  %v1028_v28 = vpop.permute.xlu0 %1027 }
 0x219   : > { %1101 = vst.msk [vmem:[#allocation3 + $0xb8] sm:$0xff] %vm1077_vm4, %v1028_v28  ;;  %1429 = vrot.lane.b32.xlu1 %v1912_v5, %s2943_s12 }
 0x21a   : > { %1814 = vrot.lane.b32.xlu0 %v1720_v41, %s2945_s30 }
 0x21b   : > { %v1795_v17 = vpop.permute.xlu1 %1794 }
 0x21c   : > { %1871 = vst.msk [vmem:[#allocation3 + $0xa0] sm:$0xff] %vm1850_vm8, %v1795_v17  ;;  %v1797_v54 = vpop.permute.xlu0 %1796 }
 0x21d   : > { %1872 = vst.msk [vmem:[#allocation3 + $0xa8] sm:$0xff] %vm1850_vm8, %v1797_v54  ;;  %1623 = vrot.lane.b32.xlu1 %v1528_v35, %s2944_s17  ;;  %s235_s17 = scalar_lea.vmem %s4196_s5, %s2739_s21 }
 0x21e   : > { %2007 = vrot.lane.b32.xlu0 %v1913_v24, %s2946_s8 }
 0x21f   : > { %v1219_v30 = vpop.permute.xlu1 %1218 }
 0x220   : > { %1293 = vst.msk [vmem:[#allocation3 + $0xb0] sm:$0xff] %vm1270_vm5, %v1219_v30  ;;  %v1221_v48 = vpop.permute.xlu0 %1220 }
 0x221   : > { %1294 = vst.msk [vmem:[#allocation3 + $0xb8] sm:$0xff] %vm1270_vm5, %v1221_v48  ;;  %1816 = vrot.lane.b32.xlu1 %v1721_v1, %s2945_s30 }
 0x223   : > { %v2839_v22 = vpop.f32.mrb[0].mxu0  ;;  %v1988_v18 = vpop.permute.xlu1 %1987 }
 0x224   : > { %2440 = vst.msk [vmem:[%s3983_s7 + $0x8] sm:$0xff] %vm378_vm0, %v2839_v22  ;;  %v2472_v58 = vsel %vm378_vm0, %v2839_v22, 0.0  ;;  %v2543_v8 = vmul.f32 %v2839_v22, %v2839_v22  ;;  %v1990_v16 = vpop.permute.xlu0 %1989  ;;  %v2280_v25 = vpop.f32.mrb[1].mxu0 }
 0x225   : > { %2064 = vst.msk [vmem:[#allocation3 + $0xa0] sm:$0xff] %vm2043_vm9, %v1988_v18  ;;  %2065 = vst.msk [vmem:[#allocation3 + $0xa8] sm:$0xff] %vm2043_vm9, %v1990_v16  ;;  %v2471_v34 = vsel %vm378_vm0, %v2280_v25, 0.0  ;;  %v2542_v37 = vmul.f32 %v2280_v25, %v2280_v25  ;;  %2009 = vrot.lane.b32.xlu1 %v1914_v50, %s2946_s8 }
 0x226   : > { %2439 = vst.msk [vmem:[%s3983_s7] sm:$0xff] %vm378_vm0, %v2280_v25  ;;  %v2575_v32 = vsel %vm378_vm0, %v2543_v8, 0.0  ;;  %v2473_v40 = vadd.f32 %v2472_v58, %v2471_v34 }
 0x227   : > { %v2574_v43 = vsel %vm378_vm0, %v2542_v37, 0.0  ;;  %v1412_v15 = vpop.permute.xlu1 %1411 }
 0x228   : > { %v2576_v10 = vadd.f32 %v2575_v32, %v2574_v43  ;;  %1486 = vst.msk [vmem:[#allocation3 + $0xb0] sm:$0xff] %vm1463_vm6, %v1412_v15  ;;  %v1606_v56 = vpop.permute.xlu0 %1605 }
 0x229   : > { %1680 = vst.msk [vmem:[#allocation3 + $0xb0] sm:$0xff] %vm1657_vm7, %v1606_v56 }
 0x22b   : > { %v1414_v12 = vpop.permute.xlu1 %1413 }
 0x22c   : > { %v2096_v31 = vld [vmem:[#allocation3 + $0xa0] sm:$0xff]  ;;  %1487 = vst.msk [vmem:[#allocation3 + $0xb8] sm:$0xff] %vm1463_vm6, %v1414_v12  ;;  %v1608_v59 = vpop.permute.xlu0 %1607  ;;  %v2097_v57 = vld [vmem:[#allocation3 + $0xa8] sm:$0xff] }
 0x22d   : > { %2867 = vmatprep.mubr.msk.f32.mxu1 %vm2117_vm10, %v2096_v31  ;;  %1681 = vst.msk [vmem:[#allocation3 + $0xb8] sm:$0xff] %vm1657_vm7, %v1608_v59 }
 0x22e   : > { %2868 = vmatmul.mubr.msk.f32.gmra.mrb[4].mxu1 %vm2117_vm10, %v2097_v57 }
 0x22f   : > { %v1030_v2 = vpop.permute.xlu1 %1029 }
 0x230   : > { %1102 = vst.msk [vmem:[#allocation3 + $0xc0] sm:$0xff] %vm1077_vm4, %v1030_v2  ;;  %v1032_v11 = vpop.permute.xlu0 %1031 }
 0x231   : > { %1103 = vst.msk [vmem:[#allocation3 + $0xc8] sm:$0xff] %vm1077_vm4, %v1032_v11 }
 0x233   : > { %v1799_v60 = vpop.permute.xlu1 %1798 }
 0x234   : > { %1873 = vst.msk [vmem:[#allocation3 + $0xb0] sm:$0xff] %vm1850_vm8, %v1799_v60  ;;  %v1801_v27 = vpop.permute.xlu0 %1800 }
 0x235   : > { %1874 = vst.msk [vmem:[#allocation3 + $0xb8] sm:$0xff] %vm1850_vm8, %v1801_v27 }
 0x237   : > { %v1223_v42 = vpop.permute.xlu1 %1222  ;;  %v2842_v45 = vpop.f32.mrb[2].mxu0 }
 0x238   : > { %1295 = vst.msk [vmem:[#allocation3 + $0xc0] sm:$0xff] %vm1270_vm5, %v1223_v42  ;;  %v1225_v20 = vpop.permute.xlu0 %1224  ;;  %v2290_v14 = vpop.f32.mrb[3].mxu0  ;;  %v2545_v36 = vmul.f32 %v2842_v45, %v2842_v45  ;;  %v2476_v53 = vsel %vm378_vm0, %v2842_v45, 0.0 }
 0x239   : > { %2442 = vst.msk [vmem:[%s3983_s7 + $0x18] sm:$0xff] %vm378_vm0, %v2842_v45  ;;  %2441 = vst.msk [vmem:[%s3983_s7 + $0x10] sm:$0xff] %vm378_vm0, %v2290_v14  ;;  %v2474_v39 = vsel %vm378_vm0, %v2290_v14, 0.0  ;;  %v2544_v47 = vmul.f32 %v2290_v14, %v2290_v14 }
 0x23a   : > { %1296 = vst.msk [vmem:[#allocation3 + $0xc8] sm:$0xff] %vm1270_vm5, %v1225_v20  ;;  %v2475_v9 = vadd.f32 %v2474_v39, %v2473_v40  ;;  %v2579_v49 = vsel %vm378_vm0, %v2545_v36, 0.0 }
 0x23b   : > { %v2577_v44 = vsel %vm378_vm0, %v2544_v47, 0.0  ;;  %v1992_v61 = vpop.permute.xlu1 %1991 }
 0x23c   : > { %v2578_v21 = vadd.f32 %v2577_v44, %v2576_v10  ;;  %2066 = vst.msk [vmem:[#allocation3 + $0xb0] sm:$0xff] %vm2043_vm9, %v1992_v61  ;;  %v1994_v62 = vpop.permute.xlu0 %1993  ;;  %v2477_v52 = vadd.f32 %v2476_v53, %v2475_v9 }
 0x23d   : > { %2067 = vst.msk [vmem:[#allocation3 + $0xb8] sm:$0xff] %vm2043_vm9, %v1994_v62 }
 0x23e   : > { %v2580_v63 = vadd.f32 %v2579_v49, %v2578_v21 }
 0x23f   : > { %v1416_v0 = vpop.permute.xlu1 %1415 }
 0x240   : > { %1488 = vst.msk [vmem:[#allocation3 + $0xc0] sm:$0xff] %vm1463_vm6, %v1416_v0  ;;  %v1610_v26 = vpop.permute.xlu0 %1609 }
 0x241   : > { %1682 = vst.msk [vmem:[#allocation3 + $0xc0] sm:$0xff] %vm1657_vm7, %v1610_v26 }
 0x243   : > { %v1418_v33 = vpop.permute.xlu1 %1417  ;;  %v2098_v23 = vld [vmem:[#allocation3 + $0xb0] sm:$0xff] }
 0x244   : > { %1489 = vst.msk [vmem:[#allocation3 + $0xc8] sm:$0xff] %vm1463_vm6, %v1418_v33  ;;  %v1612_v19 = vpop.permute.xlu0 %1611  ;;  %2870 = vmatprep.mubr.msk.f32.mxu1 %vm2117_vm10, %v2098_v23  ;;  %v2099_v3 = vld [vmem:[#allocation3 + $0xb8] sm:$0xff] }
 0x245   : > { %1683 = vst.msk [vmem:[#allocation3 + $0xc8] sm:$0xff] %vm1657_vm7, %v1612_v19  ;;  %2871 = vmatmul.mubr.msk.f32.gmra.mrb[6].mxu1 %vm2117_vm10, %v2099_v3 }
 0x247   : > { %v1034_v4 = vpop.permute.xlu1 %1033 }
 0x248   : > { %1104 = vst.msk [vmem:[#allocation3 + $0xd0] sm:$0xff] %vm1077_vm4, %v1034_v4  ;;  %v1036_v13 = vpop.permute.xlu0 %1035 }
 0x249   : > { %1105 = vst.msk [vmem:[#allocation3 + $0xd8] sm:$0xff] %vm1077_vm4, %v1036_v13 }
 0x24b   : > { %v1803_v5 = vpop.permute.xlu1 %1802  ;;  %v2845_v46 = vpop.f32.mrb[4].mxu0 }
 0x24c   : > { %1875 = vst.msk [vmem:[#allocation3 + $0xc0] sm:$0xff] %vm1850_vm8, %v1803_v5  ;;  %v1805_v6 = vpop.permute.xlu0 %1804  ;;  %v2300_v29 = vpop.f32.mrb[5].mxu0  ;;  %v2547_v51 = vmul.f32 %v2845_v46, %v2845_v46  ;;  %v2480_v41 = vsel %vm378_vm0, %v2845_v46, 0.0 }
 0x24d   : > { %2444 = vst.msk [vmem:[%s3983_s7 + $0x28] sm:$0xff] %vm378_vm0, %v2845_v46  ;;  %2443 = vst.msk [vmem:[%s3983_s7 + $0x20] sm:$0xff] %vm378_vm0, %v2300_v29  ;;  %v2478_v55 = vsel %vm378_vm0, %v2300_v29, 0.0  ;;  %v2546_v7 = vmul.f32 %v2300_v29, %v2300_v29 }
 0x24e   : > { %1876 = vst.msk [vmem:[#allocation3 + $0xc8] sm:$0xff] %vm1850_vm8, %v1805_v6  ;;  %v2479_v38 = vadd.f32 %v2478_v55, %v2477_v52  ;;  %v2583_v1 = vsel %vm378_vm0, %v2547_v51, 0.0 }
 0x24f   : > { %v2581_v28 = vsel %vm378_vm0, %v2546_v7, 0.0  ;;  %v1227_v35 = vpop.permute.xlu1 %1226 }
 0x250   : > { %v2582_v17 = vadd.f32 %v2581_v28, %v2580_v63  ;;  %1297 = vst.msk [vmem:[#allocation3 + $0xd0] sm:$0xff] %vm1270_vm5, %v1227_v35  ;;  %v1229_v24 = vpop.permute.xlu0 %1228  ;;  %v2481_v54 = vadd.f32 %v2480_v41, %v2479_v38 }
 0x251   : > { %1298 = vst.msk [vmem:[#allocation3 + $0xd8] sm:$0xff] %vm1270_vm5, %v1229_v24 }
 0x252   : > { %v2584_v30 = vadd.f32 %v2583_v1, %v2582_v17 }
 0x253   : > { %v1996_v48 = vpop.permute.xlu1 %1995 }
 0x254   : > { %2068 = vst.msk [vmem:[#allocation3 + $0xc0] sm:$0xff] %vm2043_vm9, %v1996_v48  ;;  %v1998_v50 = vpop.permute.xlu0 %1997 }
 0x255   : > { %2069 = vst.msk [vmem:[#allocation3 + $0xc8] sm:$0xff] %vm2043_vm9, %v1998_v50 }
 0x257   : > { %v1420_v22 = vpop.permute.xlu1 %1419 }
 0x258   : > { %1490 = vst.msk [vmem:[#allocation3 + $0xd0] sm:$0xff] %vm1463_vm6, %v1420_v22  ;;  %v1614_v18 = vpop.permute.xlu0 %1613 }
 0x259   : > { %1684 = vst.msk [vmem:[#allocation3 + $0xd0] sm:$0xff] %vm1657_vm7, %v1614_v18 }
 0x25b   : > { %v1422_v58 = vpop.permute.xlu1 %1421  ;;  %v2100_v8 = vld [vmem:[#allocation3 + $0xc0] sm:$0xff] }
 0x25c   : > { %1491 = vst.msk [vmem:[#allocation3 + $0xd8] sm:$0xff] %vm1463_vm6, %v1422_v58  ;;  %v1616_v16 = vpop.permute.xlu0 %1615  ;;  %2873 = vmatprep.mubr.msk.f32.mxu1 %vm2117_vm10, %v2100_v8  ;;  %v2101_v25 = vld [vmem:[#allocation3 + $0xc8] sm:$0xff] }
 0x25d   : > { %1685 = vst.msk [vmem:[#allocation3 + $0xd8] sm:$0xff] %vm1657_vm7, %v1616_v16  ;;  %2874 = vmatmul.mubr.msk.f32.gmra.mrb[8].mxu1 %vm2117_vm10, %v2101_v25 }
 0x25f   : > { %v1038_v34 = vpop.permute.xlu1 %1037  ;;  %v2848_v37 = vpop.f32.mrb[6].mxu0 }
 0x260   : > { %1106 = vst.msk [vmem:[#allocation3 + $0xe0] sm:$0xff] %vm1077_vm4, %v1038_v34  ;;  %v1040_v32 = vpop.permute.xlu0 %1039  ;;  %v2310_v40 = vpop.f32.mrb[7].mxu0  ;;  %v2549_v43 = vmul.f32 %v2848_v37, %v2848_v37  ;;  %v2484_v12 = vsel %vm378_vm0, %v2848_v37, 0.0 }
 0x261   : > { %2446 = vst.msk [vmem:[%s3983_s7 + $0x38] sm:$0xff] %vm378_vm0, %v2848_v37  ;;  %2445 = vst.msk [vmem:[%s3983_s7 + $0x30] sm:$0xff] %vm378_vm0, %v2310_v40  ;;  %v2482_v15 = vsel %vm378_vm0, %v2310_v40, 0.0  ;;  %v2548_v10 = vmul.f32 %v2310_v40, %v2310_v40 }
 0x262   : > { %1107 = vst.msk [vmem:[#allocation3 + $0xe8] sm:$0xff] %vm1077_vm4, %v1040_v32  ;;  %v2483_v56 = vadd.f32 %v2482_v15, %v2481_v54  ;;  %v2587_v60 = vsel %vm378_vm0, %v2549_v43, 0.0 }
 0x263   : > { %v2585_v31 = vsel %vm378_vm0, %v2548_v10, 0.0  ;;  %v1807_v59 = vpop.permute.xlu1 %1806 }
 0x264   : > { %v2586_v57 = vadd.f32 %v2585_v31, %v2584_v30  ;;  %1877 = vst.msk [vmem:[#allocation3 + $0xd0] sm:$0xff] %vm1850_vm8, %v1807_v59  ;;  %v1809_v2 = vpop.permute.xlu0 %1808  ;;  %v2485_v11 = vadd.f32 %v2484_v12, %v2483_v56 }
 0x265   : > { %1878 = vst.msk [vmem:[#allocation3 + $0xd8] sm:$0xff] %vm1850_vm8, %v1809_v2 }
 0x266   : > { %v2588_v27 = vadd.f32 %v2587_v60, %v2586_v57 }
 0x267   : > { %v1231_v42 = vpop.permute.xlu1 %1230 }
 0x268   : > { %1299 = vst.msk [vmem:[#allocation3 + $0xe0] sm:$0xff] %vm1270_vm5, %v1231_v42  ;;  %v1233_v45 = vpop.permute.xlu0 %1232 }
 0x269   : > { %1300 = vst.msk [vmem:[#allocation3 + $0xe8] sm:$0xff] %vm1270_vm5, %v1233_v45 }
 0x26b   : > { %v2000_v20 = vpop.permute.xlu1 %1999 }
 0x26c   : > { %2070 = vst.msk [vmem:[#allocation3 + $0xd0] sm:$0xff] %vm2043_vm9, %v2000_v20  ;;  %v2002_v14 = vpop.permute.xlu0 %2001 }
 0x26d   : > { %2071 = vst.msk [vmem:[#allocation3 + $0xd8] sm:$0xff] %vm2043_vm9, %v2002_v14 }
 0x26f   : > { %v1424_v36 = vpop.permute.xlu1 %1423 }
 0x270   : > { %1492 = vst.msk [vmem:[#allocation3 + $0xe0] sm:$0xff] %vm1463_vm6, %v1424_v36  ;;  %v1618_v39 = vpop.permute.xlu0 %1617  ;;  %v2851_v47 = vpop.f32.mrb[8].mxu0 }
 0x271   : > { %1686 = vst.msk [vmem:[#allocation3 + $0xe0] sm:$0xff] %vm1657_vm7, %v1618_v39  ;;  %v2551_v9 = vmul.f32 %v2851_v47, %v2851_v47  ;;  %v2320_v53 = vpop.f32.mrb[9].mxu0  ;;  %v2488_v44 = vsel %vm378_vm0, %v2851_v47, 0.0 }
 0x272   : > { %2448 = vst.msk [vmem:[%s3983_s7 + $0x48] sm:$0xff] %vm378_vm0, %v2851_v47  ;;  %2447 = vst.msk [vmem:[%s3983_s7 + $0x40] sm:$0xff] %vm378_vm0, %v2320_v53  ;;  %v2486_v61 = vsel %vm378_vm0, %v2320_v53, 0.0  ;;  %v2550_v21 = vmul.f32 %v2320_v53, %v2320_v53 }
 0x273   : > { %v2487_v62 = vadd.f32 %v2486_v61, %v2485_v11  ;;  %v1426_v52 = vpop.permute.xlu1 %1425  ;;  %v2102_v49 = vld [vmem:[#allocation3 + $0xd0] sm:$0xff]  ;;  %v2591_v63 = vsel %vm378_vm0, %v2551_v9, 0.0 }
 0x274   : > { %v2589_v0 = vsel %vm378_vm0, %v2550_v21, 0.0  ;;  %1493 = vst.msk [vmem:[#allocation3 + $0xe8] sm:$0xff] %vm1463_vm6, %v1426_v52  ;;  %v1620_v26 = vpop.permute.xlu0 %1619  ;;  %2876 = vmatprep.mubr.msk.f32.mxu1 %vm2117_vm10, %v2102_v49  ;;  %v2103_v33 = vld [vmem:[#allocation3 + $0xd8] sm:$0xff] }
 0x275   : > { %v2590_v23 = vadd.f32 %v2589_v0, %v2588_v27  ;;  %1687 = vst.msk [vmem:[#allocation3 + $0xe8] sm:$0xff] %vm1657_vm7, %v1620_v26  ;;  %2877 = vmatmul.mubr.msk.f32.gmra.mrb[10].mxu1 %vm2117_vm10, %v2103_v33  ;;  %v2489_v19 = vadd.f32 %v2488_v44, %v2487_v62 }
 0x277   : > { %v1042_v3 = vpop.permute.xlu1 %1041  ;;  %v2592_v4 = vadd.f32 %v2591_v63, %v2590_v23 }
 0x278   : > { %1108 = vst.msk [vmem:[#allocation3 + $0xf0] sm:$0xff] %vm1077_vm4, %v1042_v3  ;;  %v1044_v13 = vpop.permute.xlu0 %1043 }
 0x279   : > { %1109 = vst.msk [vmem:[#allocation3 + $0xf8] sm:$0xff] %vm1077_vm4, %v1044_v13 }
 0x27b   : > { %v1811_v5 = vpop.permute.xlu1 %1810 }
 0x27c   : > { %1879 = vst.msk [vmem:[#allocation3 + $0xe0] sm:$0xff] %vm1850_vm8, %v1811_v5  ;;  %v1813_v46 = vpop.permute.xlu0 %1812 }
 0x27d   : > { %1880 = vst.msk [vmem:[#allocation3 + $0xe8] sm:$0xff] %vm1850_vm8, %v1813_v46 }
 0x27f   : > { %v1235_v6 = vpop.permute.xlu1 %1234 }
 0x280   : > { %1301 = vst.msk [vmem:[#allocation3 + $0xf0] sm:$0xff] %vm1270_vm5, %v1235_v6  ;;  %v1237_v29 = vpop.permute.xlu0 %1236 }
 0x281   : > { %1302 = vst.msk [vmem:[#allocation3 + $0xf8] sm:$0xff] %vm1270_vm5, %v1237_v29 }
 0x283   : > { %v2004_v51 = vpop.permute.xlu1 %2003 }
 0x284   : > { %2072 = vst.msk [vmem:[#allocation3 + $0xe0] sm:$0xff] %vm2043_vm9, %v2004_v51  ;;  %v2006_v55 = vpop.permute.xlu0 %2005 }
 0x285   : > { %2073 = vst.msk [vmem:[#allocation3 + $0xe8] sm:$0xff] %vm2043_vm9, %v2006_v55 }
 0x287   : > { %v1428_v7 = vpop.permute.xlu1 %1427 }
 0x288   : > { %1494 = vst.msk [vmem:[#allocation3 + $0xf0] sm:$0xff] %vm1463_vm6, %v1428_v7  ;;  %v2854_v38 = vpop.f32.mrb[10].mxu0  ;;  %v1622_v41 = vpop.permute.xlu0 %1621 }
 0x289   : > { %2450 = vst.msk [vmem:[%s3983_s7 + $0x58] sm:$0xff] %vm378_vm0, %v2854_v38  ;;  %v2553_v28 = vmul.f32 %v2854_v38, %v2854_v38  ;;  %v2330_v35 = vpop.f32.mrb[11].mxu0  ;;  %v2492_v17 = vsel %vm378_vm0, %v2854_v38, 0.0 }
 0x28a   : > { %1688 = vst.msk [vmem:[#allocation3 + $0xf0] sm:$0xff] %vm1657_vm7, %v1622_v41  ;;  %v2490_v24 = vsel %vm378_vm0, %v2330_v35, 0.0  ;;  %v2552_v54 = vmul.f32 %v2330_v35, %v2330_v35 }
 0x28b   : > { %2449 = vst.msk [vmem:[%s3983_s7 + $0x50] sm:$0xff] %vm378_vm0, %v2330_v35  ;;  %v2491_v1 = vadd.f32 %v2490_v24, %v2489_v19  ;;  %v1430_v30 = vpop.permute.xlu1 %1429  ;;  %v2104_v48 = vld [vmem:[#allocation3 + $0xe0] sm:$0xff]  ;;  %v2595_v50 = vsel %vm378_vm0, %v2553_v28, 0.0 }
 0x28c   : > { %v2593_v22 = vsel %vm378_vm0, %v2552_v54, 0.0  ;;  %1495 = vst.msk [vmem:[#allocation3 + $0xf8] sm:$0xff] %vm1463_vm6, %v1430_v30  ;;  %2879 = vmatprep.mubr.msk.f32.mxu1 %vm2117_vm10, %v2104_v48  ;;  %v2105_v18 = vld [vmem:[#allocation3 + $0xe8] sm:$0xff]  ;;  %v1815_v58 = vpop.permute.xlu0 %1814 }
 0x28d   : > { %v2594_v8 = vadd.f32 %v2593_v22, %v2592_v4  ;;  %2880 = vmatmul.mubr.msk.f32.gmra.mrb[12].mxu1 %vm2117_vm10, %v2105_v18  ;;  %1881 = vst.msk [vmem:[#allocation3 + $0xf0] sm:$0xff] %vm1850_vm8, %v1815_v58  ;;  %v2493_v16 = vadd.f32 %v2492_v17, %v2491_v1 }
 0x28f   : > { %v1624_v25 = vpop.permute.xlu1 %1623  ;;  %v2596_v34 = vadd.f32 %v2595_v50, %v2594_v8 }
 0x290   : > { %1689 = vst.msk [vmem:[#allocation3 + $0xf8] sm:$0xff] %vm1657_vm7, %v1624_v25  ;;  %v2008_v37 = vpop.permute.xlu0 %2007 }
 0x291   : > { %2074 = vst.msk [vmem:[#allocation3 + $0xf0] sm:$0xff] %vm2043_vm9, %v2008_v37 }
 0x293   : > { %v1817_v32 = vpop.permute.xlu1 %1816 }
 0x294   : > { %1882 = vst.msk [vmem:[#allocation3 + $0xf8] sm:$0xff] %vm1850_vm8, %v1817_v32 }
 0x297   : > { %v2010_v40 = vpop.permute.xlu1 %2009 }
 0x298   : > { %2075 = vst.msk [vmem:[#allocation3 + $0xf8] sm:$0xff] %vm2043_vm9, %v2010_v40  ;;  %v2106_v43 = vld [vmem:[#allocation3 + $0xf0] sm:$0xff] }
 0x299   : > { %2882 = vmatprep.mubr.msk.f32.mxu1 %vm2117_vm10, %v2106_v43 }
 0x29f   : > { %v2107_v15 = vld [vmem:[#allocation3 + $0xf8] sm:$0xff] }
 0x2a0   : > { %v2857_v10 = vpop.f32.mrb[12].mxu0  ;;  %2883 = vmatmul.mubr.msk.f32.gmra.mrb[14].mxu1 %vm2117_vm10, %v2107_v15 }
 0x2a1   : > { %2452 = vst.msk [vmem:[%s3983_s7 + $0x68] sm:$0xff] %vm378_vm0, %v2857_v10  ;;  %v2555_v56 = vmul.f32 %v2857_v10, %v2857_v10  ;;  %v2340_v12 = vpop.f32.mrb[13].mxu0  ;;  %v2496_v31 = vsel %vm378_vm0, %v2857_v10, 0.0 }
 0x2a2   : > { %2451 = vst.msk [vmem:[%s3983_s7 + $0x60] sm:$0xff] %vm378_vm0, %v2340_v12  ;;  %v2494_v59 = vsel %vm378_vm0, %v2340_v12, 0.0  ;;  %v2554_v57 = vmul.f32 %v2340_v12, %v2340_v12 }
 0x2a3   : > { %v2495_v2 = vadd.f32 %v2494_v59, %v2493_v16  ;;  %v2599_v11 = vsel %vm378_vm0, %v2555_v56, 0.0 }
 0x2a4   : > { %v2597_v60 = vsel %vm378_vm0, %v2554_v57, 0.0 }
 0x2a5   : > { %v2598_v27 = vadd.f32 %v2597_v60, %v2596_v34  ;;  %v2497_v42 = vadd.f32 %v2496_v31, %v2495_v2 }
 0x2a7   : > { %v2600_v45 = vadd.f32 %v2599_v11, %v2598_v27 }
 0x2b8   : > { %v2860_v20 = vpop.f32.mrb[14].mxu0 }
 0x2b9   : > { %2454 = vst.msk [vmem:[%s3983_s7 + $0x78] sm:$0xff] %vm378_vm0, %v2860_v20  ;;  %v2557_v14 = vmul.f32 %v2860_v20, %v2860_v20  ;;  %v2350_v36 = vpop.f32.mrb[15].mxu0  ;;  %v2500_v39 = vsel %vm378_vm0, %v2860_v20, 0.0 }
 0x2ba   : > { %2453 = vst.msk [vmem:[%s3983_s7 + $0x70] sm:$0xff] %vm378_vm0, %v2350_v36  ;;  %v2498_v47 = vsel %vm378_vm0, %v2350_v36, 0.0  ;;  %v2556_v9 = vmul.f32 %v2350_v36, %v2350_v36 }
 0x2bb   : > { %v2499_v53 = vadd.f32 %v2498_v47, %v2497_v42  ;;  %v2603_v44 = vsel %vm378_vm0, %v2557_v14, 0.0 }
 0x2bc   : > { %v2601_v61 = vsel %vm378_vm0, %v2556_v9, 0.0 }
 0x2bd   : > { %v2501_v21 = vadd.f32 %v2500_v39, %v2499_v53  ;;  %v2602_v62 = vadd.f32 %v2601_v61, %v2600_v45 }
 0x2bf   : > { %v2604_v52 = vadd.f32 %v2603_v44, %v2602_v62 }
 0x2d0   : > { %v2863_v49 = vpop.f32.mrb[0].mxu1 }
 0x2d1   : > { %2456 = vst.msk [vmem:[%s3983_s7 + $0x88] sm:$0xff] %vm378_vm0, %v2863_v49  ;;  %v2559_v63 = vmul.f32 %v2863_v49, %v2863_v49  ;;  %v2360_v0 = vpop.f32.mrb[1].mxu1  ;;  %v2504_v26 = vsel %vm378_vm0, %v2863_v49, 0.0 }
 0x2d2   : > { %2455 = vst.msk [vmem:[%s3983_s7 + $0x80] sm:$0xff] %vm378_vm0, %v2360_v0  ;;  %v2502_v33 = vsel %vm378_vm0, %v2360_v0, 0.0  ;;  %v2558_v23 = vmul.f32 %v2360_v0, %v2360_v0 }
 0x2d3   : > { %v2503_v19 = vadd.f32 %v2502_v33, %v2501_v21  ;;  %v2607_v3 = vsel %vm378_vm0, %v2559_v63, 0.0 }
 0x2d4   : > { %v2605_v4 = vsel %vm378_vm0, %v2558_v23, 0.0 }
 0x2d5   : > { %v2606_v13 = vadd.f32 %v2605_v4, %v2604_v52  ;;  %v2505_v5 = vadd.f32 %v2504_v26, %v2503_v19 }
 0x2d7   : > { %v2608_v46 = vadd.f32 %v2607_v3, %v2606_v13 }
 0x2e8   : > { %v2866_v6 = vpop.f32.mrb[2].mxu1 }
 0x2e9   : > { %2458 = vst.msk [vmem:[%s3983_s7 + $0x98] sm:$0xff] %vm378_vm0, %v2866_v6  ;;  %v2561_v29 = vmul.f32 %v2866_v6, %v2866_v6  ;;  %v2370_v51 = vpop.f32.mrb[3].mxu1  ;;  %v2508_v55 = vsel %vm378_vm0, %v2866_v6, 0.0 }
 0x2ea   : > { %2457 = vst.msk [vmem:[%s3983_s7 + $0x90] sm:$0xff] %vm378_vm0, %v2370_v51  ;;  %v2506_v7 = vsel %vm378_vm0, %v2370_v51, 0.0  ;;  %v2560_v38 = vmul.f32 %v2370_v51, %v2370_v51 }
 0x2eb   : > { %v2507_v41 = vadd.f32 %v2506_v7, %v2505_v5  ;;  %v2611_v28 = vsel %vm378_vm0, %v2561_v29, 0.0 }
 0x2ec   : > { %v2609_v35 = vsel %vm378_vm0, %v2560_v38, 0.0 }
 0x2ed   : > { %v2610_v17 = vadd.f32 %v2609_v35, %v2608_v46  ;;  %v2509_v24 = vadd.f32 %v2508_v55, %v2507_v41 }
 0x2ef   : > { %v2612_v54 = vadd.f32 %v2611_v28, %v2610_v17 }
 0x301   : > { %v2869_v1 = vpop.f32.mrb[4].mxu1 }
 0x302   : > { %2460 = vst.msk [vmem:[%s3983_s7 + $0xa8] sm:$0xff] %vm378_vm0, %v2869_v1  ;;  %v2563_v30 = vmul.f32 %v2869_v1, %v2869_v1  ;;  %v2380_v48 = vpop.f32.mrb[5].mxu1  ;;  %v2512_v50 = vsel %vm378_vm0, %v2869_v1, 0.0 }
 0x303   : > { %2459 = vst.msk [vmem:[%s3983_s7 + $0xa0] sm:$0xff] %vm378_vm0, %v2380_v48  ;;  %v2510_v22 = vsel %vm378_vm0, %v2380_v48, 0.0  ;;  %v2562_v18 = vmul.f32 %v2380_v48, %v2380_v48 }
 0x304   : > { %v2511_v58 = vadd.f32 %v2510_v22, %v2509_v24  ;;  %v2615_v8 = vsel %vm378_vm0, %v2563_v30, 0.0 }
 0x305   : > { %v2613_v16 = vsel %vm378_vm0, %v2562_v18, 0.0 }
 0x306   : > { %v2614_v25 = vadd.f32 %v2613_v16, %v2612_v54  ;;  %v2513_v34 = vadd.f32 %v2512_v50, %v2511_v58 }
 0x308   : > { %v2616_v37 = vadd.f32 %v2615_v8, %v2614_v25 }
 0x318   : > { %v2872_v32 = vpop.f32.mrb[6].mxu1 }
 0x319   : > { %2462 = vst.msk [vmem:[%s3983_s7 + $0xb8] sm:$0xff] %vm378_vm0, %v2872_v32  ;;  %v2565_v40 = vmul.f32 %v2872_v32, %v2872_v32  ;;  %v2390_v43 = vpop.f32.mrb[7].mxu1  ;;  %v2516_v15 = vsel %vm378_vm0, %v2872_v32, 0.0 }
 0x31a   : > { %2461 = vst.msk [vmem:[%s3983_s7 + $0xb0] sm:$0xff] %vm378_vm0, %v2390_v43  ;;  %v2514_v10 = vsel %vm378_vm0, %v2390_v43, 0.0  ;;  %v2564_v56 = vmul.f32 %v2390_v43, %v2390_v43 }
 0x31b   : > { %v2515_v12 = vadd.f32 %v2514_v10, %v2513_v34  ;;  %v2619_v31 = vsel %vm378_vm0, %v2565_v40, 0.0 }
 0x31c   : > { %v2617_v59 = vsel %vm378_vm0, %v2564_v56, 0.0 }
 0x31d   : > { %v2618_v57 = vadd.f32 %v2617_v59, %v2616_v37  ;;  %v2517_v2 = vadd.f32 %v2516_v15, %v2515_v12 }
 0x31f   : > { %v2620_v11 = vadd.f32 %v2619_v31, %v2618_v57 }
 0x330   : > { %v2875_v60 = vpop.f32.mrb[8].mxu1 }
 0x331   : > { %2464 = vst.msk [vmem:[%s3983_s7 + $0xc8] sm:$0xff] %vm378_vm0, %v2875_v60  ;;  %v2567_v27 = vmul.f32 %v2875_v60, %v2875_v60  ;;  %v2400_v42 = vpop.f32.mrb[9].mxu1  ;;  %v2520_v45 = vsel %vm378_vm0, %v2875_v60, 0.0 }
 0x332   : > { %2463 = vst.msk [vmem:[%s3983_s7 + $0xc0] sm:$0xff] %vm378_vm0, %v2400_v42  ;;  %v2518_v20 = vsel %vm378_vm0, %v2400_v42, 0.0  ;;  %v2566_v14 = vmul.f32 %v2400_v42, %v2400_v42 }
 0x333   : > { %v2519_v36 = vadd.f32 %v2518_v20, %v2517_v2  ;;  %v2623_v39 = vsel %vm378_vm0, %v2567_v27, 0.0 }
 0x334   : > { %v2621_v47 = vsel %vm378_vm0, %v2566_v14, 0.0 }
 0x335   : > { %v2622_v9 = vadd.f32 %v2621_v47, %v2620_v11  ;;  %v2521_v53 = vadd.f32 %v2520_v45, %v2519_v36 }
 0x337   : > { %v2624_v44 = vadd.f32 %v2623_v39, %v2622_v9 }
 0x348   : > { %v2878_v61 = vpop.f32.mrb[10].mxu1 }
 0x349   : > { %2466 = vst.msk [vmem:[%s3983_s7 + $0xd8] sm:$0xff] %vm378_vm0, %v2878_v61  ;;  %v2569_v21 = vmul.f32 %v2878_v61, %v2878_v61  ;;  %v2410_v62 = vpop.f32.mrb[11].mxu1  ;;  %v2524_v52 = vsel %vm378_vm0, %v2878_v61, 0.0 }
 0x34a   : > { %2465 = vst.msk [vmem:[%s3983_s7 + $0xd0] sm:$0xff] %vm378_vm0, %v2410_v62  ;;  %v2522_v49 = vsel %vm378_vm0, %v2410_v62, 0.0  ;;  %v2568_v63 = vmul.f32 %v2410_v62, %v2410_v62 }
 0x34b   : > { %v2523_v0 = vadd.f32 %v2522_v49, %v2521_v53  ;;  %v2627_v26 = vsel %vm378_vm0, %v2569_v21, 0.0 }
 0x34c   : > { %v2625_v33 = vsel %vm378_vm0, %v2568_v63, 0.0 }
 0x34d   : > { %v2626_v23 = vadd.f32 %v2625_v33, %v2624_v44  ;;  %v2525_v19 = vadd.f32 %v2524_v52, %v2523_v0 }
 0x34f   : > { %v2628_v3 = vadd.f32 %v2627_v26, %v2626_v23 }
 0x360   : > { %v2881_v4 = vpop.f32.mrb[12].mxu1 }
 0x361   : > { %2468 = vst.msk [vmem:[%s3983_s7 + $0xe8] sm:$0xff] %vm378_vm0, %v2881_v4  ;;  %v2571_v13 = vmul.f32 %v2881_v4, %v2881_v4  ;;  %v2420_v5 = vpop.f32.mrb[13].mxu1  ;;  %v2528_v46 = vsel %vm378_vm0, %v2881_v4, 0.0 }
 0x362   : > { %2467 = vst.msk [vmem:[%s3983_s7 + $0xe0] sm:$0xff] %vm378_vm0, %v2420_v5  ;;  %v2526_v6 = vsel %vm378_vm0, %v2420_v5, 0.0  ;;  %v2570_v29 = vmul.f32 %v2420_v5, %v2420_v5 }
 0x363   : > { %v2527_v51 = vadd.f32 %v2526_v6, %v2525_v19  ;;  %v2631_v55 = vsel %vm378_vm0, %v2571_v13, 0.0 }
 0x364   : > { %v2629_v7 = vsel %vm378_vm0, %v2570_v29, 0.0 }
 0x365   : > { %v2630_v38 = vadd.f32 %v2629_v7, %v2628_v3  ;;  %v2529_v41 = vadd.f32 %v2528_v46, %v2527_v51 }
 0x367   : > { %v2632_v28 = vadd.f32 %v2631_v55, %v2630_v38 }
 0x373   : > { %v2884_v35 = vpop.f32.mrb[14].mxu1 }
 0x374   : > { %2470 = vst.msk [vmem:[%s3983_s7 + $0xf8] sm:$0xff] %vm378_vm0, %v2884_v35  ;;  %v2430_v17 = vpop.f32.mrb[15].mxu1  ;;  %v2573_v24 = vmul.f32 %v2884_v35, %v2884_v35  ;;  %v2532_v48 = vsel %vm378_vm0, %v2884_v35, 0.0 }
 0x375   : > { %2469 = vst.msk [vmem:[%s3983_s7 + $0xf0] sm:$0xff] %vm378_vm0, %v2430_v17  ;;  %v2530_v54 = vsel %vm378_vm0, %v2430_v17, 0.0  ;;  %v2572_v1 = vmul.f32 %v2430_v17, %v2430_v17 }
 0x376   : > { %v2531_v30 = vadd.f32 %v2530_v54, %v2529_v41  ;;  %v2635_v58 = vsel %vm378_vm0, %v2573_v24, 0.0 }
 0x377   : > { %v2633_v50 = vsel %vm378_vm0, %v2572_v1, 0.0 }
 0x378   : > { %v2533_v22 = vadd.f32 %v2532_v48, %v2531_v30  ;;  %v2634_v18 = vadd.f32 %v2633_v50, %v2632_v28 }
 0x37a   : > { %v2534_v8 = vrot.slane %v2533_v22, 4  ;;  %v2636_v16 = vadd.f32 %v2635_v58, %v2634_v18 }
 0x37c   : > { %v2535_v25 = vadd.f32 %v2534_v8, %v2533_v22  ;;  %v2637_v34 = vrot.slane %v2636_v16, 4 }
 0x37e   : > { %v2536_v37 = vrot.slane %v2535_v25, 2  ;;  %v2638_v32 = vadd.f32 %v2637_v34, %v2636_v16 }
 0x380   : > { %v2537_v40 = vadd.f32 %v2536_v37, %v2535_v25  ;;  %v2639_v43 = vrot.slane %v2638_v32, 2 }
 0x382   : > { %v2538_v15 = vrot.slane %v2537_v40, 1  ;;  %v2640_v10 = vadd.f32 %v2639_v43, %v2638_v32 }
 0x384   : > { %v2539_v56 = vadd.f32 %v2538_v15, %v2537_v40  ;;  %v2641_v12 = vrot.slane %v2640_v10, 1 }
 0x386   : > { %2541 = vst.msk [vmem:[%s235_s17] sm:$0x1] %vm2540_vm11, %v2539_v56  ;;  %v2642_v31 = vadd.f32 %v2641_v12, %v2640_v10 }
 0x388   : > { %2643 = vst.msk [vmem:[%s235_s17 + $0x1] sm:$0x1] %vm2540_vm11, %v2642_v31 }
 0x389 PF: > { %s16_s18 = sadd.s32 1, %s2936_s18  }
 0x38a   : > { %p13_p4 = scmp.ge.s32.totalorder %s16_s18, 4  }
 0x38c   :  { %15 = sbr.rel (!%p13_p4) target bundleno = 1 (0x1), region = 80 }

</bundles_post_ra>
